<compile_context>
chip_gen: v6e
topology: v6e:2x2x1
jax: 0.10.0
libtpu: 0.0.40
codegen_flags: <defaults>
</compile_context>

<pallas_src>
import functools

import jax
import jax.numpy as jnp
from jax import lax
from jax.experimental import pallas as pl
from jax.experimental.pallas import tpu as pltpu


def _attention_kernel(x_ref, gproj_ref, gnw_ref, gnb_ref, wqkv_ref, bqkv_ref,
                      wproj_ref, bproj_ref, o_ref, *,
                      num_heads: int, num_groups: int, eps: float, q_tile: int):
    # x_ref:     (1, C, S)  one batch element, channels on sublanes, S on lanes
    # gproj_ref: (C, C) f32 same-group indicator (precomputed in wrapper)
    # gnw/gnb:   (C, 1) f32 GroupNorm affine
    # wqkv_ref:  (3C, C) bf16 (q rows pre-scaled by d^-0.5 in wrapper)
    # bqkv_ref:  (3C, 1) f32  (q rows pre-scaled)
    # wproj_ref: (C, C) bf16
    # bproj_ref: (C, 1) f32
    # o_ref:     (1, C, S)
    x = x_ref[0].astype(jnp.float32)                       # (C, S)
    c, s_len = x.shape
    d = c // num_heads
    cg = c // num_groups
    inv_cnt = 1.0 / float(s_len * cg)

    # ---- GroupNorm(num_groups, C): per-channel sums -> group stats via a
    # tiny same-group matmul (no in-kernel reshapes / iota rebuilds). --------
    row_sum = jnp.sum(x, axis=1, keepdims=True)                        # (C, 1)
    mean_c = jnp.dot(gproj_ref[...], row_sum,
                     preferred_element_type=jnp.float32) * inv_cnt     # (C, 1)
    xc = x - mean_c
    row_sq = jnp.sum(xc * xc, axis=1, keepdims=True)                   # (C, 1)
    var_c = jnp.dot(gproj_ref[...], row_sq,
                    preferred_element_type=jnp.float32) * inv_cnt      # (C, 1)
    a = lax.rsqrt(var_c + eps) * gnw_ref[...]                          # (C, 1)
    xn = xc * a + gnb_ref[...]                                         # (C, S)

    # ---- QKV projection (1x1 conv == GEMM), bf16 operands, f32 accum. ------
    qkv = jnp.dot(wqkv_ref[...], xn.astype(jnp.bfloat16),
                  preferred_element_type=jnp.float32) + bqkv_ref[...]  # (3C, S)
    qkv_bf = qkv.astype(jnp.bfloat16)                                  # matmul operands

    # ---- Attention: query-tiled, per-head, projection fused into accum. ----
    n_qt = s_len // q_tile
    for qt in range(n_qt):
        lo = qt * q_tile
        y = jnp.zeros((c, q_tile), jnp.float32)             # proj accumulator
        for h in range(num_heads):
            qh = qkv_bf[h * d:(h + 1) * d, lo:lo + q_tile]          # (d, TQ)  (pre-scaled)
            kh = qkv_bf[c + h * d:c + (h + 1) * d, :]               # (d, S)
            vh = qkv_bf[2 * c + h * d:2 * c + (h + 1) * d, :]       # (d, S)
            # scores[i, j] = sum_dd q[dd, i] * k[dd, j]   -> (TQ, S), lane-dense
            s = lax.dot_general(qh, kh, (((0,), (0,)), ((), ())),
                                preferred_element_type=jnp.float32)
            m = jnp.max(s, axis=-1, keepdims=True)
            p = jnp.exp(s - m)                              # f32 on EUP
            l = jnp.sum(p, axis=-1, keepdims=True)
            p = p * pl.reciprocal(l, approx=True)
            # out_h[dd, i] = sum_j v[dd, j] * p[i, j]      -> (d, TQ)
            oh = lax.dot_general(vh, p.astype(jnp.bfloat16),
                                 (((1,), (1,)), ((), ())),
                                 preferred_element_type=jnp.float32)
            # fused output projection (no concat of head outputs)
            y = y + jnp.dot(wproj_ref[:, h * d:(h + 1) * d],
                            oh.astype(jnp.bfloat16),
                            preferred_element_type=jnp.float32)      # (C, TQ)
        # residual + bias, lane-dense (TQ = multiple of 128) store
        o_ref[0, :, lo:lo + q_tile] = (
            x[:, lo:lo + q_tile] + y + bproj_ref[...]).astype(o_ref.dtype)


def attention_pallas(x_nchw, gn_w, gn_b, w_qkv, b_qkv, w_proj, b_proj,
                     *, num_heads: int = 8, num_groups: int = 8,
                     eps: float = 1e-5):
    """Self-attention block; NCHW in, NCHW out (matches the PyTorch module)."""
    b, c, h, w = x_nchw.shape
    s = h * w
    d = c // num_heads
    scale = float(d) ** -0.5

    # Layout glue (plain JAX, no transposes): NCHW flattens natively to (B,C,S).
    x_bcs = x_nchw.reshape(b, c, s)

    # Fold the softmax scale into the q rows of the qkv conv weight/bias and
    # pre-cast matmul weights to bf16 (f32 accumulation happens in-kernel).
    wqkv2d = w_qkv.reshape(3 * c, c)
    bqkv2d = b_qkv.reshape(3 * c, 1)
    qscale = jnp.concatenate([jnp.full((c, 1), scale, jnp.float32),
                              jnp.ones((2 * c, 1), jnp.float32)], axis=0)
    wqkv_sc = (wqkv2d * qscale).astype(jnp.bfloat16)        # (3C, C) bf16
    bqkv_sc = bqkv2d * qscale                               # (3C, 1) f32
    wproj_bf = w_proj.reshape(c, c).astype(jnp.bfloat16)    # (C, C) bf16
    bproj2d = b_proj.reshape(c, 1)

    # Same-group indicator matrix (hoisted out of the kernel body).
    ch = jnp.arange(c)
    cg = c // num_groups
    gproj = (ch[:, None] // cg == ch[None, :] // cg).astype(jnp.float32)

    # Query tile: keep score tiles at (TQ, S) instead of (S, S).
    q_tile = 128 if (s % 128 == 0 and s > 128) else s

    kernel = functools.partial(_attention_kernel, num_heads=num_heads,
                               num_groups=num_groups, eps=eps, q_tile=q_tile)

    out_bcs = pl.pallas_call(
        kernel,
        out_shape=jax.ShapeDtypeStruct((b, c, s), x_nchw.dtype),
        grid_spec=pltpu.PrefetchScalarGridSpec(
            num_scalar_prefetch=0,
            grid=(b,),
            in_specs=[
                pl.BlockSpec((1, c, s), lambda i: (i, 0, 0)),       # x
                pl.BlockSpec((c, c), lambda i: (0, 0)),             # gproj
                pl.BlockSpec((c, 1), lambda i: (0, 0)),             # gn weight
                pl.BlockSpec((c, 1), lambda i: (0, 0)),             # gn bias
                pl.BlockSpec((3 * c, c), lambda i: (0, 0)),         # qkv weight (bf16)
                pl.BlockSpec((3 * c, 1), lambda i: (0, 0)),         # qkv bias
                pl.BlockSpec((c, c), lambda i: (0, 0)),             # proj weight (bf16)
                pl.BlockSpec((c, 1), lambda i: (0, 0)),             # proj bias
            ],
            out_specs=pl.BlockSpec((1, c, s), lambda i: (i, 0, 0)),
        ),
        compiler_params=pltpu.CompilerParams(
            dimension_semantics=("parallel",)),
    )(x_bcs, gproj, gn_w.reshape(c, 1), gn_b.reshape(c, 1),
      wqkv_sc, bqkv_sc, wproj_bf, bproj2d)

    return out_bcs.reshape(b, c, h, w)


def _reference_attention(x, gn_w, gn_b, w_qkv, b_qkv, w_proj, b_proj,
                         num_heads=8, num_groups=8, eps=1e-5):
    """Pure-JAX reference mirroring the PyTorch forward exactly (f32, HIGHEST)."""
    b, c, h, w = x.shape
    d = c // num_heads
    scale = float(d) ** -0.5

    xg = x.reshape(b, num_groups, c // num_groups, h, w)
    mean = jnp.mean(xg, axis=(2, 3, 4), keepdims=True)
    var = jnp.var(xg, axis=(2, 3, 4), keepdims=True)
    xn = ((xg - mean) / jnp.sqrt(var + eps)).reshape(b, c, h, w)
    xn = xn * gn_w.reshape(1, c, 1, 1) + gn_b.reshape(1, c, 1, 1)

    qkv = jnp.einsum('oc,bchw->bohw', w_qkv.reshape(3 * c, c), xn,
                     precision=lax.Precision.HIGHEST) + b_qkv.reshape(1, 3 * c, 1, 1)
    qkv = qkv.reshape(b, 3, num_heads, d, h * w)                    # (B,3,h,d,S)
    q = jnp.transpose(qkv[:, 0], (0, 1, 3, 2))                      # (B,h,S,d)
    k = jnp.transpose(qkv[:, 1], (0, 1, 3, 2))
    v = jnp.transpose(qkv[:, 2], (0, 1, 3, 2))

    attn = jnp.einsum('bhid,bhjd->bhij', q, k,
                      precision=lax.Precision.HIGHEST) * scale
    attn = jax.nn.softmax(attn, axis=-1)
    out = jnp.einsum('bhij,bhjd->bhid', attn, v,
                     precision=lax.Precision.HIGHEST)               # (B,h,S,d)
    out = jnp.transpose(out, (0, 1, 3, 2)).reshape(b, c, h, w)      # (B,(h d),H,W)

    y = jnp.einsum('oc,bchw->bohw', w_proj.reshape(c, c), out,
                   precision=lax.Precision.HIGHEST) + b_proj.reshape(1, c, 1, 1)
    return x + y


if __name__ == "__main__":
    key = jax.random.PRNGKey(0)
    ks = jax.random.split(key, 7)

    # channels must be divisible by num_heads(=8) and num_groups(=8)
    N, C, H, W = 2, 32, 16, 16
    NUM_HEADS, NUM_GROUPS = 8, 8

    x = jax.random.normal(ks[0], (N, C, H, W), dtype=jnp.float32)

    # GroupNorm affine params (learnable; randomized around PyTorch init).
    gn_w = 1.0 + 0.1 * jax.random.normal(ks[1], (C,), jnp.float32)
    gn_b = 0.1 * jax.random.normal(ks[2], (C,), jnp.float32)

    # 1x1 conv params with PyTorch-style uniform bound 1/sqrt(fan_in).
    bound = 1.0 / (C ** 0.5)
    w_qkv = jax.random.uniform(ks[3], (3 * C, C, 1, 1), jnp.float32, -bound, bound)
    b_qkv = jax.random.uniform(ks[4], (3 * C,), jnp.float32, -bound, bound)
    w_proj = jax.random.uniform(ks[5], (C, C, 1, 1), jnp.float32, -bound, bound)
    b_proj = jax.random.uniform(ks[6], (C,), jnp.float32, -bound, bound)

    out = attention_pallas(x, gn_w, gn_b, w_qkv, b_qkv, w_proj, b_proj,
                           num_heads=NUM_HEADS, num_groups=NUM_GROUPS)
    out = jax.block_until_ready(out)

    ref = _reference_attention(x, gn_w, gn_b, w_qkv, b_qkv, w_proj, b_proj,
                               num_heads=NUM_HEADS, num_groups=NUM_GROUPS)

    assert out.shape == (N, C, H, W), out.shape
    # Tolerance reflects bf16 operands at the MXU boundaries (f32 accumulation)
    # and the approx reciprocal in the softmax normalization; the reference is
    # full-f32 HIGHEST precision.
    max_err = float(jnp.max(jnp.abs(out - ref)))
    assert jnp.allclose(out, ref, rtol=2e-2, atol=2e-2), (
        f"mismatch vs reference attention; max abs err = {max_err}")

    print("KERNEL_OK")
</pallas_src>

<mosaic_0001>
module attributes {stable_mosaic.version = 11 : i64} {
  func.func @_attention_kernel(%arg0: i32, %arg1: memref<1x32x256xf32, #tpu.memory_space<vmem>>, %arg2: memref<32x32xf32, #tpu.memory_space<vmem>>, %arg3: memref<32x1xf32, #tpu.memory_space<vmem>>, %arg4: memref<32x1xf32, #tpu.memory_space<vmem>>, %arg5: memref<96x32xbf16, #tpu.memory_space<vmem>>, %arg6: memref<96x1xf32, #tpu.memory_space<vmem>>, %arg7: memref<32x32xbf16, #tpu.memory_space<vmem>>, %arg8: memref<32x1xf32, #tpu.memory_space<vmem>>, %arg9: memref<1x32x256xf32, #tpu.memory_space<vmem>>) attributes {dimension_semantics = [#tpu.dimension_semantics<parallel>], iteration_bounds = array<i64: 2>, scalar_prefetch = 0 : i64, scratch_operands = 0 : i64, tpu.core_type = #tpu.core_type<tc>, window_params = [{transform_indices = @transform_0, window_bounds = array<i64: 1, 32, 256>}, {pipeline_mode = #tpu.pipeline_mode<synchronous>, transform_indices = @transform_1, window_bounds = array<i64: 32, 32>}, {pipeline_mode = #tpu.pipeline_mode<synchronous>, transform_indices = @transform_2, window_bounds = array<i64: 32, 1>}, {pipeline_mode = #tpu.pipeline_mode<synchronous>, transform_indices = @transform_3, window_bounds = array<i64: 32, 1>}, {pipeline_mode = #tpu.pipeline_mode<synchronous>, transform_indices = @transform_4, window_bounds = array<i64: 96, 32>}, {pipeline_mode = #tpu.pipeline_mode<synchronous>, transform_indices = @transform_5, window_bounds = array<i64: 96, 1>}, {pipeline_mode = #tpu.pipeline_mode<synchronous>, transform_indices = @transform_6, window_bounds = array<i64: 32, 32>}, {pipeline_mode = #tpu.pipeline_mode<synchronous>, transform_indices = @transform_7, window_bounds = array<i64: 32, 1>}, {transform_indices = @transform_8, window_bounds = array<i64: 1, 32, 256>}]} {
    %c0 = arith.constant 0 : index
    %c0_0 = arith.constant 0 : index
    %c0_1 = arith.constant 0 : index
    %0 = vector.load %arg1[%c0, %c0_0, %c0_1] : memref<1x32x256xf32, #tpu.memory_space<vmem>>, vector<1x32x256xf32>
    %1 = vector.shape_cast %0 : vector<1x32x256xf32> to vector<32x256xf32>
    %cst = arith.constant dense<0.000000e+00> : vector<32xf32>
    %2 = vector.multi_reduction <add>, %1, %cst [1] : vector<32x256xf32> to vector<32xf32>
    %3 = vector.shape_cast %2 : vector<32xf32> to vector<32x1xf32>
    %c0_2 = arith.constant 0 : index
    %c0_3 = arith.constant 0 : index
    %4 = vector.load %arg2[%c0_2, %c0_3] : memref<32x32xf32, #tpu.memory_space<vmem>>, vector<32x32xf32>
    %cst_4 = arith.constant dense<0.000000e+00> : vector<32x1xf32>
    %5 = tpu.matmul %4, %3, %cst_4 {dimension_numbers = #tpu.dot_dimension_numbers<[1], [0], [0], [1], [0, 0, 1, 1], [], []>} : vector<32x32xf32>, vector<32x1xf32>, vector<32x1xf32> -> vector<32x1xf32>
    %cst_5 = arith.constant 9.765625E-4 : f32
    %6 = vector.broadcast %cst_5 : f32 to vector<32x1xf32>
    %7 = arith.mulf %5, %6 : vector<32x1xf32>
    %8 = vector.broadcast %7 : vector<32x1xf32> to vector<32x256xf32>
    %9 = arith.subf %1, %8 : vector<32x256xf32>
    %10 = arith.mulf %9, %9 : vector<32x256xf32>
    %cst_6 = arith.constant dense<0.000000e+00> : vector<32xf32>
    %11 = vector.multi_reduction <add>, %10, %cst_6 [1] : vector<32x256xf32> to vector<32xf32>
    %12 = vector.shape_cast %11 : vector<32xf32> to vector<32x1xf32>
    %c0_7 = arith.constant 0 : index
    %c0_8 = arith.constant 0 : index
    %13 = vector.load %arg2[%c0_7, %c0_8] : memref<32x32xf32, #tpu.memory_space<vmem>>, vector<32x32xf32>
    %cst_9 = arith.constant dense<0.000000e+00> : vector<32x1xf32>
    %14 = tpu.matmul %13, %12, %cst_9 {dimension_numbers = #tpu.dot_dimension_numbers<[1], [0], [0], [1], [0, 0, 1, 1], [], []>} : vector<32x32xf32>, vector<32x1xf32>, vector<32x1xf32> -> vector<32x1xf32>
    %cst_10 = arith.constant 9.765625E-4 : f32
    %15 = vector.broadcast %cst_10 : f32 to vector<32x1xf32>
    %16 = arith.mulf %14, %15 : vector<32x1xf32>
    %cst_11 = arith.constant 9.99999974E-6 : f32
    %17 = vector.broadcast %cst_11 : f32 to vector<32x1xf32>
    %18 = arith.addf %16, %17 : vector<32x1xf32>
    %19 = math.rsqrt %18 : vector<32x1xf32>
    %c0_12 = arith.constant 0 : index
    %c0_13 = arith.constant 0 : index
    %20 = vector.load %arg3[%c0_12, %c0_13] : memref<32x1xf32, #tpu.memory_space<vmem>>, vector<32x1xf32>
    %21 = arith.mulf %19, %20 : vector<32x1xf32>
    %22 = vector.broadcast %21 : vector<32x1xf32> to vector<32x256xf32>
    %23 = arith.mulf %9, %22 : vector<32x256xf32>
    %c0_14 = arith.constant 0 : index
    %c0_15 = arith.constant 0 : index
    %24 = vector.load %arg4[%c0_14, %c0_15] : memref<32x1xf32, #tpu.memory_space<vmem>>, vector<32x1xf32>
    %25 = vector.broadcast %24 : vector<32x1xf32> to vector<32x256xf32>
    %26 = arith.addf %23, %25 : vector<32x256xf32>
    %c0_16 = arith.constant 0 : index
    %c0_17 = arith.constant 0 : index
    %27 = vector.load %arg5[%c0_16, %c0_17] : memref<96x32xbf16, #tpu.memory_space<vmem>>, vector<96x32xbf16>
    %28 = arith.truncf %26 : vector<32x256xf32> to vector<32x256xbf16>
    %cst_18 = arith.constant dense<0.000000e+00> : vector<96x256xf32>
    %29 = tpu.matmul %27, %28, %cst_18 {dimension_numbers = #tpu.dot_dimension_numbers<[1], [0], [0], [1], [0, 0, 1, 1], [], []>} : vector<96x32xbf16>, vector<32x256xbf16>, vector<96x256xf32> -> vector<96x256xf32>
    %c0_19 = arith.constant 0 : index
    %c0_20 = arith.constant 0 : index
    %30 = vector.load %arg6[%c0_19, %c0_20] : memref<96x1xf32, #tpu.memory_space<vmem>>, vector<96x1xf32>
    %31 = vector.broadcast %30 : vector<96x1xf32> to vector<96x256xf32>
    %32 = arith.addf %29, %31 : vector<96x256xf32>
    %33 = arith.truncf %32 : vector<96x256xf32> to vector<96x256xbf16>
    %cst_21 = arith.constant 0.000000e+00 : f32
    %34 = vector.broadcast %cst_21 : f32 to vector<32x128xf32>
    %35 = vector.extract_strided_slice %33 {offsets = [0, 0], sizes = [4, 128], strides = [1, 1]} : vector<96x256xbf16> to vector<4x128xbf16>
    %36 = vector.extract_strided_slice %33 {offsets = [32, 0], sizes = [4, 256], strides = [1, 1]} : vector<96x256xbf16> to vector<4x256xbf16>
    %37 = vector.extract_strided_slice %33 {offsets = [64, 0], sizes = [4, 256], strides = [1, 1]} : vector<96x256xbf16> to vector<4x256xbf16>
    %cst_22 = arith.constant dense<0.000000e+00> : vector<128x256xf32>
    %38 = tpu.matmul %35, %36, %cst_22 {dimension_numbers = #tpu.dot_dimension_numbers<[0], [0], [1], [1], [0, 1, 1, 1], [], []>} : vector<4x128xbf16>, vector<4x256xbf16>, vector<128x256xf32> -> vector<128x256xf32>
    %cst_23 = arith.constant dense<0xFF800000> : vector<128xf32>
    %39 = vector.multi_reduction <maximumf>, %38, %cst_23 [1] : vector<128x256xf32> to vector<128xf32>
    %40 = vector.shape_cast %39 : vector<128xf32> to vector<128x1xf32>
    %41 = vector.broadcast %40 : vector<128x1xf32> to vector<128x256xf32>
    %42 = arith.subf %38, %41 : vector<128x256xf32>
    %43 = math.exp %42 : vector<128x256xf32>
    %cst_24 = arith.constant dense<0.000000e+00> : vector<128xf32>
    %44 = vector.multi_reduction <add>, %43, %cst_24 [1] : vector<128x256xf32> to vector<128xf32>
    %45 = vector.shape_cast %44 : vector<128xf32> to vector<128x1xf32>
    %46 = tpu.reciprocal %45 {approx = true} : vector<128x1xf32> -> vector<128x1xf32>
    %47 = vector.broadcast %46 : vector<128x1xf32> to vector<128x256xf32>
    %48 = arith.mulf %43, %47 : vector<128x256xf32>
    %49 = arith.truncf %48 : vector<128x256xf32> to vector<128x256xbf16>
    %cst_25 = arith.constant dense<0.000000e+00> : vector<4x128xf32>
    %50 = tpu.matmul %37, %49, %cst_25 {dimension_numbers = #tpu.dot_dimension_numbers<[1], [1], [0], [0], [0, 0, 1, 0], [], []>} : vector<4x256xbf16>, vector<128x256xbf16>, vector<4x128xf32> -> vector<4x128xf32>
    %c0_26 = arith.constant 0 : index
    %c0_27 = arith.constant 0 : index
    %51 = vector.load %arg7[%c0_26, %c0_27] : memref<32x32xbf16, #tpu.memory_space<vmem>>, vector<32x4xbf16>
    %52 = arith.truncf %50 : vector<4x128xf32> to vector<4x128xbf16>
    %cst_28 = arith.constant dense<0.000000e+00> : vector<32x128xf32>
    %53 = tpu.matmul %51, %52, %cst_28 {dimension_numbers = #tpu.dot_dimension_numbers<[1], [0], [0], [1], [0, 0, 1, 1], [], []>} : vector<32x4xbf16>, vector<4x128xbf16>, vector<32x128xf32> -> vector<32x128xf32>
    %54 = arith.addf %34, %53 : vector<32x128xf32>
    %55 = vector.extract_strided_slice %33 {offsets = [4, 0], sizes = [4, 128], strides = [1, 1]} : vector<96x256xbf16> to vector<4x128xbf16>
    %56 = vector.extract_strided_slice %33 {offsets = [36, 0], sizes = [4, 256], strides = [1, 1]} : vector<96x256xbf16> to vector<4x256xbf16>
    %57 = vector.extract_strided_slice %33 {offsets = [68, 0], sizes = [4, 256], strides = [1, 1]} : vector<96x256xbf16> to vector<4x256xbf16>
    %cst_29 = arith.constant dense<0.000000e+00> : vector<128x256xf32>
    %58 = tpu.matmul %55, %56, %cst_29 {dimension_numbers = #tpu.dot_dimension_numbers<[0], [0], [1], [1], [0, 1, 1, 1], [], []>} : vector<4x128xbf16>, vector<4x256xbf16>, vector<128x256xf32> -> vector<128x256xf32>
    %cst_30 = arith.constant dense<0xFF800000> : vector<128xf32>
    %59 = vector.multi_reduction <maximumf>, %58, %cst_30 [1] : vector<128x256xf32> to vector<128xf32>
    %60 = vector.shape_cast %59 : vector<128xf32> to vector<128x1xf32>
    %61 = vector.broadcast %60 : vector<128x1xf32> to vector<128x256xf32>
    %62 = arith.subf %58, %61 : vector<128x256xf32>
    %63 = math.exp %62 : vector<128x256xf32>
    %cst_31 = arith.constant dense<0.000000e+00> : vector<128xf32>
    %64 = vector.multi_reduction <add>, %63, %cst_31 [1] : vector<128x256xf32> to vector<128xf32>
    %65 = vector.shape_cast %64 : vector<128xf32> to vector<128x1xf32>
    %66 = tpu.reciprocal %65 {approx = true} : vector<128x1xf32> -> vector<128x1xf32>
    %67 = vector.broadcast %66 : vector<128x1xf32> to vector<128x256xf32>
    %68 = arith.mulf %63, %67 : vector<128x256xf32>
    %69 = arith.truncf %68 : vector<128x256xf32> to vector<128x256xbf16>
    %cst_32 = arith.constant dense<0.000000e+00> : vector<4x128xf32>
    %70 = tpu.matmul %57, %69, %cst_32 {dimension_numbers = #tpu.dot_dimension_numbers<[1], [1], [0], [0], [0, 0, 1, 0], [], []>} : vector<4x256xbf16>, vector<128x256xbf16>, vector<4x128xf32> -> vector<4x128xf32>
    %c0_33 = arith.constant 0 : index
    %c4 = arith.constant 4 : index
    %71 = vector.load %arg7[%c0_33, %c4] : memref<32x32xbf16, #tpu.memory_space<vmem>>, vector<32x4xbf16>
    %72 = arith.truncf %70 : vector<4x128xf32> to vector<4x128xbf16>
    %cst_34 = arith.constant dense<0.000000e+00> : vector<32x128xf32>
    %73 = tpu.matmul %71, %72, %cst_34 {dimension_numbers = #tpu.dot_dimension_numbers<[1], [0], [0], [1], [0, 0, 1, 1], [], []>} : vector<32x4xbf16>, vector<4x128xbf16>, vector<32x128xf32> -> vector<32x128xf32>
    %74 = arith.addf %54, %73 : vector<32x128xf32>
    %75 = vector.extract_strided_slice %33 {offsets = [8, 0], sizes = [4, 128], strides = [1, 1]} : vector<96x256xbf16> to vector<4x128xbf16>
    %76 = vector.extract_strided_slice %33 {offsets = [40, 0], sizes = [4, 256], strides = [1, 1]} : vector<96x256xbf16> to vector<4x256xbf16>
    %77 = vector.extract_strided_slice %33 {offsets = [72, 0], sizes = [4, 256], strides = [1, 1]} : vector<96x256xbf16> to vector<4x256xbf16>
    %cst_35 = arith.constant dense<0.000000e+00> : vector<128x256xf32>
    %78 = tpu.matmul %75, %76, %cst_35 {dimension_numbers = #tpu.dot_dimension_numbers<[0], [0], [1], [1], [0, 1, 1, 1], [], []>} : vector<4x128xbf16>, vector<4x256xbf16>, vector<128x256xf32> -> vector<128x256xf32>
    %cst_36 = arith.constant dense<0xFF800000> : vector<128xf32>
    %79 = vector.multi_reduction <maximumf>, %78, %cst_36 [1] : vector<128x256xf32> to vector<128xf32>
    %80 = vector.shape_cast %79 : vector<128xf32> to vector<128x1xf32>
    %81 = vector.broadcast %80 : vector<128x1xf32> to vector<128x256xf32>
    %82 = arith.subf %78, %81 : vector<128x256xf32>
    %83 = math.exp %82 : vector<128x256xf32>
    %cst_37 = arith.constant dense<0.000000e+00> : vector<128xf32>
    %84 = vector.multi_reduction <add>, %83, %cst_37 [1] : vector<128x256xf32> to vector<128xf32>
    %85 = vector.shape_cast %84 : vector<128xf32> to vector<128x1xf32>
    %86 = tpu.reciprocal %85 {approx = true} : vector<128x1xf32> -> vector<128x1xf32>
    %87 = vector.broadcast %86 : vector<128x1xf32> to vector<128x256xf32>
    %88 = arith.mulf %83, %87 : vector<128x256xf32>
    %89 = arith.truncf %88 : vector<128x256xf32> to vector<128x256xbf16>
    %cst_38 = arith.constant dense<0.000000e+00> : vector<4x128xf32>
    %90 = tpu.matmul %77, %89, %cst_38 {dimension_numbers = #tpu.dot_dimension_numbers<[1], [1], [0], [0], [0, 0, 1, 0], [], []>} : vector<4x256xbf16>, vector<128x256xbf16>, vector<4x128xf32> -> vector<4x128xf32>
    %c0_39 = arith.constant 0 : index
    %c8 = arith.constant 8 : index
    %91 = vector.load %arg7[%c0_39, %c8] : memref<32x32xbf16, #tpu.memory_space<vmem>>, vector<32x4xbf16>
    %92 = arith.truncf %90 : vector<4x128xf32> to vector<4x128xbf16>
    %cst_40 = arith.constant dense<0.000000e+00> : vector<32x128xf32>
    %93 = tpu.matmul %91, %92, %cst_40 {dimension_numbers = #tpu.dot_dimension_numbers<[1], [0], [0], [1], [0, 0, 1, 1], [], []>} : vector<32x4xbf16>, vector<4x128xbf16>, vector<32x128xf32> -> vector<32x128xf32>
    %94 = arith.addf %74, %93 : vector<32x128xf32>
    %95 = vector.extract_strided_slice %33 {offsets = [12, 0], sizes = [4, 128], strides = [1, 1]} : vector<96x256xbf16> to vector<4x128xbf16>
    %96 = vector.extract_strided_slice %33 {offsets = [44, 0], sizes = [4, 256], strides = [1, 1]} : vector<96x256xbf16> to vector<4x256xbf16>
    %97 = vector.extract_strided_slice %33 {offsets = [76, 0], sizes = [4, 256], strides = [1, 1]} : vector<96x256xbf16> to vector<4x256xbf16>
    %cst_41 = arith.constant dense<0.000000e+00> : vector<128x256xf32>
    %98 = tpu.matmul %95, %96, %cst_41 {dimension_numbers = #tpu.dot_dimension_numbers<[0], [0], [1], [1], [0, 1, 1, 1], [], []>} : vector<4x128xbf16>, vector<4x256xbf16>, vector<128x256xf32> -> vector<128x256xf32>
    %cst_42 = arith.constant dense<0xFF800000> : vector<128xf32>
    %99 = vector.multi_reduction <maximumf>, %98, %cst_42 [1] : vector<128x256xf32> to vector<128xf32>
    %100 = vector.shape_cast %99 : vector<128xf32> to vector<128x1xf32>
    %101 = vector.broadcast %100 : vector<128x1xf32> to vector<128x256xf32>
    %102 = arith.subf %98, %101 : vector<128x256xf32>
    %103 = math.exp %102 : vector<128x256xf32>
    %cst_43 = arith.constant dense<0.000000e+00> : vector<128xf32>
    %104 = vector.multi_reduction <add>, %103, %cst_43 [1] : vector<128x256xf32> to vector<128xf32>
    %105 = vector.shape_cast %104 : vector<128xf32> to vector<128x1xf32>
    %106 = tpu.reciprocal %105 {approx = true} : vector<128x1xf32> -> vector<128x1xf32>
    %107 = vector.broadcast %106 : vector<128x1xf32> to vector<128x256xf32>
    %108 = arith.mulf %103, %107 : vector<128x256xf32>
    %109 = arith.truncf %108 : vector<128x256xf32> to vector<128x256xbf16>
    %cst_44 = arith.constant dense<0.000000e+00> : vector<4x128xf32>
    %110 = tpu.matmul %97, %109, %cst_44 {dimension_numbers = #tpu.dot_dimension_numbers<[1], [1], [0], [0], [0, 0, 1, 0], [], []>} : vector<4x256xbf16>, vector<128x256xbf16>, vector<4x128xf32> -> vector<4x128xf32>
    %c0_45 = arith.constant 0 : index
    %c12 = arith.constant 12 : index
    %111 = vector.load %arg7[%c0_45, %c12] : memref<32x32xbf16, #tpu.memory_space<vmem>>, vector<32x4xbf16>
    %112 = arith.truncf %110 : vector<4x128xf32> to vector<4x128xbf16>
    %cst_46 = arith.constant dense<0.000000e+00> : vector<32x128xf32>
    %113 = tpu.matmul %111, %112, %cst_46 {dimension_numbers = #tpu.dot_dimension_numbers<[1], [0], [0], [1], [0, 0, 1, 1], [], []>} : vector<32x4xbf16>, vector<4x128xbf16>, vector<32x128xf32> -> vector<32x128xf32>
    %114 = arith.addf %94, %113 : vector<32x128xf32>
    %115 = vector.extract_strided_slice %33 {offsets = [16, 0], sizes = [4, 128], strides = [1, 1]} : vector<96x256xbf16> to vector<4x128xbf16>
    %116 = vector.extract_strided_slice %33 {offsets = [48, 0], sizes = [4, 256], strides = [1, 1]} : vector<96x256xbf16> to vector<4x256xbf16>
    %117 = vector.extract_strided_slice %33 {offsets = [80, 0], sizes = [4, 256], strides = [1, 1]} : vector<96x256xbf16> to vector<4x256xbf16>
    %cst_47 = arith.constant dense<0.000000e+00> : vector<128x256xf32>
    %118 = tpu.matmul %115, %116, %cst_47 {dimension_numbers = #tpu.dot_dimension_numbers<[0], [0], [1], [1], [0, 1, 1, 1], [], []>} : vector<4x128xbf16>, vector<4x256xbf16>, vector<128x256xf32> -> vector<128x256xf32>
    %cst_48 = arith.constant dense<0xFF800000> : vector<128xf32>
    %119 = vector.multi_reduction <maximumf>, %118, %cst_48 [1] : vector<128x256xf32> to vector<128xf32>
    %120 = vector.shape_cast %119 : vector<128xf32> to vector<128x1xf32>
    %121 = vector.broadcast %120 : vector<128x1xf32> to vector<128x256xf32>
    %122 = arith.subf %118, %121 : vector<128x256xf32>
    %123 = math.exp %122 : vector<128x256xf32>
    %cst_49 = arith.constant dense<0.000000e+00> : vector<128xf32>
    %124 = vector.multi_reduction <add>, %123, %cst_49 [1] : vector<128x256xf32> to vector<128xf32>
    %125 = vector.shape_cast %124 : vector<128xf32> to vector<128x1xf32>
    %126 = tpu.reciprocal %125 {approx = true} : vector<128x1xf32> -> vector<128x1xf32>
    %127 = vector.broadcast %126 : vector<128x1xf32> to vector<128x256xf32>
    %128 = arith.mulf %123, %127 : vector<128x256xf32>
    %129 = arith.truncf %128 : vector<128x256xf32> to vector<128x256xbf16>
    %cst_50 = arith.constant dense<0.000000e+00> : vector<4x128xf32>
    %130 = tpu.matmul %117, %129, %cst_50 {dimension_numbers = #tpu.dot_dimension_numbers<[1], [1], [0], [0], [0, 0, 1, 0], [], []>} : vector<4x256xbf16>, vector<128x256xbf16>, vector<4x128xf32> -> vector<4x128xf32>
    %c0_51 = arith.constant 0 : index
    %c16 = arith.constant 16 : index
    %131 = vector.load %arg7[%c0_51, %c16] : memref<32x32xbf16, #tpu.memory_space<vmem>>, vector<32x4xbf16>
    %132 = arith.truncf %130 : vector<4x128xf32> to vector<4x128xbf16>
    %cst_52 = arith.constant dense<0.000000e+00> : vector<32x128xf32>
    %133 = tpu.matmul %131, %132, %cst_52 {dimension_numbers = #tpu.dot_dimension_numbers<[1], [0], [0], [1], [0, 0, 1, 1], [], []>} : vector<32x4xbf16>, vector<4x128xbf16>, vector<32x128xf32> -> vector<32x128xf32>
    %134 = arith.addf %114, %133 : vector<32x128xf32>
    %135 = vector.extract_strided_slice %33 {offsets = [20, 0], sizes = [4, 128], strides = [1, 1]} : vector<96x256xbf16> to vector<4x128xbf16>
    %136 = vector.extract_strided_slice %33 {offsets = [52, 0], sizes = [4, 256], strides = [1, 1]} : vector<96x256xbf16> to vector<4x256xbf16>
    %137 = vector.extract_strided_slice %33 {offsets = [84, 0], sizes = [4, 256], strides = [1, 1]} : vector<96x256xbf16> to vector<4x256xbf16>
    %cst_53 = arith.constant dense<0.000000e+00> : vector<128x256xf32>
    %138 = tpu.matmul %135, %136, %cst_53 {dimension_numbers = #tpu.dot_dimension_numbers<[0], [0], [1], [1], [0, 1, 1, 1], [], []>} : vector<4x128xbf16>, vector<4x256xbf16>, vector<128x256xf32> -> vector<128x256xf32>
    %cst_54 = arith.constant dense<0xFF800000> : vector<128xf32>
    %139 = vector.multi_reduction <maximumf>, %138, %cst_54 [1] : vector<128x256xf32> to vector<128xf32>
    %140 = vector.shape_cast %139 : vector<128xf32> to vector<128x1xf32>
    %141 = vector.broadcast %140 : vector<128x1xf32> to vector<128x256xf32>
    %142 = arith.subf %138, %141 : vector<128x256xf32>
    %143 = math.exp %142 : vector<128x256xf32>
    %cst_55 = arith.constant dense<0.000000e+00> : vector<128xf32>
    %144 = vector.multi_reduction <add>, %143, %cst_55 [1] : vector<128x256xf32> to vector<128xf32>
    %145 = vector.shape_cast %144 : vector<128xf32> to vector<128x1xf32>
    %146 = tpu.reciprocal %145 {approx = true} : vector<128x1xf32> -> vector<128x1xf32>
    %147 = vector.broadcast %146 : vector<128x1xf32> to vector<128x256xf32>
    %148 = arith.mulf %143, %147 : vector<128x256xf32>
    %149 = arith.truncf %148 : vector<128x256xf32> to vector<128x256xbf16>
    %cst_56 = arith.constant dense<0.000000e+00> : vector<4x128xf32>
    %150 = tpu.matmul %137, %149, %cst_56 {dimension_numbers = #tpu.dot_dimension_numbers<[1], [1], [0], [0], [0, 0, 1, 0], [], []>} : vector<4x256xbf16>, vector<128x256xbf16>, vector<4x128xf32> -> vector<4x128xf32>
    %c0_57 = arith.constant 0 : index
    %c20 = arith.constant 20 : index
    %151 = vector.load %arg7[%c0_57, %c20] : memref<32x32xbf16, #tpu.memory_space<vmem>>, vector<32x4xbf16>
    %152 = arith.truncf %150 : vector<4x128xf32> to vector<4x128xbf16>
    %cst_58 = arith.constant dense<0.000000e+00> : vector<32x128xf32>
    %153 = tpu.matmul %151, %152, %cst_58 {dimension_numbers = #tpu.dot_dimension_numbers<[1], [0], [0], [1], [0, 0, 1, 1], [], []>} : vector<32x4xbf16>, vector<4x128xbf16>, vector<32x128xf32> -> vector<32x128xf32>
    %154 = arith.addf %134, %153 : vector<32x128xf32>
    %155 = vector.extract_strided_slice %33 {offsets = [24, 0], sizes = [4, 128], strides = [1, 1]} : vector<96x256xbf16> to vector<4x128xbf16>
    %156 = vector.extract_strided_slice %33 {offsets = [56, 0], sizes = [4, 256], strides = [1, 1]} : vector<96x256xbf16> to vector<4x256xbf16>
    %157 = vector.extract_strided_slice %33 {offsets = [88, 0], sizes = [4, 256], strides = [1, 1]} : vector<96x256xbf16> to vector<4x256xbf16>
    %cst_59 = arith.constant dense<0.000000e+00> : vector<128x256xf32>
    %158 = tpu.matmul %155, %156, %cst_59 {dimension_numbers = #tpu.dot_dimension_numbers<[0], [0], [1], [1], [0, 1, 1, 1], [], []>} : vector<4x128xbf16>, vector<4x256xbf16>, vector<128x256xf32> -> vector<128x256xf32>
    %cst_60 = arith.constant dense<0xFF800000> : vector<128xf32>
    %159 = vector.multi_reduction <maximumf>, %158, %cst_60 [1] : vector<128x256xf32> to vector<128xf32>
    %160 = vector.shape_cast %159 : vector<128xf32> to vector<128x1xf32>
    %161 = vector.broadcast %160 : vector<128x1xf32> to vector<128x256xf32>
    %162 = arith.subf %158, %161 : vector<128x256xf32>
    %163 = math.exp %162 : vector<128x256xf32>
    %cst_61 = arith.constant dense<0.000000e+00> : vector<128xf32>
    %164 = vector.multi_reduction <add>, %163, %cst_61 [1] : vector<128x256xf32> to vector<128xf32>
    %165 = vector.shape_cast %164 : vector<128xf32> to vector<128x1xf32>
    %166 = tpu.reciprocal %165 {approx = true} : vector<128x1xf32> -> vector<128x1xf32>
    %167 = vector.broadcast %166 : vector<128x1xf32> to vector<128x256xf32>
    %168 = arith.mulf %163, %167 : vector<128x256xf32>
    %169 = arith.truncf %168 : vector<128x256xf32> to vector<128x256xbf16>
    %cst_62 = arith.constant dense<0.000000e+00> : vector<4x128xf32>
    %170 = tpu.matmul %157, %169, %cst_62 {dimension_numbers = #tpu.dot_dimension_numbers<[1], [1], [0], [0], [0, 0, 1, 0], [], []>} : vector<4x256xbf16>, vector<128x256xbf16>, vector<4x128xf32> -> vector<4x128xf32>
    %c0_63 = arith.constant 0 : index
    %c24 = arith.constant 24 : index
    %171 = vector.load %arg7[%c0_63, %c24] : memref<32x32xbf16, #tpu.memory_space<vmem>>, vector<32x4xbf16>
    %172 = arith.truncf %170 : vector<4x128xf32> to vector<4x128xbf16>
    %cst_64 = arith.constant dense<0.000000e+00> : vector<32x128xf32>
    %173 = tpu.matmul %171, %172, %cst_64 {dimension_numbers = #tpu.dot_dimension_numbers<[1], [0], [0], [1], [0, 0, 1, 1], [], []>} : vector<32x4xbf16>, vector<4x128xbf16>, vector<32x128xf32> -> vector<32x128xf32>
    %174 = arith.addf %154, %173 : vector<32x128xf32>
    %175 = vector.extract_strided_slice %33 {offsets = [28, 0], sizes = [4, 128], strides = [1, 1]} : vector<96x256xbf16> to vector<4x128xbf16>
    %176 = vector.extract_strided_slice %33 {offsets = [60, 0], sizes = [4, 256], strides = [1, 1]} : vector<96x256xbf16> to vector<4x256xbf16>
    %177 = vector.extract_strided_slice %33 {offsets = [92, 0], sizes = [4, 256], strides = [1, 1]} : vector<96x256xbf16> to vector<4x256xbf16>
    %cst_65 = arith.constant dense<0.000000e+00> : vector<128x256xf32>
    %178 = tpu.matmul %175, %176, %cst_65 {dimension_numbers = #tpu.dot_dimension_numbers<[0], [0], [1], [1], [0, 1, 1, 1], [], []>} : vector<4x128xbf16>, vector<4x256xbf16>, vector<128x256xf32> -> vector<128x256xf32>
    %cst_66 = arith.constant dense<0xFF800000> : vector<128xf32>
    %179 = vector.multi_reduction <maximumf>, %178, %cst_66 [1] : vector<128x256xf32> to vector<128xf32>
    %180 = vector.shape_cast %179 : vector<128xf32> to vector<128x1xf32>
    %181 = vector.broadcast %180 : vector<128x1xf32> to vector<128x256xf32>
    %182 = arith.subf %178, %181 : vector<128x256xf32>
    %183 = math.exp %182 : vector<128x256xf32>
    %cst_67 = arith.constant dense<0.000000e+00> : vector<128xf32>
    %184 = vector.multi_reduction <add>, %183, %cst_67 [1] : vector<128x256xf32> to vector<128xf32>
    %185 = vector.shape_cast %184 : vector<128xf32> to vector<128x1xf32>
    %186 = tpu.reciprocal %185 {approx = true} : vector<128x1xf32> -> vector<128x1xf32>
    %187 = vector.broadcast %186 : vector<128x1xf32> to vector<128x256xf32>
    %188 = arith.mulf %183, %187 : vector<128x256xf32>
    %189 = arith.truncf %188 : vector<128x256xf32> to vector<128x256xbf16>
    %cst_68 = arith.constant dense<0.000000e+00> : vector<4x128xf32>
    %190 = tpu.matmul %177, %189, %cst_68 {dimension_numbers = #tpu.dot_dimension_numbers<[1], [1], [0], [0], [0, 0, 1, 0], [], []>} : vector<4x256xbf16>, vector<128x256xbf16>, vector<4x128xf32> -> vector<4x128xf32>
    %c0_69 = arith.constant 0 : index
    %c28 = arith.constant 28 : index
    %191 = vector.load %arg7[%c0_69, %c28] : memref<32x32xbf16, #tpu.memory_space<vmem>>, vector<32x4xbf16>
    %192 = arith.truncf %190 : vector<4x128xf32> to vector<4x128xbf16>
    %cst_70 = arith.constant dense<0.000000e+00> : vector<32x128xf32>
    %193 = tpu.matmul %191, %192, %cst_70 {dimension_numbers = #tpu.dot_dimension_numbers<[1], [0], [0], [1], [0, 0, 1, 1], [], []>} : vector<32x4xbf16>, vector<4x128xbf16>, vector<32x128xf32> -> vector<32x128xf32>
    %194 = arith.addf %174, %193 : vector<32x128xf32>
    %195 = vector.extract_strided_slice %1 {offsets = [0, 0], sizes = [32, 128], strides = [1, 1]} : vector<32x256xf32> to vector<32x128xf32>
    %196 = arith.addf %195, %194 : vector<32x128xf32>
    %c0_71 = arith.constant 0 : index
    %c0_72 = arith.constant 0 : index
    %197 = vector.load %arg8[%c0_71, %c0_72] : memref<32x1xf32, #tpu.memory_space<vmem>>, vector<32x1xf32>
    %198 = vector.broadcast %197 : vector<32x1xf32> to vector<32x128xf32>
    %199 = arith.addf %196, %198 : vector<32x128xf32>
    %c0_73 = arith.constant 0 : index
    %c0_74 = arith.constant 0 : index
    %c0_75 = arith.constant 0 : index
    %200 = vector.load %arg9[%c0_73, %c0_74, %c0_75] : memref<1x32x256xf32, #tpu.memory_space<vmem>>, vector<1x32x128xf32>
    %201 = vector.shape_cast %200 : vector<1x32x128xf32> to vector<32x128xf32>
    %202 = vector.shape_cast %199 : vector<32x128xf32> to vector<1x32x128xf32>
    tpu.vector_store %arg9[%c0_73, %c0_74, %c0_75], %202 {strides = array<i32>} : memref<1x32x256xf32, #tpu.memory_space<vmem>>, vector<1x32x128xf32>,
    %cst_76 = arith.constant 0.000000e+00 : f32
    %203 = vector.broadcast %cst_76 : f32 to vector<32x128xf32>
    %204 = vector.extract_strided_slice %33 {offsets = [0, 128], sizes = [4, 128], strides = [1, 1]} : vector<96x256xbf16> to vector<4x128xbf16>
    %205 = vector.extract_strided_slice %33 {offsets = [32, 0], sizes = [4, 256], strides = [1, 1]} : vector<96x256xbf16> to vector<4x256xbf16>
    %206 = vector.extract_strided_slice %33 {offsets = [64, 0], sizes = [4, 256], strides = [1, 1]} : vector<96x256xbf16> to vector<4x256xbf16>
    %cst_77 = arith.constant dense<0.000000e+00> : vector<128x256xf32>
    %207 = tpu.matmul %204, %205, %cst_77 {dimension_numbers = #tpu.dot_dimension_numbers<[0], [0], [1], [1], [0, 1, 1, 1], [], []>} : vector<4x128xbf16>, vector<4x256xbf16>, vector<128x256xf32> -> vector<128x256xf32>
    %cst_78 = arith.constant dense<0xFF800000> : vector<128xf32>
    %208 = vector.multi_reduction <maximumf>, %207, %cst_78 [1] : vector<128x256xf32> to vector<128xf32>
    %209 = vector.shape_cast %208 : vector<128xf32> to vector<128x1xf32>
    %210 = vector.broadcast %209 : vector<128x1xf32> to vector<128x256xf32>
    %211 = arith.subf %207, %210 : vector<128x256xf32>
    %212 = math.exp %211 : vector<128x256xf32>
    %cst_79 = arith.constant dense<0.000000e+00> : vector<128xf32>
    %213 = vector.multi_reduction <add>, %212, %cst_79 [1] : vector<128x256xf32> to vector<128xf32>
    %214 = vector.shape_cast %213 : vector<128xf32> to vector<128x1xf32>
    %215 = tpu.reciprocal %214 {approx = true} : vector<128x1xf32> -> vector<128x1xf32>
    %216 = vector.broadcast %215 : vector<128x1xf32> to vector<128x256xf32>
    %217 = arith.mulf %212, %216 : vector<128x256xf32>
    %218 = arith.truncf %217 : vector<128x256xf32> to vector<128x256xbf16>
    %cst_80 = arith.constant dense<0.000000e+00> : vector<4x128xf32>
    %219 = tpu.matmul %206, %218, %cst_80 {dimension_numbers = #tpu.dot_dimension_numbers<[1], [1], [0], [0], [0, 0, 1, 0], [], []>} : vector<4x256xbf16>, vector<128x256xbf16>, vector<4x128xf32> -> vector<4x128xf32>
    %c0_81 = arith.constant 0 : index
    %c0_82 = arith.constant 0 : index
    %220 = vector.load %arg7[%c0_81, %c0_82] : memref<32x32xbf16, #tpu.memory_space<vmem>>, vector<32x4xbf16>
    %221 = arith.truncf %219 : vector<4x128xf32> to vector<4x128xbf16>
    %cst_83 = arith.constant dense<0.000000e+00> : vector<32x128xf32>
    %222 = tpu.matmul %220, %221, %cst_83 {dimension_numbers = #tpu.dot_dimension_numbers<[1], [0], [0], [1], [0, 0, 1, 1], [], []>} : vector<32x4xbf16>, vector<4x128xbf16>, vector<32x128xf32> -> vector<32x128xf32>
    %223 = arith.addf %203, %222 : vector<32x128xf32>
    %224 = vector.extract_strided_slice %33 {offsets = [4, 128], sizes = [4, 128], strides = [1, 1]} : vector<96x256xbf16> to vector<4x128xbf16>
    %225 = vector.extract_strided_slice %33 {offsets = [36, 0], sizes = [4, 256], strides = [1, 1]} : vector<96x256xbf16> to vector<4x256xbf16>
    %226 = vector.extract_strided_slice %33 {offsets = [68, 0], sizes = [4, 256], strides = [1, 1]} : vector<96x256xbf16> to vector<4x256xbf16>
    %cst_84 = arith.constant dense<0.000000e+00> : vector<128x256xf32>
    %227 = tpu.matmul %224, %225, %cst_84 {dimension_numbers = #tpu.dot_dimension_numbers<[0], [0], [1], [1], [0, 1, 1, 1], [], []>} : vector<4x128xbf16>, vector<4x256xbf16>, vector<128x256xf32> -> vector<128x256xf32>
    %cst_85 = arith.constant dense<0xFF800000> : vector<128xf32>
    %228 = vector.multi_reduction <maximumf>, %227, %cst_85 [1] : vector<128x256xf32> to vector<128xf32>
    %229 = vector.shape_cast %228 : vector<128xf32> to vector<128x1xf32>
    %230 = vector.broadcast %229 : vector<128x1xf32> to vector<128x256xf32>
    %231 = arith.subf %227, %230 : vector<128x256xf32>
    %232 = math.exp %231 : vector<128x256xf32>
    %cst_86 = arith.constant dense<0.000000e+00> : vector<128xf32>
    %233 = vector.multi_reduction <add>, %232, %cst_86 [1] : vector<128x256xf32> to vector<128xf32>
    %234 = vector.shape_cast %233 : vector<128xf32> to vector<128x1xf32>
    %235 = tpu.reciprocal %234 {approx = true} : vector<128x1xf32> -> vector<128x1xf32>
    %236 = vector.broadcast %235 : vector<128x1xf32> to vector<128x256xf32>
    %237 = arith.mulf %232, %236 : vector<128x256xf32>
    %238 = arith.truncf %237 : vector<128x256xf32> to vector<128x256xbf16>
    %cst_87 = arith.constant dense<0.000000e+00> : vector<4x128xf32>
    %239 = tpu.matmul %226, %238, %cst_87 {dimension_numbers = #tpu.dot_dimension_numbers<[1], [1], [0], [0], [0, 0, 1, 0], [], []>} : vector<4x256xbf16>, vector<128x256xbf16>, vector<4x128xf32> -> vector<4x128xf32>
    %c0_88 = arith.constant 0 : index
    %c4_89 = arith.constant 4 : index
    %240 = vector.load %arg7[%c0_88, %c4_89] : memref<32x32xbf16, #tpu.memory_space<vmem>>, vector<32x4xbf16>
    %241 = arith.truncf %239 : vector<4x128xf32> to vector<4x128xbf16>
    %cst_90 = arith.constant dense<0.000000e+00> : vector<32x128xf32>
    %242 = tpu.matmul %240, %241, %cst_90 {dimension_numbers = #tpu.dot_dimension_numbers<[1], [0], [0], [1], [0, 0, 1, 1], [], []>} : vector<32x4xbf16>, vector<4x128xbf16>, vector<32x128xf32> -> vector<32x128xf32>
    %243 = arith.addf %223, %242 : vector<32x128xf32>
    %244 = vector.extract_strided_slice %33 {offsets = [8, 128], sizes = [4, 128], strides = [1, 1]} : vector<96x256xbf16> to vector<4x128xbf16>
    %245 = vector.extract_strided_slice %33 {offsets = [40, 0], sizes = [4, 256], strides = [1, 1]} : vector<96x256xbf16> to vector<4x256xbf16>
    %246 = vector.extract_strided_slice %33 {offsets = [72, 0], sizes = [4, 256], strides = [1, 1]} : vector<96x256xbf16> to vector<4x256xbf16>
    %cst_91 = arith.constant dense<0.000000e+00> : vector<128x256xf32>
    %247 = tpu.matmul %244, %245, %cst_91 {dimension_numbers = #tpu.dot_dimension_numbers<[0], [0], [1], [1], [0, 1, 1, 1], [], []>} : vector<4x128xbf16>, vector<4x256xbf16>, vector<128x256xf32> -> vector<128x256xf32>
    %cst_92 = arith.constant dense<0xFF800000> : vector<128xf32>
    %248 = vector.multi_reduction <maximumf>, %247, %cst_92 [1] : vector<128x256xf32> to vector<128xf32>
    %249 = vector.shape_cast %248 : vector<128xf32> to vector<128x1xf32>
    %250 = vector.broadcast %249 : vector<128x1xf32> to vector<128x256xf32>
    %251 = arith.subf %247, %250 : vector<128x256xf32>
    %252 = math.exp %251 : vector<128x256xf32>
    %cst_93 = arith.constant dense<0.000000e+00> : vector<128xf32>
    %253 = vector.multi_reduction <add>, %252, %cst_93 [1] : vector<128x256xf32> to vector<128xf32>
    %254 = vector.shape_cast %253 : vector<128xf32> to vector<128x1xf32>
    %255 = tpu.reciprocal %254 {approx = true} : vector<128x1xf32> -> vector<128x1xf32>
    %256 = vector.broadcast %255 : vector<128x1xf32> to vector<128x256xf32>
    %257 = arith.mulf %252, %256 : vector<128x256xf32>
    %258 = arith.truncf %257 : vector<128x256xf32> to vector<128x256xbf16>
    %cst_94 = arith.constant dense<0.000000e+00> : vector<4x128xf32>
    %259 = tpu.matmul %246, %258, %cst_94 {dimension_numbers = #tpu.dot_dimension_numbers<[1], [1], [0], [0], [0, 0, 1, 0], [], []>} : vector<4x256xbf16>, vector<128x256xbf16>, vector<4x128xf32> -> vector<4x128xf32>
    %c0_95 = arith.constant 0 : index
    %c8_96 = arith.constant 8 : index
    %260 = vector.load %arg7[%c0_95, %c8_96] : memref<32x32xbf16, #tpu.memory_space<vmem>>, vector<32x4xbf16>
    %261 = arith.truncf %259 : vector<4x128xf32> to vector<4x128xbf16>
    %cst_97 = arith.constant dense<0.000000e+00> : vector<32x128xf32>
    %262 = tpu.matmul %260, %261, %cst_97 {dimension_numbers = #tpu.dot_dimension_numbers<[1], [0], [0], [1], [0, 0, 1, 1], [], []>} : vector<32x4xbf16>, vector<4x128xbf16>, vector<32x128xf32> -> vector<32x128xf32>
    %263 = arith.addf %243, %262 : vector<32x128xf32>
    %264 = vector.extract_strided_slice %33 {offsets = [12, 128], sizes = [4, 128], strides = [1, 1]} : vector<96x256xbf16> to vector<4x128xbf16>
    %265 = vector.extract_strided_slice %33 {offsets = [44, 0], sizes = [4, 256], strides = [1, 1]} : vector<96x256xbf16> to vector<4x256xbf16>
    %266 = vector.extract_strided_slice %33 {offsets = [76, 0], sizes = [4, 256], strides = [1, 1]} : vector<96x256xbf16> to vector<4x256xbf16>
    %cst_98 = arith.constant dense<0.000000e+00> : vector<128x256xf32>
    %267 = tpu.matmul %264, %265, %cst_98 {dimension_numbers = #tpu.dot_dimension_numbers<[0], [0], [1], [1], [0, 1, 1, 1], [], []>} : vector<4x128xbf16>, vector<4x256xbf16>, vector<128x256xf32> -> vector<128x256xf32>
    %cst_99 = arith.constant dense<0xFF800000> : vector<128xf32>
    %268 = vector.multi_reduction <maximumf>, %267, %cst_99 [1] : vector<128x256xf32> to vector<128xf32>
    %269 = vector.shape_cast %268 : vector<128xf32> to vector<128x1xf32>
    %270 = vector.broadcast %269 : vector<128x1xf32> to vector<128x256xf32>
    %271 = arith.subf %267, %270 : vector<128x256xf32>
    %272 = math.exp %271 : vector<128x256xf32>
    %cst_100 = arith.constant dense<0.000000e+00> : vector<128xf32>
    %273 = vector.multi_reduction <add>, %272, %cst_100 [1] : vector<128x256xf32> to vector<128xf32>
    %274 = vector.shape_cast %273 : vector<128xf32> to vector<128x1xf32>
    %275 = tpu.reciprocal %274 {approx = true} : vector<128x1xf32> -> vector<128x1xf32>
    %276 = vector.broadcast %275 : vector<128x1xf32> to vector<128x256xf32>
    %277 = arith.mulf %272, %276 : vector<128x256xf32>
    %278 = arith.truncf %277 : vector<128x256xf32> to vector<128x256xbf16>
    %cst_101 = arith.constant dense<0.000000e+00> : vector<4x128xf32>
    %279 = tpu.matmul %266, %278, %cst_101 {dimension_numbers = #tpu.dot_dimension_numbers<[1], [1], [0], [0], [0, 0, 1, 0], [], []>} : vector<4x256xbf16>, vector<128x256xbf16>, vector<4x128xf32> -> vector<4x128xf32>
    %c0_102 = arith.constant 0 : index
    %c12_103 = arith.constant 12 : index
    %280 = vector.load %arg7[%c0_102, %c12_103] : memref<32x32xbf16, #tpu.memory_space<vmem>>, vector<32x4xbf16>
    %281 = arith.truncf %279 : vector<4x128xf32> to vector<4x128xbf16>
    %cst_104 = arith.constant dense<0.000000e+00> : vector<32x128xf32>
    %282 = tpu.matmul %280, %281, %cst_104 {dimension_numbers = #tpu.dot_dimension_numbers<[1], [0], [0], [1], [0, 0, 1, 1], [], []>} : vector<32x4xbf16>, vector<4x128xbf16>, vector<32x128xf32> -> vector<32x128xf32>
    %283 = arith.addf %263, %282 : vector<32x128xf32>
    %284 = vector.extract_strided_slice %33 {offsets = [16, 128], sizes = [4, 128], strides = [1, 1]} : vector<96x256xbf16> to vector<4x128xbf16>
    %285 = vector.extract_strided_slice %33 {offsets = [48, 0], sizes = [4, 256], strides = [1, 1]} : vector<96x256xbf16> to vector<4x256xbf16>
    %286 = vector.extract_strided_slice %33 {offsets = [80, 0], sizes = [4, 256], strides = [1, 1]} : vector<96x256xbf16> to vector<4x256xbf16>
    %cst_105 = arith.constant dense<0.000000e+00> : vector<128x256xf32>
    %287 = tpu.matmul %284, %285, %cst_105 {dimension_numbers = #tpu.dot_dimension_numbers<[0], [0], [1], [1], [0, 1, 1, 1], [], []>} : vector<4x128xbf16>, vector<4x256xbf16>, vector<128x256xf32> -> vector<128x256xf32>
    %cst_106 = arith.constant dense<0xFF800000> : vector<128xf32>
    %288 = vector.multi_reduction <maximumf>, %287, %cst_106 [1] : vector<128x256xf32> to vector<128xf32>
    %289 = vector.shape_cast %288 : vector<128xf32> to vector<128x1xf32>
    %290 = vector.broadcast %289 : vector<128x1xf32> to vector<128x256xf32>
    %291 = arith.subf %287, %290 : vector<128x256xf32>
    %292 = math.exp %291 : vector<128x256xf32>
    %cst_107 = arith.constant dense<0.000000e+00> : vector<128xf32>
    %293 = vector.multi_reduction <add>, %292, %cst_107 [1] : vector<128x256xf32> to vector<128xf32>
    %294 = vector.shape_cast %293 : vector<128xf32> to vector<128x1xf32>
    %295 = tpu.reciprocal %294 {approx = true} : vector<128x1xf32> -> vector<128x1xf32>
    %296 = vector.broadcast %295 : vector<128x1xf32> to vector<128x256xf32>
    %297 = arith.mulf %292, %296 : vector<128x256xf32>
    %298 = arith.truncf %297 : vector<128x256xf32> to vector<128x256xbf16>
    %cst_108 = arith.constant dense<0.000000e+00> : vector<4x128xf32>
    %299 = tpu.matmul %286, %298, %cst_108 {dimension_numbers = #tpu.dot_dimension_numbers<[1], [1], [0], [0], [0, 0, 1, 0], [], []>} : vector<4x256xbf16>, vector<128x256xbf16>, vector<4x128xf32> -> vector<4x128xf32>
    %c0_109 = arith.constant 0 : index
    %c16_110 = arith.constant 16 : index
    %300 = vector.load %arg7[%c0_109, %c16_110] : memref<32x32xbf16, #tpu.memory_space<vmem>>, vector<32x4xbf16>
    %301 = arith.truncf %299 : vector<4x128xf32> to vector<4x128xbf16>
    %cst_111 = arith.constant dense<0.000000e+00> : vector<32x128xf32>
    %302 = tpu.matmul %300, %301, %cst_111 {dimension_numbers = #tpu.dot_dimension_numbers<[1], [0], [0], [1], [0, 0, 1, 1], [], []>} : vector<32x4xbf16>, vector<4x128xbf16>, vector<32x128xf32> -> vector<32x128xf32>
    %303 = arith.addf %283, %302 : vector<32x128xf32>
    %304 = vector.extract_strided_slice %33 {offsets = [20, 128], sizes = [4, 128], strides = [1, 1]} : vector<96x256xbf16> to vector<4x128xbf16>
    %305 = vector.extract_strided_slice %33 {offsets = [52, 0], sizes = [4, 256], strides = [1, 1]} : vector<96x256xbf16> to vector<4x256xbf16>
    %306 = vector.extract_strided_slice %33 {offsets = [84, 0], sizes = [4, 256], strides = [1, 1]} : vector<96x256xbf16> to vector<4x256xbf16>
    %cst_112 = arith.constant dense<0.000000e+00> : vector<128x256xf32>
    %307 = tpu.matmul %304, %305, %cst_112 {dimension_numbers = #tpu.dot_dimension_numbers<[0], [0], [1], [1], [0, 1, 1, 1], [], []>} : vector<4x128xbf16>, vector<4x256xbf16>, vector<128x256xf32> -> vector<128x256xf32>
    %cst_113 = arith.constant dense<0xFF800000> : vector<128xf32>
    %308 = vector.multi_reduction <maximumf>, %307, %cst_113 [1] : vector<128x256xf32> to vector<128xf32>
    %309 = vector.shape_cast %308 : vector<128xf32> to vector<128x1xf32>
    %310 = vector.broadcast %309 : vector<128x1xf32> to vector<128x256xf32>
    %311 = arith.subf %307, %310 : vector<128x256xf32>
    %312 = math.exp %311 : vector<128x256xf32>
    %cst_114 = arith.constant dense<0.000000e+00> : vector<128xf32>
    %313 = vector.multi_reduction <add>, %312, %cst_114 [1] : vector<128x256xf32> to vector<128xf32>
    %314 = vector.shape_cast %313 : vector<128xf32> to vector<128x1xf32>
    %315 = tpu.reciprocal %314 {approx = true} : vector<128x1xf32> -> vector<128x1xf32>
    %316 = vector.broadcast %315 : vector<128x1xf32> to vector<128x256xf32>
    %317 = arith.mulf %312, %316 : vector<128x256xf32>
    %318 = arith.truncf %317 : vector<128x256xf32> to vector<128x256xbf16>
    %cst_115 = arith.constant dense<0.000000e+00> : vector<4x128xf32>
    %319 = tpu.matmul %306, %318, %cst_115 {dimension_numbers = #tpu.dot_dimension_numbers<[1], [1], [0], [0], [0, 0, 1, 0], [], []>} : vector<4x256xbf16>, vector<128x256xbf16>, vector<4x128xf32> -> vector<4x128xf32>
    %c0_116 = arith.constant 0 : index
    %c20_117 = arith.constant 20 : index
    %320 = vector.load %arg7[%c0_116, %c20_117] : memref<32x32xbf16, #tpu.memory_space<vmem>>, vector<32x4xbf16>
    %321 = arith.truncf %319 : vector<4x128xf32> to vector<4x128xbf16>
    %cst_118 = arith.constant dense<0.000000e+00> : vector<32x128xf32>
    %322 = tpu.matmul %320, %321, %cst_118 {dimension_numbers = #tpu.dot_dimension_numbers<[1], [0], [0], [1], [0, 0, 1, 1], [], []>} : vector<32x4xbf16>, vector<4x128xbf16>, vector<32x128xf32> -> vector<32x128xf32>
    %323 = arith.addf %303, %322 : vector<32x128xf32>
    %324 = vector.extract_strided_slice %33 {offsets = [24, 128], sizes = [4, 128], strides = [1, 1]} : vector<96x256xbf16> to vector<4x128xbf16>
    %325 = vector.extract_strided_slice %33 {offsets = [56, 0], sizes = [4, 256], strides = [1, 1]} : vector<96x256xbf16> to vector<4x256xbf16>
    %326 = vector.extract_strided_slice %33 {offsets = [88, 0], sizes = [4, 256], strides = [1, 1]} : vector<96x256xbf16> to vector<4x256xbf16>
    %cst_119 = arith.constant dense<0.000000e+00> : vector<128x256xf32>
    %327 = tpu.matmul %324, %325, %cst_119 {dimension_numbers = #tpu.dot_dimension_numbers<[0], [0], [1], [1], [0, 1, 1, 1], [], []>} : vector<4x128xbf16>, vector<4x256xbf16>, vector<128x256xf32> -> vector<128x256xf32>
    %cst_120 = arith.constant dense<0xFF800000> : vector<128xf32>
    %328 = vector.multi_reduction <maximumf>, %327, %cst_120 [1] : vector<128x256xf32> to vector<128xf32>
    %329 = vector.shape_cast %328 : vector<128xf32> to vector<128x1xf32>
    %330 = vector.broadcast %329 : vector<128x1xf32> to vector<128x256xf32>
    %331 = arith.subf %327, %330 : vector<128x256xf32>
    %332 = math.exp %331 : vector<128x256xf32>
    %cst_121 = arith.constant dense<0.000000e+00> : vector<128xf32>
    %333 = vector.multi_reduction <add>, %332, %cst_121 [1] : vector<128x256xf32> to vector<128xf32>
    %334 = vector.shape_cast %333 : vector<128xf32> to vector<128x1xf32>
    %335 = tpu.reciprocal %334 {approx = true} : vector<128x1xf32> -> vector<128x1xf32>
    %336 = vector.broadcast %335 : vector<128x1xf32> to vector<128x256xf32>
    %337 = arith.mulf %332, %336 : vector<128x256xf32>
    %338 = arith.truncf %337 : vector<128x256xf32> to vector<128x256xbf16>
    %cst_122 = arith.constant dense<0.000000e+00> : vector<4x128xf32>
    %339 = tpu.matmul %326, %338, %cst_122 {dimension_numbers = #tpu.dot_dimension_numbers<[1], [1], [0], [0], [0, 0, 1, 0], [], []>} : vector<4x256xbf16>, vector<128x256xbf16>, vector<4x128xf32> -> vector<4x128xf32>
    %c0_123 = arith.constant 0 : index
    %c24_124 = arith.constant 24 : index
    %340 = vector.load %arg7[%c0_123, %c24_124] : memref<32x32xbf16, #tpu.memory_space<vmem>>, vector<32x4xbf16>
    %341 = arith.truncf %339 : vector<4x128xf32> to vector<4x128xbf16>
    %cst_125 = arith.constant dense<0.000000e+00> : vector<32x128xf32>
    %342 = tpu.matmul %340, %341, %cst_125 {dimension_numbers = #tpu.dot_dimension_numbers<[1], [0], [0], [1], [0, 0, 1, 1], [], []>} : vector<32x4xbf16>, vector<4x128xbf16>, vector<32x128xf32> -> vector<32x128xf32>
    %343 = arith.addf %323, %342 : vector<32x128xf32>
    %344 = vector.extract_strided_slice %33 {offsets = [28, 128], sizes = [4, 128], strides = [1, 1]} : vector<96x256xbf16> to vector<4x128xbf16>
    %345 = vector.extract_strided_slice %33 {offsets = [60, 0], sizes = [4, 256], strides = [1, 1]} : vector<96x256xbf16> to vector<4x256xbf16>
    %346 = vector.extract_strided_slice %33 {offsets = [92, 0], sizes = [4, 256], strides = [1, 1]} : vector<96x256xbf16> to vector<4x256xbf16>
    %cst_126 = arith.constant dense<0.000000e+00> : vector<128x256xf32>
    %347 = tpu.matmul %344, %345, %cst_126 {dimension_numbers = #tpu.dot_dimension_numbers<[0], [0], [1], [1], [0, 1, 1, 1], [], []>} : vector<4x128xbf16>, vector<4x256xbf16>, vector<128x256xf32> -> vector<128x256xf32>
    %cst_127 = arith.constant dense<0xFF800000> : vector<128xf32>
    %348 = vector.multi_reduction <maximumf>, %347, %cst_127 [1] : vector<128x256xf32> to vector<128xf32>
    %349 = vector.shape_cast %348 : vector<128xf32> to vector<128x1xf32>
    %350 = vector.broadcast %349 : vector<128x1xf32> to vector<128x256xf32>
    %351 = arith.subf %347, %350 : vector<128x256xf32>
    %352 = math.exp %351 : vector<128x256xf32>
    %cst_128 = arith.constant dense<0.000000e+00> : vector<128xf32>
    %353 = vector.multi_reduction <add>, %352, %cst_128 [1] : vector<128x256xf32> to vector<128xf32>
    %354 = vector.shape_cast %353 : vector<128xf32> to vector<128x1xf32>
    %355 = tpu.reciprocal %354 {approx = true} : vector<128x1xf32> -> vector<128x1xf32>
    %356 = vector.broadcast %355 : vector<128x1xf32> to vector<128x256xf32>
    %357 = arith.mulf %352, %356 : vector<128x256xf32>
    %358 = arith.truncf %357 : vector<128x256xf32> to vector<128x256xbf16>
    %cst_129 = arith.constant dense<0.000000e+00> : vector<4x128xf32>
    %359 = tpu.matmul %346, %358, %cst_129 {dimension_numbers = #tpu.dot_dimension_numbers<[1], [1], [0], [0], [0, 0, 1, 0], [], []>} : vector<4x256xbf16>, vector<128x256xbf16>, vector<4x128xf32> -> vector<4x128xf32>
    %c0_130 = arith.constant 0 : index
    %c28_131 = arith.constant 28 : index
    %360 = vector.load %arg7[%c0_130, %c28_131] : memref<32x32xbf16, #tpu.memory_space<vmem>>, vector<32x4xbf16>
    %361 = arith.truncf %359 : vector<4x128xf32> to vector<4x128xbf16>
    %cst_132 = arith.constant dense<0.000000e+00> : vector<32x128xf32>
    %362 = tpu.matmul %360, %361, %cst_132 {dimension_numbers = #tpu.dot_dimension_numbers<[1], [0], [0], [1], [0, 0, 1, 1], [], []>} : vector<32x4xbf16>, vector<4x128xbf16>, vector<32x128xf32> -> vector<32x128xf32>
    %363 = arith.addf %343, %362 : vector<32x128xf32>
    %364 = vector.extract_strided_slice %1 {offsets = [0, 128], sizes = [32, 128], strides = [1, 1]} : vector<32x256xf32> to vector<32x128xf32>
    %365 = arith.addf %364, %363 : vector<32x128xf32>
    %c0_133 = arith.constant 0 : index
    %c0_134 = arith.constant 0 : index
    %366 = vector.load %arg8[%c0_133, %c0_134] : memref<32x1xf32, #tpu.memory_space<vmem>>, vector<32x1xf32>
    %367 = vector.broadcast %366 : vector<32x1xf32> to vector<32x128xf32>
    %368 = arith.addf %365, %367 : vector<32x128xf32>
    %c0_135 = arith.constant 0 : index
    %c0_136 = arith.constant 0 : index
    %c128 = arith.constant 128 : index
    %369 = vector.load %arg9[%c0_135, %c0_136, %c128] : memref<1x32x256xf32, #tpu.memory_space<vmem>>, vector<1x32x128xf32>
    %370 = vector.shape_cast %369 : vector<1x32x128xf32> to vector<32x128xf32>
    %371 = vector.shape_cast %368 : vector<32x128xf32> to vector<1x32x128xf32>
    tpu.vector_store %arg9[%c0_135, %c0_136, %c128], %371 {strides = array<i32>} : memref<1x32x256xf32, #tpu.memory_space<vmem>>, vector<1x32x128xf32>,
    return
  }
  func.func @transform_0(%arg0: i32) -> (i32, i32, i32) {
    %c0_i32 = arith.constant 0 : i32
    %c0_i32_0 = arith.constant 0 : i32
    %c0_i32_1 = arith.constant 0 : i32
    return %arg0, %c0_i32, %c0_i32_0 : i32, i32, i32
  }
  func.func @transform_1(%arg0: i32) -> (i32, i32) {
    %c0_i32 = arith.constant 0 : i32
    %c0_i32_0 = arith.constant 0 : i32
    %c0_i32_1 = arith.constant 0 : i32
    return %c0_i32, %c0_i32_0 : i32, i32
  }
  func.func @transform_2(%arg0: i32) -> (i32, i32) {
    %c0_i32 = arith.constant 0 : i32
    %c0_i32_0 = arith.constant 0 : i32
    %c0_i32_1 = arith.constant 0 : i32
    return %c0_i32, %c0_i32_0 : i32, i32
  }
  func.func @transform_3(%arg0: i32) -> (i32, i32) {
    %c0_i32 = arith.constant 0 : i32
    %c0_i32_0 = arith.constant 0 : i32
    %c0_i32_1 = arith.constant 0 : i32
    return %c0_i32, %c0_i32_0 : i32, i32
  }
  func.func @transform_4(%arg0: i32) -> (i32, i32) {
    %c0_i32 = arith.constant 0 : i32
    %c0_i32_0 = arith.constant 0 : i32
    %c0_i32_1 = arith.constant 0 : i32
    return %c0_i32, %c0_i32_0 : i32, i32
  }
  func.func @transform_5(%arg0: i32) -> (i32, i32) {
    %c0_i32 = arith.constant 0 : i32
    %c0_i32_0 = arith.constant 0 : i32
    %c0_i32_1 = arith.constant 0 : i32
    return %c0_i32, %c0_i32_0 : i32, i32
  }
  func.func @transform_6(%arg0: i32) -> (i32, i32) {
    %c0_i32 = arith.constant 0 : i32
    %c0_i32_0 = arith.constant 0 : i32
    %c0_i32_1 = arith.constant 0 : i32
    return %c0_i32, %c0_i32_0 : i32, i32
  }
  func.func @transform_7(%arg0: i32) -> (i32, i32) {
    %c0_i32 = arith.constant 0 : i32
    %c0_i32_0 = arith.constant 0 : i32
    %c0_i32_1 = arith.constant 0 : i32
    return %c0_i32, %c0_i32_0 : i32, i32
  }
  func.func @transform_8(%arg0: i32) -> (i32, i32, i32) {
    %c0_i32 = arith.constant 0 : i32
    %c0_i32_0 = arith.constant 0 : i32
    %c0_i32_1 = arith.constant 0 : i32
    return %arg0, %c0_i32, %c0_i32_0 : i32, i32, i32
  }
}

</mosaic_0001>

<bundles_post_ra>
// kernel: tpu_custom_call.1
= control target key start
LH: loop header
LB: loop body
LE: loop exit
PB: predicated region body
PF: predicated region fallthrough
CT: control target
= control target key end

     0   :  { %13 = vsyncpa [#allocation3], 0  ;;  %s16739_s0 = inlined_call_operand.vmem [shape: f32[2,32,256], index: 0, kind: input, shape index: {}]   ;;  %s16740_s1 = inlined_call_operand.vmem [shape: f32[32,32], index: 1, kind: input, shape index: {}]   ;;  %s16741_s2 = inlined_call_operand.vmem [shape: f32[32,1], index: 2, kind: input, shape index: {}]   ;;  %s16742_s3 = inlined_call_operand.vmem [shape: f32[32,1], index: 3, kind: input, shape index: {}]   ;;  %s16743_s4 = inlined_call_operand.vmem [shape: bf16[96,32], index: 4, kind: input, shape index: {}]   ;;  %s16744_s5 = inlined_call_operand.vmem [shape: f32[96,1], index: 5, kind: input, shape index: {}]   ;;  %s16745_s6 = inlined_call_operand.vmem [shape: bf16[32,32], index: 6, kind: input, shape index: {}]   ;;  %s16746_s7 = inlined_call_operand.vmem [shape: f32[32,1], index: 7, kind: input, shape index: {}]   ;;  %s16747_s8 = inlined_call_operand.hbm [shape: f32[2,32,256], index: 8, kind: output, shape index: {}]  }
   0x1   :  { %15 = vsyncpa [#allocation3 + $0x1], 0  ;;  %s11578_s27 = smov 0   ;;  %s11580_s28 = smov 0  }
   0x2   :  { %s11582_s29 = smov 0   ;;  %s11584_s30 = smov 0  }
   0x3 LB: > { %s11599_s9 = sadd.s32 4294967295, %s11520_s30   ;;  %s9415_s10 = sadd.s32 4294967294, %s11520_s30   ;;  %s11520_s30 = sphi %s11584_s30, %s17135_s30   ;;  %s11516_s29 = sphi %s11582_s29, %s17134_s29   ;;  %s11512_s28 = sphi %s11580_s28, %s17133_s28   ;;  %s11508_s27 = sphi %s11578_s27, %s17132_s27  }
   0x4   : > { %s11603_s11 = sadd.s32 1, %s11520_s30   ;;  %s201_s12 = sadd.s32 1, %s11516_s29 }
   0x5   : > { %s198_s13 = ssub.s32 %s11520_s30, %s11603_s11  ;;  %p211_p0 = scmp.ne.s32.totalorder %s11516_s29, %s11512_s28 }
   0x6   : > { %p199_p1 = scmp.eq.s32.totalorder %s198_s13, 0  ;;  %p212_p2 = scmp.eq.s32.totalorder %s11599_s9, 1 }
   0x7   : > { %p217_p3 = scmp.ne.s32.totalorder %s11512_s28, %s11508_s27  ;;  %p218_p4 = scmp.eq.s32.totalorder %s9415_s10, 1 }
   0x8   : > { %s11614_s14 = scalar_select %p199_p1, %s11516_s29, %s201_s12  }
   0x9   : > { %p11616_p5 = por %p212_p2, %p211_p0  ;;  %p11620_p6 = por %p218_p4, %p217_p3 }
   0xa   : > { %p9418_p7 = scmp.ge.s32.totalorder %s11520_s30, 1  ;;  %p265_p8 = scmp.lt.s32.totalorder %s11520_s30, 3 }
   0xc   : > { %p266_p9 = pnand %p9418_p7, %p265_p8 }
   0xe   : > { %269 = sbr.rel (%p266_p9) target bundleno = 11977 (0x2ec9), region = 52 }
  0x13   : > { %p299_p10 = scmp.lt.s32.totalorder %s11599_s9, 1  ;;  %v325_v12 = vld [vmem:[%s16740_s1] sm:$0xff]  ;;  %vm329_vm0 = vcmask 261120   ;;  %v11655_v17 = vld [vmem:[%s16740_s1 + $0x8] sm:$0xff]  ;;  %v11660_v18 = vld [vmem:[%s16740_s1 + $0x10] sm:$0xff]  ;;  %v16749_v20 = vmov 0  }
  0x14   : > { %9701 = vmatprep.mubr.msk.f32.mxu0 %vm329_vm0, %v325_v12  ;;  %9715 = vmatprep.mubr.msk.f32.mxu1 %vm329_vm0, %v325_v12  ;;  %v11669_v19 = vld [vmem:[%s16740_s1 + $0x18] sm:$0xff]  ;;  %v614_v53 = vld [vmem:[%s16742_s3 + $0x10] sm:$0xff]  ;;  %vm926_vm1 = vcmask 1041408   ;;  %vm901_vm2 = vcmask 31744   ;;  %s11523_s24 = smov 124   ;;  %s11524_s13 = smov 120  }
  0x15   : > { %s300_s17 = scalar_select %p299_p10, %s11599_s9, 1  ;;  %9883 = vset.pattern.permute.xlu1 %v16749_v20  ;;  %9882 = vset.pattern.permute.xlu0 %v16749_v20  ;;  %v615_v54 = vld [vmem:[%s16742_s3 + $0x18] sm:$0xff] }
  0x16   : > { %s11526_s12 = smov 112   ;;  %s11528_s25 = smov 104  }
  0x17   : > { %s9627_s18 = sshll.u32 %s300_s17, 6  ;;  %s11525_s17 = smov 116  }
  0x18   : > { %s11631_s21 = scalar_lea.vmem %s16739_s0, %s9627_s18  ;;  %s11527_s18 = smov 108  }
  0x19   : > { %v311_v0 = vld [vmem:[%s11631_s21 + $0x30] sm:$0xff]  ;;  %v312_v1 = vld [vmem:[%s11631_s21 + $0x38] sm:$0xff]  ;;  %v309_v2 = vld [vmem:[%s11631_s21 + $0x20] sm:$0xff]  ;;  %s11529_s19 = smov 100   ;;  %s9628_s22 = sshll.u32 %s11599_s9, 10 }
  0x1a   : > { %v322_v3 = vadd.f32 %v312_v1, %v311_v0  ;;  %v310_v4 = vld [vmem:[%s11631_s21 + $0x28] sm:$0xff]  ;;  %v307_v5 = vld [vmem:[%s11631_s21 + $0x10] sm:$0xff]  ;;  %v308_v6 = vld [vmem:[%s11631_s21 + $0x18] sm:$0xff] }
  0x1b   : > { %v316_v7 = vadd.f32 %v308_v6, %v307_v5  ;;  %v11640_v8 = vld [vmem:[%s11631_s21] sm:$0xff]  ;;  %v11643_v9 = vld [vmem:[%s11631_s21 + $0x8] sm:$0xff]  ;;  %v319_v10 = vadd.f32 %v310_v4, %v309_v2 }
  0x1c   : > { %323 = vadd.xlane.f32.xlu0 %v322_v3  ;;  %v313_v11 = vadd.f32 %v11643_v9, %v11640_v8 }
  0x1d   : > { %317 = vadd.xlane.f32.xlu1 %v316_v7  ;;  %v579_v7 = vld [vmem:[%s16741_s2 + $0x18] sm:$0xff] }
  0x20   : > { %320 = vadd.xlane.f32.xlu0 %v319_v10 }
  0x21   : > { %314 = vadd.xlane.f32.xlu1 %v313_v11 }
  0xa5   : > { %v324_v13 = vpop.xlane.xlu0 %323 }
  0xa6   : > { %9693 = vmatprep.subr.mxu0 %v324_v13  ;;  %v318_v14 = vpop.xlane.xlu1 %317 }
  0xa7   : > { %9694 = vmatpush3.msra.mxu0 %v324_v13  ;;  %v577_v13 = vld [vmem:[%s16741_s2 + $0x8] sm:$0xff] }
  0xa9   : > { %v321_v15 = vpop.xlane.xlu0 %320 }
  0xaa   : > { %9695 = vmatprep.subr.mxu0 %v321_v15  ;;  %v315_v16 = vpop.xlane.xlu1 %314 }
  0xab   : > { %9696 = vmatpush3.msra.mxu0 %v321_v15 }
  0xac   : > { %9697 = vmatprep.subr.mxu0 %v318_v14 }
  0xad   : > { %9698 = vmatpush3.msra.mxu0 %v318_v14 }
  0xae   : > { %9699 = vmatprep.subr.mxu0 %v315_v16 }
  0xaf   : > { %9700 = vmatpush3.msra.mxu0 %v315_v16  ;;  %v576_v16 = vld [vmem:[%s16741_s2] sm:$0xff] }
  0xb0   : > { %9702 = vmatmul.mubr.msk.f32.vlgmr.msra.gmra.mxu0 %vm329_vm0, %v11655_v17 }
  0xb1   : > { %9704 = vmatprep.mubr.msk.f32.mxu0 %vm329_vm0, %v11660_v18 }
  0xb4   : > { %9705 = vmatmul.mubr.msk.f32.gmra.mxu0 %vm329_vm0, %v11669_v19 }
  0xb5   : > { %812 = vmatprep.mubr.bf16.mxu0 %v16749_v20 }
 0x170   : > { %v9703_v21 = vpop.f32.mrf.mxu0 }
 0x171   : > { %v428_v22 = vmul.f32 0.0009765625, %v9703_v21  ;;  %v612_v21 = vld [vmem:[%s16742_s3] sm:$0xff] }
 0x172   : > { %v408_v23 = vpop.f32.mrf.mxu0 }
 0x173   : > { %438 = vperm.xlu1 %9883, %v428_v22   ;;  %v427_v28 = vmul.f32 0.0009765625, %v408_v23  ;;  %v661_v22 = vld [vmem:[%s16744_s5 + $0x8] sm:$0xff]  ;;  %v660_v23 = vld [vmem:[%s16744_s5] sm:$0xff] }
 0x174   : > { %v9706_v24 = vpop.f32.mrf.mxu0 }
 0x175   : > { %v430_v25 = vmul.f32 0.0009765625, %v9706_v24  ;;  %v665_v24 = vld [vmem:[%s16744_s5 + $0x28] sm:$0xff] }
 0x176   : > { %v418_v26 = vpop.f32.mrf.mxu0 }
 0x177   : > { %v429_v27 = vmul.f32 0.0009765625, %v418_v26  ;;  %448 = vperm.xlu0 %9882, %v430_v25   ;;  %v664_v25 = vld [vmem:[%s16744_s5 + $0x20] sm:$0xff] }
 0x179   : > { %443 = vperm.xlu1 %9883, %v429_v27  }
 0x17d   : > { %433 = vperm.xlu1 %9883, %v427_v28  }
 0x1ee   : > { %v439_v29 = vpop.permute.xlu1 %438 }
 0x1ef   : > { %v11676_v30 = vsub.f32 %v307_v5, %v439_v29  ;;  %v11678_v32 = vsub.f32 %v308_v6, %v439_v29 }
 0x1f1   : > { %v461_v40 = vmul.f32 %v11676_v30, %v11676_v30  ;;  %v462_v44 = vmul.f32 %v11678_v32, %v11678_v32 }
 0x1f2   : > { %v449_v31 = vpop.permute.xlu0 %448 }
 0x1f3   : > { %v11680_v33 = vsub.f32 %v311_v0, %v449_v31  ;;  %v11682_v34 = vsub.f32 %v312_v1, %v449_v31  ;;  %v470_v49 = vadd.f32 %v462_v44, %v461_v40 }
 0x1f4   : > { %v444_v35 = vpop.permute.xlu1 %443 }
 0x1f5   : > { %v11684_v36 = vsub.f32 %v309_v2, %v444_v35  ;;  %v11686_v37 = vsub.f32 %v310_v4, %v444_v35  ;;  %v465_v38 = vmul.f32 %v11680_v33, %v11680_v33  ;;  %v466_v39 = vmul.f32 %v11682_v34, %v11682_v34 }
 0x1f7   : > { %v476_v41 = vadd.f32 %v466_v39, %v465_v38  ;;  %v463_v42 = vmul.f32 %v11684_v36, %v11684_v36  ;;  %v464_v43 = vmul.f32 %v11686_v37, %v11686_v37 }
 0x1f8   : > { %v434_v45 = vpop.permute.xlu1 %433 }
 0x1f9   : > { %v11701_v46 = vsub.f32 %v11640_v8, %v434_v45  ;;  %v11704_v47 = vsub.f32 %v11643_v9, %v434_v45  ;;  %477 = vadd.xlane.f32.xlu1 %v476_v41  ;;  %v473_v48 = vadd.f32 %v464_v43, %v463_v42  ;;  %v578_v9 = vld [vmem:[%s16741_s2 + $0x10] sm:$0xff] }
 0x1fb   : > { %474 = vadd.xlane.f32.xlu0 %v473_v48  ;;  %v459_v50 = vmul.f32 %v11701_v46, %v11701_v46  ;;  %v460_v51 = vmul.f32 %v11704_v47, %v11704_v47 }
 0x1fd   : > { %471 = vadd.xlane.f32.xlu1 %v470_v49  ;;  %v467_v52 = vadd.f32 %v460_v51, %v459_v50 }
 0x201   : > { %468 = vadd.xlane.f32.xlu1 %v467_v52 }
 0x212   : > { %628 = vperm.xlu1 %9883, %v614_v53  }
 0x216   : > { %633 = vperm.xlu1 %9883, %v615_v54  }
 0x282   : > { %v478_v55 = vpop.xlane.xlu1 %477 }
 0x283   : > { %9707 = vmatprep.subr.mxu1 %v478_v55 }
 0x284   : > { %v475_v56 = vpop.xlane.xlu0 %474  ;;  %9708 = vmatpush3.msra.mxu1 %v478_v55 }
 0x285   : > { %9709 = vmatprep.subr.mxu1 %v475_v56 }
 0x286   : > { %9710 = vmatpush3.msra.mxu1 %v475_v56  ;;  %v472_v57 = vpop.xlane.xlu1 %471 }
 0x287   : > { %9711 = vmatprep.subr.mxu1 %v472_v57 }
 0x288   : > { %9712 = vmatpush3.msra.mxu1 %v472_v57 }
 0x28a   : > { %v469_v58 = vpop.xlane.xlu1 %468 }
 0x28b   : > { %9713 = vmatprep.subr.mxu1 %v469_v58 }
 0x28c   : > { %9714 = vmatpush3.msra.mxu1 %v469_v58 }
 0x28d   : > { %9716 = vmatmul.mubr.msk.f32.vlgmr.msra.gmra.mxu1 %vm329_vm0, %v11655_v17 }
 0x28e   : > { %9718 = vmatprep.mubr.msk.f32.mxu1 %vm329_vm0, %v11660_v18  ;;  %v629_v26 = vpop.permute.xlu1 %628 }
 0x291   : > { %9719 = vmatmul.mubr.msk.f32.gmra.mxu1 %vm329_vm0, %v11669_v19  ;;  %v613_v19 = vld [vmem:[%s16742_s3 + $0x8] sm:$0xff] }
 0x292   : > { %965 = vmatprep.mubr.bf16.mxu1 %v16749_v20  ;;  %v634_v27 = vpop.permute.xlu1 %633 }
 0x34d   : > { %v9717_v59 = vpop.f32.mrf.mxu1 }
 0x34e   : > { %v565_v60 = vmul.f32 0.0009765625, %v9717_v59 }
 0x34f   : > { %v545_v61 = vpop.f32.mrf.mxu1 }
 0x350   : > { %v564_v63 = vmul.f32 0.0009765625, %v545_v61  ;;  %v569_v1 = vadd.f32 1e-05, %v565_v60 }
 0x351   : > { %v9720_v62 = vpop.f32.mrf.mxu1 }
 0x352   : > { %v567_v0 = vmul.f32 0.0009765625, %v9720_v62  ;;  %v568_v5 = vadd.f32 1e-05, %v564_v63 }
 0x353   : > { %v555_v2 = vpop.f32.mrf.mxu1 }
 0x354   : > { %v571_v3 = vadd.f32 1e-05, %v567_v0  ;;  %v566_v4 = vmul.f32 0.0009765625, %v555_v2 }
 0x356   : > { %9894 = vrsqrt.f32 %v571_v3  ;;  %v570_v6 = vadd.f32 1e-05, %v566_v4 }
 0x357   : > { %9896 = vrsqrt.f32 %v569_v1 }
 0x358   : > { %9898 = vrsqrt.f32 %v570_v6 }
 0x359   : > { %9900 = vrsqrt.f32 %v568_v5 }
 0x363   : > { %v9895_v8 = vpop.eup %9894 }
 0x364   : > { %v9897_v10 = vpop.eup %9896  ;;  %v583_v11 = vmul.f32 %v9895_v8, %v579_v7 }
 0x365   : > { %v9899_v12 = vpop.eup %9898  ;;  %v581_v17 = vmul.f32 %v9897_v10, %v577_v13 }
 0x366   : > { %601 = vperm.xlu0 %9882, %v583_v11   ;;  %v582_v14 = vmul.f32 %v9899_v12, %v578_v9  ;;  %v9901_v15 = vpop.eup %9900 }
 0x367   : > { %v580_v18 = vmul.f32 %v9901_v15, %v576_v16 }
 0x368   : > { %596 = vperm.xlu1 %9883, %v582_v14  }
 0x36a   : > { %591 = vperm.xlu0 %9882, %v581_v17  }
 0x36c   : > { %586 = vperm.xlu1 %9883, %v580_v18  }
 0x36e   : > { %623 = vperm.xlu0 %9882, %v613_v19  }
 0x370   : > { %618 = vperm.xlu1 %9883, %v612_v21  }
 0x372   : > { %679 = vperm.xlu0 %9882, %v661_v22  }
 0x374   : > { %674 = vperm.xlu1 %9883, %v660_v23  }
 0x376   : > { %699 = vperm.xlu0 %9882, %v665_v24  }
 0x378   : > { %694 = vperm.xlu1 %9883, %v664_v25  }
 0x3e1   : > { %v602_v28 = vpop.permute.xlu0 %601 }
 0x3e2   : > { %v610_v29 = vmul.f32 %v602_v28, %v11680_v33  ;;  %v611_v31 = vmul.f32 %v602_v28, %v11682_v34 }
 0x3e3   : > { %v597_v35 = vpop.permute.xlu1 %596 }
 0x3e4   : > { %v608_v38 = vmul.f32 %v597_v35, %v11684_v36  ;;  %v609_v39 = vmul.f32 %v597_v35, %v11686_v37  ;;  %v642_v41 = vadd.f32 %v634_v27, %v610_v29  ;;  %v643_v42 = vadd.f32 %v634_v27, %v611_v31 }
 0x3e5   : > { %v592_v40 = vpop.permute.xlu0 %591 }
 0x3e6   : > { %v640_v43 = vadd.f32 %v629_v26, %v608_v38  ;;  %v641_v44 = vadd.f32 %v629_v26, %v609_v39  ;;  %v606_v51 = vmul.f32 %v592_v40, %v11676_v30  ;;  %v607_v33 = vmul.f32 %v592_v40, %v11678_v32  ;;  %v9884_v30 = vld [vmem:[%s16743_s4] sm:$0xff]   ;;  %v9885_v32 = vld [vmem:[%s16743_s4 + $0x8] sm:$0xff]  }
 0x3e7   : > { %v587_v45 = vpop.permute.xlu1 %586 }
 0x3e8   : > { %v658_v48 = vpack.c.bf16 %v642_v41, %v640_v43  ;;  %v659_v49 = vpack.c.bf16 %v643_v42, %v641_v44  ;;  %v604_v34 = vmul.f32 %v587_v45, %v11701_v46  ;;  %v605_v52 = vmul.f32 %v587_v45, %v11704_v47  ;;  %v9886_v46 = vld [vmem:[%s16743_s4 + $0x10] sm:$0xff]  }
 0x3e9   : > { %v624_v50 = vpop.permute.xlu0 %623 }
 0x3ea   : > { %792 = vmatprep.subr.bf16.mxu0 %v659_v49  ;;  %v638_v37 = vadd.f32 %v624_v50, %v606_v51  ;;  %v639_v53 = vadd.f32 %v624_v50, %v607_v33 }
 0x3eb   : > { %793 = vmatpush1.bf16.msra.mxu0 %v658_v48  ;;  %v619_v36 = vpop.permute.xlu1 %618 }
 0x3ec   : > { %v636_v54 = vadd.f32 %v619_v36, %v604_v34  ;;  %v637_v55 = vadd.f32 %v619_v36, %v605_v52 }
 0x3ed   : > { %v11778_v59 = vpop.permute.xlu0 %679 }
 0x3ee   : > { %v656_v56 = vpack.c.bf16 %v638_v37, %v636_v54  ;;  %v657_v57 = vpack.c.bf16 %v639_v53, %v637_v55  ;;  %16876 = vst [vmem:[#allocation6_spill] sm:$0xff] %v11778_v59 }
 0x3ef   : > { %v11780_v60 = vpop.permute.xlu1 %674 }
 0x3f0   : > { %794 = vmatprep.subr.bf16.mxu0 %v657_v57  ;;  %16877 = vst [vmem:[#allocation7_spill] sm:$0xff] %v11780_v60 }
 0x3f1   : > { %795 = vmatpush1.bf16.msra.mxu0 %v656_v56  ;;  %v700_v9 = vpop.permute.xlu0 %699 }
 0x3f3   : > { %v695_v10 = vpop.permute.xlu1 %694 }
 0x3f4   : > { %9436 = vmatmul.mubr.msk.bf16.vlgmr.msra.gmra.mxu0 %vm329_vm0, %v9884_v30 }
 0x3f5   : > { %822 = vmatprep.mubr.bf16.mxu0 %v16749_v20 }
 0x3fc   : > { %9437 = vmatmul.mubr.msk.bf16.gmra.mxu0 %vm329_vm0, %v9885_v32 }
 0x3fd   : > { %832 = vmatprep.mubr.bf16.mxu0 %v16749_v20 }
 0x404   : > { %9438 = vmatmul.mubr.msk.bf16.gmra.mxu0 %vm329_vm0, %v9886_v46 }
 0x405   : > { %842 = vmatprep.mubr.bf16.mxu0 %v16749_v20 }
 0x4b4   : > { %v814_v47 = vpop.f32.mrf.mxu0 }
 0x4b5   : > { %v815_v62 = vadd.f32 %v814_v47, %v11780_v60 }
 0x4b6   : > { %v11776_v58 = vpop.f32.mrf.mxu0 }
 0x4b7   : > { %16875 = vst [vmem:[#allocation5_spill] sm:$0xff] %v11776_v58 }
 0x4b8   : > { %v818_v61 = vpop.f32.mrf.mxu0 }
 0x4b9   : > { %v819_v63 = vadd.f32 %v818_v61, %v11778_v59 }
 0x4ba   : > { %v11784_v0 = vpop.f32.mrf.mxu0 }
 0x4bb   : > { %16878 = vst [vmem:[#allocation8_spill] sm:$0xff] %v11784_v0  ;;  %v11786_v1 = vpack.c.bf16 %v819_v63, %v815_v62 }
 0x4bc   : > { %v11788_v2 = vpop.f32.mrf.mxu0 }
 0x4bd   : > { %16879 = vst [vmem:[#allocation9_spill] sm:$0xff] %v11786_v1  ;;  %16880 = vst [vmem:[#allocation10_spill] sm:$0xff] %v11788_v2  ;;  %885 = vxpose.xlu1.c.b16.start.end [1/1] (short) %v11786_v1, 128  ;;  %v1348_v3 = vrot.slane %v11786_v1, 2 }
 0x4be   : > { %v11792_v4 = vpop.f32.mrf.mxu0 }
 0x4bf   : > { %16881 = vst [vmem:[#allocation11_spill] sm:$0xff] %v11792_v4  ;;  %1350 = vxpose.xlu0.c.b16.start.end [1/1] (short) %v1348_v3, 128 }
 0x4c0   : > { %v11794_v5 = vpop.f32.mrf.mxu0 }
 0x4c1   : > { %16882 = vst [vmem:[#allocation12_spill] sm:$0xff] %v11794_v5 }
 0x4c2   : > { %v11796_v6 = vpop.f32.mrf.mxu0 }
 0x4c3   : > { %16883 = vst [vmem:[#allocation13_spill] sm:$0xff] %v11796_v6 }
 0x4c4   : > { %v834_v7 = vpop.f32.mrf.mxu0 }
 0x4c5   : > { %v835_v12 = vadd.f32 %v834_v7, %v695_v10 }
 0x4c6   : > { %v836_v8 = vpop.f32.mrf.mxu0 }
 0x4c7   : > { %v837_v15 = vadd.f32 %v836_v8, %v695_v10 }
 0x4c8   : > { %v838_v11 = vpop.f32.mrf.mxu0 }
 0x4c9   : > { %v839_v13 = vadd.f32 %v838_v11, %v700_v9 }
 0x4ca   : > { %v840_v14 = vpop.f32.mrf.mxu0 }
 0x4cb   : > { %v11798_v16 = vpack.c.bf16 %v839_v13, %v835_v12  ;;  %v841_v17 = vadd.f32 %v840_v14, %v700_v9 }
 0x4cd   : > { %16884 = vst [vmem:[#allocation14_spill] sm:$0xff] %v11798_v16  ;;  %v11800_v18 = vpack.c.bf16 %v841_v17, %v837_v15  ;;  %v11806_v19 = vsel %vm926_vm1, %v11798_v16, 0  ;;  %v1368_v22 = vrot.slane %v11798_v16, 2 }
 0x4ce   : > { %16886 = vst [vmem:[#allocation16_spill] sm:$0xff] %v11806_v19 }
 0x4cf   : > { %16885 = vst [vmem:[#allocation15_spill] sm:$0xff] %v11800_v18  ;;  %9442 = vmatprep.subr.msk.bf16.mxu1 %vm926_vm1, %v11800_v18  ;;  %v16748_v21 = vrot.slane %v11800_v18, 2  ;;  %v11816_v24 = vsel %vm926_vm1, %v1368_v22, 0 }
 0x4d0   : > { %948 = vmatpush1.bf16.msra.mxu1 %v11806_v19  ;;  %16887 = vst [vmem:[#allocation17_spill] sm:$0xff] %v11816_v24 }
 0x4d1   : > { %9451 = vmatprep.subr.msk.bf16.mxu1 %vm926_vm1, %v16748_v21 }
 0x51f   : > { %v893_v23 = vpop.trf.xlu1 }
 0x520   : > { %9443 = vmatmul.mubr.msk.bf16.vlgmr.msra.gmra.mxu1 %vm901_vm2, %v893_v23 }
 0x521   : > { %1415 = vmatpush1.bf16.msra.mxu1 %v11816_v24  ;;  %975 = vmatprep.mubr.bf16.mxu1 %v16749_v20  ;;  %v1358_v38 = vpop.trf.xlu0 }
 0x523   : > { %v894_v25 = vpop.trf.xlu1 }
 0x525   : > { %v1359_v39 = vpop.trf.xlu0 }
 0x527   : > { %v895_v26 = vpop.trf.xlu1 }
 0x528   : > { %9444 = vmatmul.mubr.msk.bf16.gmra.mxu1 %vm901_vm2, %v894_v25 }
 0x529   : > { %985 = vmatprep.mubr.bf16.mxu1 %v16749_v20  ;;  %v1360_v40 = vpop.trf.xlu0 }
 0x52b   : > { %v896_v27 = vpop.trf.xlu1 }
 0x52d   : > { %v1361_v41 = vpop.trf.xlu0 }
 0x52f   : > { %v897_v28 = vpop.trf.xlu1 }
 0x530   : > { %9445 = vmatmul.mubr.msk.bf16.gmra.mxu1 %vm901_vm2, %v895_v26 }
 0x531   : > { %995 = vmatprep.mubr.bf16.mxu1 %v16749_v20  ;;  %v1362_v42 = vpop.trf.xlu0 }
 0x533   : > { %v898_v29 = vpop.trf.xlu1 }
 0x535   : > { %v1363_v43 = vpop.trf.xlu0 }
 0x537   : > { %v899_v31 = vpop.trf.xlu1 }
 0x538   : > { %9446 = vmatmul.mubr.msk.bf16.gmra.mxu1 %vm901_vm2, %v896_v27 }
 0x539   : > { %1005 = vmatprep.mubr.bf16.mxu1 %v16749_v20  ;;  %v1364_v44 = vpop.trf.xlu0 }
 0x53b   : > { %v900_v35 = vpop.trf.xlu1 }
 0x53d   : > { %v1365_v45 = vpop.trf.xlu0 }
 0x540   : > { %9447 = vmatmul.mubr.msk.bf16.gmra.mxu1 %vm901_vm2, %v897_v28 }
 0x541   : > { %1015 = vmatprep.mubr.bf16.mxu1 %v16749_v20 }
 0x548   : > { %9448 = vmatmul.mubr.msk.bf16.gmra.mxu1 %vm901_vm2, %v898_v29 }
 0x549   : > { %1025 = vmatprep.mubr.bf16.mxu1 %v16749_v20 }
 0x550   : > { %9449 = vmatmul.mubr.msk.bf16.gmra.mxu1 %vm901_vm2, %v899_v31 }
 0x551   : > { %1035 = vmatprep.mubr.bf16.mxu1 %v16749_v20 }
 0x558   : > { %9450 = vmatmul.mubr.msk.bf16.gmra.mxu1 %vm901_vm2, %v900_v35 }
 0x559   : > { %1432 = vmatprep.mubr.bf16.mxu1 %v16749_v20 }
 0x560   : > { %9452 = vmatmul.mubr.msk.bf16.vlgmr.msra.gmra.mxu1 %vm901_vm2, %v1358_v38 }
 0x561   : > { %1442 = vmatprep.mubr.bf16.mxu1 %v16749_v20 }
 0x568   : > { %9453 = vmatmul.mubr.msk.bf16.gmra.mxu1 %vm901_vm2, %v1359_v39 }
 0x569   : > { %1452 = vmatprep.mubr.bf16.mxu1 %v16749_v20 }
 0x570   : > { %9454 = vmatmul.mubr.msk.bf16.gmra.mxu1 %vm901_vm2, %v1360_v40 }
 0x571   : > { %1462 = vmatprep.mubr.bf16.mxu1 %v16749_v20 }
 0x578   : > { %9455 = vmatmul.mubr.msk.bf16.gmra.mxu1 %vm901_vm2, %v1361_v41 }
 0x579   : > { %1472 = vmatprep.mubr.bf16.mxu1 %v16749_v20 }
 0x580   : > { %9456 = vmatmul.mubr.msk.bf16.gmra.mxu1 %vm901_vm2, %v1362_v42 }
 0x581   : > { %1482 = vmatprep.mubr.bf16.mxu1 %v16749_v20 }
 0x588   : > { %9457 = vmatmul.mubr.msk.bf16.gmra.mxu1 %vm901_vm2, %v1363_v43 }
 0x589   : > { %1492 = vmatprep.mubr.bf16.mxu1 %v16749_v20 }
 0x590   : > { %9458 = vmatmul.mubr.msk.bf16.gmra.mxu1 %vm901_vm2, %v1364_v44 }
 0x591   : > { %1502 = vmatprep.mubr.bf16.mxu1 %v16749_v20 }
 0x598   : > { %9459 = vmatmul.mubr.msk.bf16.gmra.mxu1 %vm901_vm2, %v1365_v45 }
 0x5e0   : > { %v11849_v48 = vpop.f32.mrf.mxu1 }
 0x5e2   : > { %v11851_v49 = vpop.f32.mrf.mxu1 }
 0x5e4   : > { %v11853_v50 = vpop.f32.mrf.mxu1 }
 0x5e6   : > { %v11855_v51 = vpop.f32.mrf.mxu1 }
 0x5e7   : > { %v1049_v20 = vmax.f32 %v11853_v50, %v11855_v51 }
 0x5e8   : > { %v11857_v33 = vpop.f32.mrf.mxu1 }
 0x5ea   : > { %v11859_v34 = vpop.f32.mrf.mxu1 }
 0x5ec   : > { %v11861_v52 = vpop.f32.mrf.mxu1 }
 0x5ee   : > { %v11863_v36 = vpop.f32.mrf.mxu1 }
 0x5f0   : > { %v11865_v37 = vpop.f32.mrf.mxu1 }
 0x5f2   : > { %v11867_v53 = vpop.f32.mrf.mxu1 }
 0x5f4   : > { %v11869_v54 = vpop.f32.mrf.mxu1 }
 0x5f6   : > { %v11871_v55 = vpop.f32.mrf.mxu1 }
 0x5f8   : > { %v11873_v56 = vpop.f32.mrf.mxu1 }
 0x5fa   : > { %v11875_v57 = vpop.f32.mrf.mxu1 }
 0x5fb   : > { %v1064_v42 = vmax.f32 %v11873_v56, %v11875_v57 }
 0x5fc   : > { %v11877_v30 = vpop.f32.mrf.mxu1 }
 0x5fe   : > { %v11879_v32 = vpop.f32.mrf.mxu1 }
 0x600   : > { %v11881_v46 = vpop.f32.mrf.mxu1 }
 0x602   : > { %v11883_v47 = vpop.f32.mrf.mxu1 }
 0x603   : > { %v1070_v38 = vmax.f32 %v11881_v46, %v11883_v47 }
 0x604   : > { %v11885_v61 = vpop.f32.mrf.mxu1 }
 0x606   : > { %v11887_v62 = vpop.f32.mrf.mxu1 }
 0x607   : > { %v1073_v43 = vmax.f32 %v11885_v61, %v11887_v62 }
 0x608   : > { %v11889_v63 = vpop.f32.mrf.mxu1 }
 0x60a   : > { %v11891_v3 = vpop.f32.mrf.mxu1 }
 0x60b   : > { %v1076_v28 = vmax.f32 %v11889_v63, %v11891_v3 }
 0x60c   : > { %v11893_v7 = vpop.f32.mrf.mxu1 }
 0x60e   : > { %v11895_v8 = vpop.f32.mrf.mxu1 }
 0x60f   : > { %v1079_v39 = vmax.f32 %v11893_v7, %v11895_v8 }
 0x610   : > { %v11897_v9 = vpop.f32.mrf.mxu1 }
 0x612   : > { %v11899_v10 = vpop.f32.mrf.mxu1 }
 0x613   : > { %v1082_v23 = vmax.f32 %v11897_v9, %v11899_v10 }
 0x614   : > { %v11901_v11 = vpop.f32.mrf.mxu1 }
 0x616   : > { %v11903_v12 = vpop.f32.mrf.mxu1 }
 0x617   : > { %v1085_v29 = vmax.f32 %v11901_v11, %v11903_v12 }
 0x618   : > { %v11905_v13 = vpop.f32.mrf.mxu1 }
 0x61a   : > { %v11907_v14 = vpop.f32.mrf.mxu1 }
 0x61b   : > { %v1088_v15 = vmax.f32 %v11905_v13, %v11907_v14 }
 0x61c   : > { %v11911_v17 = vpop.f32.mrf.mxu1 }
 0x61d   : > { %1089 = vmax.xlane.f32.xlu0 %v1088_v15  ;;  %v1058_v15 = vmax.f32 %v11865_v37, %v11867_v53 }
 0x61e   : > { %v11913_v22 = vpop.f32.mrf.mxu1 }
 0x61f   : > { %v1091_v25 = vmax.f32 %v11911_v17, %v11913_v22 }
 0x620   : > { %v11919_v26 = vpop.f32.mrf.mxu1 }
 0x621   : > { %1083 = vmax.xlane.f32.xlu0 %v1082_v23  ;;  %1092 = vmax.xlane.f32.xlu1 %v1091_v25  ;;  %v1067_v23 = vmax.f32 %v11877_v30, %v11879_v32 }
 0x622   : > { %v11921_v27 = vpop.f32.mrf.mxu1 }
 0x624   : > { %v11927_v31 = vpop.f32.mrf.mxu1 }
 0x625   : > { %1077 = vmax.xlane.f32.xlu0 %v1076_v28  ;;  %1086 = vmax.xlane.f32.xlu1 %v1085_v29  ;;  %v1052_v29 = vmax.f32 %v11857_v33, %v11859_v34 }
 0x626   : > { %v11929_v35 = vpop.f32.mrf.mxu1 }
 0x628   : > { %v11935_v40 = vpop.f32.mrf.mxu1 }
 0x629   : > { %16888 = vst [vmem:[#allocation18_spill] sm:$0xff] %v11935_v40  ;;  %1071 = vmax.xlane.f32.xlu0 %v1070_v38  ;;  %1080 = vmax.xlane.f32.xlu1 %v1079_v39  ;;  %v1061_v38 = vmax.f32 %v11869_v54, %v11871_v55 }
 0x62a   : > { %v11937_v41 = vpop.f32.mrf.mxu1 }
 0x62b   : > { %16889 = vst [vmem:[#allocation19_spill] sm:$0xff] %v11937_v41 }
 0x62c   : > { %v11943_v44 = vpop.f32.mrf.mxu1 }
 0x62d   : > { %16890 = vst [vmem:[#allocation20_spill] sm:$0xff] %v11943_v44  ;;  %1065 = vmax.xlane.f32.xlu0 %v1064_v42  ;;  %1074 = vmax.xlane.f32.xlu1 %v1073_v43  ;;  %v1046_v43 = vmax.f32 %v11849_v48, %v11851_v49 }
 0x62e   : > { %v11945_v45 = vpop.f32.mrf.mxu1 }
 0x62f   : > { %16891 = vst [vmem:[#allocation21_spill] sm:$0xff] %v11945_v45 }
 0x630   : > { %v11951_v25 = vpop.f32.mrf.mxu1 }
 0x631   : > { %16892 = vst [vmem:[#allocation22_spill] sm:$0xff] %v11951_v25  ;;  %1059 = vmax.xlane.f32.xlu0 %v1058_v15  ;;  %1068 = vmax.xlane.f32.xlu1 %v1067_v23  ;;  %v1055_v15 = vmax.f32 %v11861_v52, %v11863_v36 }
 0x632   : > { %v11953_v28 = vpop.f32.mrf.mxu1 }
 0x633   : > { %16893 = vst [vmem:[#allocation23_spill] sm:$0xff] %v11953_v28 }
 0x634   : > { %v11959_v39 = vpop.f32.mrf.mxu1 }
 0x635   : > { %16894 = vst [vmem:[#allocation24_spill] sm:$0xff] %v11959_v39  ;;  %1053 = vmax.xlane.f32.xlu0 %v1052_v29  ;;  %1062 = vmax.xlane.f32.xlu1 %v1061_v38  ;;  %v9887_v38 = vld [vmem:[%s16743_s4 + $0x18] sm:$0xff]  }
 0x636   : > { %v11961_v42 = vpop.f32.mrf.mxu1  ;;  %9439 = vmatmul.mubr.msk.bf16.gmra.mxu0 %vm329_vm0, %v9887_v38 }
 0x637   : > { %16895 = vst [vmem:[#allocation25_spill] sm:$0xff] %v11961_v42 }
 0x638   : > { %v11967_v23 = vpop.f32.mrf.mxu1 }
 0x639   : > { %1047 = vmax.xlane.f32.xlu0 %v1046_v43  ;;  %1056 = vmax.xlane.f32.xlu1 %v1055_v15  ;;  %v16901_v15 = vmov 0  }
 0x63a   : > { %v11969_v21 = vpop.f32.mrf.mxu1  ;;  %852 = vmatprep.mubr.bf16.mxu0 %v16901_v15 }
 0x63b   : > { %16896 = vst [vmem:[#allocation26_spill] sm:$0xff] %v11969_v21 }
 0x63c   : > { %v11973_v4 = vpop.f32.mrf.mxu1 }
 0x63d   : > { %16897 = vst [vmem:[#allocation27_spill] sm:$0xff] %v11973_v4  ;;  %1050 = vmax.xlane.f32.xlu1 %v1049_v20  ;;  %v9888_v20 = vld [vmem:[%s16743_s4 + $0x20] sm:$0xff]  }
 0x63e   : > { %v11975_v29 = vpop.f32.mrf.mxu1  ;;  %9440 = vmatmul.mubr.msk.bf16.gmra.mxu0 %vm329_vm0, %v9888_v20 }
 0x63f   : > { %16898 = vst [vmem:[#allocation28_spill] sm:$0xff] %v11975_v29  ;;  %862 = vmatprep.mubr.bf16.mxu0 %v16901_v15 }
 0x640   : > { %v11980_v6 = vpop.f32.mrf.mxu1 }
 0x641   : > { %16899 = vst [vmem:[#allocation29_spill] sm:$0xff] %v11980_v6 }
 0x642   : > { %v11983_v43 = vpop.f32.mrf.mxu1 }
 0x643   : > { %16900 = vst [vmem:[#allocation30_spill] sm:$0xff] %v11983_v43 }
 0x644   : > { %v11986_v24 = vpop.f32.mrf.mxu1 }
 0x646   : > { %v11988_v19 = vpop.f32.mrf.mxu1 }
 0x648   : > { %v11993_v58 = vpop.f32.mrf.mxu1 }
 0x64a   : > { %v11996_v60 = vpop.f32.mrf.mxu1 }
 0x64b   : > { %v1543_v38 = vmax.f32 %v11993_v58, %v11996_v60 }
 0x64c   : > { %v12001_v0 = vpop.f32.mrf.mxu1 }
 0x64d   : > { %16902 = vst [vmem:[#allocation31_spill] sm:$0xff] %v12001_v0  ;;  %1544 = vmax.xlane.f32.xlu0 %v1543_v38 }
 0x64e   : > { %v12003_v59 = vpop.f32.mrf.mxu1 }
 0x64f   : > { %16903 = vst [vmem:[#allocation32_spill] sm:$0xff] %v12003_v59  ;;  %v1546_v5 = vmax.f32 %v12001_v0, %v12003_v59 }
 0x650   : > { %v12007_v2 = vpop.f32.mrf.mxu1 }
 0x651   : > { %16904 = vst [vmem:[#allocation33_spill] sm:$0xff] %v12007_v2  ;;  %1547 = vmax.xlane.f32.xlu1 %v1546_v5 }
 0x652   : > { %v12009_v16 = vpop.f32.mrf.mxu1 }
 0x653   : > { %16905 = vst [vmem:[#allocation34_spill] sm:$0xff] %v12009_v16  ;;  %v1549_v20 = vmax.f32 %v12007_v2, %v12009_v16  ;;  %v1537_v16 = vmax.f32 %v11980_v6, %v11983_v43  ;;  %v1534_v43 = vmax.f32 %v11973_v4, %v11975_v29 }
 0x654   : > { %v12013_v15 = vpop.f32.mrf.mxu1 }
 0x655   : > { %1550 = vmax.xlane.f32.xlu0 %v1549_v20 }
 0x656   : > { %v12015_v18 = vpop.f32.mrf.mxu1 }
 0x657   : > { %16906 = vst [vmem:[#allocation35_spill] sm:$0xff] %v12015_v18  ;;  %v1552_v38 = vmax.f32 %v12013_v15, %v12015_v18  ;;  %v1531_v18 = vmax.f32 %v11967_v23, %v11969_v21 }
 0x658   : > { %v12019_v1 = vpop.f32.mrf.mxu1 }
 0x659   : > { %1553 = vmax.xlane.f32.xlu1 %v1552_v38  ;;  %v1540_v38 = vmax.f32 %v11986_v24, %v11988_v19 }
 0x65a   : > { %v12021_v59 = vpop.f32.mrf.mxu1 }
 0x65b   : > { %v1555_v5 = vmax.f32 %v12019_v1, %v12021_v59 }
 0x65c   : > { %v12025_v0 = vpop.f32.mrf.mxu1 }
 0x65d   : > { %1556 = vmax.xlane.f32.xlu0 %v1555_v5  ;;  %v1525_v5 = vmax.f32 %v11951_v25, %v11953_v28 }
 0x65e   : > { %v12029_v20 = vpop.f32.mrf.mxu1 }
 0x65f   : > { %v1558_v2 = vmax.f32 %v12025_v0, %v12029_v20 }
 0x661   : > { %1538 = vmax.xlane.f32.xlu0 %v1537_v16  ;;  %1559 = vmax.xlane.f32.xlu1 %v1558_v2  ;;  %v1519_v16 = vmax.f32 %v11935_v40, %v11937_v41  ;;  %v1528_v2 = vmax.f32 %v11959_v39, %v11961_v42 }
 0x665   : > { %1532 = vmax.xlane.f32.xlu0 %v1531_v18  ;;  %1541 = vmax.xlane.f32.xlu1 %v1540_v38  ;;  %v1522_v18 = vmax.f32 %v11943_v44, %v11945_v45 }
 0x669   : > { %1526 = vmax.xlane.f32.xlu0 %v1525_v5  ;;  %1535 = vmax.xlane.f32.xlu1 %v1534_v43 }
 0x66d   : > { %1520 = vmax.xlane.f32.xlu0 %v1519_v16  ;;  %1529 = vmax.xlane.f32.xlu1 %v1528_v2 }
 0x671   : > { %1523 = vmax.xlane.f32.xlu1 %v1522_v18 }
 0x6a6   : > { %v1090_v38 = vpop.xlane.xlu0 %1089 }
 0x6a7   : > { %v1122_v41 = vsub.f32 %v11905_v13, %v1090_v38  ;;  %v1123_v2 = vsub.f32 %v11907_v14, %v1090_v38 }
 0x6a9   : > { %v1182_v21 = vmul.f32 1.442695, %v1122_v41 }
 0x6aa   : > { %v1084_v6 = vpop.xlane.xlu0 %1083  ;;  %v1093_v28 = vpop.xlane.xlu1 %1092 }
 0x6ab   : > { %v1118_v25 = vsub.f32 %v11897_v9, %v1084_v6  ;;  %v1119_v5 = vsub.f32 %v11899_v10, %v1084_v6  ;;  %v1184_v10 = vmul.f32 1.442695, %v1123_v2  ;;  %v1125_v38 = vsub.f32 %v11913_v22, %v1093_v28 }
 0x6ad   : > { %v1174_v42 = vmul.f32 1.442695, %v1118_v25  ;;  %v1176_v44 = vmul.f32 1.442695, %v1119_v5 }
 0x6ae   : > { %v1078_v43 = vpop.xlane.xlu0 %1077  ;;  %v1087_v29 = vpop.xlane.xlu1 %1086 }
 0x6af   : > { %v1114_v40 = vsub.f32 %v11889_v63, %v1078_v43  ;;  %v1115_v16 = vsub.f32 %v11891_v3, %v1078_v43  ;;  %v1120_v6 = vsub.f32 %v11901_v11, %v1087_v29  ;;  %v1121_v63 = vsub.f32 %v11903_v12, %v1087_v29 }
 0x6b0   : > { %v1124_v11 = vsub.f32 %v11911_v17, %v1093_v28 }
 0x6b1   : > { %v1166_v45 = vmul.f32 1.442695, %v1114_v40  ;;  %v1168_v18 = vmul.f32 1.442695, %v1115_v16  ;;  %v1180_v12 = vmul.f32 1.442695, %v1121_v63 }
 0x6b2   : > { %v1072_v39 = vpop.xlane.xlu0 %1071  ;;  %v1081_v4 = vpop.xlane.xlu1 %1080 }
 0x6b3   : > { %9902 = vpow2.f32 %v1166_v45  ;;  %v1116_v9 = vsub.f32 %v11893_v7, %v1081_v4  ;;  %v1117_v3 = vsub.f32 %v11895_v8, %v1081_v4  ;;  %v1110_v13 = vsub.f32 %v11881_v46, %v1072_v39 }
 0x6b4   : > { %9904 = vpow2.f32 %v1168_v18  ;;  %v1111_v40 = vsub.f32 %v11883_v47, %v1072_v39  ;;  %v1178_v7 = vmul.f32 1.442695, %v1120_v6  ;;  %v1188_v39 = vmul.f32 1.442695, %v1125_v38 }
 0x6b5   : > { %9906 = vpow2.f32 %v1174_v42  ;;  %v1170_v14 = vmul.f32 1.442695, %v1116_v9  ;;  %v1172_v25 = vmul.f32 1.442695, %v1117_v3  ;;  %v1158_v29 = vmul.f32 1.442695, %v1110_v13 }
 0x6b6   : > { %9908 = vpow2.f32 %v1176_v44  ;;  %v1066_v41 = vpop.xlane.xlu0 %1065  ;;  %v1075_v45 = vpop.xlane.xlu1 %1074  ;;  %v1160_v4 = vmul.f32 1.442695, %v1111_v40  ;;  %v1186_v44 = vmul.f32 1.442695, %v1124_v11 }
 0x6b7   : > { %9910 = vpow2.f32 %v1182_v21  ;;  %v1112_v47 = vsub.f32 %v11885_v61, %v1075_v45  ;;  %v1113_v21 = vsub.f32 %v11887_v62, %v1075_v45  ;;  %v1106_v17 = vsub.f32 %v11873_v56, %v1066_v41 }
 0x6b8   : > { %9912 = vpow2.f32 %v1184_v10  ;;  %v1107_v22 = vsub.f32 %v11875_v57, %v1066_v41 }
 0x6b9   : > { %9914 = vpow2.f32 %v1170_v14  ;;  %v1162_v28 = vmul.f32 1.442695, %v1112_v47  ;;  %v1164_v5 = vmul.f32 1.442695, %v1113_v21  ;;  %v1150_v61 = vmul.f32 1.442695, %v1106_v17 }
 0x6ba   : > { %9916 = vpow2.f32 %v1172_v25  ;;  %v1060_v46 = vpop.xlane.xlu0 %1059  ;;  %v1069_v8 = vpop.xlane.xlu1 %1068  ;;  %v1152_v6 = vmul.f32 1.442695, %v1107_v22 }
 0x6bb   : > { %9918 = vpow2.f32 %v1178_v7  ;;  %v1102_v18 = vsub.f32 %v11865_v37, %v1060_v46  ;;  %v1103_v56 = vsub.f32 %v11867_v53, %v1060_v46  ;;  %v1108_v10 = vsub.f32 %v11877_v30, %v1069_v8 }
 0x6bc   : > { %9920 = vpow2.f32 %v1180_v12  ;;  %v1109_v3 = vsub.f32 %v11879_v32, %v1069_v8 }
 0x6bd   : > { %9922 = vpow2.f32 %v1158_v29  ;;  %v1142_v13 = vmul.f32 1.442695, %v1102_v18  ;;  %v1144_v40 = vmul.f32 1.442695, %v1103_v56  ;;  %v1154_v32 = vmul.f32 1.442695, %v1108_v10 }
 0x6be   : > { %9924 = vpow2.f32 %v1160_v4  ;;  %v1054_v43 = vpop.xlane.xlu0 %1053  ;;  %v1063_v16 = vpop.xlane.xlu1 %1062  ;;  %v1156_v12 = vmul.f32 1.442695, %v1109_v3 }
 0x6bf   : > { %9926 = vpow2.f32 %v1186_v44  ;;  %v1098_v53 = vsub.f32 %v11857_v33, %v1054_v43  ;;  %v1099_v25 = vsub.f32 %v11859_v34, %v1054_v43  ;;  %v1104_v7 = vsub.f32 %v11869_v54, %v1063_v16 }
 0x6c0   : > { %v12065_v42 = vpop.eup %9902  ;;  %9928 = vpow2.f32 %v1188_v39  ;;  %v1105_v33 = vsub.f32 %v11871_v55, %v1063_v16 }
 0x6c1   : > { %v12067_v2 = vpop.eup %9904  ;;  %9930 = vpow2.f32 %v1162_v28  ;;  %v1134_v4 = vmul.f32 1.442695, %v1098_v53  ;;  %v1136_v44 = vmul.f32 1.442695, %v1099_v25  ;;  %v1146_v39 = vmul.f32 1.442695, %v1104_v7 }
 0x6c2   : > { %v12070_v62 = vpop.eup %9906  ;;  %v1220_v57 = vadd.f32 %v12067_v2, %v12065_v42  ;;  %9932 = vpow2.f32 %v1164_v5  ;;  %v1048_v41 = vpop.xlane.xlu0 %1047 }
 0x6c3   : > { %v12075_v9 = vpop.eup %9908  ;;  %9934 = vpow2.f32 %v1150_v61  ;;  %v1057_v30 = vpop.xlane.xlu1 %1056  ;;  %v1094_v46 = vsub.f32 %v11849_v48, %v1048_v41  ;;  %v1095_v54 = vsub.f32 %v11851_v49, %v1048_v41  ;;  %v1148_v48 = vmul.f32 1.442695, %v1105_v33 }
 0x6c4   : > { %v12078_v63 = vpop.eup %9910  ;;  %1221 = vadd.xlane.f32.xlu0 %v1220_v57  ;;  %9936 = vpow2.f32 %v1152_v6  ;;  %v1226_v45 = vadd.f32 %v12075_v9, %v12070_v62  ;;  %v1100_v21 = vsub.f32 %v11861_v52, %v1057_v30  ;;  %v1101_v22 = vsub.f32 %v11863_v36, %v1057_v30 }
 0x6c5   : > { %v12081_v37 = vpop.eup %9912  ;;  %9938 = vpow2.f32 %v1142_v13  ;;  %v1126_v43 = vmul.f32 1.442695, %v1094_v46  ;;  %v1128_v16 = vmul.f32 1.442695, %v1095_v54  ;;  %v1516_v33 = vmax.f32 %v11927_v31, %v11929_v35 }
 0x6c6   : > { %v12084_v14 = vpop.eup %9914  ;;  %9940 = vpow2.f32 %v1144_v40  ;;  %v1232_v55 = vadd.f32 %v12081_v37, %v12078_v63  ;;  %v1138_v61 = vmul.f32 1.442695, %v1100_v21  ;;  %v1140_v6 = vmul.f32 1.442695, %v1101_v22  ;;  %v16908_v21 = vld [vmem:[#allocation32_spill] sm:$0xff] }
 0x6c7   : > { %v12089_v11 = vpop.eup %9916  ;;  %9942 = vpow2.f32 %v1154_v32  ;;  %v1051_v28 = vpop.xlane.xlu1 %1050 }
 0x6c8   : > { %v12092_v38 = vpop.eup %9918  ;;  %1227 = vadd.xlane.f32.xlu0 %v1226_v45  ;;  %v1223_v29 = vadd.f32 %v12089_v11, %v12084_v14  ;;  %9944 = vpow2.f32 %v1156_v12  ;;  %v1096_v18 = vsub.f32 %v11853_v50, %v1051_v28  ;;  %v1097_v56 = vsub.f32 %v11855_v51, %v1051_v28 }
 0x6c9   : > { %v12097_v34 = vpop.eup %9920  ;;  %9946 = vpow2.f32 %v1134_v4  ;;  %v1513_v50 = vmax.f32 %v11919_v26, %v11921_v27 }
 0x6ca   : > { %v12100_v8 = vpop.eup %9922  ;;  %1224 = vadd.xlane.f32.xlu1 %v1223_v29  ;;  %v1229_v49 = vadd.f32 %v12097_v34, %v12092_v38  ;;  %9948 = vpow2.f32 %v1136_v44  ;;  %v1130_v53 = vmul.f32 1.442695, %v1096_v18  ;;  %v1132_v51 = vmul.f32 1.442695, %v1097_v56  ;;  %v16909_v56 = vld [vmem:[#allocation33_spill] sm:$0xff] }
 0x6cb   : > { %v12105_v47 = vpop.eup %9924  ;;  %9950 = vpow2.f32 %v1146_v39 }
 0x6cc   : > { %v12108_v17 = vpop.eup %9926  ;;  %1233 = vadd.xlane.f32.xlu0 %v1232_v55  ;;  %v1214_v52 = vadd.f32 %v12105_v47, %v12100_v8  ;;  %9952 = vpow2.f32 %v1148_v48 }
 0x6cd   : > { %v12113_v5 = vpop.eup %9928  ;;  %9954 = vpow2.f32 %v1126_v43 }
 0x6ce   : > { %1230 = vadd.xlane.f32.xlu1 %v1229_v49  ;;  %v12118_v36 = vpop.eup %9930  ;;  %v1235_v57 = vadd.f32 %v12113_v5, %v12108_v17  ;;  %9956 = vpow2.f32 %v1128_v16 }
 0x6cf   : > { %v12123_v10 = vpop.eup %9932  ;;  %9958 = vpow2.f32 %v1138_v61 }
 0x6d0   : > { %1215 = vadd.xlane.f32.xlu0 %v1214_v52  ;;  %v12125_v3 = vpop.eup %9934  ;;  %9960 = vpow2.f32 %v1140_v6  ;;  %v1217_v40 = vadd.f32 %v12123_v10, %v12118_v36 }
 0x6d1   : > { %v12129_v13 = vpop.eup %9936  ;;  %9962 = vpow2.f32 %v1130_v53 }
 0x6d2   : > { %1236 = vadd.xlane.f32.xlu1 %v1235_v57  ;;  %v12133_v25 = vpop.eup %9938  ;;  %v1208_v30 = vadd.f32 %v12129_v13, %v12125_v3  ;;  %9964 = vpow2.f32 %v1132_v51 }
 0x6d3   : > { %v12137_v45 = vpop.eup %9940 }
 0x6d4   : > { %1514 = vmax.xlane.f32.xlu0 %v1513_v50  ;;  %v12141_v12 = vpop.eup %9942  ;;  %v16910_v50 = vld [vmem:[#allocation34_spill] sm:$0xff] }
 0x6d5   : > { %v12145_v29 = vpop.eup %9944 }
 0x6d6   : > { %1218 = vadd.xlane.f32.xlu1 %v1217_v40  ;;  %v1545_v41 = vpop.xlane.xlu0 %1544  ;;  %v12147_v44 = vpop.eup %9946  ;;  %v1211_v28 = vadd.f32 %v12145_v29, %v12141_v12 }
 0x6d7   : > { %v1581_v32 = vsub.f32 %v11993_v58, %v1545_v41  ;;  %v1582_v7 = vsub.f32 %v11996_v60, %v1545_v41  ;;  %v1202_v58 = vadd.f32 %v12137_v45, %v12133_v25  ;;  %v12151_v55 = vpop.eup %9948  ;;  %v16907_v60 = vld [vmem:[#allocation31_spill] sm:$0xff] }
 0x6d8   : > { %1209 = vadd.xlane.f32.xlu0 %v1208_v30  ;;  %v12155_v22 = vpop.eup %9950  ;;  %v1196_v18 = vadd.f32 %v12151_v55, %v12147_v44 }
 0x6d9   : > { %v1633_v4 = vmul.f32 1.442695, %v1581_v32  ;;  %v1635_v46 = vmul.f32 1.442695, %v1582_v7  ;;  %v12159_v49 = vpop.eup %9952 }
 0x6da   : > { %1517 = vmax.xlane.f32.xlu1 %v1516_v33  ;;  %v1548_v54 = vpop.xlane.xlu1 %1547  ;;  %v12161_v52 = vpop.eup %9954  ;;  %v1205_v40 = vadd.f32 %v12159_v49, %v12155_v22 }
 0x6db   : > { %9966 = vpow2.f32 %v1633_v4  ;;  %v1583_v39 = vsub.f32 %v16907_v60, %v1548_v54  ;;  %v1584_v48 = vsub.f32 %v16908_v21, %v1548_v54  ;;  %v12165_v6 = vpop.eup %9956 }
 0x6dc   : > { %9968 = vpow2.f32 %v1635_v46  ;;  %1203 = vadd.xlane.f32.xlu0 %v1202_v58  ;;  %v12169_v51 = vpop.eup %9958  ;;  %v1190_v33 = vadd.f32 %v12165_v6, %v12161_v52  ;;  %v16911_v46 = vld [vmem:[#allocation35_spill] sm:$0xff] }
 0x6dd   : > { %v1637_v43 = vmul.f32 1.442695, %v1583_v39  ;;  %v1639_v16 = vmul.f32 1.442695, %v1584_v48  ;;  %v12173_v41 = vpop.eup %9960 }
 0x6de   : > { %1212 = vadd.xlane.f32.xlu1 %v1211_v28  ;;  %v1551_v61 = vpop.xlane.xlu0 %1550  ;;  %v12179_v58 = vpop.eup %9962  ;;  %v1199_v60 = vadd.f32 %v12173_v41, %v12169_v51 }
 0x6df   : > { %9970 = vpow2.f32 %v1637_v43  ;;  %v1585_v57 = vsub.f32 %v16909_v56, %v1551_v61  ;;  %v1586_v53 = vsub.f32 %v16910_v50, %v1551_v61  ;;  %v12183_v39 = vpop.eup %9964 }
 0x6e0   : > { %9972 = vpow2.f32 %v1639_v16  ;;  %1197 = vadd.xlane.f32.xlu0 %v1196_v18  ;;  %v1193_v61 = vadd.f32 %v12183_v39, %v12179_v58 }
 0x6e1   : > { %v1641_v30 = vmul.f32 1.442695, %v1585_v57  ;;  %v1643_v32 = vmul.f32 1.442695, %v1586_v53 }
 0x6e2   : > { %1206 = vadd.xlane.f32.xlu1 %v1205_v40  ;;  %v1554_v7 = vpop.xlane.xlu1 %1553 }
 0x6e3   : > { %9974 = vpow2.f32 %v1641_v30  ;;  %v1587_v4 = vsub.f32 %v12013_v15, %v1554_v7  ;;  %v1588_v54 = vsub.f32 %v16911_v46, %v1554_v7 }
 0x6e4   : > { %9976 = vpow2.f32 %v1643_v32  ;;  %1191 = vadd.xlane.f32.xlu0 %v1190_v33 }
 0x6e5   : > { %v1645_v21 = vmul.f32 1.442695, %v1587_v4  ;;  %v1647_v48 = vmul.f32 1.442695, %v1588_v54 }
 0x6e6   : > { %1200 = vadd.xlane.f32.xlu1 %v1199_v60  ;;  %v1557_v28 = vpop.xlane.xlu0 %1556 }
 0x6e7   : > { %9978 = vpow2.f32 %v1645_v21  ;;  %v1589_v43 = vsub.f32 %v12019_v1, %v1557_v28  ;;  %v1590_v15 = vsub.f32 %v12021_v59, %v1557_v28 }
 0x6e8   : > { %v12187_v16 = vpop.eup %9966  ;;  %9980 = vpow2.f32 %v1647_v48 }
 0x6e9   : > { %16912 = vst [vmem:[#allocation31_spill] sm:$0xff] %v12187_v16  ;;  %v12191_v18 = vpop.eup %9968  ;;  %v1649_v56 = vmul.f32 1.442695, %v1589_v43  ;;  %v1651_v57 = vmul.f32 1.442695, %v1590_v15 }
 0x6ea   : > { %16913 = vst [vmem:[#allocation32_spill] sm:$0xff] %v12191_v18  ;;  %1194 = vadd.xlane.f32.xlu1 %v1193_v61  ;;  %v1560_v50 = vpop.xlane.xlu1 %1559  ;;  %v1687_v53 = vadd.f32 %v12191_v18, %v12187_v16 }
 0x6eb   : > { %9982 = vpow2.f32 %v1649_v56  ;;  %v1591_v1 = vsub.f32 %v12025_v0, %v1560_v50  ;;  %v1592_v59 = vsub.f32 %v12029_v20, %v1560_v50  ;;  %v1539_v56 = vpop.xlane.xlu0 %1538  ;;  %v669_v50 = vld [vmem:[%s16744_s5 + $0x48] sm:$0xff] }
 0x6ec   : > { %v12196_v40 = vpop.eup %9970  ;;  %9984 = vpow2.f32 %v1651_v57  ;;  %1688 = vadd.xlane.f32.xlu0 %v1687_v53  ;;  %v668_v57 = vld [vmem:[%s16744_s5 + $0x40] sm:$0xff]  ;;  %v9890_v53 = vld [vmem:[%s16743_s4 + $0x28] sm:$0xff]  }
 0x6ed   : > { %16914 = vst [vmem:[#allocation33_spill] sm:$0xff] %v12196_v40  ;;  %v12199_v30 = vpop.eup %9972  ;;  %v1653_v32 = vmul.f32 1.442695, %v1591_v1  ;;  %v1655_v7 = vmul.f32 1.442695, %v1592_v59  ;;  %9441 = vmatmul.mubr.msk.bf16.gmra.mxu0 %vm329_vm0, %v9890_v53 }
 0x6ee   : > { %16915 = vst [vmem:[#allocation34_spill] sm:$0xff] %v12199_v30  ;;  %v1690_v33 = vadd.f32 %v12199_v30, %v12196_v40  ;;  %v1542_v59 = vpop.xlane.xlu1 %1541  ;;  %v16923_v40 = vld [vmem:[#allocation29_spill] sm:$0xff] }
 0x6ef   : > { %9986 = vpow2.f32 %v1653_v32  ;;  %v1533_v1 = vpop.xlane.xlu0 %1532  ;;  %v1579_v32 = vsub.f32 %v11986_v24, %v1542_v59  ;;  %v1577_v18 = vsub.f32 %v16923_v40, %v1539_v56  ;;  %v16926_v24 = vld [vmem:[#allocation23_spill] sm:$0xff] }
 0x6f0   : > { %v12203_v4 = vpop.eup %9974  ;;  %1691 = vadd.xlane.f32.xlu1 %v1690_v33  ;;  %9988 = vpow2.f32 %v1655_v7  ;;  %v1580_v7 = vsub.f32 %v11988_v19, %v1542_v59 }
 0x6f1   : > { %16916 = vst [vmem:[#allocation35_spill] sm:$0xff] %v12203_v4  ;;  %v12205_v46 = vpop.eup %9976 }
 0x6f2   : > { %16917 = vst [vmem:[#allocation36_spill] sm:$0xff] %v12205_v46  ;;  %v1693_v0 = vadd.f32 %v12205_v46, %v12203_v4  ;;  %v1631_v16 = vmul.f32 1.442695, %v1580_v7  ;;  %v16924_v4 = vld [vmem:[#allocation30_spill] sm:$0xff] }
 0x6f3   : > { %v1527_v33 = vpop.xlane.xlu0 %1526  ;;  %v1578_v30 = vsub.f32 %v16924_v4, %v1539_v56 }
 0x6f4   : > { %v12209_v54 = vpop.eup %9978  ;;  %1694 = vadd.xlane.f32.xlu0 %v1693_v0  ;;  %v1536_v0 = vpop.xlane.xlu1 %1535  ;;  %v1570_v19 = vsub.f32 %v16926_v24, %v1527_v33 }
 0x6f5   : > { %16918 = vst [vmem:[#allocation37_spill] sm:$0xff] %v12209_v54  ;;  %v12211_v20 = vpop.eup %9980 }
 0x6f6   : > { %16919 = vst [vmem:[#allocation38_spill] sm:$0xff] %v12211_v20  ;;  %v1696_v60 = vadd.f32 %v12211_v20, %v12209_v54  ;;  %v1625_v20 = vmul.f32 1.442695, %v1577_v18  ;;  %v1611_v56 = vmul.f32 1.442695, %v1570_v19  ;;  %v16932_v18 = vld [vmem:[#allocation25_spill] sm:$0xff] }
 0x6f7   : > { %v1521_v59 = vpop.xlane.xlu0 %1520 }
 0x6f8   : > { %v12215_v21 = vpop.eup %9982  ;;  %1697 = vadd.xlane.f32.xlu1 %v1696_v60  ;;  %v1573_v60 = vsub.f32 %v11967_v23, %v1533_v1  ;;  %v16927_v23 = vld [vmem:[#allocation27_spill] sm:$0xff] }
 0x6f9   : > { %16920 = vst [vmem:[#allocation39_spill] sm:$0xff] %v12215_v21  ;;  %v12217_v48 = vpop.eup %9984 }
 0x6fa   : > { %v1699_v28 = vadd.f32 %v12217_v48, %v12215_v21  ;;  %v1617_v54 = vmul.f32 1.442695, %v1573_v60  ;;  %v1530_v21 = vpop.xlane.xlu1 %1529  ;;  %v16930_v60 = vld [vmem:[#allocation19_spill] sm:$0xff] }
 0x6fb   : > { %v1572_v24 = vsub.f32 %v16932_v18, %v1530_v21 }
 0x6fc   : > { %1700 = vadd.xlane.f32.xlu0 %v1699_v28  ;;  %v12221_v43 = vpop.eup %9986  ;;  %v1629_v28 = vmul.f32 1.442695, %v1579_v32  ;;  %v1575_v32 = vsub.f32 %v16927_v23, %v1536_v0 }
 0x6fd   : > { %16921 = vst [vmem:[#allocation40_spill] sm:$0xff] %v12221_v43  ;;  %v12223_v15 = vpop.eup %9988  ;;  %v1615_v19 = vmul.f32 1.442695, %v1572_v24 }
 0x6fe   : > { %v1702_v61 = vadd.f32 %v12223_v15, %v12221_v43  ;;  %9990 = vpow2.f32 %v1629_v28  ;;  %v1627_v43 = vmul.f32 1.442695, %v1578_v30  ;;  %v1566_v28 = vsub.f32 %v16930_v60, %v1521_v59  ;;  %v1524_v23 = vpop.xlane.xlu1 %1523 }
 0x6ff   : > { %9992 = vpow2.f32 %v1631_v16  ;;  %v1621_v16 = vmul.f32 1.442695, %v1575_v32 }
 0x700   : > { %1703 = vadd.xlane.f32.xlu1 %v1702_v61  ;;  %v16922_v61 = vld [vmem:[#allocation26_spill] sm:$0xff]  ;;  %9994 = vpow2.f32 %v1617_v54  ;;  %v1603_v54 = vmul.f32 1.442695, %v1566_v28 }
 0x70b   : > { %v12253_v32 = vpop.eup %9990 }
 0x711   : > { %719 = vperm.xlu1 %9883, %v669_v50   ;;  %v16925_v50 = vld [vmem:[#allocation22_spill] sm:$0xff] }
 0x712   : > { %714 = vperm.xlu0 %9882, %v668_v57   ;;  %v1574_v57 = vsub.f32 %v16922_v61, %v1533_v1  ;;  %v1569_v53 = vsub.f32 %v16925_v50, %v1527_v33  ;;  %v16928_v1 = vld [vmem:[#allocation28_spill] sm:$0xff]  ;;  %v16929_v61 = vld [vmem:[#allocation18_spill] sm:$0xff] }
 0x713   : > { %v1576_v7 = vsub.f32 %v16928_v1, %v1536_v0  ;;  %v1565_v4 = vsub.f32 %v16929_v61, %v1521_v59  ;;  %v16934_v59 = vld [vmem:[#allocation21_spill] sm:$0xff] }
 0x714   : > { %v1619_v46 = vmul.f32 1.442695, %v1574_v57  ;;  %v1609_v40 = vmul.f32 1.442695, %v1569_v53  ;;  %v16931_v57 = vld [vmem:[#allocation24_spill] sm:$0xff] }
 0x715   : > { %v1571_v33 = vsub.f32 %v16931_v57, %v1530_v21  ;;  %v1623_v50 = vmul.f32 1.442695, %v1576_v7  ;;  %v1601_v30 = vmul.f32 1.442695, %v1565_v4  ;;  %v16933_v53 = vld [vmem:[#allocation20_spill] sm:$0xff] }
 0x716   : > { %9996 = vpow2.f32 %v1619_v46  ;;  %v1567_v46 = vsub.f32 %v16933_v53, %v1524_v23 }
 0x717   : > { %9998 = vpow2.f32 %v1625_v20  ;;  %v1613_v0 = vmul.f32 1.442695, %v1571_v33  ;;  %v1568_v20 = vsub.f32 %v16934_v59, %v1524_v23 }
 0x718   : > { %10000 = vpow2.f32 %v1627_v43  ;;  %v12255_v43 = vpop.eup %9992  ;;  %v1605_v21 = vmul.f32 1.442695, %v1567_v46 }
 0x719   : > { %10002 = vpow2.f32 %v1609_v40  ;;  %v1607_v1 = vmul.f32 1.442695, %v1568_v20  ;;  %v12257_v7 = vpop.eup %9994  ;;  %v1684_v40 = vadd.f32 %v12255_v43, %v12253_v32 }
 0x71a   : > { %10004 = vpow2.f32 %v1611_v56 }
 0x71b   : > { %10006 = vpow2.f32 %v1621_v16 }
 0x71c   : > { %10008 = vpow2.f32 %v1623_v50 }
 0x71d   : > { %10010 = vpow2.f32 %v1601_v30 }
 0x71e   : > { %10012 = vpow2.f32 %v1603_v54 }
 0x71f   : > { %10014 = vpow2.f32 %v1613_v0 }
 0x720   : > { %10016 = vpow2.f32 %v1615_v19 }
 0x721   : > { %10018 = vpow2.f32 %v1605_v21 }
 0x722   : > { %10020 = vpow2.f32 %v1607_v1 }
 0x723   : > { %v12261_v61 = vpop.eup %9996 }
 0x724   : > { %v12263_v4 = vpop.eup %9998  ;;  %v1675_v28 = vadd.f32 %v12261_v61, %v12257_v7 }
 0x725   : > { %v12265_v56 = vpop.eup %10000 }
 0x726   : > { %v12267_v60 = vpop.eup %10002  ;;  %v1681_v33 = vadd.f32 %v12265_v56, %v12263_v4 }
 0x727   : > { %16935 = vst [vmem:[#allocation26_spill] sm:$0xff] %v12267_v60  ;;  %v12271_v16 = vpop.eup %10004 }
 0x728   : > { %v12273_v57 = vpop.eup %10006  ;;  %v1669_v24 = vadd.f32 %v12271_v16, %v12267_v60 }
 0x729   : > { %v12277_v50 = vpop.eup %10008 }
 0x72a   : > { %v12279_v18 = vpop.eup %10010  ;;  %v1678_v54 = vadd.f32 %v12277_v50, %v12273_v57 }
 0x72b   : > { %16936 = vst [vmem:[#allocation29_spill] sm:$0xff] %v12279_v18  ;;  %v12283_v23 = vpop.eup %10012 }
 0x72c   : > { %16937 = vst [vmem:[#allocation30_spill] sm:$0xff] %v12283_v23  ;;  %v12285_v30 = vpop.eup %10014  ;;  %v1663_v53 = vadd.f32 %v12283_v23, %v12279_v18 }
 0x72d   : > { %16938 = vst [vmem:[#allocation22_spill] sm:$0xff] %v12285_v30  ;;  %v12289_v0 = vpop.eup %10016 }
 0x72e   : > { %v12293_v46 = vpop.eup %10018  ;;  %v1672_v19 = vadd.f32 %v12289_v0, %v12285_v30 }
 0x72f   : > { %16939 = vst [vmem:[#allocation23_spill] sm:$0xff] %v12293_v46  ;;  %v12297_v59 = vpop.eup %10020 }
 0x730   : > { %16940 = vst [vmem:[#allocation27_spill] sm:$0xff] %v12297_v59  ;;  %v1666_v20 = vadd.f32 %v12297_v59, %v12293_v46 }
 0x731   : > { %1685 = vadd.xlane.f32.xlu0 %v1684_v40 }
 0x735   : > { %1676 = vadd.xlane.f32.xlu0 %v1675_v28  ;;  %1682 = vadd.xlane.f32.xlu1 %v1681_v33 }
 0x739   : > { %1670 = vadd.xlane.f32.xlu0 %v1669_v24  ;;  %1679 = vadd.xlane.f32.xlu1 %v1678_v54 }
 0x73d   : > { %1664 = vadd.xlane.f32.xlu0 %v1663_v53  ;;  %1673 = vadd.xlane.f32.xlu1 %v1672_v19 }
 0x741   : > { %1667 = vadd.xlane.f32.xlu1 %v1666_v20 }
 0x74d   : > { %v1222_v21 = vpop.xlane.xlu0 %1221 }
 0x751   : > { %v1228_v1 = vpop.xlane.xlu0 %1227 }
 0x753   : > { %v1225_v40 = vpop.xlane.xlu1 %1224 }
 0x755   : > { %v1234_v28 = vpop.xlane.xlu0 %1233 }
 0x756   : > { %10022 = vrcp.f32 %v1234_v28 }
 0x757   : > { %v1231_v33 = vpop.xlane.xlu1 %1230 }
 0x758   : > { %10024 = vrcp.f32 %v1231_v33 }
 0x759   : > { %v1216_v24 = vpop.xlane.xlu0 %1215  ;;  %10026 = vrcp.f32 %v1228_v1 }
 0x75b   : > { %v1237_v54 = vpop.xlane.xlu1 %1236 }
 0x75c   : > { %10028 = vrcp.f32 %v1237_v54 }
 0x75d   : > { %v1515_v53 = vpop.xlane.xlu0 %1514  ;;  %10030 = vrcp.f32 %v1225_v40 }
 0x75e   : > { %v1561_v18 = vsub.f32 %v11919_v26, %v1515_v53  ;;  %v1562_v19 = vsub.f32 %v11921_v27, %v1515_v53 }
 0x75f   : > { %v1219_v23 = vpop.xlane.xlu1 %1218 }
 0x760   : > { %v1593_v60 = vmul.f32 1.442695, %v1561_v18  ;;  %v1595_v46 = vmul.f32 1.442695, %v1562_v19 }
 0x762   : > { %10032 = vpow2.f32 %v1593_v60 }
 0x763   : > { %10034 = vpow2.f32 %v1595_v46  ;;  %v1518_v20 = vpop.xlane.xlu1 %1517  ;;  %v10023_v1 = vpop.eup %10022 }
 0x764   : > { %10036 = vrcp.f32 %v1222_v21  ;;  %v1563_v28 = vsub.f32 %v11927_v31, %v1518_v20  ;;  %v1564_v33 = vsub.f32 %v11929_v35, %v1518_v20  ;;  %v1283_v18 = vmul.f32 %v10023_v1, %v12081_v37  ;;  %v1210_v35 = vpop.xlane.xlu0 %1209 }
 0x765   : > { %v10025_v30 = vpop.eup %10024  ;;  %10038 = vrcp.f32 %v1219_v23  ;;  %v1282_v46 = vmul.f32 %v10023_v1, %v12078_v63 }
 0x766   : > { %v1597_v59 = vmul.f32 1.442695, %v1563_v28  ;;  %v1599_v54 = vmul.f32 1.442695, %v1564_v33  ;;  %v10027_v26 = vpop.eup %10026  ;;  %v1281_v31 = vmul.f32 %v10025_v30, %v12097_v34 }
 0x767   : > { %v1279_v23 = vmul.f32 %v10027_v26, %v12075_v9  ;;  %v1213_v19 = vpop.xlane.xlu1 %1212  ;;  %v1278_v1 = vmul.f32 %v10027_v26, %v12070_v62 }
 0x768   : > { %10040 = vpow2.f32 %v1597_v59 }
 0x769   : > { %v10029_v27 = vpop.eup %10028  ;;  %10042 = vpow2.f32 %v1599_v54  ;;  %v1299_v20 = vpack.c.bf16 %v1281_v31, %v1279_v23 }
 0x76a   : > { %v1285_v60 = vmul.f32 %v10029_v27, %v12113_v5  ;;  %v1284_v21 = vmul.f32 %v10029_v27, %v12108_v17  ;;  %10044 = vrcp.f32 %v1216_v24  ;;  %v10031_v59 = vpop.eup %10030  ;;  %v1204_v17 = vpop.xlane.xlu0 %1203  ;;  %v1280_v5 = vmul.f32 %v10025_v30, %v12092_v38 }
 0x76b   : > { %v12318_v24 = vpop.f32.mrf.mxu0  ;;  %10046 = vrcp.f32 %v1213_v19  ;;  %v1277_v9 = vmul.f32 %v10031_v59, %v12089_v11  ;;  %v1207_v33 = vpop.xlane.xlu1 %1206  ;;  %v1276_v26 = vmul.f32 %v10031_v59, %v12084_v14 }
 0x76c   : > { %v1301_v40 = vpack.c.bf16 %v1285_v60, %v1283_v18  ;;  %v1300_v53 = vpack.c.bf16 %v1284_v21, %v1282_v46  ;;  %10048 = vrcp.f32 %v1210_v35  ;;  %v1298_v60 = vpack.c.bf16 %v1280_v5, %v1278_v1 }
 0x76d   : > { %v12325_v46 = vpop.f32.mrf.mxu0  ;;  %10050 = vrcp.f32 %v1207_v33 }
 0x76e   : > { %1302 = vmatprep.subr.bf16.mxu0 %v1301_v40  ;;  %v1198_v30 = vpop.xlane.xlu0 %1197  ;;  %10052 = vrcp.f32 %v1204_v17 }
 0x76f   : > { %v12311_v28 = vpop.eup %10032  ;;  %1303 = vmatpush1.bf16.xpose.msra.mxu0 %v1300_v53  ;;  %v1201_v62 = vpop.xlane.xlu1 %1200 }
 0x770   : > { %v12313_v37 = vpop.eup %10034  ;;  %1304 = vmatprep.subr.bf16.mxu0 %v1299_v20  ;;  %10054 = vrcp.f32 %v1201_v62 }
 0x771   : > { %v10037_v63 = vpop.eup %10036  ;;  %v1657_v34 = vadd.f32 %v12313_v37, %v12311_v28  ;;  %10056 = vrcp.f32 %v1198_v30 }
 0x772   : > { %v10039_v54 = vpop.eup %10038  ;;  %v1275_v27 = vmul.f32 %v10037_v63, %v12067_v2  ;;  %v12332_v2 = vpop.f32.mrf.mxu0  ;;  %v1274_v40 = vmul.f32 %v10037_v63, %v12065_v42 }
 0x773   : > { %1658 = vadd.xlane.f32.xlu0 %v1657_v34  ;;  %v1273_v35 = vmul.f32 %v10039_v54, %v12123_v10  ;;  %v1192_v23 = vpop.xlane.xlu0 %1191  ;;  %v1272_v33 = vmul.f32 %v10039_v54, %v12118_v36  ;;  %v12352_v36 = vld [vmem:[%s16745_s6 + $0x8] sm:$0xff]  }
 0x774   : > { %v1297_v38 = vpack.c.bf16 %v1277_v9, %v1275_v27  ;;  %v1296_v19 = vpack.c.bf16 %v1276_v26, %v1274_v40  ;;  %v12337_v20 = vpop.f32.mrf.mxu0  ;;  %v1195_v9 = vpop.xlane.xlu1 %1194 }
 0x775   : > { %v12323_v18 = vpop.eup %10040  ;;  %10058 = vrcp.f32 %v1195_v9 }
 0x776   : > { %v12327_v21 = vpop.eup %10042  ;;  %v12342_v10 = vpop.f32.mrf.mxu0  ;;  %10060 = vrcp.f32 %v1192_v23 }
 0x777   : > { %1305 = vmatpush1.bf16.xpose.msra.mxu0 %v1298_v60  ;;  %v1660_v11 = vadd.f32 %v12327_v21, %v12323_v18  ;;  %v10045_v31 = vpop.eup %10044  ;;  %v12339_v59 = vpop.xlane.xlu0 %1688 }
 0x778   : > { %1306 = vmatprep.subr.bf16.mxu0 %v1297_v38  ;;  %v1271_v53 = vmul.f32 %v10045_v31, %v12105_v47  ;;  %v10047_v5 = vpop.eup %10046  ;;  %v1270_v63 = vmul.f32 %v10045_v31, %v12100_v8  ;;  %v856_v60 = vpop.f32.mrf.mxu0 }
 0x779   : > { %1661 = vadd.xlane.f32.xlu1 %v1660_v11  ;;  %v10049_v14 = vpop.eup %10048  ;;  %v1269_v42 = vmul.f32 %v10047_v5, %v12145_v29  ;;  %v12345_v47 = vpop.xlane.xlu1 %1691  ;;  %v1268_v8 = vmul.f32 %v10047_v5, %v12141_v12 }
 0x77a   : > { %v1295_v34 = vpack.c.bf16 %v1273_v35, %v1271_v53  ;;  %v1267_v17 = vmul.f32 %v10049_v14, %v12129_v13  ;;  %v1294_v27 = vpack.c.bf16 %v1272_v33, %v1270_v63  ;;  %v10051_v54 = vpop.eup %10050  ;;  %v858_v26 = vpop.f32.mrf.mxu0  ;;  %v1266_v31 = vmul.f32 %v10049_v14, %v12125_v3 }
 0x77b   : > { %v10053_v29 = vpop.eup %10052  ;;  %v1265_v13 = vmul.f32 %v10051_v54, %v12159_v49  ;;  %v1264_v63 = vmul.f32 %v10051_v54, %v12155_v22 }
 0x77c   : > { %v1293_v38 = vpack.c.bf16 %v1269_v42, %v1267_v17  ;;  %v1263_v35 = vmul.f32 %v10053_v29, %v12137_v45  ;;  %v860_v40 = vpop.f32.mrf.mxu0  ;;  %v1262_v45 = vmul.f32 %v10053_v29, %v12133_v25 }
 0x77d   : > { %v1695_v1 = vpop.xlane.xlu0 %1694  ;;  %v10055_v42 = vpop.eup %10054 }
 0x77e   : > { %v1291_v33 = vpack.c.bf16 %v1265_v13, %v1263_v35  ;;  %v10057_v9 = vpop.eup %10056  ;;  %v1261_v3 = vmul.f32 %v10055_v42, %v12173_v41  ;;  %v1290_v14 = vpack.c.bf16 %v1264_v63, %v1262_v45  ;;  %v1260_v22 = vmul.f32 %v10055_v42, %v12169_v51  ;;  %v16949_v63 = vld [vmem:[#allocation34_spill] sm:$0xff]  ;;  %v16950_v45 = vld [vmem:[#allocation35_spill] sm:$0xff] }
 0x77f   : > { %1307 = vmatpush1.bf16.xpose.msra.mxu0 %v1296_v19  ;;  %v1292_v19 = vpack.c.bf16 %v1268_v8, %v1266_v31  ;;  %v1259_v23 = vmul.f32 %v10057_v9, %v12151_v55  ;;  %v1258_v41 = vmul.f32 %v10057_v9, %v12147_v44 }
 0x780   : > { %1308 = vmatprep.subr.bf16.mxu0 %v1295_v34 }
 0x781   : > { %v1698_v11 = vpop.xlane.xlu1 %1697  ;;  %v1289_v17 = vpack.c.bf16 %v1261_v3, %v1259_v23  ;;  %v1288_v54 = vpack.c.bf16 %v1260_v22, %v1258_v41  ;;  %v16952_v22 = vld [vmem:[#allocation33_spill] sm:$0xff] }
 0x785   : > { %v1701_v62 = vpop.xlane.xlu0 %1700 }
 0x787   : > { %1309 = vmatpush1.bf16.xpose.msra.mxu0 %v1294_v27  ;;  %v10059_v27 = vpop.eup %10058 }
 0x788   : > { %1310 = vmatprep.subr.bf16.mxu0 %v1293_v38  ;;  %v1257_v38 = vmul.f32 %v10059_v27, %v12183_v39  ;;  %v1256_v8 = vmul.f32 %v10059_v27, %v12179_v58  ;;  %v16942_v58 = vld [vmem:[#allocation40_spill] sm:$0xff] }
 0x789   : > { %v1704_v30 = vpop.xlane.xlu1 %1703 }
 0x78a   : > { %1828 = vrot.lane.b32.xlu1 %v12352_v36, %s11523_s24  ;;  %10062 = vrcp.f32 %v1704_v30 }
 0x78b   : > { %10064 = vrcp.f32 %v1701_v62 }
 0x78c   : > { %10066 = vrcp.f32 %v1698_v11 }
 0x78d   : > { %v715_v53 = vpop.permute.xlu0 %714  ;;  %v720_v12 = vpop.permute.xlu1 %719  ;;  %10068 = vrcp.f32 %v1695_v1 }
 0x78e   : > { %v857_v34 = vadd.f32 %v856_v60, %v715_v53  ;;  %v861_v5 = vadd.f32 %v860_v40, %v720_v12  ;;  %v10061_v60 = vpop.eup %10060  ;;  %10070 = vrcp.f32 %v12345_v47  ;;  %v855_v13 = vadd.f32 %v12342_v10, %v715_v53  ;;  %v16943_v47 = vld [vmem:[#allocation38_spill] sm:$0xff] }
 0x78f   : > { %1311 = vmatpush1.bf16.xpose.msra.mxu0 %v1292_v19  ;;  %v1255_v25 = vmul.f32 %v10061_v60, %v12165_v6  ;;  %v1254_v11 = vmul.f32 %v10061_v60, %v12161_v52  ;;  %10072 = vrcp.f32 %v12339_v59  ;;  %v859_v30 = vadd.f32 %v858_v26, %v720_v12  ;;  %v16945_v52 = vld [vmem:[#allocation39_spill] sm:$0xff]  ;;  %v16948_v12 = vld [vmem:[#allocation37_spill] sm:$0xff] }
 0x790   : > { %1312 = vmatprep.subr.bf16.mxu0 %v1291_v33  ;;  %v12361_v49 = vpack.c.bf16 %v861_v5, %v857_v34 }
 0x791   : > { %v1287_v29 = vpack.c.bf16 %v1257_v38, %v1255_v25  ;;  %v1286_v39 = vpack.c.bf16 %v1256_v8, %v1254_v11  ;;  %v12382_v59 = vpack.c.bf16 %v859_v30, %v855_v13  ;;  %v16953_v25 = vld [vmem:[#allocation31_spill] sm:$0xff] }
 0x792   : > { %16941 = vst [vmem:[#allocation28_spill] sm:$0xff] %v12361_v49  ;;  %1334 = vmatprep.mubr.bf16.mxu0 %v12361_v49  ;;  %v16799_v5 = vrot.slane %v12361_v49, 2 }
 0x793   : > { %16946 = vst [vmem:[#allocation18_spill] sm:$0xff] %v12382_v59 }
 0x797   : > { %1313 = vmatpush1.bf16.xpose.msra.mxu0 %v1290_v14  ;;  %v10063_v62 = vpop.eup %10062  ;;  %v16951_v14 = vld [vmem:[#allocation32_spill] sm:$0xff] }
 0x798   : > { %1314 = vmatprep.subr.bf16.mxu0 %v1289_v17  ;;  %v10065_v55 = vpop.eup %10064  ;;  %v1752_v51 = vmul.f32 %v10063_v62, %v12223_v15  ;;  %v1751_v35 = vmul.f32 %v10063_v62, %v16942_v58  ;;  %v16944_v15 = vld [vmem:[#allocation9_spill] sm:$0xff] }
 0x799   : > { %v1750_v44 = vmul.f32 %v10065_v55, %v12217_v48  ;;  %v10067_v1 = vpop.eup %10066  ;;  %v1946_v19 = vrot.slane %v16944_v15, 4  ;;  %v1749_v34 = vmul.f32 %v10065_v55, %v16945_v52  ;;  %v16947_v48 = vld [vmem:[#allocation36_spill] sm:$0xff] }
 0x79a   : > { %v10069_v31 = vpop.eup %10068  ;;  %v1748_v40 = vmul.f32 %v10067_v1, %v16943_v47  ;;  %v1747_v9 = vmul.f32 %v10067_v1, %v16948_v12 }
 0x79b   : > { %v1768_v6 = vpack.c.bf16 %v1752_v51, %v1750_v44  ;;  %v1746_v33 = vmul.f32 %v10069_v31, %v16947_v48  ;;  %v1767_v42 = vpack.c.bf16 %v1751_v35, %v1749_v34  ;;  %v10071_v26 = vpop.eup %10070  ;;  %v1745_v23 = vmul.f32 %v10069_v31, %v16950_v45 }
 0x79c   : > { %v10073_v53 = vpop.eup %10072  ;;  %v1744_v3 = vmul.f32 %v10071_v26, %v16949_v63  ;;  %v1743_v38 = vmul.f32 %v10071_v26, %v16952_v22  ;;  %v9891_v22 = vld [vmem:[%s16745_s6] sm:$0xff]  }
 0x79d   : > { %v1766_v10 = vpack.c.bf16 %v1748_v40, %v1746_v33  ;;  %v1742_v17 = vmul.f32 %v10073_v53, %v16951_v14  ;;  %v1765_v27 = vpack.c.bf16 %v1747_v9, %v1745_v23  ;;  %v16955_v9 = vld [vmem:[#allocation27_spill] sm:$0xff]  ;;  %1826 = vrot.lane.b32.xlu0 %v9891_v22, %s11523_s24 }
 0x79f   : > { %1315 = vmatpush1.bf16.xpose.msra.mxu0 %v1288_v54  ;;  %v1764_v60 = vpack.c.bf16 %v1744_v3, %v1742_v17  ;;  %v1741_v54 = vmul.f32 %v10073_v53, %v16953_v25  ;;  %v16956_v3 = vld [vmem:[#allocation26_spill] sm:$0xff]  ;;  %v16959_v17 = vld [vmem:[#allocation29_spill] sm:$0xff] }
 0x7a0   : > { %1316 = vmatprep.subr.bf16.mxu0 %v1287_v29 }
 0x7a1   : > { %v1763_v29 = vpack.c.bf16 %v1743_v38, %v1741_v54 }
 0x7a7   : > { %1317 = vmatpush1.bf16.xpose.msra.mxu0 %v1286_v39 }
 0x7a8   : > { %1775 = vmatprep.subr.bf16.mxu0 %v1768_v6 }
 0x7ad   : > { %1948 = vxpose.xlu1.c.b16.start.end [1/1] (short) %v1946_v19, 128 }
 0x7ae   : > { %1335 = vmatmul.mubr.bf16.vlgmr.msra.gmra.mxu0 %v12382_v59 }
 0x7af   : > { %1776 = vmatpush1.bf16.xpose.msra.mxu0 %v1767_v42  ;;  %1807 = vmatprep.mubr.bf16.mxu0 %v16799_v5 }
 0x7b0   : > { %1777 = vmatprep.subr.bf16.mxu0 %v1766_v10 }
 0x7b7   : > { %1778 = vmatpush1.bf16.xpose.msra.mxu0 %v1765_v27 }
 0x7b8   : > { %1779 = vmatprep.subr.bf16.mxu0 %v1764_v60 }
 0x7ba   : > { %v1686_v41 = vpop.xlane.xlu0 %1685 }
 0x7bb   : > { %10074 = vrcp.f32 %v1686_v41 }
 0x7be   : > { %v1677_v62 = vpop.xlane.xlu0 %1676  ;;  %v1683_v55 = vpop.xlane.xlu1 %1682 }
 0x7bf   : > { %1780 = vmatpush1.bf16.xpose.msra.mxu0 %v1763_v29  ;;  %10076 = vrcp.f32 %v1683_v55 }
 0x7c0   : > { %10078 = vrcp.f32 %v1677_v62 }
 0x7c2   : > { %v1680_v8 = vpop.xlane.xlu1 %1679  ;;  %v1671_v51 = vpop.xlane.xlu0 %1670 }
 0x7c3   : > { %10080 = vrcp.f32 %v1680_v8 }
 0x7c4   : > { %10082 = vrcp.f32 %v1671_v51 }
 0x7c6   : > { %v1674_v11 = vpop.xlane.xlu1 %1673  ;;  %v1665_v1 = vpop.xlane.xlu0 %1664 }
 0x7c7   : > { %10084 = vrcp.f32 %v1674_v11 }
 0x7c8   : > { %v10075_v44 = vpop.eup %10074 }
 0x7c9   : > { %v1740_v13 = vmul.f32 %v10075_v44, %v12255_v43  ;;  %v1739_v58 = vmul.f32 %v10075_v44, %v12253_v32  ;;  %v16798_v44 = vrot.slane %v12382_v59, 2 }
 0x7ca   : > { %v1668_v39 = vpop.xlane.xlu1 %1667 }
 0x7cb   : > { %10086 = vrcp.f32 %v1668_v39  ;;  %v12423_v39 = vpop.f32.mrf.mxu0 }
 0x7cc   : > { %v10077_v6 = vpop.eup %10076  ;;  %10088 = vrcp.f32 %v1665_v1  ;;  %16960 = vst [vmem:[#allocation19_spill] sm:$0xff] %v12423_v39 }
 0x7cd   : > { %v1738_v30 = vmul.f32 %v10077_v6, %v12265_v56  ;;  %v1737_v31 = vmul.f32 %v10077_v6, %v12263_v4  ;;  %v10079_v35 = vpop.eup %10078 }
 0x7ce   : > { %v1734_v52 = vmul.f32 %v10079_v35, %v12261_v61  ;;  %v1733_v32 = vmul.f32 %v10079_v35, %v12257_v7  ;;  %v16958_v7 = vld [vmem:[#allocation23_spill] sm:$0xff]  ;;  %v16797_v35 = vrot.slane %v12361_v49, 4 }
 0x7cf   : > { %v1762_v47 = vpack.c.bf16 %v1740_v13, %v1738_v30  ;;  %v1761_v40 = vpack.c.bf16 %v1739_v58, %v1737_v31 }
 0x7d0   : > { %v10081_v19 = vpop.eup %10080 }
 0x7d1   : > { %1781 = vmatprep.subr.bf16.mxu0 %v1762_v47  ;;  %v1736_v34 = vmul.f32 %v10081_v19, %v12277_v50  ;;  %v10083_v48 = vpop.eup %10082  ;;  %v1735_v56 = vmul.f32 %v10081_v19, %v12273_v57  ;;  %v16954_v50 = vld [vmem:[#allocation22_spill] sm:$0xff] }
 0x7d2   : > { %1782 = vmatpush1.bf16.xpose.msra.mxu0 %v1761_v40  ;;  %v1730_v42 = vmul.f32 %v10083_v48, %v12271_v16  ;;  %v1729_v45 = vmul.f32 %v10083_v48, %v16956_v3  ;;  %v16957_v57 = vld [vmem:[#allocation30_spill] sm:$0xff] }
 0x7d3   : > { %v1760_v43 = vpack.c.bf16 %v1736_v34, %v1734_v52  ;;  %v1759_v10 = vpack.c.bf16 %v1735_v56, %v1733_v32  ;;  %v16962_v34 = vld [vmem:[#allocation15_spill] sm:$0xff] }
 0x7d4   : > { %v10085_v33 = vpop.eup %10084  ;;  %v16796_v48 = vrot.slane %v16962_v34, 4 }
 0x7d5   : > { %1783 = vmatprep.subr.bf16.mxu0 %v1760_v43  ;;  %v1732_v4 = vmul.f32 %v10085_v33, %v12289_v0  ;;  %v1731_v12 = vmul.f32 %v10085_v33, %v16954_v50  ;;  %v16963_v43 = vld [vmem:[#allocation14_spill] sm:$0xff] }
 0x7d6   : > { %v1964_v33 = vrot.slane %v16963_v43, 4 }
 0x7d7   : > { %v1758_v26 = vpack.c.bf16 %v1732_v4, %v1730_v42  ;;  %v1757_v14 = vpack.c.bf16 %v1731_v12, %v1729_v45  ;;  %v16965_v42 = vmov 0  }
 0x7d8   : > { %v10087_v53 = vpop.eup %10086  ;;  %v12448_v32 = vsel %vm926_vm1, %v1964_v33, 0 }
 0x7d9   : > { %v10089_v61 = vpop.eup %10088  ;;  %v1728_v63 = vmul.f32 %v10087_v53, %v16955_v9  ;;  %v1727_v16 = vmul.f32 %v10087_v53, %v16958_v7  ;;  %16964 = vst [vmem:[#allocation25_spill] sm:$0xff] %v12448_v32 }
 0x7da   : > { %1784 = vmatpush1.bf16.xpose.msra.mxu0 %v1759_v10  ;;  %v1726_v23 = vmul.f32 %v10089_v61, %v16957_v57  ;;  %v1725_v27 = vmul.f32 %v10089_v61, %v16959_v17 }
 0x7db   : > { %1785 = vmatprep.subr.bf16.mxu0 %v1758_v26 }
 0x7dc   : > { %v1756_v0 = vpack.c.bf16 %v1728_v63, %v1726_v23  ;;  %v1755_v60 = vpack.c.bf16 %v1727_v16, %v1725_v27 }
 0x7e2   : > { %1786 = vmatpush1.bf16.xpose.msra.mxu0 %v1757_v14 }
 0x7e3   : > { %1787 = vmatprep.subr.bf16.mxu0 %v1756_v0 }
 0x7ea   : > { %1788 = vmatpush1.bf16.xpose.msra.mxu0 %v1755_v60 }
 0x7fc   : > { %v1659_v38 = vpop.xlane.xlu0 %1658 }
 0x7fd   : > { %10090 = vrcp.f32 %v1659_v38 }
 0x802   : > { %v1662_v41 = vpop.xlane.xlu1 %1661 }
 0x803   : > { %10092 = vrcp.f32 %v1662_v41 }
 0x80a   : > { %v10091_v25 = vpop.eup %10090 }
 0x80b   : > { %v1722_v29 = vmul.f32 %v10091_v25, %v12313_v37  ;;  %v1721_v55 = vmul.f32 %v10091_v25, %v12311_v28  ;;  %v12425_v37 = vpop.f32.mrf.mxu0 }
 0x80d   : > { %v12428_v28 = vpop.f32.mrf.mxu0 }
 0x80e   : > { %16961 = vst [vmem:[#allocation24_spill] sm:$0xff] %v12428_v28 }
 0x810   : > { %v10093_v54 = vpop.eup %10092 }
 0x811   : > { %v1724_v62 = vmul.f32 %v10093_v54, %v12327_v21  ;;  %v1723_v8 = vmul.f32 %v10093_v54, %v12323_v18  ;;  %v1827_v21 = vpop.permute.xlu0 %1826  ;;  %v12430_v18 = vpop.f32.mrf.mxu0 }
 0x812   : > { %9723 = vmatprep.mubr.msk.bf16.mxu1 %vm901_vm2, %v1827_v21 }
 0x813   : > { %v1754_v51 = vpack.c.bf16 %v1724_v62, %v1722_v29  ;;  %v1753_v11 = vpack.c.bf16 %v1723_v8, %v1721_v55 }
 0x815   : > { %1789 = vmatprep.subr.bf16.mxu0 %v1754_v51 }
 0x816   : > { %1790 = vmatpush1.bf16.xpose.msra.mxu0 %v1753_v11 }
 0x81d   : > { %1808 = vmatmul.mubr.bf16.vlgmr.msra.gmra.mxu0 %v16798_v44 }
 0x81e   : > { %9729 = vmatprep.mubr.msk.bf16.mxu0 %vm901_vm2, %v9891_v22 }
 0x86e   : > { %v1336_v6 = vpop.f32.mrf.mxu0 }
 0x86f   : > { %v1346_v1 = vpack.c.bf16 %v1336_v6, %v1336_v6 }
 0x870   : > { %v1338_v13 = vpop.f32.mrf.mxu0 }
 0x871   : > { %v1895_v30 = vsel %vm926_vm1, %v1346_v1, 0  ;;  %9818 = vmatprep.subr.msk.bf16.mxu0 %vm926_vm1, %v1346_v1 }
 0x872   : > { %v1339_v31 = vpop.f32.mrf.mxu0  ;;  %9728 = vmatpush3.bf16.msra.mxu0 %v1895_v30 }
 0x874   : > { %v1340_v58 = vpop.f32.mrf.mxu0 }
 0x875   : > { %9730 = vmatmul.mubr.msk.bf16.vlgmr.msra.gmra.mxu0 %vm901_vm2, %v12352_v36  ;;  %v1829_v36 = vpop.permute.xlu1 %1828 }
 0x876   : > { %2401 = vmatprep.mubr.bf16.mxu0 %v16797_v35 }
 0x879   : > { %v1956_v10 = vpop.trf.xlu1 }
 0x87d   : > { %v1957_v26 = vpop.trf.xlu1 }
 0x881   : > { %v1958_v53 = vpop.trf.xlu1 }
 0x885   : > { %v1959_v61 = vpop.trf.xlu1 }
 0x889   : > { %v1960_v50 = vpop.trf.xlu1 }
 0x88d   : > { %v1961_v12 = vpop.trf.xlu1 }
 0x891   : > { %v1962_v9 = vpop.trf.xlu1 }
 0x895   : > { %v1963_v63 = vpop.trf.xlu1 }
 0x8dd   : > { %v1809_v47 = vpop.f32.mrf.mxu0 }
 0x8de   : > { %v1815_v40 = vpack.c.bf16 %v1809_v47, %v1809_v47 }
 0x8df   : > { %v1811_v19 = vpop.f32.mrf.mxu0 }
 0x8e0   : > { %v1837_v52 = vsel %vm926_vm1, %v1815_v40, 0  ;;  %9817 = vmatprep.subr.msk.bf16.mxu1 %vm926_vm1, %v1815_v40 }
 0x8e1   : > { %v1812_v56 = vpop.f32.mrf.mxu0  ;;  %9722 = vmatpush3.bf16.msra.mxu1 %v1837_v52 }
 0x8e2   : > { %9466 = vmatprep.subr.msk.bf16.mxu1 %vm926_vm1, %v16796_v48 }
 0x8e3   : > { %v1813_v4 = vpop.f32.mrf.mxu0 }
 0x8e4   : > { %9724 = vmatmul.mubr.msk.bf16.vlgmr.msra.gmra.mxu1 %vm901_vm2, %v1829_v36 }
 0x8e5   : > { %2011 = vmatpush1.bf16.msra.mxu1 %v12448_v32  ;;  %2028 = vmatprep.mubr.bf16.mxu1 %v16965_v42 }
 0x8ec   : > { %9467 = vmatmul.mubr.msk.bf16.vlgmr.msra.gmra.mxu1 %vm901_vm2, %v1956_v10 }
 0x8ed   : > { %2038 = vmatprep.mubr.bf16.mxu1 %v16965_v42 }
 0x8f4   : > { %9468 = vmatmul.mubr.msk.bf16.gmra.mxu1 %vm901_vm2, %v1957_v26 }
 0x8f5   : > { %2048 = vmatprep.mubr.bf16.mxu1 %v16965_v42 }
 0x8fc   : > { %9469 = vmatmul.mubr.msk.bf16.gmra.mxu1 %vm901_vm2, %v1958_v53 }
 0x8fd   : > { %2058 = vmatprep.mubr.bf16.mxu1 %v16965_v42 }
 0x904   : > { %9470 = vmatmul.mubr.msk.bf16.gmra.mxu1 %vm901_vm2, %v1959_v61 }
 0x905   : > { %2068 = vmatprep.mubr.bf16.mxu1 %v16965_v42 }
 0x90c   : > { %9471 = vmatmul.mubr.msk.bf16.gmra.mxu1 %vm901_vm2, %v1960_v50 }
 0x90d   : > { %2078 = vmatprep.mubr.bf16.mxu1 %v16965_v42 }
 0x914   : > { %9472 = vmatmul.mubr.msk.bf16.gmra.mxu1 %vm901_vm2, %v1961_v12 }
 0x915   : > { %2088 = vmatprep.mubr.bf16.mxu1 %v16965_v42 }
 0x91c   : > { %9473 = vmatmul.mubr.msk.bf16.gmra.mxu1 %vm901_vm2, %v1962_v9 }
 0x91d   : > { %2098 = vmatprep.mubr.bf16.mxu1 %v16965_v42 }
 0x924   : > { %9474 = vmatmul.mubr.msk.bf16.gmra.mxu1 %vm901_vm2, %v1963_v63 }
 0x9a4   : > { %v12467_v3 = vpop.f32.mrf.mxu1 }
 0x9a6   : > { %v12469_v45 = vpop.f32.mrf.mxu1 }
 0x9a8   : > { %v12471_v57 = vpop.f32.mrf.mxu1 }
 0x9aa   : > { %v12473_v23 = vpop.f32.mrf.mxu1 }
 0x9ab   : > { %16966 = vst [vmem:[#allocation20_spill] sm:$0xff] %v12473_v23 }
 0x9ac   : > { %v12475_v14 = vpop.f32.mrf.mxu1 }
 0x9ae   : > { %v12477_v0 = vpop.f32.mrf.mxu1 }
 0x9b0   : > { %v12479_v7 = vpop.f32.mrf.mxu1 }
 0x9b2   : > { %v12481_v16 = vpop.f32.mrf.mxu1 }
 0x9b3   : > { %v2112_v4 = vmax.f32 %v12479_v7, %v12481_v16 }
 0x9b4   : > { %v12483_v17 = vpop.f32.mrf.mxu1 }
 0x9b6   : > { %v12485_v27 = vpop.f32.mrf.mxu1 }
 0x9b8   : > { %v12487_v60 = vpop.f32.mrf.mxu1 }
 0x9ba   : > { %v12489_v22 = vpop.f32.mrf.mxu1 }
 0x9bb   : > { %v2118_v33 = vmax.f32 %v12487_v60, %v12489_v22 }
 0x9bc   : > { %v12491_v38 = vpop.f32.mrf.mxu1 }
 0x9be   : > { %v12493_v41 = vpop.f32.mrf.mxu1 }
 0x9c0   : > { %v12495_v25 = vpop.f32.mrf.mxu1 }
 0x9c2   : > { %v12497_v54 = vpop.f32.mrf.mxu1 }
 0x9c4   : > { %v12499_v29 = vpop.f32.mrf.mxu1 }
 0x9c6   : > { %v12501_v62 = vpop.f32.mrf.mxu1 }
 0x9c8   : > { %v12503_v55 = vpop.f32.mrf.mxu1 }
 0x9ca   : > { %v12505_v8 = vpop.f32.mrf.mxu1 }
 0x9cc   : > { %v12507_v51 = vpop.f32.mrf.mxu1 }
 0x9ce   : > { %v12509_v11 = vpop.f32.mrf.mxu1 }
 0x9cf   : > { %v2133_v63 = vmax.f32 %v12507_v51, %v12509_v11 }
 0x9d0   : > { %v12511_v21 = vpop.f32.mrf.mxu1 }
 0x9d2   : > { %v12513_v6 = vpop.f32.mrf.mxu1 }
 0x9d4   : > { %v12515_v1 = vpop.f32.mrf.mxu1 }
 0x9d6   : > { %v12517_v13 = vpop.f32.mrf.mxu1 }
 0x9d7   : > { %v2139_v12 = vmax.f32 %v12515_v1, %v12517_v13 }
 0x9d8   : > { %v12519_v30 = vpop.f32.mrf.mxu1 }
 0x9da   : > { %v12521_v31 = vpop.f32.mrf.mxu1 }
 0x9db   : > { %v2142_v9 = vmax.f32 %v12519_v30, %v12521_v31 }
 0x9dc   : > { %v2090_v58 = vpop.f32.mrf.mxu1 }
 0x9de   : > { %v2092_v47 = vpop.f32.mrf.mxu1 }
 0x9df   : > { %v2145_v40 = vmax.f32 %v2090_v58, %v2092_v47 }
 0x9e0   : > { %v2094_v19 = vpop.f32.mrf.mxu1 }
 0x9e1   : > { %2146 = vmax.xlane.f32.xlu1 %v2145_v40  ;;  %v2136_v40 = vmax.f32 %v12511_v21, %v12513_v6 }
 0x9e2   : > { %v2096_v52 = vpop.f32.mrf.mxu1 }
 0x9e3   : > { %v2148_v50 = vmax.f32 %v2094_v19, %v2096_v52 }
 0x9e4   : > { %v2100_v56 = vpop.f32.mrf.mxu1 }
 0x9e5   : > { %2119 = vmax.xlane.f32.xlu1 %v2118_v33  ;;  %v2127_v33 = vmax.f32 %v12499_v29, %v12501_v62 }
 0x9e6   : > { %v2102_v36 = vpop.f32.mrf.mxu1 }
 0x9e7   : > { %v2151_v10 = vmax.f32 %v2100_v56, %v2102_v36 }
 0x9e8   : > { %v2104_v26 = vpop.f32.mrf.mxu1 }
 0x9e9   : > { %2113 = vmax.xlane.f32.xlu1 %v2112_v4  ;;  %2152 = vmax.xlane.f32.xlu0 %v2151_v10  ;;  %v2130_v4 = vmax.f32 %v12503_v55, %v12505_v8  ;;  %v2121_v10 = vmax.f32 %v12491_v38, %v12493_v41 }
 0x9ea   : > { %v2106_v53 = vpop.f32.mrf.mxu1 }
 0x9eb   : > { %v2154_v61 = vmax.f32 %v2104_v26, %v2106_v53 }
 0x9ed   : > { %2155 = vmax.xlane.f32.xlu0 %v2154_v61  ;;  %v2124_v61 = vmax.f32 %v12495_v25, %v12497_v54 }
 0x9f1   : > { %2149 = vmax.xlane.f32.xlu0 %v2148_v50  ;;  %v2115_v50 = vmax.f32 %v12483_v17, %v12485_v27 }
 0x9f5   : > { %2140 = vmax.xlane.f32.xlu0 %v2139_v12  ;;  %v2109_v12 = vmax.f32 %v12475_v14, %v12477_v0 }
 0x9f9   : > { %2143 = vmax.xlane.f32.xlu0 %v2142_v9 }
 0x9fd   : > { %2134 = vmax.xlane.f32.xlu0 %v2133_v63 }
 0xa01   : > { %2137 = vmax.xlane.f32.xlu0 %v2136_v40 }
 0xa05   : > { %2128 = vmax.xlane.f32.xlu0 %v2127_v33 }
 0xa09   : > { %2131 = vmax.xlane.f32.xlu0 %v2130_v4 }
 0xa0d   : > { %2122 = vmax.xlane.f32.xlu0 %v2121_v10 }
 0xa11   : > { %2125 = vmax.xlane.f32.xlu0 %v2124_v61 }
 0xa15   : > { %2116 = vmax.xlane.f32.xlu0 %v2115_v50 }
 0xa19   : > { %2110 = vmax.xlane.f32.xlu0 %v2109_v12 }
 0xa6a   : > { %v2147_v9 = vpop.xlane.xlu1 %2146 }
 0xa6b   : > { %v2181_v63 = vsub.f32 %v2090_v58, %v2147_v9  ;;  %v2182_v40 = vsub.f32 %v2092_v47, %v2147_v9 }
 0xa6d   : > { %v2237_v35 = vmul.f32 1.442695, %v2181_v63  ;;  %v2239_v5 = vmul.f32 1.442695, %v2182_v40 }
 0xa72   : > { %v2153_v33 = vpop.xlane.xlu0 %2152 }
 0xa73   : > { %v2185_v4 = vsub.f32 %v2100_v56, %v2153_v33  ;;  %v2186_v48 = vsub.f32 %v2102_v36, %v2153_v33 }
 0xa75   : > { %v2245_v10 = vmul.f32 1.442695, %v2185_v4  ;;  %v2247_v44 = vmul.f32 1.442695, %v2186_v48 }
 0xa76   : > { %v2156_v23 = vpop.xlane.xlu0 %2155 }
 0xa77   : > { %10094 = vpow2.f32 %v2245_v10  ;;  %v2187_v61 = vsub.f32 %v2104_v26, %v2156_v23  ;;  %v2188_v32 = vsub.f32 %v2106_v53, %v2156_v23 }
 0xa78   : > { %10096 = vpow2.f32 %v2247_v44 }
 0xa79   : > { %10098 = vpow2.f32 %v2237_v35  ;;  %v2249_v50 = vmul.f32 1.442695, %v2187_v61  ;;  %v2251_v39 = vmul.f32 1.442695, %v2188_v32 }
 0xa7a   : > { %10100 = vpow2.f32 %v2239_v5  ;;  %v2150_v12 = vpop.xlane.xlu0 %2149 }
 0xa7b   : > { %10102 = vpow2.f32 %v2249_v50  ;;  %v2183_v58 = vsub.f32 %v2094_v19, %v2150_v12  ;;  %v2184_v47 = vsub.f32 %v2096_v52, %v2150_v12 }
 0xa7c   : > { %10104 = vpow2.f32 %v2251_v39 }
 0xa7d   : > { %v2241_v56 = vmul.f32 1.442695, %v2183_v58  ;;  %v2243_v36 = vmul.f32 1.442695, %v2184_v47 }
 0xa7e   : > { %v2141_v9 = vpop.xlane.xlu0 %2140 }
 0xa7f   : > { %10106 = vpow2.f32 %v2241_v56  ;;  %v2177_v48 = vsub.f32 %v12515_v1, %v2141_v9  ;;  %v2178_v63 = vsub.f32 %v12517_v13, %v2141_v9 }
 0xa80   : > { %10108 = vpow2.f32 %v2243_v36 }
 0xa81   : > { %v2229_v23 = vmul.f32 1.442695, %v2177_v48  ;;  %v2231_v44 = vmul.f32 1.442695, %v2178_v63 }
 0xa82   : > { %v2144_v35 = vpop.xlane.xlu0 %2143 }
 0xa83   : > { %10110 = vpow2.f32 %v2229_v23  ;;  %v2179_v5 = vsub.f32 %v12519_v30, %v2144_v35  ;;  %v2180_v32 = vsub.f32 %v12521_v31, %v2144_v35 }
 0xa84   : > { %v12551_v19 = vpop.eup %10094  ;;  %10112 = vpow2.f32 %v2231_v44 }
 0xa85   : > { %v12553_v39 = vpop.eup %10096  ;;  %v2233_v52 = vmul.f32 1.442695, %v2179_v5  ;;  %v2235_v26 = vmul.f32 1.442695, %v2180_v32 }
 0xa86   : > { %v12555_v53 = vpop.eup %10098  ;;  %v2135_v1 = vpop.xlane.xlu0 %2134  ;;  %v2295_v13 = vadd.f32 %v12553_v39, %v12551_v19 }
 0xa87   : > { %v12559_v40 = vpop.eup %10100  ;;  %10114 = vpow2.f32 %v2233_v52  ;;  %v2173_v30 = vsub.f32 %v12507_v51, %v2135_v1  ;;  %v2174_v31 = vsub.f32 %v12509_v11, %v2135_v1 }
 0xa88   : > { %v12563_v33 = vpop.eup %10102  ;;  %10116 = vpow2.f32 %v2235_v26  ;;  %2296 = vadd.xlane.f32.xlu0 %v2295_v13  ;;  %v2289_v58 = vadd.f32 %v12559_v40, %v12555_v53 }
 0xa89   : > { %v12565_v4 = vpop.eup %10104  ;;  %v2221_v10 = vmul.f32 1.442695, %v2173_v30  ;;  %v2223_v61 = vmul.f32 1.442695, %v2174_v31 }
 0xa8a   : > { %v2138_v50 = vpop.xlane.xlu0 %2137  ;;  %v2298_v12 = vadd.f32 %v12565_v4, %v12563_v33 }
 0xa8b   : > { %10118 = vpow2.f32 %v2221_v10  ;;  %v2175_v51 = vsub.f32 %v12511_v21, %v2138_v50  ;;  %v2176_v11 = vsub.f32 %v12513_v6, %v2138_v50 }
 0xa8c   : > { %v12573_v47 = vpop.eup %10106  ;;  %10120 = vpow2.f32 %v2223_v61  ;;  %2299 = vadd.xlane.f32.xlu1 %v2298_v12  ;;  %2290 = vadd.xlane.f32.xlu0 %v2289_v58 }
 0xa8d   : > { %v12575_v56 = vpop.eup %10108  ;;  %v2225_v36 = vmul.f32 1.442695, %v2175_v51  ;;  %v2227_v9 = vmul.f32 1.442695, %v2176_v11 }
 0xa8e   : > { %v2129_v48 = vpop.xlane.xlu0 %2128  ;;  %v2292_v63 = vadd.f32 %v12575_v56, %v12573_v47 }
 0xa8f   : > { %10122 = vpow2.f32 %v2225_v36  ;;  %v2169_v23 = vsub.f32 %v12499_v29, %v2129_v48  ;;  %v2170_v21 = vsub.f32 %v12501_v62, %v2129_v48  ;;  %v2120_v62 = vpop.xlane.xlu1 %2119 }
 0xa90   : > { %v12581_v44 = vpop.eup %10110  ;;  %10124 = vpow2.f32 %v2227_v9  ;;  %2293 = vadd.xlane.f32.xlu1 %v2292_v63  ;;  %v2163_v58 = vsub.f32 %v12487_v60, %v2120_v62  ;;  %v2164_v36 = vsub.f32 %v12489_v22, %v2120_v62 }
 0xa91   : > { %v12583_v6 = vpop.eup %10112  ;;  %v2213_v35 = vmul.f32 1.442695, %v2169_v23  ;;  %v2215_v5 = vmul.f32 1.442695, %v2170_v21 }
 0xa92   : > { %v2132_v32 = vpop.xlane.xlu0 %2131  ;;  %v2283_v52 = vadd.f32 %v12583_v6, %v12581_v44  ;;  %v2201_v60 = vmul.f32 1.442695, %v2163_v58 }
 0xa93   : > { %10126 = vpow2.f32 %v2213_v35  ;;  %v2171_v26 = vsub.f32 %v12503_v55, %v2132_v32  ;;  %v2172_v1 = vsub.f32 %v12505_v8, %v2132_v32  ;;  %v2114_v9 = vpop.xlane.xlu1 %2113  ;;  %v2203_v32 = vmul.f32 1.442695, %v2164_v36 }
 0xa94   : > { %v12589_v29 = vpop.eup %10114  ;;  %10128 = vpow2.f32 %v2215_v5  ;;  %2284 = vadd.xlane.f32.xlu0 %v2283_v52  ;;  %v2159_v35 = vsub.f32 %v12479_v7, %v2114_v9  ;;  %v2160_v52 = vsub.f32 %v12481_v16, %v2114_v9 }
 0xa95   : > { %v12591_v13 = vpop.eup %10116  ;;  %v2217_v30 = vmul.f32 1.442695, %v2171_v26  ;;  %v2219_v31 = vmul.f32 1.442695, %v2172_v1 }
 0xa96   : > { %v2123_v10 = vpop.xlane.xlu0 %2122  ;;  %v2286_v61 = vadd.f32 %v12591_v13, %v12589_v29  ;;  %v2193_v7 = vmul.f32 1.442695, %v2159_v35  ;;  %v2195_v16 = vmul.f32 1.442695, %v2160_v52 }
 0xa97   : > { %10130 = vpow2.f32 %v2217_v30  ;;  %v2165_v50 = vsub.f32 %v12491_v38, %v2123_v10  ;;  %v2166_v55 = vsub.f32 %v12493_v41, %v2123_v10 }
 0xa98   : > { %v12597_v12 = vpop.eup %10118  ;;  %10132 = vpow2.f32 %v2219_v31  ;;  %2287 = vadd.xlane.f32.xlu1 %v2286_v61 }
 0xa99   : > { %v12599_v8 = vpop.eup %10120  ;;  %v2205_v51 = vmul.f32 1.442695, %v2165_v50  ;;  %v2207_v11 = vmul.f32 1.442695, %v2166_v55 }
 0xa9a   : > { %v2126_v48 = vpop.xlane.xlu0 %2125  ;;  %v2277_v63 = vadd.f32 %v12599_v8, %v12597_v12 }
 0xa9b   : > { %10134 = vpow2.f32 %v2205_v51  ;;  %v2167_v38 = vsub.f32 %v12495_v25, %v2126_v48  ;;  %v2168_v41 = vsub.f32 %v12497_v54, %v2126_v48 }
 0xa9c   : > { %v12607_v23 = vpop.eup %10122  ;;  %10136 = vpow2.f32 %v2207_v11  ;;  %2278 = vadd.xlane.f32.xlu0 %v2277_v63 }
 0xa9d   : > { %v12609_v21 = vpop.eup %10124  ;;  %v2209_v22 = vmul.f32 1.442695, %v2167_v38  ;;  %v2211_v5 = vmul.f32 1.442695, %v2168_v41 }
 0xa9e   : > { %v2117_v26 = vpop.xlane.xlu0 %2116  ;;  %v2280_v25 = vadd.f32 %v12609_v21, %v12607_v23 }
 0xa9f   : > { %10138 = vpow2.f32 %v2209_v22  ;;  %v2161_v54 = vsub.f32 %v12483_v17, %v2117_v26  ;;  %v2162_v1 = vsub.f32 %v12485_v27, %v2117_v26 }
 0xaa0   : > { %v12617_v62 = vpop.eup %10126  ;;  %10140 = vpow2.f32 %v2211_v5  ;;  %2281 = vadd.xlane.f32.xlu1 %v2280_v25 }
 0xaa1   : > { %v12619_v30 = vpop.eup %10128  ;;  %10142 = vpow2.f32 %v2201_v60  ;;  %v2197_v31 = vmul.f32 1.442695, %v2161_v54  ;;  %v2199_v10 = vmul.f32 1.442695, %v2162_v1 }
 0xaa2   : > { %10144 = vpow2.f32 %v2203_v32  ;;  %v2111_v61 = vpop.xlane.xlu0 %2110  ;;  %v2271_v50 = vadd.f32 %v12619_v30, %v12617_v62 }
 0xaa3   : > { %10146 = vpow2.f32 %v2197_v31  ;;  %v2157_v17 = vsub.f32 %v12475_v14, %v2111_v61  ;;  %v2158_v27 = vsub.f32 %v12477_v0, %v2111_v61  ;;  %v2476_v31 = vrot.slane %v16944_v15, 6 }
 0xaa4   : > { %v12625_v55 = vpop.eup %10130  ;;  %10148 = vpow2.f32 %v2199_v10  ;;  %2272 = vadd.xlane.f32.xlu0 %v2271_v50 }
 0xaa5   : > { %v12627_v58 = vpop.eup %10132  ;;  %10150 = vpow2.f32 %v2193_v7  ;;  %v2189_v51 = vmul.f32 1.442695, %v2157_v17  ;;  %v2191_v11 = vmul.f32 1.442695, %v2158_v27 }
 0xaa6   : > { %10152 = vpow2.f32 %v2195_v16  ;;  %v2274_v36 = vadd.f32 %v12627_v58, %v12625_v55 }
 0xaa7   : > { %10154 = vpow2.f32 %v2189_v51 }
 0xaa8   : > { %v12631_v9 = vpop.eup %10134  ;;  %10156 = vpow2.f32 %v2191_v11  ;;  %2275 = vadd.xlane.f32.xlu1 %v2274_v36 }
 0xaa9   : > { %v12633_v14 = vpop.eup %10136 }
 0xaaa   : > { %v2265_v0 = vadd.f32 %v12633_v14, %v12631_v9 }
 0xaac   : > { %v12637_v48 = vpop.eup %10138  ;;  %2266 = vadd.xlane.f32.xlu0 %v2265_v0 }
 0xaad   : > { %v12639_v63 = vpop.eup %10140 }
 0xaae   : > { %v12641_v38 = vpop.eup %10142  ;;  %v2268_v41 = vadd.f32 %v12639_v63, %v12637_v48 }
 0xaaf   : > { %v12645_v60 = vpop.eup %10144 }
 0xab0   : > { %v12647_v35 = vpop.eup %10146  ;;  %2269 = vadd.xlane.f32.xlu1 %v2268_v41  ;;  %v2262_v52 = vadd.f32 %v12645_v60, %v12641_v38 }
 0xab1   : > { %v12649_v22 = vpop.eup %10148 }
 0xab2   : > { %v12651_v5 = vpop.eup %10150  ;;  %v2259_v32 = vadd.f32 %v12649_v22, %v12647_v35 }
 0xab3   : > { %v12657_v26 = vpop.eup %10152 }
 0xab4   : > { %v12659_v25 = vpop.eup %10154  ;;  %2260 = vadd.xlane.f32.xlu0 %v2259_v32  ;;  %2263 = vadd.xlane.f32.xlu1 %v2262_v52  ;;  %v2256_v7 = vadd.f32 %v12657_v26, %v12651_v5 }
 0xab5   : > { %v12661_v54 = vpop.eup %10156 }
 0xab6   : > { %v2253_v1 = vadd.f32 %v12661_v54, %v12659_v25 }
 0xab8   : > { %2254 = vadd.xlane.f32.xlu0 %v2253_v1  ;;  %2257 = vadd.xlane.f32.xlu1 %v2256_v7 }
 0xae5   : > { %2478 = vxpose.xlu0.c.b16.start.end [1/1] (short) %v2476_v31, 128 }
 0xb11   : > { %v2297_v10 = vpop.xlane.xlu0 %2296 }
 0xb12   : > { %10158 = vrcp.f32 %v2297_v10 }
 0xb15   : > { %v2291_v16 = vpop.xlane.xlu0 %2290  ;;  %v2300_v61 = vpop.xlane.xlu1 %2299 }
 0xb16   : > { %10160 = vrcp.f32 %v2300_v61 }
 0xb17   : > { %10162 = vrcp.f32 %v2291_v16 }
 0xb19   : > { %v2294_v50 = vpop.xlane.xlu1 %2293 }
 0xb1a   : > { %10164 = vrcp.f32 %v2294_v50 }
 0xb1d   : > { %v2285_v17 = vpop.xlane.xlu0 %2284 }
 0xb1e   : > { %10166 = vrcp.f32 %v2285_v17 }
 0xb1f   : > { %v10159_v51 = vpop.eup %10158 }
 0xb20   : > { %v2346_v41 = vmul.f32 %v10159_v51, %v12553_v39  ;;  %v2345_v32 = vmul.f32 %v10159_v51, %v12551_v19 }
 0xb21   : > { %v2288_v27 = vpop.xlane.xlu1 %2287 }
 0xb22   : > { %10168 = vrcp.f32 %v2288_v27 }
 0xb23   : > { %v10161_v11 = vpop.eup %10160 }
 0xb24   : > { %v10163_v36 = vpop.eup %10162  ;;  %v2348_v15 = vmul.f32 %v10161_v11, %v12565_v4  ;;  %v2347_v52 = vmul.f32 %v10161_v11, %v12563_v33 }
 0xb25   : > { %v2279_v0 = vpop.xlane.xlu0 %2278  ;;  %v2342_v10 = vmul.f32 %v10163_v36, %v12559_v40  ;;  %v2341_v33 = vmul.f32 %v10163_v36, %v12555_v53 }
 0xb26   : > { %v2364_v7 = vpack.c.bf16 %v2348_v15, %v2346_v41  ;;  %v2363_v31 = vpack.c.bf16 %v2347_v52, %v2345_v32  ;;  %10170 = vrcp.f32 %v2279_v0 }
 0xb27   : > { %v10165_v1 = vpop.eup %10164 }
 0xb28   : > { %v2344_v16 = vmul.f32 %v10165_v1, %v12575_v56  ;;  %2369 = vmatprep.subr.bf16.mxu0 %v2364_v7  ;;  %v2343_v39 = vmul.f32 %v10165_v1, %v12573_v47 }
 0xb29   : > { %v2282_v61 = vpop.xlane.xlu1 %2281  ;;  %2370 = vmatpush1.bf16.xpose.msra.mxu0 %v2363_v31 }
 0xb2a   : > { %10172 = vrcp.f32 %v2282_v61  ;;  %v2362_v50 = vpack.c.bf16 %v2344_v16, %v2342_v10  ;;  %v2361_v27 = vpack.c.bf16 %v2343_v39, %v2341_v33 }
 0xb2b   : > { %v10167_v4 = vpop.eup %10166 }
 0xb2c   : > { %2371 = vmatprep.subr.bf16.mxu0 %v2362_v50  ;;  %v2338_v51 = vmul.f32 %v10167_v4, %v12583_v6  ;;  %v2337_v15 = vmul.f32 %v10167_v4, %v12581_v44 }
 0xb2d   : > { %v2273_v19 = vpop.xlane.xlu0 %2272 }
 0xb2e   : > { %10174 = vrcp.f32 %v2273_v19 }
 0xb2f   : > { %v10169_v17 = vpop.eup %10168 }
 0xb30   : > { %v2340_v40 = vmul.f32 %v10169_v17, %v12591_v13  ;;  %v2339_v0 = vmul.f32 %v10169_v17, %v12589_v29 }
 0xb31   : > { %v2276_v56 = vpop.xlane.xlu1 %2275  ;;  %2372 = vmatpush1.bf16.xpose.msra.mxu0 %v2361_v27 }
 0xb32   : > { %10176 = vrcp.f32 %v2276_v56  ;;  %v2360_v11 = vpack.c.bf16 %v2340_v40, %v2338_v51  ;;  %v2359_v53 = vpack.c.bf16 %v2339_v0, %v2337_v15 }
 0xb33   : > { %v10171_v41 = vpop.eup %10170 }
 0xb34   : > { %2373 = vmatprep.subr.bf16.mxu0 %v2360_v11  ;;  %v2334_v36 = vmul.f32 %v10171_v41, %v12599_v8  ;;  %v2333_v44 = vmul.f32 %v10171_v41, %v12597_v12 }
 0xb35   : > { %v2267_v47 = vpop.xlane.xlu0 %2266 }
 0xb36   : > { %10178 = vrcp.f32 %v2267_v47 }
 0xb37   : > { %v10173_v32 = vpop.eup %10172 }
 0xb38   : > { %v2336_v6 = vmul.f32 %v10173_v32, %v12609_v21  ;;  %v2335_v1 = vmul.f32 %v10173_v32, %v12607_v23 }
 0xb39   : > { %v2270_v52 = vpop.xlane.xlu1 %2269  ;;  %2374 = vmatpush1.bf16.xpose.msra.mxu0 %v2359_v53 }
 0xb3a   : > { %10180 = vrcp.f32 %v2270_v52  ;;  %v2358_v13 = vpack.c.bf16 %v2336_v6, %v2334_v36  ;;  %v2357_v16 = vpack.c.bf16 %v2335_v1, %v2333_v44  ;;  %v16802_v36 = vrot.slane %v16962_v34, 6 }
 0xb3b   : > { %v10175_v7 = vpop.eup %10174 }
 0xb3c   : > { %2375 = vmatprep.subr.bf16.mxu0 %v2358_v13  ;;  %v2330_v8 = vmul.f32 %v10175_v7, %v12619_v30  ;;  %v2329_v19 = vmul.f32 %v10175_v7, %v12617_v62  ;;  %v12728_v7 = vpop.f32.mrf.mxu0 }
 0xb3d   : > { %v2261_v29 = vpop.xlane.xlu0 %2260  ;;  %v2264_v31 = vpop.xlane.xlu1 %2263 }
 0xb3e   : > { %10182 = vrcp.f32 %v2261_v29  ;;  %v12730_v29 = vpop.f32.mrf.mxu0 }
 0xb3f   : > { %v10177_v10 = vpop.eup %10176  ;;  %10184 = vrcp.f32 %v2264_v31 }
 0xb40   : > { %v2332_v21 = vmul.f32 %v10177_v10, %v12627_v58  ;;  %v2331_v23 = vmul.f32 %v10177_v10, %v12625_v55  ;;  %v12732_v31 = vpop.f32.mrf.mxu0 }
 0xb41   : > { %v2255_v61 = vpop.xlane.xlu0 %2254  ;;  %2376 = vmatpush1.bf16.xpose.msra.mxu0 %v2357_v16  ;;  %v2258_v50 = vpop.xlane.xlu1 %2257 }
 0xb42   : > { %v2356_v39 = vpack.c.bf16 %v2332_v21, %v2330_v8  ;;  %10186 = vrcp.f32 %v2255_v61  ;;  %v2355_v33 = vpack.c.bf16 %v2331_v23, %v2329_v19  ;;  %v12734_v44 = vpop.f32.mrf.mxu0 }
 0xb43   : > { %v10179_v4 = vpop.eup %10178  ;;  %10188 = vrcp.f32 %v2258_v50  ;;  %16968 = vst [vmem:[#allocation40_spill] sm:$0xff] %v12734_v44 }
 0xb44   : > { %2377 = vmatprep.subr.bf16.mxu0 %v2356_v39  ;;  %v2326_v17 = vmul.f32 %v10179_v4, %v12633_v14  ;;  %v2325_v11 = vmul.f32 %v10179_v4, %v12631_v9 }
 0xb47   : > { %v10181_v12 = vpop.eup %10180 }
 0xb48   : > { %v2328_v30 = vmul.f32 %v10181_v12, %v12639_v63  ;;  %v2327_v40 = vmul.f32 %v10181_v12, %v12637_v48 }
 0xb49   : > { %2378 = vmatpush1.bf16.xpose.msra.mxu0 %v2355_v33 }
 0xb4a   : > { %v2354_v58 = vpack.c.bf16 %v2328_v30, %v2326_v17  ;;  %v2353_v62 = vpack.c.bf16 %v2327_v40, %v2325_v11 }
 0xb4b   : > { %v10183_v27 = vpop.eup %10182 }
 0xb4c   : > { %v10185_v51 = vpop.eup %10184  ;;  %2379 = vmatprep.subr.bf16.mxu0 %v2354_v58  ;;  %v2322_v56 = vmul.f32 %v10183_v27, %v12649_v22  ;;  %v2321_v14 = vmul.f32 %v10183_v27, %v12647_v35  ;;  %v16801_v35 = vrot.slane %v12382_v59, 4 }
 0xb4d   : > { %v2324_v55 = vmul.f32 %v10185_v51, %v12645_v60  ;;  %v2323_v63 = vmul.f32 %v10185_v51, %v12641_v38  ;;  %v2494_v38 = vrot.slane %v16963_v43, 6 }
 0xb4f   : > { %v10187_v0 = vpop.eup %10186  ;;  %v2352_v41 = vpack.c.bf16 %v2324_v55, %v2322_v56  ;;  %v2351_v32 = vpack.c.bf16 %v2323_v63, %v2321_v14 }
 0xb50   : > { %v10189_v47 = vpop.eup %10188  ;;  %v2318_v15 = vmul.f32 %v10187_v0, %v12661_v54  ;;  %v2317_v9 = vmul.f32 %v10187_v0, %v12659_v25 }
 0xb51   : > { %2380 = vmatpush1.bf16.xpose.msra.mxu0 %v2353_v62  ;;  %v2320_v48 = vmul.f32 %v10189_v47, %v12657_v26  ;;  %v2319_v60 = vmul.f32 %v10189_v47, %v12651_v5  ;;  %v12709_v26 = vsel %vm926_vm1, %v2494_v38, 0  ;;  %v2486_v5 = vpop.trf.xlu0 }
 0xb52   : > { %2381 = vmatprep.subr.bf16.mxu0 %v2352_v41  ;;  %16967 = vst [vmem:[#allocation21_spill] sm:$0xff] %v12709_v26 }
 0xb53   : > { %v2350_v22 = vpack.c.bf16 %v2320_v48, %v2318_v15  ;;  %v2349_v53 = vpack.c.bf16 %v2319_v60, %v2317_v9 }
 0xb55   : > { %v2487_v25 = vpop.trf.xlu0 }
 0xb59   : > { %2382 = vmatpush1.bf16.xpose.msra.mxu0 %v2351_v32  ;;  %v2488_v43 = vpop.trf.xlu0 }
 0xb5a   : > { %2383 = vmatprep.subr.bf16.mxu0 %v2350_v22 }
 0xb5d   : > { %v2489_v54 = vpop.trf.xlu0 }
 0xb61   : > { %2384 = vmatpush1.bf16.xpose.msra.mxu0 %v2349_v53  ;;  %v2490_v6 = vpop.trf.xlu0 }
 0xb62   : > { %9477 = vmatprep.subr.msk.bf16.mxu0 %vm926_vm1, %v16802_v36 }
 0xb65   : > { %v2491_v52 = vpop.trf.xlu0 }
 0xb68   : > { %2402 = vmatmul.mubr.bf16.vlgmr.msra.gmra.mxu0 %v16801_v35 }
 0xb69   : > { %2541 = vmatpush1.bf16.msra.mxu0 %v12709_v26  ;;  %2558 = vmatprep.mubr.bf16.mxu0 %v16965_v42  ;;  %v2492_v13 = vpop.trf.xlu0 }
 0xb6d   : > { %v2493_v1 = vpop.trf.xlu0 }
 0xb70   : > { %9478 = vmatmul.mubr.msk.bf16.vlgmr.msra.gmra.mxu0 %vm901_vm2, %v2486_v5 }
 0xb71   : > { %2568 = vmatprep.mubr.bf16.mxu0 %v16965_v42 }
 0xb78   : > { %9479 = vmatmul.mubr.msk.bf16.gmra.mxu0 %vm901_vm2, %v2487_v25 }
 0xb79   : > { %2578 = vmatprep.mubr.bf16.mxu0 %v16965_v42 }
 0xb80   : > { %9480 = vmatmul.mubr.msk.bf16.gmra.mxu0 %vm901_vm2, %v2488_v43  ;;  %v11438_v43 = vld [vmem:[%s16745_s6] sm:$0xff]  }
 0xb81   : > { %2588 = vmatprep.mubr.bf16.mxu0 %v16965_v42 }
 0xb88   : > { %9481 = vmatmul.mubr.msk.bf16.gmra.mxu0 %vm901_vm2, %v2489_v54 }
 0xb89   : > { %2598 = vmatprep.mubr.bf16.mxu0 %v16965_v42 }
 0xb90   : > { %9482 = vmatmul.mubr.msk.bf16.gmra.mxu0 %vm901_vm2, %v2490_v6 }
 0xb91   : > { %2608 = vmatprep.mubr.bf16.mxu0 %v16965_v42 }
 0xb98   : > { %9483 = vmatmul.mubr.msk.bf16.gmra.mxu0 %vm901_vm2, %v2491_v52 }
 0xb99   : > { %2618 = vmatprep.mubr.bf16.mxu0 %v16965_v42 }
 0xba0   : > { %9484 = vmatmul.mubr.msk.bf16.gmra.mxu0 %vm901_vm2, %v2492_v13 }
 0xba1   : > { %2628 = vmatprep.mubr.bf16.mxu0 %v16965_v42 }
 0xba8   : > { %9485 = vmatmul.mubr.msk.bf16.gmra.mxu0 %vm901_vm2, %v2493_v1 }
 0xc28   : > { %v2403_v10 = vpop.f32.mrf.mxu0 }
 0xc29   : > { %v2409_v16 = vpack.c.bf16 %v2403_v10, %v2403_v10 }
 0xc2a   : > { %v2405_v8 = vpop.f32.mrf.mxu0 }
 0xc2b   : > { %v2421_v21 = vsel %vm926_vm1, %v2409_v16, 0  ;;  %9819 = vmatprep.subr.msk.bf16.mxu1 %vm926_vm1, %v2409_v16 }
 0xc2c   : > { %v2406_v61 = vpop.f32.mrf.mxu0  ;;  %9734 = vmatpush3.bf16.msra.mxu1 %v2421_v21 }
 0xc2e   : > { %v2407_v50 = vpop.f32.mrf.mxu0 }
 0xc30   : > { %v12738_v39 = vpop.f32.mrf.mxu0 }
 0xc32   : > { %v12740_v23 = vpop.f32.mrf.mxu0 }
 0xc34   : > { %v12742_v4 = vpop.f32.mrf.mxu0 }
 0xc36   : > { %v12744_v19 = vpop.f32.mrf.mxu0 }
 0xc38   : > { %v12746_v12 = vpop.f32.mrf.mxu0 }
 0xc3a   : > { %v12748_v33 = vpop.f32.mrf.mxu0 }
 0xc3c   : > { %v12750_v17 = vpop.f32.mrf.mxu0 }
 0xc3e   : > { %v12752_v30 = vpop.f32.mrf.mxu0 }
 0xc40   : > { %v12754_v58 = vpop.f32.mrf.mxu0 }
 0xc42   : > { %v12756_v27 = vpop.f32.mrf.mxu0 }
 0xc44   : > { %v12758_v51 = vpop.f32.mrf.mxu0 }
 0xc46   : > { %v12760_v40 = vpop.f32.mrf.mxu0 }
 0xc47   : > { %v2654_v56 = vmax.f32 %v12758_v51, %v12760_v40 }
 0xc48   : > { %v12764_v55 = vpop.f32.mrf.mxu0 }
 0xc49   : > { %2655 = vmax.xlane.f32.xlu0 %v2654_v56 }
 0xc4a   : > { %v12766_v11 = vpop.f32.mrf.mxu0 }
 0xc4b   : > { %v2657_v62 = vmax.f32 %v12764_v55, %v12766_v11 }
 0xc4c   : > { %v2594_v0 = vpop.f32.mrf.mxu0 }
 0xc4d   : > { %2658 = vmax.xlane.f32.xlu1 %v2657_v62  ;;  %v2651_v62 = vmax.f32 %v12754_v58, %v12756_v27 }
 0xc4e   : > { %v2596_v41 = vpop.f32.mrf.mxu0 }
 0xc4f   : > { %v2660_v47 = vmax.f32 %v2594_v0, %v2596_v41 }
 0xc50   : > { %v2600_v14 = vpop.f32.mrf.mxu0 }
 0xc51   : > { %2661 = vmax.xlane.f32.xlu1 %v2660_v47  ;;  %v2645_v47 = vmax.f32 %v12746_v12, %v12748_v33 }
 0xc52   : > { %v2602_v63 = vpop.f32.mrf.mxu0 }
 0xc53   : > { %v2663_v15 = vmax.f32 %v2600_v14, %v2602_v63 }
 0xc54   : > { %v2604_v48 = vpop.f32.mrf.mxu0 }
 0xc55   : > { %2664 = vmax.xlane.f32.xlu1 %v2663_v15  ;;  %v2648_v15 = vmax.f32 %v12750_v17, %v12752_v30 }
 0xc56   : > { %v2606_v32 = vpop.f32.mrf.mxu0 }
 0xc57   : > { %v2666_v22 = vmax.f32 %v2604_v48, %v2606_v32 }
 0xc58   : > { %v12770_v9 = vpop.f32.mrf.mxu0 }
 0xc59   : > { %2667 = vmax.xlane.f32.xlu1 %v2666_v22  ;;  %v2639_v22 = vmax.f32 %v12738_v39, %v12740_v23 }
 0xc5a   : > { %v12772_v60 = vpop.f32.mrf.mxu0 }
 0xc5b   : > { %v2669_v53 = vmax.f32 %v12770_v9, %v12772_v60 }
 0xc5c   : > { %v12776_v38 = vpop.f32.mrf.mxu0 }
 0xc5d   : > { %2670 = vmax.xlane.f32.xlu1 %v2669_v53  ;;  %v2642_v53 = vmax.f32 %v12742_v4, %v12744_v19 }
 0xc5e   : > { %v12778_v5 = vpop.f32.mrf.mxu0 }
 0xc5f   : > { %v2672_v25 = vmax.f32 %v12776_v38, %v12778_v5  ;;  %2410 = vrot.lane.b32.xlu0 %v11438_v43, %s11524_s13 }
 0xc60   : > { %v12786_v54 = vpop.f32.mrf.mxu0 }
 0xc61   : > { %2673 = vmax.xlane.f32.xlu1 %v2672_v25 }
 0xc62   : > { %v12788_v6 = vpop.f32.mrf.mxu0 }
 0xc63   : > { %v2675_v52 = vmax.f32 %v12786_v54, %v12788_v6 }
 0xc64   : > { %v12792_v13 = vpop.f32.mrf.mxu0 }
 0xc65   : > { %2676 = vmax.xlane.f32.xlu1 %v2675_v52 }
 0xc66   : > { %v12794_v1 = vpop.f32.mrf.mxu0 }
 0xc67   : > { %v2678_v10 = vmax.f32 %v12792_v13, %v12794_v1 }
 0xc68   : > { %v12798_v16 = vpop.f32.mrf.mxu0 }
 0xc69   : > { %2679 = vmax.xlane.f32.xlu1 %v2678_v10 }
 0xc6a   : > { %v12800_v8 = vpop.f32.mrf.mxu0 }
 0xc6b   : > { %v2681_v21 = vmax.f32 %v12798_v16, %v12800_v8 }
 0xc6c   : > { %v12804_v61 = vpop.f32.mrf.mxu0 }
 0xc6d   : > { %2682 = vmax.xlane.f32.xlu1 %v2681_v21 }
 0xc6e   : > { %v12806_v50 = vpop.f32.mrf.mxu0 }
 0xc6f   : > { %v2684_v56 = vmax.f32 %v12804_v61, %v12806_v50 }
 0xc71   : > { %2685 = vmax.xlane.f32.xlu1 %v2684_v56 }
 0xc75   : > { %2652 = vmax.xlane.f32.xlu1 %v2651_v62 }
 0xc79   : > { %2646 = vmax.xlane.f32.xlu1 %v2645_v47 }
 0xc7d   : > { %2649 = vmax.xlane.f32.xlu1 %v2648_v15 }
 0xc81   : > { %2640 = vmax.xlane.f32.xlu1 %v2639_v22 }
 0xc85   : > { %2643 = vmax.xlane.f32.xlu1 %v2642_v53 }
 0xcd2   : > { %v12822_v28 = vpop.xlane.xlu0 %2655 }
 0xcd6   : > { %v12820_v25 = vpop.xlane.xlu1 %2658 }
 0xcda   : > { %v2662_v43 = vpop.xlane.xlu1 %2661 }
 0xcdb   : > { %v2701_v52 = vsub.f32 %v2594_v0, %v2662_v43  ;;  %v2702_v10 = vsub.f32 %v2596_v41, %v2662_v43 }
 0xcdd   : > { %v2747_v47 = vmul.f32 1.442695, %v2701_v52  ;;  %v2749_v15 = vmul.f32 1.442695, %v2702_v10 }
 0xcde   : > { %v2665_v21 = vpop.xlane.xlu1 %2664 }
 0xcdf   : > { %v2703_v56 = vsub.f32 %v2600_v14, %v2665_v21  ;;  %v2704_v62 = vsub.f32 %v2602_v63, %v2665_v21 }
 0xce1   : > { %v2751_v35 = vmul.f32 1.442695, %v2703_v56  ;;  %v2753_v36 = vmul.f32 1.442695, %v2704_v62 }
 0xce2   : > { %v2668_v44 = vpop.xlane.xlu1 %2667 }
 0xce3   : > { %10190 = vpow2.f32 %v2751_v35  ;;  %v2705_v26 = vsub.f32 %v2604_v48, %v2668_v44  ;;  %v2706_v22 = vsub.f32 %v2606_v32, %v2668_v44  ;;  %v2411_v35 = vpop.permute.xlu0 %2410 }
 0xce4   : > { %10192 = vpow2.f32 %v2753_v36  ;;  %9735 = vmatprep.mubr.msk.bf16.mxu1 %vm901_vm2, %v2411_v35 }
 0xce5   : > { %10194 = vpow2.f32 %v2747_v47  ;;  %v2755_v34 = vmul.f32 1.442695, %v2705_v26  ;;  %v2757_v53 = vmul.f32 1.442695, %v2706_v22 }
 0xce6   : > { %10196 = vpow2.f32 %v2749_v15  ;;  %v2671_v0 = vpop.xlane.xlu1 %2670 }
 0xce7   : > { %10198 = vpow2.f32 %v2755_v34  ;;  %v2707_v41 = vsub.f32 %v12770_v9, %v2671_v0  ;;  %v2708_v14 = vsub.f32 %v12772_v60, %v2671_v0 }
 0xce8   : > { %10200 = vpow2.f32 %v2757_v53 }
 0xce9   : > { %v2759_v63 = vmul.f32 1.442695, %v2707_v41  ;;  %v2761_v43 = vmul.f32 1.442695, %v2708_v14 }
 0xcea   : > { %v2674_v52 = vpop.xlane.xlu1 %2673 }
 0xceb   : > { %10202 = vpow2.f32 %v2759_v63  ;;  %v2709_v36 = vsub.f32 %v12776_v38, %v2674_v52  ;;  %v2710_v26 = vsub.f32 %v12778_v5, %v2674_v52 }
 0xcec   : > { %10204 = vpow2.f32 %v2761_v43 }
 0xced   : > { %v2763_v44 = vmul.f32 1.442695, %v2709_v36  ;;  %v2765_v48 = vmul.f32 1.442695, %v2710_v26 }
 0xcee   : > { %v2677_v34 = vpop.xlane.xlu1 %2676 }
 0xcef   : > { %10206 = vpow2.f32 %v2763_v44  ;;  %v2711_v32 = vsub.f32 %v12786_v54, %v2677_v34  ;;  %v2712_v9 = vsub.f32 %v12788_v6, %v2677_v34 }
 0xcf0   : > { %v12831_v60 = vpop.eup %10190  ;;  %10208 = vpow2.f32 %v2765_v48 }
 0xcf1   : > { %v12833_v10 = vpop.eup %10192  ;;  %v2767_v21 = vmul.f32 1.442695, %v2711_v32  ;;  %v2769_v38 = vmul.f32 1.442695, %v2712_v9 }
 0xcf2   : > { %v12835_v56 = vpop.eup %10194  ;;  %v2680_v5 = vpop.xlane.xlu1 %2679  ;;  %v2807_v62 = vadd.f32 %v12833_v10, %v12831_v60 }
 0xcf3   : > { %v12839_v47 = vpop.eup %10196  ;;  %10210 = vpow2.f32 %v2767_v21  ;;  %v2713_v54 = vsub.f32 %v12792_v13, %v2680_v5  ;;  %v2714_v6 = vsub.f32 %v12794_v1, %v2680_v5 }
 0xcf4   : > { %v12843_v15 = vpop.eup %10198  ;;  %10212 = vpow2.f32 %v2769_v38  ;;  %2808 = vadd.xlane.f32.xlu0 %v2807_v62  ;;  %v2804_v14 = vadd.f32 %v12839_v47, %v12835_v56 }
 0xcf5   : > { %v12845_v22 = vpop.eup %10200  ;;  %v2771_v53 = vmul.f32 1.442695, %v2713_v54  ;;  %v2773_v0 = vmul.f32 1.442695, %v2714_v6 }
 0xcf6   : > { %v2683_v41 = vpop.xlane.xlu1 %2682  ;;  %v2810_v63 = vadd.f32 %v12845_v22, %v12843_v15 }
 0xcf7   : > { %10214 = vpow2.f32 %v2771_v53  ;;  %v2715_v13 = vsub.f32 %v12798_v16, %v2683_v41  ;;  %v2716_v1 = vsub.f32 %v12800_v8, %v2683_v41 }
 0xcf8   : > { %v12853_v43 = vpop.eup %10202  ;;  %10216 = vpow2.f32 %v2773_v0  ;;  %2805 = vadd.xlane.f32.xlu0 %v2804_v14  ;;  %2811 = vadd.xlane.f32.xlu1 %v2810_v63 }
 0xcf9   : > { %v12855_v52 = vpop.eup %10204  ;;  %v2775_v35 = vmul.f32 1.442695, %v2715_v13  ;;  %v2777_v36 = vmul.f32 1.442695, %v2716_v1 }
 0xcfa   : > { %v2686_v26 = vpop.xlane.xlu1 %2685  ;;  %v2813_v44 = vadd.f32 %v12855_v52, %v12853_v43 }
 0xcfb   : > { %10218 = vpow2.f32 %v2775_v35  ;;  %v2717_v48 = vsub.f32 %v12804_v61, %v2686_v26  ;;  %v2718_v16 = vsub.f32 %v12806_v50, %v2686_v26 }
 0xcfc   : > { %v12861_v34 = vpop.eup %10206  ;;  %10220 = vpow2.f32 %v2777_v36  ;;  %2814 = vadd.xlane.f32.xlu1 %v2813_v44 }
 0xcfd   : > { %v12863_v8 = vpop.eup %10208  ;;  %v2779_v32 = vmul.f32 1.442695, %v2717_v48  ;;  %v2781_v9 = vmul.f32 1.442695, %v2718_v16 }
 0xcfe   : > { %v2653_v21 = vpop.xlane.xlu1 %2652  ;;  %v2816_v38 = vadd.f32 %v12863_v8, %v12861_v34 }
 0xcff   : > { %10222 = vpow2.f32 %v2779_v32  ;;  %v2695_v5 = vsub.f32 %v12754_v58, %v2653_v21  ;;  %v2696_v62 = vsub.f32 %v12756_v27, %v2653_v21 }
 0xd00   : > { %v12869_v61 = vpop.eup %10210  ;;  %10224 = vpow2.f32 %v2781_v9  ;;  %2817 = vadd.xlane.f32.xlu1 %v2816_v38 }
 0xd01   : > { %v12871_v50 = vpop.eup %10212  ;;  %v2735_v54 = vmul.f32 1.442695, %v2695_v5  ;;  %v2737_v6 = vmul.f32 1.442695, %v2696_v62 }
 0xd02   : > { %v2647_v53 = vpop.xlane.xlu1 %2646  ;;  %v2819_v0 = vadd.f32 %v12871_v50, %v12869_v61 }
 0xd03   : > { %10226 = vpow2.f32 %v2735_v54  ;;  %v2691_v41 = vsub.f32 %v12746_v12, %v2647_v53  ;;  %v2692_v14 = vsub.f32 %v12748_v33, %v2647_v53 }
 0xd04   : > { %v12877_v58 = vpop.eup %10214  ;;  %10228 = vpow2.f32 %v2737_v6  ;;  %2820 = vadd.xlane.f32.xlu1 %v2819_v0 }
 0xd05   : > { %v12879_v27 = vpop.eup %10216  ;;  %v2727_v63 = vmul.f32 1.442695, %v2691_v41  ;;  %v2729_v13 = vmul.f32 1.442695, %v2692_v14  ;;  %v12918_v14 = vld [vmem:[%s16745_s6 + $0x8] sm:$0xff]  }
 0xd06   : > { %v2650_v1 = vpop.xlane.xlu1 %2649  ;;  %v2822_v35 = vadd.f32 %v12879_v27, %v12877_v58 }
 0xd07   : > { %10230 = vpow2.f32 %v2727_v63  ;;  %v2699_v63 = vsub.f32 %v12764_v55, %v12820_v25 }
 0xd08   : > { %v12883_v36 = vpop.eup %10218  ;;  %10232 = vpow2.f32 %v2729_v13  ;;  %2823 = vadd.xlane.f32.xlu1 %v2822_v35  ;;  %v2700_v13 = vsub.f32 %v12766_v11, %v12820_v25  ;;  %v2697_v35 = vsub.f32 %v12758_v51, %v12822_v28  ;;  %v662_v11 = vld [vmem:[%s16744_s5 + $0x10] sm:$0xff] }
 0xd09   : > { %v12885_v12 = vpop.eup %10220 }
 0xd0a   : > { %v2641_v33 = vpop.xlane.xlu1 %2640  ;;  %v2825_v26 = vadd.f32 %v12885_v12, %v12883_v36 }
 0xd0b   : > { %v2687_v44 = vsub.f32 %v12738_v39, %v2641_v33  ;;  %v2688_v48 = vsub.f32 %v12740_v23, %v2641_v33  ;;  %v2743_v33 = vmul.f32 1.442695, %v2699_v63 }
 0xd0c   : > { %v12891_v16 = vpop.eup %10222  ;;  %2826 = vadd.xlane.f32.xlu1 %v2825_v26  ;;  %v2698_v26 = vsub.f32 %v12760_v40, %v12822_v28 }
 0xd0d   : > { %v12893_v32 = vpop.eup %10224  ;;  %v2719_v9 = vmul.f32 1.442695, %v2687_v44  ;;  %v2721_v21 = vmul.f32 1.442695, %v2688_v48  ;;  %v2745_v44 = vmul.f32 1.442695, %v2700_v13 }
 0xd0e   : > { %v2828_v38 = vadd.f32 %v12893_v32, %v12891_v16  ;;  %v2739_v48 = vmul.f32 1.442695, %v2697_v35  ;;  %v2644_v55 = vpop.xlane.xlu1 %2643 }
 0xd0f   : > { %10234 = vpow2.f32 %v2719_v9  ;;  %v2693_v9 = vsub.f32 %v12750_v17, %v2650_v1  ;;  %v2689_v25 = vsub.f32 %v12742_v4, %v2644_v55  ;;  %v2690_v40 = vsub.f32 %v12744_v19, %v2644_v55 }
 0xd10   : > { %v12897_v5 = vpop.eup %10226  ;;  %10236 = vpow2.f32 %v2721_v21  ;;  %2829 = vadd.xlane.f32.xlu1 %v2828_v38  ;;  %v2741_v21 = vmul.f32 1.442695, %v2698_v26  ;;  %v2694_v38 = vsub.f32 %v12752_v30, %v2650_v1 }
 0xd11   : > { %v12899_v62 = vpop.eup %10228  ;;  %10238 = vpow2.f32 %v2743_v33  ;;  %v2731_v51 = vmul.f32 1.442695, %v2693_v9  ;;  %v2723_v17 = vmul.f32 1.442695, %v2689_v25  ;;  %v666_v9 = vld [vmem:[%s16744_s5 + $0x30] sm:$0xff] }
 0xd12   : > { %v2795_v39 = vadd.f32 %v12899_v62, %v12897_v5  ;;  %10240 = vpow2.f32 %v2745_v44  ;;  %v2733_v28 = vmul.f32 1.442695, %v2694_v38 }
 0xd13   : > { %10242 = vpow2.f32 %v2739_v48  ;;  %v663_v48 = vld [vmem:[%s16744_s5 + $0x18] sm:$0xff] }
 0xd14   : > { %v12903_v23 = vpop.eup %10230  ;;  %2796 = vadd.xlane.f32.xlu0 %v2795_v39  ;;  %10244 = vpow2.f32 %v2741_v21  ;;  %v2725_v39 = vmul.f32 1.442695, %v2690_v40  ;;  %v667_v21 = vld [vmem:[%s16744_s5 + $0x38] sm:$0xff] }
 0xd15   : > { %v12905_v54 = vpop.eup %10232  ;;  %10246 = vpow2.f32 %v2731_v51 }
 0xd16   : > { %v2789_v6 = vadd.f32 %v12905_v54, %v12903_v23  ;;  %10248 = vpow2.f32 %v2733_v28 }
 0xd17   : > { %10250 = vpow2.f32 %v2723_v17 }
 0xd18   : > { %2790 = vadd.xlane.f32.xlu0 %v2789_v6  ;;  %10252 = vpow2.f32 %v2725_v39  ;;  %v16805_v39 = vrot.slane %v12361_v49, 6 }
 0xd1c   : > { %v12909_v53 = vpop.eup %10234 }
 0xd1d   : > { %v12911_v0 = vpop.eup %10236 }
 0xd1e   : > { %v2783_v41 = vadd.f32 %v12911_v0, %v12909_v53  ;;  %v12937_v30 = vpop.eup %10238 }
 0xd1f   : > { %v12939_v1 = vpop.eup %10240 }
 0xd20   : > { %2784 = vadd.xlane.f32.xlu0 %v2783_v41  ;;  %v12941_v6 = vpop.eup %10242  ;;  %v2801_v4 = vadd.f32 %v12939_v1, %v12937_v30 }
 0xd21   : > { %2412 = vrot.lane.b32.xlu1 %v12918_v14, %s11524_s13  ;;  %v12945_v41 = vpop.eup %10244 }
 0xd22   : > { %v12947_v63 = vpop.eup %10246  ;;  %v2798_v19 = vadd.f32 %v12945_v41, %v12941_v6 }
 0xd23   : > { %v12951_v13 = vpop.eup %10248 }
 0xd24   : > { %v12953_v35 = vpop.eup %10250  ;;  %v2792_v33 = vadd.f32 %v12951_v13, %v12947_v63 }
 0xd25   : > { %v12957_v26 = vpop.eup %10252 }
 0xd26   : > { %v2786_v44 = vadd.f32 %v12957_v26, %v12953_v35 }
 0xd36   : > { %684 = vperm.xlu0 %9882, %v662_v11  }
 0xd45   : > { %2802 = vadd.xlane.f32.xlu1 %v2801_v4 }
 0xd49   : > { %2799 = vadd.xlane.f32.xlu1 %v2798_v19 }
 0xd4d   : > { %2793 = vadd.xlane.f32.xlu1 %v2792_v33 }
 0xd51   : > { %2787 = vadd.xlane.f32.xlu1 %v2786_v44 }
 0xd62   : > { %689 = vperm.xlu1 %9883, %v663_v48  }
 0xd66   : > { %704 = vperm.xlu1 %9883, %v666_v9  }
 0xd6a   : > { %709 = vperm.xlu1 %9883, %v667_v21  }
 0xd7d   : > { %v2809_v48 = vpop.xlane.xlu0 %2808 }
 0xd81   : > { %v2812_v38 = vpop.xlane.xlu1 %2811 }
 0xd85   : > { %v2815_v55 = vpop.xlane.xlu1 %2814 }
 0xd89   : > { %v2818_v11 = vpop.xlane.xlu1 %2817 }
 0xd8d   : > { %v2821_v51 = vpop.xlane.xlu1 %2820 }
 0xd91   : > { %v2824_v25 = vpop.xlane.xlu1 %2823 }
 0xd92   : > { %10254 = vrcp.f32 %v2824_v25 }
 0xd95   : > { %v2827_v28 = vpop.xlane.xlu1 %2826 }
 0xd96   : > { %10256 = vrcp.f32 %v2827_v28 }
 0xd97   : > { %10258 = vrcp.f32 %v2821_v51 }
 0xd99   : > { %v2830_v40 = vpop.xlane.xlu1 %2829 }
 0xd9a   : > { %10260 = vrcp.f32 %v2830_v40 }
 0xd9b   : > { %10262 = vrcp.f32 %v2818_v11 }
 0xd9c   : > { %10264 = vrcp.f32 %v2815_v55 }
 0xd9d   : > { %v2413_v17 = vpop.permute.xlu1 %2412  ;;  %10266 = vrcp.f32 %v2812_v38 }
 0xd9e   : > { %9736 = vmatmul.mubr.msk.bf16.vlgmr.msra.gmra.mxu1 %vm901_vm2, %v2413_v17  ;;  %10268 = vrcp.f32 %v2809_v48 }
 0xd9f   : > { %2931 = vmatprep.mubr.bf16.mxu1 %v16805_v39  ;;  %v10255_v4 = vpop.eup %10254 }
 0xda0   : > { %v2874_v9 = vmul.f32 %v10255_v4, %v12879_v27  ;;  %v2873_v27 = vmul.f32 %v10255_v4, %v12877_v58 }
 0xda3   : > { %v10257_v19 = vpop.eup %10256 }
 0xda4   : > { %v10259_v33 = vpop.eup %10258  ;;  %v2876_v21 = vmul.f32 %v10257_v19, %v12885_v12  ;;  %v2875_v25 = vmul.f32 %v10257_v19, %v12883_v36 }
 0xda5   : > { %v2872_v55 = vmul.f32 %v10259_v33, %v12871_v50 }
 0xda7   : > { %v10261_v44 = vpop.eup %10260  ;;  %v2892_v17 = vpack.c.bf16 %v2874_v9, %v2872_v55 }
 0xda8   : > { %v2878_v51 = vmul.f32 %v10261_v44, %v12893_v32  ;;  %v2877_v28 = vmul.f32 %v10261_v44, %v12891_v16  ;;  %v10263_v39 = vpop.eup %10262  ;;  %v2871_v32 = vmul.f32 %v10259_v33, %v12869_v61 }
 0xda9   : > { %v10265_v38 = vpop.eup %10264  ;;  %v2870_v12 = vmul.f32 %v10263_v39, %v12863_v8  ;;  %v2869_v48 = vmul.f32 %v10263_v39, %v12861_v34 }
 0xdaa   : > { %v2894_v40 = vpack.c.bf16 %v2878_v51, %v2876_v21  ;;  %v2893_v11 = vpack.c.bf16 %v2877_v28, %v2875_v25  ;;  %v2868_v36 = vmul.f32 %v10265_v38, %v12855_v52  ;;  %v2891_v16 = vpack.c.bf16 %v2873_v27, %v2871_v32  ;;  %v10267_v19 = vpop.eup %10266  ;;  %v2806_v51 = vpop.xlane.xlu0 %2805  ;;  %v16971_v32 = vld [vmem:[#allocation10_spill] sm:$0xff] }
 0xdab   : > { %v10269_v50 = vpop.eup %10268  ;;  %v2866_v9 = vmul.f32 %v10267_v19, %v12845_v22  ;;  %v2867_v21 = vmul.f32 %v10265_v38, %v12853_v43  ;;  %v2865_v52 = vmul.f32 %v10267_v19, %v12843_v15  ;;  %10270 = vrcp.f32 %v2806_v51 }
 0xdac   : > { %2899 = vmatprep.subr.bf16.mxu1 %v2894_v40  ;;  %v2890_v44 = vpack.c.bf16 %v2870_v12, %v2868_v36  ;;  %v2864_v58 = vmul.f32 %v10269_v50, %v12833_v10  ;;  %v2863_v61 = vmul.f32 %v10269_v50, %v12831_v60 }
 0xdad   : > { %2900 = vmatpush1.bf16.xpose.msra.mxu1 %v2893_v11  ;;  %v2889_v4 = vpack.c.bf16 %v2869_v48, %v2867_v21 }
 0xdae   : > { %2901 = vmatprep.subr.bf16.mxu1 %v2892_v17  ;;  %v2888_v8 = vpack.c.bf16 %v2866_v9, %v2864_v58  ;;  %v2887_v33 = vpack.c.bf16 %v2865_v52, %v2863_v61  ;;  %v2797_v25 = vpop.xlane.xlu0 %2796 }
 0xdb2   : > { %v2791_v43 = vpop.xlane.xlu0 %2790 }
 0xdb5   : > { %2902 = vmatpush1.bf16.xpose.msra.mxu1 %v2891_v16  ;;  %v16972_v16 = vld [vmem:[#allocation12_spill] sm:$0xff] }
 0xdb6   : > { %2903 = vmatprep.subr.bf16.mxu1 %v2890_v44  ;;  %v2785_v39 = vpop.xlane.xlu0 %2784 }
 0xdb8   : > { %v10271_v28 = vpop.eup %10270 }
 0xdb9   : > { %v2862_v60 = vmul.f32 %v10271_v28, %v12839_v47  ;;  %v2861_v38 = vmul.f32 %v10271_v28, %v12835_v56 }
 0xdba   : > { %v12990_v11 = vpop.permute.xlu0 %684 }
 0xdbb   : > { %16969 = vst [vmem:[#allocation38_spill] sm:$0xff] %v12990_v11  ;;  %v825_v36 = vadd.f32 %v16971_v32, %v12990_v11 }
 0xdbd   : > { %2904 = vmatpush1.bf16.xpose.msra.mxu1 %v2889_v4 }
 0xdbe   : > { %2905 = vmatprep.subr.bf16.mxu1 %v2888_v8 }
 0xdc5   : > { %2906 = vmatpush1.bf16.xpose.msra.mxu1 %v2887_v33 }
 0xdce   : > { %v2803_v34 = vpop.xlane.xlu1 %2802 }
 0xdcf   : > { %10272 = vrcp.f32 %v2803_v34 }
 0xdd0   : > { %10274 = vrcp.f32 %v2797_v25 }
 0xdd2   : > { %v2800_v22 = vpop.xlane.xlu1 %2799 }
 0xdd3   : > { %10276 = vrcp.f32 %v2800_v22 }
 0xdd4   : > { %10278 = vrcp.f32 %v2791_v43 }
 0xdd6   : > { %v2794_v10 = vpop.xlane.xlu1 %2793 }
 0xdd7   : > { %10280 = vrcp.f32 %v2794_v10 }
 0xdda   : > { %v2788_v40 = vpop.xlane.xlu1 %2787 }
 0xddb   : > { %10282 = vrcp.f32 %v2788_v40 }
 0xddc   : > { %v10273_v15 = vpop.eup %10272  ;;  %10284 = vrcp.f32 %v2785_v39 }
 0xddd   : > { %v2860_v55 = vmul.f32 %v10273_v15, %v12939_v1  ;;  %v2859_v17 = vmul.f32 %v10273_v15, %v12937_v30  ;;  %v10275_v27 = vpop.eup %10274  ;;  %v1940_v15 = vadd.f32 %v12728_v7, %v12467_v3 }
 0xdde   : > { %v12996_v12 = vpop.permute.xlu1 %689  ;;  %v2856_v30 = vmul.f32 %v10275_v27, %v12899_v62  ;;  %v2855_v8 = vmul.f32 %v10275_v27, %v12897_v5  ;;  %v1943_v27 = vadd.f32 %v12732_v31, %v12471_v57 }
 0xddf   : > { %16970 = vst [vmem:[#allocation9_spill] sm:$0xff] %v12996_v12  ;;  %v829_v19 = vadd.f32 %v16972_v16, %v12996_v12  ;;  %v2886_v44 = vpack.c.bf16 %v2862_v60, %v2860_v55  ;;  %v2885_v50 = vpack.c.bf16 %v2861_v38, %v2859_v17  ;;  %v1932_v55 = vadd.f32 %v12730_v29, %v12469_v45 }
 0xde0   : > { %v10277_v47 = vpop.eup %10276 }
 0xde1   : > { %v13002_v48 = vpack.c.bf16 %v829_v19, %v825_v36  ;;  %2907 = vmatprep.subr.bf16.mxu1 %v2886_v44  ;;  %v2858_v56 = vmul.f32 %v10277_v47, %v12945_v41  ;;  %v10279_v1 = vpop.eup %10278  ;;  %v2857_v58 = vmul.f32 %v10277_v47, %v12941_v6 }
 0xde2   : > { %2908 = vmatpush1.bf16.xpose.msra.mxu1 %v2885_v50  ;;  %v2852_v52 = vmul.f32 %v10279_v1, %v12905_v54  ;;  %v705_v51 = vpop.permute.xlu1 %704  ;;  %v2851_v6 = vmul.f32 %v10279_v1, %v12903_v23 }
 0xde3   : > { %3006 = vxpose.xlu0.c.b16.start.end [1/1] (short) %v13002_v48, 128  ;;  %v2884_v9 = vpack.c.bf16 %v2858_v56, %v2856_v30  ;;  %v2883_v61 = vpack.c.bf16 %v2857_v58, %v2855_v8  ;;  %v847_v28 = vadd.f32 %v12325_v46, %v705_v51  ;;  %v845_v23 = vadd.f32 %v12318_v24, %v705_v51 }
 0xde4   : > { %v10281_v21 = vpop.eup %10280 }
 0xde5   : > { %2909 = vmatprep.subr.bf16.mxu1 %v2884_v9  ;;  %v2854_v4 = vmul.f32 %v10281_v21, %v12951_v13  ;;  %v2853_v25 = vmul.f32 %v10281_v21, %v12947_v63 }
 0xde6   : > { %v710_v5 = vpop.permute.xlu1 %709 }
 0xde7   : > { %v2882_v33 = vpack.c.bf16 %v2854_v4, %v2852_v52  ;;  %v2881_v13 = vpack.c.bf16 %v2853_v25, %v2851_v6  ;;  %v851_v10 = vadd.f32 %v12337_v20, %v710_v5 }
 0xde8   : > { %v10283_v62 = vpop.eup %10282 }
 0xde9   : > { %v10285_v41 = vpop.eup %10284  ;;  %v2850_v34 = vmul.f32 %v10283_v62, %v12957_v26  ;;  %v2849_v54 = vmul.f32 %v10283_v62, %v12953_v35  ;;  %v849_v26 = vadd.f32 %v12332_v2, %v710_v5  ;;  %v13020_v40 = vpack.c.bf16 %v851_v10, %v847_v28 }
 0xdea   : > { %2910 = vmatpush1.bf16.xpose.msra.mxu1 %v2883_v61  ;;  %v2848_v22 = vmul.f32 %v10285_v41, %v12911_v0  ;;  %v2847_v39 = vmul.f32 %v10285_v41, %v12909_v53  ;;  %v16806_v35 = vrot.slane %v12382_v59, 6 }
 0xdeb   : > { %2911 = vmatprep.subr.bf16.mxu1 %v2882_v33  ;;  %16973 = vst [vmem:[#allocation39_spill] sm:$0xff] %v13020_v40  ;;  %v13025_v0 = vpack.c.bf16 %v849_v26, %v845_v23 }
 0xdec   : > { %v2880_v43 = vpack.c.bf16 %v2850_v34, %v2848_v22  ;;  %v2879_v63 = vpack.c.bf16 %v2849_v54, %v2847_v39 }
 0xded   : > { %v13032_v46 = vsel %vm926_vm1, %v13025_v0, 0 }
 0xdee   : > { %16974 = vst [vmem:[#allocation36_spill] sm:$0xff] %v13032_v46 }
 0xdf2   : > { %2912 = vmatpush1.bf16.xpose.msra.mxu1 %v2881_v13 }
 0xdf3   : > { %2913 = vmatprep.subr.bf16.mxu1 %v2880_v43 }
 0xdfa   : > { %2914 = vmatpush1.bf16.xpose.msra.mxu1 %v2879_v63 }
 0xdfb   : > { %9488 = vmatprep.subr.msk.bf16.mxu1 %vm926_vm1, %v13020_v40 }
 0xe01   : > { %2932 = vmatmul.mubr.bf16.vlgmr.msra.gmra.mxu1 %v16806_v35 }
 0xe02   : > { %3067 = vmatpush1.bf16.msra.mxu1 %v13032_v46  ;;  %3084 = vmatprep.mubr.bf16.mxu1 %v16965_v42 }
 0xe45   : > { %v3014_v2 = vpop.trf.xlu0 }
 0xe46   : > { %9489 = vmatmul.mubr.msk.bf16.vlgmr.msra.gmra.mxu1 %vm901_vm2, %v3014_v2 }
 0xe47   : > { %3094 = vmatprep.mubr.bf16.mxu1 %v16965_v42 }
 0xe49   : > { %v3015_v24 = vpop.trf.xlu0 }
 0xe4d   : > { %v3016_v20 = vpop.trf.xlu0 }
 0xe4e   : > { %9490 = vmatmul.mubr.msk.bf16.gmra.mxu1 %vm901_vm2, %v3015_v24 }
 0xe4f   : > { %3104 = vmatprep.mubr.bf16.mxu1 %v16965_v42 }
 0xe51   : > { %v3017_v53 = vpop.trf.xlu0 }
 0xe55   : > { %v3018_v3 = vpop.trf.xlu0 }
 0xe56   : > { %9491 = vmatmul.mubr.msk.bf16.gmra.mxu1 %vm901_vm2, %v3016_v20 }
 0xe57   : > { %3114 = vmatprep.mubr.bf16.mxu1 %v16965_v42 }
 0xe59   : > { %v3019_v7 = vpop.trf.xlu0 }
 0xe5d   : > { %v3020_v45 = vpop.trf.xlu0 }
 0xe5e   : > { %v9737_v60 = vpop.f32.mrf.mxu1  ;;  %9492 = vmatmul.mubr.msk.bf16.gmra.mxu1 %vm901_vm2, %v3017_v53 }
 0xe5f   : > { %v13047_v17 = vadd.f32 %v9737_v60, %v1940_v15  ;;  %3124 = vmatprep.mubr.bf16.mxu1 %v16965_v42 }
 0xe60   : > { %v2457_v38 = vpop.f32.mrf.mxu1 }
 0xe61   : > { %v13052_v32 = vadd.f32 %v2457_v38, %v1932_v55  ;;  %v3021_v57 = vpop.trf.xlu0 }
 0xe62   : > { %v9738_v36 = vpop.f32.mrf.mxu1 }
 0xe63   : > { %v13054_v16 = vadd.f32 %v9738_v36, %v1943_v27 }
 0xe64   : > { %v13063_v29 = vpop.f32.mrf.mxu1 }
 0xe65   : > { %16975 = vst [vmem:[#allocation37_spill] sm:$0xff] %v13063_v29 }
 0xe66   : > { %9493 = vmatmul.mubr.msk.bf16.gmra.mxu1 %vm901_vm2, %v3018_v3 }
 0xe67   : > { %3134 = vmatprep.mubr.bf16.mxu1 %v16965_v42 }
 0xe6e   : > { %9494 = vmatmul.mubr.msk.bf16.gmra.mxu1 %vm901_vm2, %v3019_v7 }
 0xe6f   : > { %3144 = vmatprep.mubr.bf16.mxu1 %v16965_v42 }
 0xe76   : > { %9495 = vmatmul.mubr.msk.bf16.gmra.mxu1 %vm901_vm2, %v3020_v45 }
 0xe77   : > { %3154 = vmatprep.mubr.bf16.mxu1 %v16965_v42 }
 0xe7e   : > { %9496 = vmatmul.mubr.msk.bf16.gmra.mxu1 %vm901_vm2, %v3021_v57 }
 0xec1   : > { %v2933_v31 = vpop.f32.mrf.mxu1 }
 0xec2   : > { %v2939_v19 = vpack.c.bf16 %v2933_v31, %v2933_v31 }
 0xec3   : > { %v2935_v44 = vpop.f32.mrf.mxu1 }
 0xec4   : > { %v2951_v50 = vsel %vm926_vm1, %v2939_v19, 0  ;;  %9820 = vmatprep.subr.msk.bf16.mxu0 %vm926_vm1, %v2939_v19 }
 0xec5   : > { %v2936_v47 = vpop.f32.mrf.mxu1  ;;  %9740 = vmatpush3.bf16.msra.mxu0 %v2951_v50 }
 0xec7   : > { %v2937_v30 = vpop.f32.mrf.mxu1 }
 0xf06   : > { %v13067_v56 = vpop.f32.mrf.mxu1 }
 0xf08   : > { %v13069_v1 = vpop.f32.mrf.mxu1 }
 0xf09   : > { %v3165_v45 = vmax.f32 %v13067_v56, %v13069_v1 }
 0xf0a   : > { %v13071_v9 = vpop.f32.mrf.mxu1 }
 0xf0c   : > { %v13073_v21 = vpop.f32.mrf.mxu1 }
 0xf0e   : > { %v13075_v58 = vpop.f32.mrf.mxu1 }
 0xf10   : > { %v13077_v4 = vpop.f32.mrf.mxu1 }
 0xf11   : > { %v3171_v3 = vmax.f32 %v13075_v58, %v13077_v4 }
 0xf12   : > { %v13079_v8 = vpop.f32.mrf.mxu1 }
 0xf14   : > { %v13081_v52 = vpop.f32.mrf.mxu1 }
 0xf15   : > { %v3174_v30 = vmax.f32 %v13079_v8, %v13081_v52 }
 0xf16   : > { %v13083_v61 = vpop.f32.mrf.mxu1 }
 0xf18   : > { %v13085_v33 = vpop.f32.mrf.mxu1 }
 0xf19   : > { %v3177_v27 = vmax.f32 %v13083_v61, %v13085_v33 }
 0xf1a   : > { %v13087_v62 = vpop.f32.mrf.mxu1 }
 0xf1c   : > { %v13089_v41 = vpop.f32.mrf.mxu1 }
 0xf1d   : > { %v3180_v47 = vmax.f32 %v13087_v62, %v13089_v41 }
 0xf1e   : > { %v13091_v51 = vpop.f32.mrf.mxu1 }
 0xf20   : > { %v13093_v25 = vpop.f32.mrf.mxu1 }
 0xf21   : > { %v3183_v44 = vmax.f32 %v13091_v51, %v13093_v25 }
 0xf22   : > { %v13095_v34 = vpop.f32.mrf.mxu1 }
 0xf24   : > { %v13097_v6 = vpop.f32.mrf.mxu1 }
 0xf25   : > { %v3186_v50 = vmax.f32 %v13095_v34, %v13097_v6 }
 0xf26   : > { %v13099_v22 = vpop.f32.mrf.mxu1 }
 0xf28   : > { %v13101_v13 = vpop.f32.mrf.mxu1 }
 0xf29   : > { %v3189_v31 = vmax.f32 %v13099_v22, %v13101_v13 }
 0xf2a   : > { %v13103_v43 = vpop.f32.mrf.mxu1 }
 0xf2c   : > { %v13105_v5 = vpop.f32.mrf.mxu1 }
 0xf2d   : > { %v3192_v19 = vmax.f32 %v13103_v43, %v13105_v5 }
 0xf2e   : > { %v3136_v54 = vpop.f32.mrf.mxu1 }
 0xf30   : > { %v13107_v10 = vpop.f32.mrf.mxu1 }
 0xf31   : > { %v3195_v7 = vmax.f32 %v3136_v54, %v13107_v10 }
 0xf32   : > { %v13109_v39 = vpop.f32.mrf.mxu1 }
 0xf34   : > { %v13111_v28 = vpop.f32.mrf.mxu1 }
 0xf35   : > { %v3198_v57 = vmax.f32 %v13109_v39, %v13111_v28 }
 0xf36   : > { %v3146_v63 = vpop.f32.mrf.mxu1 }
 0xf38   : > { %v3148_v26 = vpop.f32.mrf.mxu1 }
 0xf39   : > { %v3201_v55 = vmax.f32 %v3146_v63, %v3148_v26 }
 0xf3a   : > { %v13113_v23 = vpop.f32.mrf.mxu1 }
 0xf3c   : > { %v13115_v2 = vpop.f32.mrf.mxu1 }
 0xf3d   : > { %v3204_v36 = vmax.f32 %v13113_v23, %v13115_v2 }
 0xf3e   : > { %v13117_v24 = vpop.f32.mrf.mxu1 }
 0xf40   : > { %v13119_v20 = vpop.f32.mrf.mxu1 }
 0xf41   : > { %v3207_v53 = vmax.f32 %v13117_v24, %v13119_v20 }
 0xf42   : > { %v13123_v15 = vpop.f32.mrf.mxu1 }
 0xf43   : > { %3208 = vmax.xlane.f32.xlu1 %v3207_v53  ;;  %v3168_v53 = vmax.f32 %v13071_v9, %v13073_v21 }
 0xf44   : > { %v13125_v60 = vpop.f32.mrf.mxu1 }
 0xf45   : > { %v3210_v38 = vmax.f32 %v13123_v15, %v13125_v60 }
 0xf47   : > { %3202 = vmax.xlane.f32.xlu1 %v3201_v55  ;;  %3211 = vmax.xlane.f32.xlu0 %v3210_v38 }
 0xf4b   : > { %3205 = vmax.xlane.f32.xlu1 %v3204_v36  ;;  %3178 = vmax.xlane.f32.xlu0 %v3177_v27 }
 0xf4f   : > { %3196 = vmax.xlane.f32.xlu1 %v3195_v7  ;;  %3172 = vmax.xlane.f32.xlu0 %v3171_v3 }
 0xf53   : > { %3199 = vmax.xlane.f32.xlu1 %v3198_v57  ;;  %3166 = vmax.xlane.f32.xlu0 %v3165_v45 }
 0xf57   : > { %3190 = vmax.xlane.f32.xlu1 %v3189_v31 }
 0xf5b   : > { %3193 = vmax.xlane.f32.xlu1 %v3192_v19 }
 0xf5f   : > { %3184 = vmax.xlane.f32.xlu1 %v3183_v44 }
 0xf63   : > { %3187 = vmax.xlane.f32.xlu1 %v3186_v50 }
 0xf67   : > { %3181 = vmax.xlane.f32.xlu1 %v3180_v47 }
 0xf6b   : > { %3175 = vmax.xlane.f32.xlu1 %v3174_v30 }
 0xf6f   : > { %3169 = vmax.xlane.f32.xlu1 %v3168_v53 }
 0xfcc   : > { %v3209_v55 = vpop.xlane.xlu1 %3208 }
 0xfd0   : > { %v3203_v38 = vpop.xlane.xlu1 %3202 }
 0xfd1   : > { %v3237_v3 = vsub.f32 %v3146_v63, %v3203_v38  ;;  %v3238_v7 = vsub.f32 %v3148_v26, %v3203_v38 }
 0xfd3   : > { %v3293_v57 = vmul.f32 1.442695, %v3237_v3  ;;  %v3295_v19 = vmul.f32 1.442695, %v3238_v7 }
 0xfd4   : > { %v3206_v27 = vpop.xlane.xlu1 %3205 }
 0xfd5   : > { %10286 = vpow2.f32 %v3293_v57  ;;  %v3212_v57 = vpop.xlane.xlu0 %3211 }
 0xfd6   : > { %10288 = vpow2.f32 %v3295_v19 }
 0xfd8   : > { %v3197_v36 = vpop.xlane.xlu1 %3196 }
 0xfd9   : > { %v3233_v31 = vsub.f32 %v3136_v54, %v3197_v36  ;;  %v3234_v44 = vsub.f32 %v13107_v10, %v3197_v36  ;;  %v3241_v54 = vsub.f32 %v13117_v24, %v3209_v55  ;;  %v3239_v36 = vsub.f32 %v13113_v23, %v3206_v27 }
 0xfda   : > { %v3244_v23 = vsub.f32 %v13125_v60, %v3212_v57 }
 0xfdb   : > { %v3285_v35 = vmul.f32 1.442695, %v3233_v31  ;;  %v3287_v63 = vmul.f32 1.442695, %v3234_v44  ;;  %v3301_v24 = vmul.f32 1.442695, %v3241_v54 }
 0xfdc   : > { %v3200_v45 = vpop.xlane.xlu1 %3199 }
 0xfdd   : > { %v3235_v53 = vsub.f32 %v13109_v39, %v3200_v45  ;;  %v3236_v26 = vsub.f32 %v13111_v28, %v3200_v45  ;;  %v3240_v28 = vsub.f32 %v13115_v2, %v3206_v27  ;;  %v3307_v2 = vmul.f32 1.442695, %v3244_v23 }
 0xfdf   : > { %v3289_v39 = vmul.f32 1.442695, %v3235_v53  ;;  %v3291_v45 = vmul.f32 1.442695, %v3236_v26 }
 0xfe0   : > { %v3191_v50 = vpop.xlane.xlu1 %3190 }
 0xfe1   : > { %v3229_v47 = vsub.f32 %v13099_v22, %v3191_v50  ;;  %v3230_v30 = vsub.f32 %v13101_v13, %v3191_v50  ;;  %v3242_v13 = vsub.f32 %v13119_v20, %v3209_v55 }
 0xfe3   : > { %v3277_v29 = vmul.f32 1.442695, %v3229_v47  ;;  %v3279_v46 = vmul.f32 1.442695, %v3230_v30 }
 0xfe4   : > { %v3194_v38 = vpop.xlane.xlu1 %3193 }
 0xfe5   : > { %10290 = vpow2.f32 %v3277_v29  ;;  %v3231_v10 = vsub.f32 %v13103_v43, %v3194_v38  ;;  %v3232_v22 = vsub.f32 %v13105_v5, %v3194_v38  ;;  %v3303_v29 = vmul.f32 1.442695, %v3242_v13 }
 0xfe6   : > { %10292 = vpow2.f32 %v3279_v46  ;;  %v3243_v43 = vsub.f32 %v13123_v15, %v3212_v57  ;;  %v3297_v5 = vmul.f32 1.442695, %v3239_v36  ;;  %v3299_v46 = vmul.f32 1.442695, %v3240_v28 }
 0xfe7   : > { %10294 = vpow2.f32 %v3285_v35  ;;  %v3281_v3 = vmul.f32 1.442695, %v3231_v10  ;;  %v3283_v7 = vmul.f32 1.442695, %v3232_v22  ;;  %v13167_v35 = vpop.eup %10286 }
 0xfe8   : > { %10296 = vpow2.f32 %v3287_v63  ;;  %v3305_v20 = vmul.f32 1.442695, %v3243_v43  ;;  %v13169_v55 = vpop.eup %10288  ;;  %v3185_v28 = vpop.xlane.xlu1 %3184 }
 0xfe9   : > { %10298 = vpow2.f32 %v3281_v3  ;;  %v3345_v22 = vadd.f32 %v13169_v55, %v13167_v35 }
 0xfea   : > { %10300 = vpow2.f32 %v3283_v7 }
 0xfeb   : > { %10302 = vpow2.f32 %v3289_v39 }
 0xfec   : > { %10304 = vpow2.f32 %v3291_v45  ;;  %v3179_v45 = vpop.xlane.xlu0 %3178 }
 0xfed   : > { %10306 = vpow2.f32 %v3301_v24  ;;  %v3188_v24 = vpop.xlane.xlu1 %3187 }
 0xfee   : > { %10308 = vpow2.f32 %v3303_v29  ;;  %v13220_v29 = vld [vmem:[%s16745_s6] sm:$0xff]   ;;  %v3227_v43 = vsub.f32 %v13095_v34, %v3188_v24  ;;  %v3228_v23 = vsub.f32 %v13097_v6, %v3188_v24 }
 0xfef   : > { %10310 = vpow2.f32 %v3297_v5 }
 0xff0   : > { %10312 = vpow2.f32 %v3299_v46  ;;  %v3173_v5 = vpop.xlane.xlu0 %3172 }
 0xff1   : > { %10314 = vpow2.f32 %v3305_v20  ;;  %v3182_v46 = vpop.xlane.xlu1 %3181  ;;  %v3221_v20 = vsub.f32 %v13083_v61, %v3179_v45  ;;  %v3218_v34 = vsub.f32 %v13077_v4, %v3173_v5 }
 0xff2   : > { %v13171_v27 = vpop.eup %10290  ;;  %10316 = vpow2.f32 %v3307_v2  ;;  %v3222_v2 = vsub.f32 %v13085_v33, %v3179_v45  ;;  %v3223_v61 = vsub.f32 %v13087_v62, %v3182_v46  ;;  %v3224_v33 = vsub.f32 %v13089_v41, %v3182_v46 }
 0xff3   : > { %v13173_v31 = vpop.eup %10292 }
 0xff4   : > { %v13175_v15 = vpop.eup %10294  ;;  %v3333_v60 = vadd.f32 %v13173_v31, %v13171_v27  ;;  %v3265_v4 = vmul.f32 1.442695, %v3223_v61 }
 0xff5   : > { %v13179_v19 = vpop.eup %10296 }
 0xff6   : > { %v13181_v44 = vpop.eup %10298  ;;  %3334 = vadd.xlane.f32.xlu0 %v3333_v60  ;;  %v3339_v53 = vadd.f32 %v13179_v19, %v13175_v15  ;;  %v3273_v60 = vmul.f32 1.442695, %v3227_v43  ;;  %v3267_v43 = vmul.f32 1.442695, %v3224_v33 }
 0xff7   : > { %v13183_v50 = vpop.eup %10300 }
 0xff8   : > { %v13185_v47 = vpop.eup %10302  ;;  %v3336_v30 = vadd.f32 %v13183_v50, %v13181_v44  ;;  %10318 = vpow2.f32 %v3273_v60 }
 0xff9   : > { %v13191_v63 = vpop.eup %10304 }
 0xffa   : > { %v13193_v26 = vpop.eup %10306  ;;  %3337 = vadd.xlane.f32.xlu1 %v3336_v30  ;;  %3340 = vadd.xlane.f32.xlu0 %v3339_v53  ;;  %v3342_v10 = vadd.f32 %v13191_v63, %v13185_v47  ;;  %v3226_v30 = vsub.f32 %v13093_v25, %v3185_v28  ;;  %v3275_v53 = vmul.f32 1.442695, %v3228_v23 }
 0xffb   : > { %v13195_v38 = vpop.eup %10308 }
 0xffc   : > { %v13197_v54 = vpop.eup %10310  ;;  %v3351_v3 = vadd.f32 %v13195_v38, %v13193_v26  ;;  %v3271_v24 = vmul.f32 1.442695, %v3226_v30  ;;  %10320 = vpow2.f32 %v3275_v53 }
 0xffd   : > { %v13203_v13 = vpop.eup %10312 }
 0xffe   : > { %3343 = vadd.xlane.f32.xlu1 %v3342_v10  ;;  %3346 = vadd.xlane.f32.xlu0 %v3345_v22  ;;  %v13205_v36 = vpop.eup %10314  ;;  %v3348_v39 = vadd.f32 %v13203_v13, %v13197_v54  ;;  %v3261_v10 = vmul.f32 1.442695, %v3221_v20  ;;  %v3217_v22 = vsub.f32 %v13075_v58, %v3173_v5 }
 0xfff   : > { %v13211_v7 = vpop.eup %10316 }
0x1000   : > { %v3354_v57 = vadd.f32 %v13211_v7, %v13205_v36  ;;  %10322 = vpow2.f32 %v3261_v10 }
0x1002   : > { %3349 = vadd.xlane.f32.xlu1 %v3348_v39  ;;  %3352 = vadd.xlane.f32.xlu0 %v3351_v3  ;;  %v3263_v39 = vmul.f32 1.442695, %v3222_v2  ;;  %v3167_v3 = vpop.xlane.xlu0 %3166 }
0x1003   : > { %v3213_v25 = vsub.f32 %v13067_v56, %v3167_v3  ;;  %v3214_v58 = vsub.f32 %v13069_v1, %v3167_v3 }
0x1004   : > { %10324 = vpow2.f32 %v3263_v39 }
0x1005   : > { %v3245_v23 = vmul.f32 1.442695, %v3213_v25  ;;  %v3247_v41 = vmul.f32 1.442695, %v3214_v58  ;;  %v13240_v2 = vpop.eup %10318 }
0x1006   : > { %3355 = vadd.xlane.f32.xlu1 %v3354_v57  ;;  %v3176_v57 = vpop.xlane.xlu1 %3175 }
0x1007   : > { %v3219_v45 = vsub.f32 %v13079_v8, %v3176_v57  ;;  %v3220_v62 = vsub.f32 %v13081_v52, %v3176_v57 }
0x1009   : > { %v3257_v46 = vmul.f32 1.442695, %v3219_v45  ;;  %v3259_v20 = vmul.f32 1.442695, %v3220_v62  ;;  %v671_v62 = vld [vmem:[%s16744_s5 + $0x58] sm:$0xff] }
0x100a   : > { %v3170_v5 = vpop.xlane.xlu1 %3169 }
0x100b   : > { %v3215_v56 = vsub.f32 %v13071_v9, %v3170_v5  ;;  %v3216_v1 = vsub.f32 %v13073_v21, %v3170_v5  ;;  %v670_v5 = vld [vmem:[%s16744_s5 + $0x50] sm:$0xff] }
0x100d   : > { %v3249_v8 = vmul.f32 1.442695, %v3215_v56  ;;  %v3251_v52 = vmul.f32 1.442695, %v3216_v1 }
0x1017   : > { %2942 = vrot.lane.b32.xlu1 %v12918_v14, %s11525_s17  ;;  %v3225_v14 = vsub.f32 %v13091_v51, %v3185_v28  ;;  %v3253_v51 = vmul.f32 1.442695, %v3217_v22  ;;  %v3255_v28 = vmul.f32 1.442695, %v3218_v34 }
0x1018   : > { %2940 = vrot.lane.b32.xlu0 %v13220_v29, %s11525_s17 }
0x1019   : > { %v3269_v6 = vmul.f32 1.442695, %v3225_v14  ;;  %v13242_v14 = vpop.eup %10320 }
0x101a   : > { %v13244_v60 = vpop.eup %10322  ;;  %v3330_v21 = vadd.f32 %v13242_v14, %v13240_v2 }
0x101b   : > { %10326 = vpow2.f32 %v3269_v6  ;;  %v13246_v30 = vpop.eup %10324 }
0x101c   : > { %10328 = vpow2.f32 %v3271_v24  ;;  %v3321_v3 = vadd.f32 %v13246_v30, %v13244_v60 }
0x101d   : > { %10330 = vpow2.f32 %v3253_v51 }
0x101e   : > { %10332 = vpow2.f32 %v3255_v28 }
0x101f   : > { %10334 = vpow2.f32 %v3265_v4 }
0x1020   : > { %10336 = vpow2.f32 %v3267_v43 }
0x1021   : > { %10338 = vpow2.f32 %v3245_v23  ;;  %v3529_v23 = vrot.slane %v13002_v48, 2 }
0x1022   : > { %10340 = vpow2.f32 %v3247_v41 }
0x1023   : > { %10342 = vpow2.f32 %v3257_v46 }
0x1024   : > { %10344 = vpow2.f32 %v3259_v20 }
0x1025   : > { %10346 = vpow2.f32 %v3249_v8 }
0x1026   : > { %10348 = vpow2.f32 %v3251_v52 }
0x1028   : > { %v13248_v9 = vpop.eup %10326 }
0x1029   : > { %v13252_v53 = vpop.eup %10328 }
0x102a   : > { %v13254_v10 = vpop.eup %10330  ;;  %v3327_v34 = vadd.f32 %v13252_v53, %v13248_v9 }
0x102b   : > { %v13256_v22 = vpop.eup %10332 }
0x102c   : > { %v13258_v39 = vpop.eup %10334  ;;  %v3315_v51 = vadd.f32 %v13256_v22, %v13254_v10 }
0x102d   : > { %v13264_v57 = vpop.eup %10336 }
0x102e   : > { %v13266_v6 = vpop.eup %10338  ;;  %v3324_v33 = vadd.f32 %v13264_v57, %v13258_v39 }
0x102f   : > { %v13268_v61 = vpop.eup %10340 }
0x1030   : > { %v13270_v24 = vpop.eup %10342  ;;  %v3309_v4 = vadd.f32 %v13268_v61, %v13266_v6 }
0x1031   : > { %v13276_v25 = vpop.eup %10344 }
0x1032   : > { %v13278_v28 = vpop.eup %10346  ;;  %v3318_v58 = vadd.f32 %v13276_v25, %v13270_v24 }
0x1033   : > { %v13284_v45 = vpop.eup %10348 }
0x1034   : > { %v3312_v43 = vadd.f32 %v13284_v45, %v13278_v28 }
0x1037   : > { %3331 = vadd.xlane.f32.xlu0 %v3330_v21 }
0x103b   : > { %3328 = vadd.xlane.f32.xlu1 %v3327_v34  ;;  %3322 = vadd.xlane.f32.xlu0 %v3321_v3 }
0x103f   : > { %3325 = vadd.xlane.f32.xlu1 %v3324_v33  ;;  %3316 = vadd.xlane.f32.xlu0 %v3315_v51 }
0x1043   : > { %3319 = vadd.xlane.f32.xlu1 %v3318_v58  ;;  %3310 = vadd.xlane.f32.xlu0 %v3309_v4 }
0x1047   : > { %3313 = vadd.xlane.f32.xlu1 %v3312_v43 }
0x1058   : > { %729 = vperm.xlu1 %9883, %v671_v62  }
0x1059   : > { %724 = vperm.xlu0 %9882, %v670_v5  }
0x107b   : > { %3531 = vxpose.xlu1.c.b16.start.end [1/1] (short) %v3529_v23, 128 }
0x107f   : > { %v3335_v41 = vpop.xlane.xlu0 %3334 }
0x1083   : > { %v3338_v46 = vpop.xlane.xlu1 %3337  ;;  %v3341_v56 = vpop.xlane.xlu0 %3340 }
0x1087   : > { %v3344_v20 = vpop.xlane.xlu1 %3343  ;;  %v3347_v1 = vpop.xlane.xlu0 %3346 }
0x108b   : > { %v3350_v8 = vpop.xlane.xlu1 %3349  ;;  %v3353_v52 = vpop.xlane.xlu0 %3352 }
0x108c   : > { %10350 = vrcp.f32 %v3350_v8 }
0x108d   : > { %10352 = vrcp.f32 %v3353_v52 }
0x108e   : > { %10354 = vrcp.f32 %v3347_v1 }
0x108f   : > { %v3356_v21 = vpop.xlane.xlu1 %3355  ;;  %v2941_v34 = vpop.permute.xlu0 %2940 }
0x1090   : > { %10356 = vrcp.f32 %v3356_v21  ;;  %9741 = vmatprep.mubr.msk.bf16.mxu0 %vm901_vm2, %v2941_v34 }
0x1091   : > { %10358 = vrcp.f32 %v3344_v20 }
0x1092   : > { %10360 = vrcp.f32 %v3341_v56 }
0x1093   : > { %v2943_v3 = vpop.permute.xlu1 %2942  ;;  %10362 = vrcp.f32 %v3338_v46 }
0x1094   : > { %9742 = vmatmul.mubr.msk.bf16.vlgmr.msra.gmra.mxu0 %vm901_vm2, %v2943_v3  ;;  %10364 = vrcp.f32 %v3335_v41 }
0x1099   : > { %v10351_v33 = vpop.eup %10350 }
0x109a   : > { %v10353_v51 = vpop.eup %10352  ;;  %v3400_v43 = vmul.f32 %v10351_v33, %v13203_v13  ;;  %v3399_v13 = vmul.f32 %v10351_v33, %v13197_v54 }
0x109b   : > { %v10355_v58 = vpop.eup %10354  ;;  %v3402_v62 = vmul.f32 %v10353_v51, %v13195_v38  ;;  %v3401_v23 = vmul.f32 %v10353_v51, %v13193_v26 }
0x109c   : > { %v3398_v56 = vmul.f32 %v10355_v58, %v13169_v55 }
0x109d   : > { %v10357_v4 = vpop.eup %10356 }
0x109e   : > { %v3404_v5 = vmul.f32 %v10357_v4, %v13211_v7  ;;  %v3403_v1 = vmul.f32 %v10357_v4, %v13205_v36  ;;  %v3418_v20 = vpack.c.bf16 %v3400_v43, %v3398_v56  ;;  %v10359_v21 = vpop.eup %10358  ;;  %v3397_v7 = vmul.f32 %v10355_v58, %v13167_v35 }
0x109f   : > { %v10361_v46 = vpop.eup %10360  ;;  %v3396_v38 = vmul.f32 %v10359_v21, %v13191_v63  ;;  %v3395_v3 = vmul.f32 %v10359_v21, %v13185_v47 }
0x10a0   : > { %v3420_v8 = vpack.c.bf16 %v3404_v5, %v3402_v62  ;;  %v3419_v52 = vpack.c.bf16 %v3403_v1, %v3401_v23  ;;  %v3394_v26 = vmul.f32 %v10361_v46, %v13179_v19  ;;  %v3417_v36 = vpack.c.bf16 %v3399_v13, %v3397_v7  ;;  %v10363_v41 = vpop.eup %10362 }
0x10a1   : > { %v10365_v55 = vpop.eup %10364  ;;  %v3392_v51 = vmul.f32 %v10363_v41, %v13183_v50  ;;  %v3393_v4 = vmul.f32 %v10361_v46, %v13175_v15  ;;  %v3391_v35 = vmul.f32 %v10363_v41, %v13181_v44 }
0x10a2   : > { %3421 = vmatprep.subr.bf16.mxu0 %v3420_v8  ;;  %v3416_v34 = vpack.c.bf16 %v3396_v38, %v3394_v26  ;;  %v3390_v54 = vmul.f32 %v10365_v55, %v13173_v31  ;;  %v3389_v19 = vmul.f32 %v10365_v55, %v13171_v27 }
0x10a3   : > { %3422 = vmatpush1.bf16.xpose.msra.mxu0 %v3419_v52  ;;  %v3415_v33 = vpack.c.bf16 %v3395_v3, %v3393_v4 }
0x10a4   : > { %3423 = vmatprep.subr.bf16.mxu0 %v3418_v20  ;;  %v3414_v63 = vpack.c.bf16 %v3392_v51, %v3390_v54  ;;  %v3413_v58 = vpack.c.bf16 %v3391_v35, %v3389_v19 }
0x10ab   : > { %3424 = vmatpush1.bf16.xpose.msra.mxu0 %v3417_v36 }
0x10ac   : > { %3425 = vmatprep.subr.bf16.mxu0 %v3416_v34 }
0x10b3   : > { %3426 = vmatpush1.bf16.xpose.msra.mxu0 %v3415_v33 }
0x10b4   : > { %3427 = vmatprep.subr.bf16.mxu0 %v3414_v63 }
0x10bb   : > { %3428 = vmatpush1.bf16.xpose.msra.mxu0 %v3413_v58  ;;  %v16808_v58 = vrot.slane %v13020_v40, 2 }
0x10c0   : > { %v3332_v43 = vpop.xlane.xlu0 %3331 }
0x10c1   : > { %10366 = vrcp.f32 %v3332_v43  ;;  %v16977_v43 = vld [vmem:[#allocation24_spill] sm:$0xff] }
0x10c4   : > { %v3329_v62 = vpop.xlane.xlu1 %3328  ;;  %v3323_v47 = vpop.xlane.xlu0 %3322 }
0x10c5   : > { %10368 = vrcp.f32 %v3329_v62  ;;  %v16978_v62 = vld [vmem:[#allocation19_spill] sm:$0xff] }
0x10c6   : > { %10370 = vrcp.f32 %v3323_v47 }
0x10c8   : > { %v3326_v50 = vpop.xlane.xlu1 %3325  ;;  %v3317_v15 = vpop.xlane.xlu0 %3316 }
0x10c9   : > { %10372 = vrcp.f32 %v3326_v50 }
0x10cc   : > { %v3320_v31 = vpop.xlane.xlu1 %3319  ;;  %v3311_v5 = vpop.xlane.xlu0 %3310 }
0x10cd   : > { %10374 = vrcp.f32 %v3320_v31 }
0x10ce   : > { %10376 = vrcp.f32 %v3317_v15  ;;  %v10367_v1 = vpop.eup %10366 }
0x10cf   : > { %v3388_v21 = vmul.f32 %v10367_v1, %v13242_v14  ;;  %v3387_v46 = vmul.f32 %v10367_v1, %v13240_v2 }
0x10d0   : > { %v3314_v23 = vpop.xlane.xlu1 %3313 }
0x10d1   : > { %10378 = vrcp.f32 %v3314_v23 }
0x10d2   : > { %v10369_v44 = vpop.eup %10368  ;;  %10380 = vrcp.f32 %v3311_v5 }
0x10d3   : > { %v3386_v27 = vmul.f32 %v10369_v44, %v13252_v53  ;;  %v3385_v8 = vmul.f32 %v10369_v44, %v13248_v9  ;;  %v10371_v52 = vpop.eup %10370 }
0x10d4   : > { %v730_v56 = vpop.permute.xlu1 %729  ;;  %v725_v20 = vpop.permute.xlu0 %724  ;;  %v3382_v9 = vmul.f32 %v10371_v52, %v13246_v30  ;;  %v3381_v55 = vmul.f32 %v10371_v52, %v13244_v60 }
0x10d5   : > { %v871_v13 = vadd.f32 %v12430_v18, %v730_v56  ;;  %v867_v38 = vadd.f32 %v12425_v37, %v725_v20  ;;  %v3412_v26 = vpack.c.bf16 %v3388_v21, %v3386_v27  ;;  %v3411_v36 = vpack.c.bf16 %v3387_v46, %v3385_v8 }
0x10d6   : > { %v10373_v7 = vpop.eup %10372 }
0x10d7   : > { %v13319_v41 = vpack.c.bf16 %v871_v13, %v867_v38  ;;  %v3384_v53 = vmul.f32 %v10373_v7, %v13264_v57  ;;  %3429 = vmatprep.subr.bf16.mxu0 %v3412_v26  ;;  %v3383_v37 = vmul.f32 %v10373_v7, %v13258_v39 }
0x10d8   : > { %3430 = vmatpush1.bf16.xpose.msra.mxu0 %v3411_v36 }
0x10d9   : > { %16976 = vst [vmem:[#allocation34_spill] sm:$0xff] %v13319_v41  ;;  %3453 = vmatprep.mubr.bf16.mxu0 %v13319_v41  ;;  %v3410_v14 = vpack.c.bf16 %v3384_v53, %v3382_v9  ;;  %v3409_v51 = vpack.c.bf16 %v3383_v37, %v3381_v55 }
0x10da   : > { %v10375_v2 = vpop.eup %10374 }
0x10db   : > { %v10377_v34 = vpop.eup %10376  ;;  %3431 = vmatprep.subr.bf16.mxu0 %v3410_v14  ;;  %v3380_v18 = vmul.f32 %v10375_v2, %v13276_v25  ;;  %v3379_v54 = vmul.f32 %v10375_v2, %v13270_v24  ;;  %v869_v24 = vadd.f32 %v16977_v43, %v730_v56 }
0x10dc   : > { %v3378_v3 = vmul.f32 %v10377_v34, %v13256_v22  ;;  %v3377_v63 = vmul.f32 %v10377_v34, %v13254_v10  ;;  %v3549_v10 = vrot.slane %v13025_v0, 2 }
0x10de   : > { %v3408_v30 = vpack.c.bf16 %v3380_v18, %v3378_v3  ;;  %v10379_v4 = vpop.eup %10378  ;;  %v3407_v35 = vpack.c.bf16 %v3379_v54, %v3377_v63 }
0x10df   : > { %v10381_v57 = vpop.eup %10380  ;;  %v3376_v33 = vmul.f32 %v10379_v4, %v13284_v45  ;;  %v3375_v60 = vmul.f32 %v10379_v4, %v13278_v28  ;;  %v865_v45 = vadd.f32 %v16978_v62, %v725_v20  ;;  %v3539_v28 = vpop.trf.xlu1 }
0x10e0   : > { %3432 = vmatpush1.bf16.xpose.msra.mxu0 %v3409_v51  ;;  %v3374_v39 = vmul.f32 %v10381_v57, %v13268_v61  ;;  %v3373_v22 = vmul.f32 %v10381_v57, %v13266_v6  ;;  %v13345_v6 = vsel %vm926_vm1, %v3549_v10, 0 }
0x10e1   : > { %3433 = vmatprep.subr.bf16.mxu0 %v3408_v30  ;;  %v13341_v61 = vpack.c.bf16 %v869_v24, %v865_v45  ;;  %16980 = vst [vmem:[#allocation32_spill] sm:$0xff] %v13345_v6 }
0x10e2   : > { %v3406_v25 = vpack.c.bf16 %v3376_v33, %v3374_v39  ;;  %v3405_v19 = vpack.c.bf16 %v3375_v60, %v3373_v22 }
0x10e3   : > { %16979 = vst [vmem:[#allocation35_spill] sm:$0xff] %v13341_v61  ;;  %v3540_v47 = vpop.trf.xlu1 }
0x10e7   : > { %v3541_v50 = vpop.trf.xlu1 }
0x10e8   : > { %3434 = vmatpush1.bf16.xpose.msra.mxu0 %v3407_v35 }
0x10e9   : > { %3435 = vmatprep.subr.bf16.mxu0 %v3406_v25 }
0x10eb   : > { %v3542_v15 = vpop.trf.xlu1 }
0x10ef   : > { %v3543_v31 = vpop.trf.xlu1 }
0x10f0   : > { %3436 = vmatpush1.bf16.xpose.msra.mxu0 %v3405_v19 }
0x10f1   : > { %9499 = vmatprep.subr.msk.bf16.mxu0 %vm926_vm1, %v16808_v58 }
0x10f3   : > { %v3544_v5 = vpop.trf.xlu1 }
0x10f7   : > { %3454 = vmatmul.mubr.bf16.vlgmr.msra.gmra.mxu0 %v13341_v61  ;;  %v3545_v23 = vpop.trf.xlu1 }
0x10f8   : > { %3596 = vmatpush1.bf16.msra.mxu0 %v13345_v6  ;;  %3613 = vmatprep.mubr.bf16.mxu0 %v16965_v42 }
0x10fb   : > { %v3546_v1 = vpop.trf.xlu1 }
0x10ff   : > { %9500 = vmatmul.mubr.msk.bf16.vlgmr.msra.gmra.mxu0 %vm901_vm2, %v3539_v28 }
0x1100   : > { %3623 = vmatprep.mubr.bf16.mxu0 %v16965_v42 }
0x1107   : > { %9501 = vmatmul.mubr.msk.bf16.gmra.mxu0 %vm901_vm2, %v3540_v47 }
0x1108   : > { %3633 = vmatprep.mubr.bf16.mxu0 %v16965_v42 }
0x110f   : > { %9502 = vmatmul.mubr.msk.bf16.gmra.mxu0 %vm901_vm2, %v3541_v50 }
0x1110   : > { %3643 = vmatprep.mubr.bf16.mxu0 %v16965_v42 }
0x1117   : > { %9503 = vmatmul.mubr.msk.bf16.gmra.mxu0 %vm901_vm2, %v3542_v15 }
0x1118   : > { %3653 = vmatprep.mubr.bf16.mxu0 %v16965_v42 }
0x111f   : > { %9504 = vmatmul.mubr.msk.bf16.gmra.mxu0 %vm901_vm2, %v3543_v31 }
0x1120   : > { %3663 = vmatprep.mubr.bf16.mxu0 %v16965_v42 }
0x1127   : > { %9505 = vmatmul.mubr.msk.bf16.gmra.mxu0 %vm901_vm2, %v3544_v5 }
0x1128   : > { %3673 = vmatprep.mubr.bf16.mxu0 %v16965_v42 }
0x112f   : > { %9506 = vmatmul.mubr.msk.bf16.gmra.mxu0 %vm901_vm2, %v3545_v23 }
0x1130   : > { %3683 = vmatprep.mubr.bf16.mxu0 %v16965_v42 }
0x1137   : > { %9507 = vmatmul.mubr.msk.bf16.gmra.mxu0 %vm901_vm2, %v3546_v1 }
0x1154   : > { %v9743_v44 = vpop.f32.mrf.mxu0 }
0x1155   : > { %v13365_v27 = vadd.f32 %v9743_v44, %v13047_v17 }
0x1156   : > { %v2987_v8 = vpop.f32.mrf.mxu0 }
0x1157   : > { %v13368_v52 = vadd.f32 %v2987_v8, %v13052_v32 }
0x1158   : > { %v9744_v56 = vpop.f32.mrf.mxu0 }
0x1159   : > { %v13371_v20 = vadd.f32 %v9744_v56, %v13054_v16 }
0x115a   : > { %v13373_v21 = vpop.f32.mrf.mxu0 }
0x115b   : > { %16981 = vst [vmem:[#allocation33_spill] sm:$0xff] %v13373_v21 }
0x11b7   : > { %v3455_v46 = vpop.f32.mrf.mxu0 }
0x11b8   : > { %v3461_v13 = vpack.c.bf16 %v3455_v46, %v3455_v46 }
0x11b9   : > { %v3457_v38 = vpop.f32.mrf.mxu0 }
0x11ba   : > { %v3473_v7 = vsel %vm926_vm1, %v3461_v13, 0  ;;  %9821 = vmatprep.subr.msk.bf16.mxu1 %vm926_vm1, %v3461_v13 }
0x11bb   : > { %v3458_v26 = vpop.f32.mrf.mxu0  ;;  %9746 = vmatpush3.bf16.msra.mxu1 %v3473_v7 }
0x11bd   : > { %v3459_v17 = vpop.f32.mrf.mxu0 }
0x11bf   : > { %v13377_v36 = vpop.f32.mrf.mxu0 }
0x11c1   : > { %v13379_v32 = vpop.f32.mrf.mxu0 }
0x11c3   : > { %v13381_v9 = vpop.f32.mrf.mxu0 }
0x11c5   : > { %v13383_v16 = vpop.f32.mrf.mxu0 }
0x11c6   : > { %v3697_v1 = vmax.f32 %v13381_v9, %v13383_v16 }
0x11c7   : > { %v13385_v53 = vpop.f32.mrf.mxu0 }
0x11c9   : > { %v13387_v14 = vpop.f32.mrf.mxu0 }
0x11ca   : > { %v3700_v17 = vmax.f32 %v13385_v53, %v13387_v14 }
0x11cb   : > { %v13389_v2 = vpop.f32.mrf.mxu0 }
0x11cd   : > { %v13391_v34 = vpop.f32.mrf.mxu0 }
0x11ce   : > { %v3703_v5 = vmax.f32 %v13389_v2, %v13391_v34 }
0x11cf   : > { %v13393_v37 = vpop.f32.mrf.mxu0 }
0x11d1   : > { %v13395_v18 = vpop.f32.mrf.mxu0 }
0x11d2   : > { %v3706_v7 = vmax.f32 %v13393_v37, %v13395_v18 }
0x11d3   : > { %v13397_v55 = vpop.f32.mrf.mxu0 }
0x11d5   : > { %v13399_v3 = vpop.f32.mrf.mxu0 }
0x11d6   : > { %v3709_v26 = vmax.f32 %v13397_v55, %v13399_v3 }
0x11d7   : > { %v13401_v51 = vpop.f32.mrf.mxu0 }
0x11d9   : > { %v13403_v30 = vpop.f32.mrf.mxu0 }
0x11da   : > { %v3712_v13 = vmax.f32 %v13401_v51, %v13403_v30 }
0x11db   : > { %v13405_v4 = vpop.f32.mrf.mxu0 }
0x11dd   : > { %v13407_v57 = vpop.f32.mrf.mxu0 }
0x11de   : > { %v3715_v38 = vmax.f32 %v13405_v4, %v13407_v57 }
0x11df   : > { %v13409_v54 = vpop.f32.mrf.mxu0 }
0x11e1   : > { %v13411_v33 = vpop.f32.mrf.mxu0 }
0x11e2   : > { %v3718_v56 = vmax.f32 %v13409_v54, %v13411_v33 }
0x11e3   : > { %v13413_v63 = vpop.f32.mrf.mxu0 }
0x11e5   : > { %v13415_v39 = vpop.f32.mrf.mxu0 }
0x11e6   : > { %v3721_v46 = vmax.f32 %v13413_v63, %v13415_v39 }
0x11e7   : > { %v3665_v35 = vpop.f32.mrf.mxu0 }
0x11e9   : > { %v13417_v25 = vpop.f32.mrf.mxu0 }
0x11ea   : > { %v3724_v44 = vmax.f32 %v3665_v35, %v13417_v25 }
0x11eb   : > { %v13419_v60 = vpop.f32.mrf.mxu0 }
0x11ed   : > { %v13421_v22 = vpop.f32.mrf.mxu0 }
0x11ee   : > { %v3727_v8 = vmax.f32 %v13419_v60, %v13421_v22 }
0x11ef   : > { %v3675_v19 = vpop.f32.mrf.mxu0 }
0x11f1   : > { %v3677_v43 = vpop.f32.mrf.mxu0 }
0x11f2   : > { %v3730_v15 = vmax.f32 %v3675_v19, %v3677_v43 }
0x11f3   : > { %v13423_v24 = vpop.f32.mrf.mxu0 }
0x11f5   : > { %v13425_v62 = vpop.f32.mrf.mxu0 }
0x11f6   : > { %v3733_v23 = vmax.f32 %v13423_v24, %v13425_v62 }
0x11f7   : > { %v13427_v45 = vpop.f32.mrf.mxu0 }
0x11f9   : > { %v13429_v10 = vpop.f32.mrf.mxu0 }
0x11fa   : > { %v3736_v28 = vmax.f32 %v13427_v45, %v13429_v10 }
0x11fb   : > { %v13433_v47 = vpop.f32.mrf.mxu0 }
0x11fc   : > { %3737 = vmax.xlane.f32.xlu0 %v3736_v28  ;;  %v3694_v28 = vmax.f32 %v13377_v36, %v13379_v32 }
0x11fd   : > { %v13435_v50 = vpop.f32.mrf.mxu0 }
0x11fe   : > { %v3739_v31 = vmax.f32 %v13433_v47, %v13435_v50 }
0x1200   : > { %3731 = vmax.xlane.f32.xlu0 %v3730_v15  ;;  %3740 = vmax.xlane.f32.xlu1 %v3739_v31 }
0x1204   : > { %3734 = vmax.xlane.f32.xlu0 %v3733_v23  ;;  %3704 = vmax.xlane.f32.xlu1 %v3703_v5 }
0x1208   : > { %3725 = vmax.xlane.f32.xlu0 %v3724_v44  ;;  %3698 = vmax.xlane.f32.xlu1 %v3697_v1 }
0x120c   : > { %3728 = vmax.xlane.f32.xlu0 %v3727_v8 }
0x1210   : > { %3719 = vmax.xlane.f32.xlu0 %v3718_v56 }
0x1214   : > { %3722 = vmax.xlane.f32.xlu0 %v3721_v46 }
0x1218   : > { %3713 = vmax.xlane.f32.xlu0 %v3712_v13 }
0x121c   : > { %3716 = vmax.xlane.f32.xlu0 %v3715_v38 }
0x1220   : > { %3707 = vmax.xlane.f32.xlu0 %v3706_v7 }
0x1224   : > { %3710 = vmax.xlane.f32.xlu0 %v3709_v26 }
0x1228   : > { %3701 = vmax.xlane.f32.xlu0 %v3700_v17 }
0x122c   : > { %3695 = vmax.xlane.f32.xlu0 %v3694_v28 }
0x1285   : > { %v3738_v15 = vpop.xlane.xlu0 %3737 }
0x1289   : > { %v3732_v31 = vpop.xlane.xlu0 %3731 }
0x128a   : > { %v3766_v1 = vsub.f32 %v3675_v19, %v3732_v31  ;;  %v3767_v44 = vsub.f32 %v3677_v43, %v3732_v31 }
0x128c   : > { %v3822_v56 = vmul.f32 1.442695, %v3766_v1  ;;  %v3824_v13 = vmul.f32 1.442695, %v3767_v44 }
0x128d   : > { %v3735_v5 = vpop.xlane.xlu0 %3734 }
0x128e   : > { %10382 = vpow2.f32 %v3822_v56  ;;  %v3741_v56 = vpop.xlane.xlu1 %3740 }
0x128f   : > { %10384 = vpow2.f32 %v3824_v13 }
0x1291   : > { %v3726_v23 = vpop.xlane.xlu0 %3725 }
0x1292   : > { %v3762_v46 = vsub.f32 %v3665_v35, %v3726_v23  ;;  %v3763_v38 = vsub.f32 %v13417_v25, %v3726_v23  ;;  %v3770_v35 = vsub.f32 %v13427_v45, %v3738_v15  ;;  %v3768_v23 = vsub.f32 %v13423_v24, %v3735_v5 }
0x1293   : > { %v3773_v24 = vsub.f32 %v13435_v50, %v3741_v56 }
0x1294   : > { %v3814_v58 = vmul.f32 1.442695, %v3762_v46  ;;  %v3816_v19 = vmul.f32 1.442695, %v3763_v38  ;;  %v3830_v45 = vmul.f32 1.442695, %v3770_v35 }
0x1295   : > { %v3729_v8 = vpop.xlane.xlu0 %3728 }
0x1296   : > { %v3764_v28 = vsub.f32 %v13419_v60, %v3729_v8  ;;  %v3765_v43 = vsub.f32 %v13421_v22, %v3729_v8  ;;  %v3769_v22 = vsub.f32 %v13425_v62, %v3735_v5  ;;  %v3836_v62 = vmul.f32 1.442695, %v3773_v24 }
0x1298   : > { %v3818_v60 = vmul.f32 1.442695, %v3764_v28  ;;  %v3820_v8 = vmul.f32 1.442695, %v3765_v43 }
0x1299   : > { %v3720_v7 = vpop.xlane.xlu0 %3719 }
0x129a   : > { %v3758_v26 = vsub.f32 %v13409_v54, %v3720_v7  ;;  %v3759_v17 = vsub.f32 %v13411_v33, %v3720_v7  ;;  %v3771_v33 = vsub.f32 %v13429_v10, %v3738_v15 }
0x129c   : > { %v3806_v21 = vmul.f32 1.442695, %v3758_v26  ;;  %v3808_v6 = vmul.f32 1.442695, %v3759_v17 }
0x129d   : > { %v3723_v31 = vpop.xlane.xlu0 %3722 }
0x129e   : > { %10386 = vpow2.f32 %v3806_v21  ;;  %v3760_v25 = vsub.f32 %v13413_v63, %v3723_v31  ;;  %v3761_v54 = vsub.f32 %v13415_v39, %v3723_v31  ;;  %v3832_v21 = vmul.f32 1.442695, %v3771_v33 }
0x129f   : > { %10388 = vpow2.f32 %v3808_v6  ;;  %v3772_v63 = vsub.f32 %v13433_v47, %v3741_v56  ;;  %v3826_v39 = vmul.f32 1.442695, %v3768_v23  ;;  %v3828_v6 = vmul.f32 1.442695, %v3769_v22 }
0x12a0   : > { %10390 = vpow2.f32 %v3814_v58  ;;  %v3810_v1 = vmul.f32 1.442695, %v3760_v25  ;;  %v3812_v44 = vmul.f32 1.442695, %v3761_v54  ;;  %v13477_v58 = vpop.eup %10382 }
0x12a1   : > { %10392 = vpow2.f32 %v3816_v19  ;;  %v3834_v10 = vmul.f32 1.442695, %v3772_v63  ;;  %v13479_v15 = vpop.eup %10384  ;;  %v3714_v22 = vpop.xlane.xlu0 %3713 }
0x12a2   : > { %10394 = vpow2.f32 %v3810_v1  ;;  %v3874_v25 = vadd.f32 %v13479_v15, %v13477_v58 }
0x12a3   : > { %10396 = vpow2.f32 %v3812_v44 }
0x12a4   : > { %10398 = vpow2.f32 %v3818_v60 }
0x12a5   : > { %10400 = vpow2.f32 %v3820_v8  ;;  %v3717_v8 = vpop.xlane.xlu0 %3716 }
0x12a6   : > { %10402 = vpow2.f32 %v3830_v45  ;;  %v3757_v24 = vsub.f32 %v13407_v57, %v3717_v8 }
0x12a7   : > { %10404 = vpow2.f32 %v3832_v21  ;;  %v13528_v21 = vld [vmem:[%s16745_s6 + $0x8] sm:$0xff]  }
0x12a8   : > { %10406 = vpow2.f32 %v3826_v39  ;;  %v3756_v39 = vsub.f32 %v13405_v4, %v3717_v8 }
0x12a9   : > { %10408 = vpow2.f32 %v3828_v6  ;;  %v3708_v45 = vpop.xlane.xlu0 %3707  ;;  %v3754_v6 = vsub.f32 %v13401_v51, %v3714_v22 }
0x12aa   : > { %10410 = vpow2.f32 %v3834_v10  ;;  %v3755_v10 = vsub.f32 %v13403_v30, %v3714_v22 }
0x12ab   : > { %v13481_v5 = vpop.eup %10386  ;;  %10412 = vpow2.f32 %v3836_v62 }
0x12ac   : > { %v13483_v46 = vpop.eup %10388 }
0x12ad   : > { %v13485_v47 = vpop.eup %10390  ;;  %v3862_v50 = vadd.f32 %v13483_v46, %v13481_v5  ;;  %v3711_v63 = vpop.xlane.xlu0 %3710 }
0x12ae   : > { %v13489_v13 = vpop.eup %10392  ;;  %v3753_v4 = vsub.f32 %v13399_v3, %v3711_v63 }
0x12af   : > { %v13491_v38 = vpop.eup %10394  ;;  %3863 = vadd.xlane.f32.xlu0 %v3862_v50  ;;  %v3868_v17 = vadd.f32 %v13489_v13, %v13485_v47  ;;  %v3802_v50 = vmul.f32 1.442695, %v3756_v39 }
0x12b0   : > { %v13493_v7 = vpop.eup %10396 }
0x12b1   : > { %v13495_v26 = vpop.eup %10398  ;;  %v3865_v28 = vadd.f32 %v13493_v7, %v13491_v38  ;;  %v3702_v62 = vpop.xlane.xlu0 %3701  ;;  %10414 = vpow2.f32 %v3802_v50 }
0x12b2   : > { %v13501_v19 = vpop.eup %10400  ;;  %v3746_v51 = vsub.f32 %v13385_v53, %v3702_v62 }
0x12b3   : > { %v13503_v43 = vpop.eup %10402  ;;  %3869 = vadd.xlane.f32.xlu0 %v3868_v17  ;;  %3866 = vadd.xlane.f32.xlu1 %v3865_v28  ;;  %v3871_v54 = vadd.f32 %v13501_v19, %v13495_v26  ;;  %v3750_v17 = vsub.f32 %v13393_v37, %v3708_v45  ;;  %v3804_v28 = vmul.f32 1.442695, %v3757_v24 }
0x12b4   : > { %v13505_v31 = vpop.eup %10404 }
0x12b5   : > { %v13507_v35 = vpop.eup %10406  ;;  %v3880_v60 = vadd.f32 %v13505_v31, %v13503_v43  ;;  %v3790_v57 = vmul.f32 1.442695, %v3750_v17  ;;  %10416 = vpow2.f32 %v3804_v28  ;;  %v3696_v22 = vpop.xlane.xlu0 %3695 }
0x12b6   : > { %v13513_v33 = vpop.eup %10408  ;;  %v3742_v3 = vsub.f32 %v13377_v36, %v3696_v22  ;;  %v3743_v39 = vsub.f32 %v13379_v32, %v3696_v22 }
0x12b7   : > { %3875 = vadd.xlane.f32.xlu0 %v3874_v25  ;;  %3872 = vadd.xlane.f32.xlu1 %v3871_v54  ;;  %v13515_v23 = vpop.eup %10410  ;;  %v3877_v1 = vadd.f32 %v13513_v33, %v13507_v35  ;;  %v3751_v25 = vsub.f32 %v13395_v18, %v3708_v45  ;;  %v3798_v54 = vmul.f32 1.442695, %v3754_v6  ;;  %v3782_v45 = vmul.f32 1.442695, %v3746_v51 }
0x12b8   : > { %v13521_v44 = vpop.eup %10412  ;;  %v3774_v6 = vmul.f32 1.442695, %v3742_v3 }
0x12b9   : > { %v3883_v56 = vadd.f32 %v13521_v44, %v13515_v23  ;;  %v3792_v30 = vmul.f32 1.442695, %v3751_v25  ;;  %10418 = vpow2.f32 %v3798_v54 }
0x12bb   : > { %3881 = vadd.xlane.f32.xlu0 %v3880_v60  ;;  %3878 = vadd.xlane.f32.xlu1 %v3877_v1  ;;  %v3752_v60 = vsub.f32 %v13397_v55, %v3711_v63  ;;  %v3800_v1 = vmul.f32 1.442695, %v3755_v10  ;;  %v3796_v55 = vmul.f32 1.442695, %v3753_v4  ;;  %v3776_v10 = vmul.f32 1.442695, %v3743_v39 }
0x12bd   : > { %v3794_v18 = vmul.f32 1.442695, %v3752_v60  ;;  %10420 = vpow2.f32 %v3800_v1 }
0x12be   : > { %10422 = vpow2.f32 %v3790_v57 }
0x12bf   : > { %3884 = vadd.xlane.f32.xlu1 %v3883_v56  ;;  %v3747_v56 = vsub.f32 %v13387_v14, %v3702_v62  ;;  %10424 = vpow2.f32 %v3792_v30  ;;  %v13550_v62 = vpop.eup %10414 }
0x12c0   : > { %10426 = vpow2.f32 %v3794_v18 }
0x12c1   : > { %v3784_v53 = vmul.f32 1.442695, %v3747_v56  ;;  %10428 = vpow2.f32 %v3796_v55 }
0x12c2   : > { %10430 = vpow2.f32 %v3782_v45  ;;  %v13552_v32 = vpop.eup %10416 }
0x12c3   : > { %10432 = vpow2.f32 %v3784_v53  ;;  %v4063_v53 = vrot.slane %v13002_v48, 4 }
0x12c6   : > { %v13554_v17 = vpop.eup %10418 }
0x12ca   : > { %v13556_v28 = vpop.eup %10420 }
0x12cb   : > { %v3856_v4 = vadd.f32 %v13556_v28, %v13554_v17 }
0x12d0   : > { %3464 = vrot.lane.b32.xlu1 %v13528_v21, %s11526_s12 }
0x12d1   : > { %3462 = vrot.lane.b32.xlu0 %v13220_v29, %s11526_s12  ;;  %v3705_v29 = vpop.xlane.xlu1 %3704 }
0x12d2   : > { %v3748_v37 = vsub.f32 %v13389_v2, %v3705_v29  ;;  %v3749_v8 = vsub.f32 %v13391_v34, %v3705_v29 }
0x12d4   : > { %v3786_v24 = vmul.f32 1.442695, %v3748_v37  ;;  %v3788_v14 = vmul.f32 1.442695, %v3749_v8 }
0x12d5   : > { %v3699_v63 = vpop.xlane.xlu1 %3698 }
0x12d6   : > { %v3744_v2 = vsub.f32 %v13381_v9, %v3699_v63  ;;  %v3745_v34 = vsub.f32 %v13383_v16, %v3699_v63  ;;  %10434 = vpow2.f32 %v3786_v24  ;;  %v13558_v9 = vpop.eup %10422  ;;  %v3859_v16 = vadd.f32 %v13552_v32, %v13550_v62 }
0x12d7   : > { %10436 = vpow2.f32 %v3788_v14  ;;  %v13562_v25 = vpop.eup %10424 }
0x12d8   : > { %v3778_v36 = vmul.f32 1.442695, %v3744_v2  ;;  %10438 = vpow2.f32 %v3774_v6  ;;  %v3780_v50 = vmul.f32 1.442695, %v3745_v34  ;;  %v13564_v54 = vpop.eup %10426  ;;  %v3850_v1 = vadd.f32 %v13562_v25, %v13558_v9 }
0x12d9   : > { %10440 = vpow2.f32 %v3776_v10  ;;  %v13566_v60 = vpop.eup %10428 }
0x12da   : > { %10442 = vpow2.f32 %v3778_v36  ;;  %v13568_v29 = vpop.eup %10430  ;;  %v3853_v37 = vadd.f32 %v13566_v60, %v13564_v54 }
0x12db   : > { %10444 = vpow2.f32 %v3780_v50  ;;  %v13574_v57 = vpop.eup %10432 }
0x12dc   : > { %v3844_v22 = vadd.f32 %v13574_v57, %v13568_v29 }
0x12e3   : > { %v13576_v51 = vpop.eup %10434 }
0x12e4   : > { %v13578_v30 = vpop.eup %10436 }
0x12e5   : > { %v13580_v56 = vpop.eup %10438  ;;  %v3847_v45 = vadd.f32 %v13578_v30, %v13576_v51 }
0x12e6   : > { %v13586_v18 = vpop.eup %10440 }
0x12e7   : > { %v13588_v8 = vpop.eup %10442  ;;  %v3838_v55 = vadd.f32 %v13586_v18, %v13580_v56 }
0x12e8   : > { %v13594_v3 = vpop.eup %10444 }
0x12e9   : > { %v3841_v63 = vadd.f32 %v13594_v3, %v13588_v8 }
0x12f0   : > { %3860 = vadd.xlane.f32.xlu0 %v3859_v16 }
0x12f4   : > { %3851 = vadd.xlane.f32.xlu0 %v3850_v1  ;;  %3857 = vadd.xlane.f32.xlu1 %v3856_v4  ;;  %v16812_v1 = vrot.slane %v13319_v41, 2 }
0x12f8   : > { %3845 = vadd.xlane.f32.xlu0 %v3844_v22  ;;  %3854 = vadd.xlane.f32.xlu1 %v3853_v37 }
0x12fc   : > { %3839 = vadd.xlane.f32.xlu0 %v3838_v55  ;;  %3848 = vadd.xlane.f32.xlu1 %v3847_v45 }
0x1300   : > { %3842 = vadd.xlane.f32.xlu1 %v3841_v63 }
0x1329   : > { %4065 = vxpose.xlu0.c.b16.start.end [1/1] (short) %v4063_v53, 128 }
0x1338   : > { %v3864_v39 = vpop.xlane.xlu0 %3863 }
0x133c   : > { %v3870_v24 = vpop.xlane.xlu0 %3869  ;;  %v3867_v14 = vpop.xlane.xlu1 %3866 }
0x1340   : > { %v3876_v2 = vpop.xlane.xlu0 %3875  ;;  %v3873_v6 = vpop.xlane.xlu1 %3872 }
0x1344   : > { %v3882_v34 = vpop.xlane.xlu0 %3881  ;;  %v3879_v10 = vpop.xlane.xlu1 %3878 }
0x1345   : > { %10446 = vrcp.f32 %v3882_v34 }
0x1346   : > { %10448 = vrcp.f32 %v3879_v10 }
0x1347   : > { %10450 = vrcp.f32 %v3876_v2 }
0x1348   : > { %v3463_v36 = vpop.permute.xlu0 %3462  ;;  %v3885_v50 = vpop.xlane.xlu1 %3884 }
0x1349   : > { %10452 = vrcp.f32 %v3885_v50  ;;  %9747 = vmatprep.mubr.msk.bf16.mxu1 %vm901_vm2, %v3463_v36 }
0x134a   : > { %10454 = vrcp.f32 %v3873_v6 }
0x134b   : > { %10456 = vrcp.f32 %v3870_v24 }
0x134c   : > { %v3465_v16 = vpop.permute.xlu1 %3464  ;;  %10458 = vrcp.f32 %v3867_v14 }
0x134d   : > { %9748 = vmatmul.mubr.msk.bf16.vlgmr.msra.gmra.mxu1 %vm901_vm2, %v3465_v16  ;;  %10460 = vrcp.f32 %v3864_v39 }
0x134e   : > { %3988 = vmatprep.mubr.bf16.mxu1 %v16812_v1 }
0x1352   : > { %v10447_v4 = vpop.eup %10446 }
0x1353   : > { %v10449_v22 = vpop.eup %10448  ;;  %v3931_v45 = vmul.f32 %v10447_v4, %v13505_v31  ;;  %v3930_v53 = vmul.f32 %v10447_v4, %v13503_v43 }
0x1354   : > { %v10451_v37 = vpop.eup %10450  ;;  %v3929_v34 = vmul.f32 %v10449_v22, %v13513_v33  ;;  %v3928_v31 = vmul.f32 %v10449_v22, %v13507_v35 }
0x1355   : > { %v3927_v24 = vmul.f32 %v10451_v37, %v13479_v15  ;;  %v3926_v43 = vmul.f32 %v10451_v37, %v13477_v58 }
0x1356   : > { %v10453_v55 = vpop.eup %10452 }
0x1357   : > { %v3933_v63 = vmul.f32 %v10453_v55, %v13521_v44  ;;  %v3932_v2 = vmul.f32 %v10453_v55, %v13515_v23  ;;  %v3947_v6 = vpack.c.bf16 %v3929_v34, %v3927_v24  ;;  %v10455_v50 = vpop.eup %10454  ;;  %v3946_v33 = vpack.c.bf16 %v3928_v31, %v3926_v43 }
0x1358   : > { %v10457_v14 = vpop.eup %10456  ;;  %v3925_v44 = vmul.f32 %v10455_v50, %v13501_v19  ;;  %v3924_v4 = vmul.f32 %v10455_v50, %v13495_v26 }
0x1359   : > { %v3949_v10 = vpack.c.bf16 %v3933_v63, %v3931_v45  ;;  %v3948_v36 = vpack.c.bf16 %v3932_v2, %v3930_v53  ;;  %v3923_v23 = vmul.f32 %v10457_v14, %v13489_v13  ;;  %v10459_v39 = vpop.eup %10458  ;;  %v3922_v45 = vmul.f32 %v10457_v14, %v13485_v47 }
0x135a   : > { %v10461_v15 = vpop.eup %10460  ;;  %v3921_v55 = vmul.f32 %v10459_v39, %v13493_v7  ;;  %v3920_v58 = vmul.f32 %v10459_v39, %v13491_v38 }
0x135b   : > { %3956 = vmatprep.subr.bf16.mxu1 %v3949_v10  ;;  %v3945_v16 = vpack.c.bf16 %v3925_v44, %v3923_v23  ;;  %v3919_v35 = vmul.f32 %v10461_v15, %v13483_v46  ;;  %v3944_v22 = vpack.c.bf16 %v3924_v4, %v3922_v45  ;;  %v3918_v13 = vmul.f32 %v10461_v15, %v13481_v5 }
0x135c   : > { %3957 = vmatpush1.bf16.xpose.msra.mxu1 %v3948_v36 }
0x135d   : > { %3958 = vmatprep.subr.bf16.mxu1 %v3947_v6  ;;  %v3943_v19 = vpack.c.bf16 %v3921_v55, %v3919_v35  ;;  %v3942_v37 = vpack.c.bf16 %v3920_v58, %v3918_v13  ;;  %v16811_v58 = vrot.slane %v13020_v40, 4 }
0x1364   : > { %3959 = vmatpush1.bf16.xpose.msra.mxu1 %v3946_v33 }
0x1365   : > { %3960 = vmatprep.subr.bf16.mxu1 %v3945_v16 }
0x136c   : > { %3961 = vmatpush1.bf16.xpose.msra.mxu1 %v3944_v22 }
0x136d   : > { %3962 = vmatprep.subr.bf16.mxu1 %v3943_v19 }
0x1374   : > { %3963 = vmatpush1.bf16.xpose.msra.mxu1 %v3942_v37 }
0x1379   : > { %v3861_v63 = vpop.xlane.xlu0 %3860 }
0x137a   : > { %10462 = vrcp.f32 %v3861_v63 }
0x137d   : > { %v3852_v53 = vpop.xlane.xlu0 %3851  ;;  %v3858_v26 = vpop.xlane.xlu1 %3857 }
0x137e   : > { %10464 = vrcp.f32 %v3858_v26 }
0x137f   : > { %10466 = vrcp.f32 %v3852_v53 }
0x1381   : > { %v3855_v7 = vpop.xlane.xlu1 %3854  ;;  %v3846_v47 = vpop.xlane.xlu0 %3845 }
0x1382   : > { %10468 = vrcp.f32 %v3855_v7 }
0x1383   : > { %10470 = vrcp.f32 %v3846_v47 }
0x1385   : > { %v3849_v46 = vpop.xlane.xlu1 %3848  ;;  %v3840_v38 = vpop.xlane.xlu0 %3839 }
0x1386   : > { %10472 = vrcp.f32 %v3849_v46 }
0x1387   : > { %v10463_v2 = vpop.eup %10462 }
0x1388   : > { %v3917_v5 = vmul.f32 %v10463_v2, %v13552_v32  ;;  %v3916_v6 = vmul.f32 %v10463_v2, %v13550_v62 }
0x1389   : > { %v3843_v34 = vpop.xlane.xlu1 %3842 }
0x138a   : > { %10474 = vrcp.f32 %v3843_v34 }
0x138b   : > { %v10465_v10 = vpop.eup %10464  ;;  %10476 = vrcp.f32 %v3840_v38 }
0x138c   : > { %v3915_v36 = vmul.f32 %v10465_v10, %v13556_v28  ;;  %v3914_v24 = vmul.f32 %v10465_v10, %v13554_v17  ;;  %v10467_v50 = vpop.eup %10466 }
0x138d   : > { %v3911_v43 = vmul.f32 %v10467_v50, %v13562_v25  ;;  %v3910_v62 = vmul.f32 %v10467_v50, %v13558_v9 }
0x138e   : > { %v3941_v14 = vpack.c.bf16 %v3917_v5, %v3915_v36  ;;  %v3940_v31 = vpack.c.bf16 %v3916_v6, %v3914_v24 }
0x138f   : > { %v10469_v44 = vpop.eup %10468 }
0x1390   : > { %3964 = vmatprep.subr.bf16.mxu1 %v3941_v14  ;;  %v3913_v23 = vmul.f32 %v10469_v44, %v13566_v60  ;;  %v10471_v33 = vpop.eup %10470  ;;  %v3912_v28 = vmul.f32 %v10469_v44, %v13564_v54 }
0x1391   : > { %3965 = vmatpush1.bf16.xpose.msra.mxu1 %v3940_v31  ;;  %v3907_v16 = vmul.f32 %v10471_v33, %v13574_v57  ;;  %v3906_v35 = vmul.f32 %v10471_v33, %v13568_v29  ;;  %v4081_v29 = vrot.slane %v13025_v0, 4 }
0x1392   : > { %v3939_v32 = vpack.c.bf16 %v3913_v23, %v3911_v43  ;;  %v3938_v15 = vpack.c.bf16 %v3912_v28, %v3910_v62 }
0x1393   : > { %v10473_v39 = vpop.eup %10472 }
0x1394   : > { %3966 = vmatprep.subr.bf16.mxu1 %v3939_v32  ;;  %v3909_v17 = vmul.f32 %v10473_v39, %v13578_v30  ;;  %v3908_v60 = vmul.f32 %v10473_v39, %v13576_v51  ;;  %v16810_v51 = vrot.slane %v13341_v61, 2 }
0x1396   : > { %v3937_v4 = vpack.c.bf16 %v3909_v17, %v3907_v16  ;;  %v3936_v22 = vpack.c.bf16 %v3908_v60, %v3906_v35 }
0x1397   : > { %v10475_v55 = vpop.eup %10474 }
0x1398   : > { %v10477_v25 = vpop.eup %10476  ;;  %v3905_v45 = vmul.f32 %v10475_v55, %v13594_v3  ;;  %v3904_v9 = vmul.f32 %v10475_v55, %v13588_v8 }
0x1399   : > { %3967 = vmatpush1.bf16.xpose.msra.mxu1 %v3938_v15  ;;  %v3903_v54 = vmul.f32 %v10477_v25, %v13586_v18  ;;  %v3902_v57 = vmul.f32 %v10477_v25, %v13580_v56  ;;  %v13645_v18 = vsel %vm926_vm1, %v4081_v29, 0  ;;  %v4073_v56 = vpop.trf.xlu0 }
0x139a   : > { %3968 = vmatprep.subr.bf16.mxu1 %v3937_v4  ;;  %16982 = vst [vmem:[#allocation31_spill] sm:$0xff] %v13645_v18 }
0x139b   : > { %v3935_v30 = vpack.c.bf16 %v3905_v45, %v3903_v54  ;;  %v3934_v19 = vpack.c.bf16 %v3904_v9, %v3902_v57 }
0x139d   : > { %v4074_v8 = vpop.trf.xlu0 }
0x13a1   : > { %3969 = vmatpush1.bf16.xpose.msra.mxu1 %v3936_v22  ;;  %v4075_v3 = vpop.trf.xlu0 }
0x13a2   : > { %3970 = vmatprep.subr.bf16.mxu1 %v3935_v30 }
0x13a5   : > { %v4076_v13 = vpop.trf.xlu0 }
0x13a9   : > { %3971 = vmatpush1.bf16.xpose.msra.mxu1 %v3934_v19  ;;  %v4077_v37 = vpop.trf.xlu0 }
0x13aa   : > { %9510 = vmatprep.subr.msk.bf16.mxu1 %vm926_vm1, %v16811_v58 }
0x13ad   : > { %v4078_v63 = vpop.trf.xlu0 }
0x13b0   : > { %3989 = vmatmul.mubr.bf16.vlgmr.msra.gmra.mxu1 %v16810_v51 }
0x13b1   : > { %4128 = vmatpush1.bf16.msra.mxu1 %v13645_v18  ;;  %4145 = vmatprep.mubr.bf16.mxu1 %v16965_v42  ;;  %v4079_v53 = vpop.trf.xlu0 }
0x13b5   : > { %v4080_v26 = vpop.trf.xlu0 }
0x13b8   : > { %9511 = vmatmul.mubr.msk.bf16.vlgmr.msra.gmra.mxu1 %vm901_vm2, %v4073_v56 }
0x13b9   : > { %4155 = vmatprep.mubr.bf16.mxu1 %v16965_v42 }
0x13c0   : > { %9512 = vmatmul.mubr.msk.bf16.gmra.mxu1 %vm901_vm2, %v4074_v8 }
0x13c1   : > { %4165 = vmatprep.mubr.bf16.mxu1 %v16965_v42 }
0x13c8   : > { %9513 = vmatmul.mubr.msk.bf16.gmra.mxu1 %vm901_vm2, %v4075_v3 }
0x13c9   : > { %4175 = vmatprep.mubr.bf16.mxu1 %v16965_v42 }
0x13d0   : > { %9514 = vmatmul.mubr.msk.bf16.gmra.mxu1 %vm901_vm2, %v4076_v13 }
0x13d1   : > { %4185 = vmatprep.mubr.bf16.mxu1 %v16965_v42 }
0x13d8   : > { %9515 = vmatmul.mubr.msk.bf16.gmra.mxu1 %vm901_vm2, %v4077_v37 }
0x13d9   : > { %4195 = vmatprep.mubr.bf16.mxu1 %v16965_v42 }
0x13e0   : > { %9516 = vmatmul.mubr.msk.bf16.gmra.mxu1 %vm901_vm2, %v4078_v63 }
0x13e1   : > { %4205 = vmatprep.mubr.bf16.mxu1 %v16965_v42 }
0x13e8   : > { %9517 = vmatmul.mubr.msk.bf16.gmra.mxu1 %vm901_vm2, %v4079_v53 }
0x13e9   : > { %4215 = vmatprep.mubr.bf16.mxu1 %v16965_v42 }
0x13f0   : > { %9518 = vmatmul.mubr.msk.bf16.gmra.mxu1 %vm901_vm2, %v4080_v26 }
0x140d   : > { %v9749_v7 = vpop.f32.mrf.mxu1 }
0x140e   : > { %v13665_v47 = vadd.f32 %v9749_v7, %v13365_v27 }
0x140f   : > { %v3509_v46 = vpop.f32.mrf.mxu1 }
0x1410   : > { %v13668_v2 = vadd.f32 %v3509_v46, %v13368_v52 }
0x1411   : > { %v9750_v34 = vpop.f32.mrf.mxu1 }
0x1412   : > { %v13671_v10 = vadd.f32 %v9750_v34, %v13371_v20 }
0x1413   : > { %v13673_v38 = vpop.f32.mrf.mxu1 }
0x1414   : > { %16983 = vst [vmem:[#allocation22_spill] sm:$0xff] %v13673_v38 }
0x1470   : > { %v3990_v5 = vpop.f32.mrf.mxu1 }
0x1471   : > { %v3996_v36 = vpack.c.bf16 %v3990_v5, %v3990_v5 }
0x1472   : > { %v3992_v24 = vpop.f32.mrf.mxu1 }
0x1473   : > { %v4008_v6 = vsel %vm926_vm1, %v3996_v36, 0  ;;  %9822 = vmatprep.subr.msk.bf16.mxu0 %vm926_vm1, %v3996_v36 }
0x1474   : > { %v3993_v50 = vpop.f32.mrf.mxu1  ;;  %9752 = vmatpush3.bf16.msra.mxu0 %v4008_v6 }
0x1476   : > { %v3994_v27 = vpop.f32.mrf.mxu1 }
0x1478   : > { %v13677_v14 = vpop.f32.mrf.mxu1 }
0x147a   : > { %v13679_v52 = vpop.f32.mrf.mxu1 }
0x147c   : > { %v13681_v31 = vpop.f32.mrf.mxu1 }
0x147e   : > { %v13683_v20 = vpop.f32.mrf.mxu1 }
0x1480   : > { %v13685_v44 = vpop.f32.mrf.mxu1 }
0x1482   : > { %v13687_v43 = vpop.f32.mrf.mxu1 }
0x1483   : > { %v4232_v23 = vmax.f32 %v13685_v44, %v13687_v43 }
0x1484   : > { %v13691_v33 = vpop.f32.mrf.mxu1 }
0x1485   : > { %4233 = vmax.xlane.f32.xlu0 %v4232_v23 }
0x1486   : > { %v13693_v32 = vpop.f32.mrf.mxu1 }
0x1487   : > { %v4235_v23 = vmax.f32 %v13691_v33, %v13693_v32 }
0x1488   : > { %v13695_v39 = vpop.f32.mrf.mxu1 }
0x148a   : > { %v13697_v28 = vpop.f32.mrf.mxu1 }
0x148b   : > { %v4238_v50 = vmax.f32 %v13695_v39, %v13697_v28 }
0x148c   : > { %v13699_v17 = vpop.f32.mrf.mxu1 }
0x148e   : > { %v13701_v62 = vpop.f32.mrf.mxu1 }
0x148f   : > { %v4241_v27 = vmax.f32 %v13699_v17, %v13701_v62 }
0x1490   : > { %v13703_v16 = vpop.f32.mrf.mxu1 }
0x1492   : > { %v13705_v15 = vpop.f32.mrf.mxu1 }
0x1493   : > { %v4244_v24 = vmax.f32 %v13703_v16, %v13705_v15 }
0x1494   : > { %v13707_v4 = vpop.f32.mrf.mxu1 }
0x1496   : > { %v13709_v55 = vpop.f32.mrf.mxu1 }
0x1497   : > { %v4247_v6 = vmax.f32 %v13707_v4, %v13709_v55 }
0x1498   : > { %v4187_v25 = vpop.f32.mrf.mxu1 }
0x149a   : > { %v4189_v60 = vpop.f32.mrf.mxu1 }
0x149b   : > { %v4250_v5 = vmax.f32 %v4187_v25, %v4189_v60 }
0x149c   : > { %v13711_v45 = vpop.f32.mrf.mxu1 }
0x149e   : > { %v13713_v35 = vpop.f32.mrf.mxu1 }
0x149f   : > { %v4253_v36 = vmax.f32 %v13711_v45, %v13713_v35 }
0x14a0   : > { %v4197_v54 = vpop.f32.mrf.mxu1 }
0x14a2   : > { %v4199_v22 = vpop.f32.mrf.mxu1 }
0x14a3   : > { %v4256_v46 = vmax.f32 %v4197_v54, %v4199_v22 }
0x14a4   : > { %v13715_v30 = vpop.f32.mrf.mxu1 }
0x14a6   : > { %v13717_v9 = vpop.f32.mrf.mxu1 }
0x14a7   : > { %v4259_v34 = vmax.f32 %v13715_v30, %v13717_v9 }
0x14a8   : > { %v13719_v57 = vpop.f32.mrf.mxu1 }
0x14aa   : > { %v13721_v19 = vpop.f32.mrf.mxu1 }
0x14ab   : > { %v4262_v29 = vmax.f32 %v13719_v57, %v13721_v19 }
0x14ac   : > { %v13725_v56 = vpop.f32.mrf.mxu1 }
0x14ad   : > { %4263 = vmax.xlane.f32.xlu1 %v4262_v29  ;;  %v4226_v29 = vmax.f32 %v13677_v14, %v13679_v52 }
0x14ae   : > { %v13727_v8 = vpop.f32.mrf.mxu1 }
0x14af   : > { %v4265_v3 = vmax.f32 %v13725_v56, %v13727_v8 }
0x14b0   : > { %v13731_v13 = vpop.f32.mrf.mxu1 }
0x14b1   : > { %4266 = vmax.xlane.f32.xlu1 %v4265_v3  ;;  %v4229_v3 = vmax.f32 %v13681_v31, %v13683_v20 }
0x14b2   : > { %v13733_v37 = vpop.f32.mrf.mxu1 }
0x14b3   : > { %v4268_v63 = vmax.f32 %v13731_v13, %v13733_v37 }
0x14b4   : > { %v13737_v53 = vpop.f32.mrf.mxu1 }
0x14b5   : > { %4269 = vmax.xlane.f32.xlu1 %v4268_v63 }
0x14b6   : > { %v13739_v26 = vpop.f32.mrf.mxu1 }
0x14b7   : > { %v4271_v7 = vmax.f32 %v13737_v53, %v13739_v26 }
0x14b9   : > { %4272 = vmax.xlane.f32.xlu1 %v4271_v7 }
0x14bd   : > { %4257 = vmax.xlane.f32.xlu1 %v4256_v46 }
0x14c1   : > { %4260 = vmax.xlane.f32.xlu1 %v4259_v34 }
0x14c5   : > { %4251 = vmax.xlane.f32.xlu1 %v4250_v5 }
0x14c9   : > { %4254 = vmax.xlane.f32.xlu1 %v4253_v36 }
0x14cd   : > { %4245 = vmax.xlane.f32.xlu1 %v4244_v24 }
0x14d1   : > { %4248 = vmax.xlane.f32.xlu1 %v4247_v6 }
0x14d5   : > { %4239 = vmax.xlane.f32.xlu1 %v4238_v50 }
0x14d9   : > { %4242 = vmax.xlane.f32.xlu1 %v4241_v27 }
0x14dd   : > { %4236 = vmax.xlane.f32.xlu1 %v4235_v23 }
0x14e1   : > { %4227 = vmax.xlane.f32.xlu1 %v4226_v29 }
0x14e5   : > { %4230 = vmax.xlane.f32.xlu1 %v4229_v3 }
0x1536   : > { %v4264_v63 = vpop.xlane.xlu1 %4263 }
0x153a   : > { %v4267_v7 = vpop.xlane.xlu1 %4266 }
0x153e   : > { %v4270_v46 = vpop.xlane.xlu1 %4269 }
0x1542   : > { %v4273_v34 = vpop.xlane.xlu1 %4272 }
0x1546   : > { %v4258_v5 = vpop.xlane.xlu1 %4257 }
0x1547   : > { %v4294_v24 = vsub.f32 %v4197_v54, %v4258_v5  ;;  %v4295_v6 = vsub.f32 %v4199_v22, %v4258_v5  ;;  %v4298_v54 = vsub.f32 %v13719_v57, %v4264_v63 }
0x1549   : > { %v4346_v23 = vmul.f32 1.442695, %v4294_v24  ;;  %v4348_v38 = vmul.f32 1.442695, %v4295_v6 }
0x154a   : > { %v4261_v36 = vpop.xlane.xlu1 %4260 }
0x154b   : > { %v4296_v58 = vsub.f32 %v13715_v30, %v4261_v36  ;;  %v4297_v18 = vsub.f32 %v13717_v9, %v4261_v36  ;;  %v4299_v30 = vsub.f32 %v13721_v19, %v4264_v63  ;;  %v4354_v9 = vmul.f32 1.442695, %v4298_v54 }
0x154e   : > { %v4252_v50 = vpop.xlane.xlu1 %4251 }
0x154f   : > { %v4290_v27 = vsub.f32 %v4187_v25, %v4252_v50  ;;  %v4291_v51 = vsub.f32 %v4189_v60, %v4252_v50  ;;  %v4350_v25 = vmul.f32 1.442695, %v4296_v58  ;;  %v4302_v58 = vsub.f32 %v13731_v13, %v4270_v46 }
0x1551   : > { %v4338_v1 = vmul.f32 1.442695, %v4290_v27  ;;  %v4340_v29 = vmul.f32 1.442695, %v4291_v51  ;;  %v4352_v51 = vmul.f32 1.442695, %v4297_v18 }
0x1552   : > { %v4255_v3 = vpop.xlane.xlu1 %4254  ;;  %v4362_v19 = vmul.f32 1.442695, %v4302_v58 }
0x1553   : > { %10478 = vpow2.f32 %v4338_v1  ;;  %v4292_v11 = vsub.f32 %v13711_v45, %v4255_v3  ;;  %v4293_v12 = vsub.f32 %v13713_v35, %v4255_v3  ;;  %v4300_v1 = vsub.f32 %v13725_v56, %v4267_v7 }
0x1554   : > { %10480 = vpow2.f32 %v4340_v29  ;;  %v4356_v45 = vmul.f32 1.442695, %v4299_v30  ;;  %v4301_v35 = vsub.f32 %v13727_v8, %v4267_v7  ;;  %v4304_v56 = vsub.f32 %v13737_v53, %v4273_v34 }
0x1555   : > { %10482 = vpow2.f32 %v4346_v23  ;;  %v4342_v60 = vmul.f32 1.442695, %v4292_v11  ;;  %v4344_v22 = vmul.f32 1.442695, %v4293_v12  ;;  %v4358_v57 = vmul.f32 1.442695, %v4300_v1 }
0x1556   : > { %10484 = vpow2.f32 %v4348_v38  ;;  %v4360_v11 = vmul.f32 1.442695, %v4301_v35  ;;  %v4303_v12 = vsub.f32 %v13733_v37, %v4270_v46  ;;  %v4305_v7 = vsub.f32 %v13739_v26, %v4273_v34  ;;  %v13795_v50 = vpop.xlane.xlu1 %4245 }
0x1557   : > { %10486 = vpow2.f32 %v4342_v60  ;;  %v4366_v36 = vmul.f32 1.442695, %v4304_v56 }
0x1558   : > { %10488 = vpow2.f32 %v4344_v22  ;;  %v4364_v8 = vmul.f32 1.442695, %v4303_v12  ;;  %v4368_v53 = vmul.f32 1.442695, %v4305_v7 }
0x1559   : > { %10490 = vpow2.f32 %v4350_v25 }
0x155a   : > { %10492 = vpow2.f32 %v4352_v51  ;;  %v4249_v3 = vpop.xlane.xlu1 %4248 }
0x155b   : > { %10494 = vpow2.f32 %v4354_v9  ;;  %v4288_v12 = vsub.f32 %v13707_v4, %v4249_v3  ;;  %v13834_v4 = vld [vmem:[%s16745_s6] sm:$0xff]  }
0x155c   : > { %10496 = vpow2.f32 %v4356_v45 }
0x155d   : > { %10498 = vpow2.f32 %v4358_v57 }
0x155e   : > { %10500 = vpow2.f32 %v4360_v11  ;;  %v4240_v9 = vpop.xlane.xlu1 %4239 }
0x155f   : > { %10502 = vpow2.f32 %v4362_v19  ;;  %v4289_v19 = vsub.f32 %v13709_v55, %v4249_v3 }
0x1560   : > { %v13771_v38 = vpop.eup %10478  ;;  %10504 = vpow2.f32 %v4364_v8  ;;  %v4334_v8 = vmul.f32 1.442695, %v4288_v12 }
0x1561   : > { %v13773_v18 = vpop.eup %10480  ;;  %10506 = vpow2.f32 %v4366_v36 }
0x1562   : > { %v13776_v63 = vpop.eup %10482  ;;  %v4394_v13 = vadd.f32 %v13773_v18, %v13771_v38  ;;  %10508 = vpow2.f32 %v4368_v53  ;;  %v4243_v57 = vpop.xlane.xlu1 %4242 }
0x1563   : > { %v13781_v5 = vpop.eup %10484  ;;  %v4284_v7 = vsub.f32 %v13699_v17, %v4243_v57  ;;  %v4285_v36 = vsub.f32 %v13701_v62, %v4243_v57  ;;  %10510 = vpow2.f32 %v4334_v8 }
0x1564   : > { %v13783_v37 = vpop.eup %10486  ;;  %4395 = vadd.xlane.f32.xlu1 %v4394_v13  ;;  %v4400_v6 = vadd.f32 %v13781_v5, %v13776_v63  ;;  %v4336_v13 = vmul.f32 1.442695, %v4289_v19  ;;  %v4283_v19 = vsub.f32 %v13697_v28, %v4240_v9 }
0x1565   : > { %v13785_v46 = vpop.eup %10488  ;;  %v4326_v53 = vmul.f32 1.442695, %v4284_v7 }
0x1566   : > { %v13787_v24 = vpop.eup %10490  ;;  %v4397_v26 = vadd.f32 %v13785_v46, %v13783_v37  ;;  %v4237_v11 = vpop.xlane.xlu1 %4236  ;;  %10512 = vpow2.f32 %v4336_v13  ;;  %v4324_v13 = vmul.f32 1.442695, %v4283_v19 }
0x1567   : > { %v13793_v34 = vpop.eup %10492  ;;  %10514 = vpow2.f32 %v4326_v53 }
0x1568   : > { %4401 = vadd.xlane.f32.xlu1 %v4400_v6  ;;  %4398 = vadd.xlane.f32.xlu0 %v4397_v26  ;;  %v13797_v27 = vpop.eup %10494  ;;  %v4403_v23 = vadd.f32 %v13793_v34, %v13787_v24  ;;  %v4280_v6 = vsub.f32 %v13691_v33, %v4237_v11  ;;  %v4328_v26 = vmul.f32 1.442695, %v4285_v36 }
0x1569   : > { %v13801_v29 = vpop.eup %10496 }
0x156a   : > { %v13803_v54 = vpop.eup %10498  ;;  %v4406_v25 = vadd.f32 %v13801_v29, %v13797_v27  ;;  %v4228_v56 = vpop.xlane.xlu1 %4227  ;;  %v4318_v17 = vmul.f32 1.442695, %v4280_v6  ;;  %10516 = vpow2.f32 %v4328_v26 }
0x156b   : > { %v13807_v60 = vpop.eup %10500  ;;  %v4274_v53 = vsub.f32 %v13677_v14, %v4228_v56  ;;  %v4275_v26 = vsub.f32 %v13679_v52, %v4228_v56 }
0x156c   : > { %4404 = vadd.xlane.f32.xlu1 %v4403_v23  ;;  %v13809_v22 = vpop.eup %10502  ;;  %v4409_v30 = vadd.f32 %v13807_v60, %v13803_v54  ;;  %10518 = vpow2.f32 %v4318_v17 }
0x156d   : > { %v13813_v51 = vpop.eup %10504  ;;  %v4308_v17 = vmul.f32 1.442695, %v4275_v26  ;;  %v16818_v26 = vrot.slane %v13319_v41, 4 }
0x156e   : > { %v13815_v1 = vpop.eup %10506  ;;  %v4412_v45 = vadd.f32 %v13813_v51, %v13809_v22  ;;  %v4231_v23 = vpop.xlane.xlu1 %4230 }
0x156f   : > { %v13819_v35 = vpop.eup %10508  ;;  %v4276_v62 = vsub.f32 %v13681_v31, %v4231_v23  ;;  %v4277_v33 = vsub.f32 %v13683_v20, %v4231_v23  ;;  %v4306_v23 = vmul.f32 1.442695, %v4274_v53 }
0x1570   : > { %4407 = vadd.xlane.f32.xlu1 %v4406_v25  ;;  %v4415_v58 = vadd.f32 %v13819_v35, %v13815_v1  ;;  %v4286_v25 = vsub.f32 %v13703_v16, %v13795_v50 }
0x1571   : > { %v4310_v3 = vmul.f32 1.442695, %v4276_v62 }
0x1572   : > { %v4330_v31 = vmul.f32 1.442695, %v4286_v25 }
0x1574   : > { %4410 = vadd.xlane.f32.xlu1 %v4409_v30  ;;  %v13842_v30 = vpop.eup %10510 }
0x1575   : > { %v13846_v57 = vpop.eup %10512 }
0x1576   : > { %v13849_v20 = vpop.eup %10514  ;;  %v4391_v16 = vadd.f32 %v13846_v57, %v13842_v30 }
0x1577   : > { %v13854_v8 = vpop.eup %10516 }
0x1578   : > { %4413 = vadd.xlane.f32.xlu1 %v4412_v45  ;;  %v4287_v45 = vsub.f32 %v13705_v15, %v13795_v50  ;;  %v4385_v36 = vadd.f32 %v13854_v8, %v13849_v20 }
0x1579   : > { %v13857_v7 = vpop.eup %10518 }
0x157a   : > { %v4332_v12 = vmul.f32 1.442695, %v4287_v45 }
0x157c   : > { %4416 = vadd.xlane.f32.xlu1 %v4415_v58  ;;  %v4282_v58 = vsub.f32 %v13695_v39, %v4240_v9 }
0x157e   : > { %3999 = vrot.lane.b32.xlu0 %v13528_v21, %s11527_s18  ;;  %v4281_v21 = vsub.f32 %v13693_v32, %v4237_v11  ;;  %v4312_v32 = vmul.f32 1.442695, %v4277_v33  ;;  %v4234_v11 = vpop.xlane.xlu0 %4233  ;;  %v4322_v50 = vmul.f32 1.442695, %v4282_v58 }
0x157f   : > { %v4278_v15 = vsub.f32 %v13685_v44, %v4234_v11  ;;  %v4279_v39 = vsub.f32 %v13687_v43, %v4234_v11 }
0x1580   : > { %v4320_v55 = vmul.f32 1.442695, %v4281_v21 }
0x1581   : > { %v4314_v9 = vmul.f32 1.442695, %v4278_v15  ;;  %v4316_v44 = vmul.f32 1.442695, %v4279_v39 }
0x1582   : > { %10520 = vpow2.f32 %v4320_v55 }
0x1583   : > { %10522 = vpow2.f32 %v4310_v3 }
0x1584   : > { %10524 = vpow2.f32 %v4312_v32 }
0x1585   : > { %10526 = vpow2.f32 %v4330_v31 }
0x1586   : > { %10528 = vpow2.f32 %v4332_v12  ;;  %v4593_v12 = vrot.slane %v13002_v48, 6 }
0x1587   : > { %10530 = vpow2.f32 %v4322_v50 }
0x1588   : > { %10532 = vpow2.f32 %v4324_v13 }
0x1589   : > { %10534 = vpow2.f32 %v4314_v9 }
0x158a   : > { %10536 = vpow2.f32 %v4316_v44 }
0x158b   : > { %10538 = vpow2.f32 %v4306_v23 }
0x158c   : > { %10540 = vpow2.f32 %v4308_v17 }
0x158d   : > { %3997 = vrot.lane.b32.xlu1 %v13834_v4, %s11527_s18 }
0x158f   : > { %v13862_v28 = vpop.eup %10520 }
0x1590   : > { %v13865_v6 = vpop.eup %10522  ;;  %v4379_v43 = vadd.f32 %v13862_v28, %v13857_v7 }
0x1591   : > { %v13870_v21 = vpop.eup %10524 }
0x1592   : > { %v4373_v62 = vadd.f32 %v13870_v21, %v13865_v6  ;;  %v13874_v14 = vpop.eup %10526 }
0x1593   : > { %v13876_v55 = vpop.eup %10528 }
0x1594   : > { %v13878_v52 = vpop.eup %10530  ;;  %v4388_v56 = vadd.f32 %v13876_v55, %v13874_v14 }
0x1595   : > { %v13882_v33 = vpop.eup %10532 }
0x1596   : > { %v13884_v3 = vpop.eup %10534  ;;  %v4382_v32 = vadd.f32 %v13882_v33, %v13878_v52 }
0x1597   : > { %v13888_v25 = vpop.eup %10536 }
0x1598   : > { %v13890_v45 = vpop.eup %10538  ;;  %v4376_v31 = vadd.f32 %v13888_v25, %v13884_v3 }
0x1599   : > { %v13894_v58 = vpop.eup %10540 }
0x159a   : > { %v4370_v11 = vadd.f32 %v13894_v58, %v13890_v45 }
0x159d   : > { %4392 = vadd.xlane.f32.xlu0 %v4391_v16 }
0x15a1   : > { %4386 = vadd.xlane.f32.xlu0 %v4385_v36 }
0x15a5   : > { %4380 = vadd.xlane.f32.xlu0 %v4379_v43 }
0x15a9   : > { %4374 = vadd.xlane.f32.xlu0 %v4373_v62 }
0x15b1   : > { %4389 = vadd.xlane.f32.xlu1 %v4388_v56 }
0x15b5   : > { %4383 = vadd.xlane.f32.xlu1 %v4382_v32 }
0x15b9   : > { %4377 = vadd.xlane.f32.xlu1 %v4376_v31 }
0x15bd   : > { %4371 = vadd.xlane.f32.xlu1 %v4370_v11 }
0x15ea   : > { %4595 = vxpose.xlu1.c.b16.start.end [1/1] (short) %v4593_v12, 128 }
0x15ed   : > { %v4396_v19 = vpop.xlane.xlu1 %4395 }
0x15f1   : > { %v4402_v16 = vpop.xlane.xlu1 %4401  ;;  %v4399_v9 = vpop.xlane.xlu0 %4398 }
0x15f5   : > { %v4405_v15 = vpop.xlane.xlu1 %4404  ;;  %v4000_v44 = vpop.permute.xlu0 %3999 }
0x15f9   : > { %v4408_v50 = vpop.xlane.xlu1 %4407 }
0x15fd   : > { %v4411_v39 = vpop.xlane.xlu1 %4410 }
0x15fe   : > { %10542 = vrcp.f32 %v4411_v39 }
0x1601   : > { %v4414_v13 = vpop.xlane.xlu1 %4413 }
0x1602   : > { %10544 = vrcp.f32 %v4414_v13 }
0x1603   : > { %10546 = vrcp.f32 %v4408_v50 }
0x1605   : > { %v4417_v36 = vpop.xlane.xlu1 %4416 }
0x1606   : > { %10548 = vrcp.f32 %v4417_v36 }
0x1607   : > { %10550 = vrcp.f32 %v4405_v15 }
0x1608   : > { %10552 = vrcp.f32 %v4402_v16 }
0x1609   : > { %v3998_v53 = vpop.permute.xlu1 %3997  ;;  %10554 = vrcp.f32 %v4399_v9 }
0x160a   : > { %9753 = vmatprep.mubr.msk.bf16.mxu0 %vm901_vm2, %v3998_v53  ;;  %10556 = vrcp.f32 %v4396_v19 }
0x160b   : > { %9754 = vmatmul.mubr.msk.bf16.vlgmr.msra.gmra.mxu0 %vm901_vm2, %v4000_v44  ;;  %v10543_v48 = vpop.eup %10542 }
0x160c   : > { %4518 = vmatprep.mubr.bf16.mxu0 %v16818_v26  ;;  %v4461_v62 = vmul.f32 %v10543_v48, %v13807_v60  ;;  %v4460_v60 = vmul.f32 %v10543_v48, %v13803_v54 }
0x160f   : > { %v10545_v43 = vpop.eup %10544 }
0x1610   : > { %v10547_v23 = vpop.eup %10546  ;;  %v4463_v56 = vmul.f32 %v10545_v43, %v13813_v51  ;;  %v4462_v31 = vmul.f32 %v10545_v43, %v13809_v22 }
0x1611   : > { %v4459_v16 = vmul.f32 %v10547_v23, %v13801_v29 }
0x1613   : > { %v10549_v17 = vpop.eup %10548  ;;  %v4479_v50 = vpack.c.bf16 %v4461_v62, %v4459_v16 }
0x1614   : > { %v4465_v32 = vmul.f32 %v10549_v17, %v13819_v35  ;;  %v4464_v11 = vmul.f32 %v10549_v17, %v13815_v1  ;;  %v10551_v39 = vpop.eup %10550  ;;  %v4458_v35 = vmul.f32 %v10547_v23, %v13797_v27 }
0x1615   : > { %v10553_v13 = vpop.eup %10552  ;;  %v4457_v51 = vmul.f32 %v10551_v39, %v13793_v34  ;;  %v4456_v9 = vmul.f32 %v10551_v39, %v13787_v24 }
0x1616   : > { %v4481_v12 = vpack.c.bf16 %v4465_v32, %v4463_v56  ;;  %v4480_v15 = vpack.c.bf16 %v4464_v11, %v4462_v31  ;;  %v4455_v22 = vmul.f32 %v10553_v13, %v13781_v5  ;;  %v4478_v1 = vpack.c.bf16 %v4460_v60, %v4458_v35  ;;  %v10555_v19 = vpop.eup %10554 }
0x1617   : > { %v10557_v29 = vpop.eup %10556  ;;  %v4453_v53 = vmul.f32 %v10555_v19, %v13785_v46  ;;  %v4454_v44 = vmul.f32 %v10553_v13, %v13776_v63  ;;  %v4452_v5 = vmul.f32 %v10555_v19, %v13783_v37 }
0x1618   : > { %4486 = vmatprep.subr.bf16.mxu0 %v4481_v12  ;;  %v4477_v36 = vpack.c.bf16 %v4457_v51, %v4455_v22  ;;  %v4451_v54 = vmul.f32 %v10557_v29, %v13773_v18  ;;  %v4450_v27 = vmul.f32 %v10557_v29, %v13771_v38 }
0x1619   : > { %4487 = vmatpush1.bf16.xpose.msra.mxu0 %v4480_v15  ;;  %v4476_v48 = vpack.c.bf16 %v4456_v9, %v4454_v44 }
0x161a   : > { %4488 = vmatprep.subr.bf16.mxu0 %v4479_v50  ;;  %v4475_v34 = vpack.c.bf16 %v4453_v53, %v4451_v54  ;;  %v4474_v43 = vpack.c.bf16 %v4452_v5, %v4450_v27  ;;  %v16817_v54 = vrot.slane %v13020_v40, 6 }
0x1621   : > { %4489 = vmatpush1.bf16.xpose.msra.mxu0 %v4478_v1 }
0x1622   : > { %4490 = vmatprep.subr.bf16.mxu0 %v4477_v36 }
0x1626   : > { %v4393_v23 = vpop.xlane.xlu0 %4392 }
0x1627   : > { %10558 = vrcp.f32 %v4393_v23 }
0x1629   : > { %4491 = vmatpush1.bf16.xpose.msra.mxu0 %v4476_v48 }
0x162a   : > { %4492 = vmatprep.subr.bf16.mxu0 %v4475_v34  ;;  %v4387_v17 = vpop.xlane.xlu0 %4386 }
0x162e   : > { %v4381_v63 = vpop.xlane.xlu0 %4380 }
0x1631   : > { %4493 = vmatpush1.bf16.xpose.msra.mxu0 %v4474_v43 }
0x1632   : > { %v4375_v37 = vpop.xlane.xlu0 %4374 }
0x1634   : > { %v10559_v62 = vpop.eup %10558 }
0x1635   : > { %v4449_v38 = vmul.f32 %v10559_v62, %v13846_v57  ;;  %v4448_v12 = vmul.f32 %v10559_v62, %v13842_v30 }
0x163a   : > { %v4390_v24 = vpop.xlane.xlu1 %4389 }
0x163b   : > { %10560 = vrcp.f32 %v4390_v24 }
0x163c   : > { %10562 = vrcp.f32 %v4387_v17 }
0x163e   : > { %v4384_v46 = vpop.xlane.xlu1 %4383 }
0x163f   : > { %10564 = vrcp.f32 %v4384_v46 }
0x1640   : > { %10566 = vrcp.f32 %v4381_v63 }
0x1642   : > { %v4378_v18 = vpop.xlane.xlu1 %4377 }
0x1643   : > { %10568 = vrcp.f32 %v4378_v18 }
0x1646   : > { %v4372_v56 = vpop.xlane.xlu1 %4371 }
0x1647   : > { %10570 = vrcp.f32 %v4372_v56 }
0x1648   : > { %v10561_v32 = vpop.eup %10560  ;;  %10572 = vrcp.f32 %v4375_v37 }
0x1649   : > { %v4447_v31 = vmul.f32 %v10561_v32, %v13876_v55  ;;  %v4446_v11 = vmul.f32 %v10561_v32, %v13874_v14  ;;  %v10563_v15 = vpop.eup %10562 }
0x164a   : > { %v4445_v60 = vmul.f32 %v10563_v15, %v13854_v8  ;;  %v4444_v30 = vmul.f32 %v10563_v15, %v13849_v20 }
0x164b   : > { %v4473_v16 = vpack.c.bf16 %v4449_v38, %v4447_v31  ;;  %v4472_v50 = vpack.c.bf16 %v4448_v12, %v4446_v11 }
0x164c   : > { %v10565_v39 = vpop.eup %10564 }
0x164d   : > { %4494 = vmatprep.subr.bf16.mxu0 %v4473_v16  ;;  %v4443_v13 = vmul.f32 %v10565_v39, %v13882_v33  ;;  %v10567_v51 = vpop.eup %10566  ;;  %v4442_v55 = vmul.f32 %v10565_v39, %v13878_v52 }
0x164e   : > { %4495 = vmatpush1.bf16.xpose.msra.mxu0 %v4472_v50  ;;  %v4441_v22 = vmul.f32 %v10567_v51, %v13862_v28  ;;  %v4440_v9 = vmul.f32 %v10567_v51, %v13857_v7  ;;  %v4611_v7 = vrot.slane %v13025_v0, 6 }
0x164f   : > { %v4471_v57 = vpack.c.bf16 %v4445_v60, %v4443_v13  ;;  %v4470_v1 = vpack.c.bf16 %v4444_v30, %v4442_v55 }
0x1650   : > { %v10569_v35 = vpop.eup %10568 }
0x1651   : > { %4496 = vmatprep.subr.bf16.mxu0 %v4471_v57  ;;  %v4439_v14 = vmul.f32 %v10569_v35, %v13888_v25  ;;  %v4438_v8 = vmul.f32 %v10569_v35, %v13884_v3  ;;  %v13945_v3 = vsel %vm926_vm1, %v4611_v7, 0 }
0x1652   : > { %16984 = vst [vmem:[#allocation27_spill] sm:$0xff] %v13945_v3 }
0x1653   : > { %v4469_v19 = vpack.c.bf16 %v4441_v22, %v4439_v14  ;;  %v4468_v53 = vpack.c.bf16 %v4440_v9, %v4438_v8 }
0x1654   : > { %v10571_v36 = vpop.eup %10570 }
0x1655   : > { %v10573_v33 = vpop.eup %10572  ;;  %v4435_v29 = vmul.f32 %v10571_v36, %v13894_v58  ;;  %v4434_v20 = vmul.f32 %v10571_v36, %v13890_v45 }
0x1656   : > { %4497 = vmatpush1.bf16.xpose.msra.mxu0 %v4470_v1  ;;  %v4437_v52 = vmul.f32 %v10573_v33, %v13870_v21  ;;  %v4436_v28 = vmul.f32 %v10573_v33, %v13865_v6  ;;  %v16816_v21 = vrot.slane %v13341_v61, 4  ;;  %v4603_v6 = vpop.trf.xlu1 }
0x1657   : > { %4498 = vmatprep.subr.bf16.mxu0 %v4469_v19 }
0x1658   : > { %v4467_v25 = vpack.c.bf16 %v4437_v52, %v4435_v29  ;;  %v4466_v44 = vpack.c.bf16 %v4436_v28, %v4434_v20 }
0x165a   : > { %v4604_v45 = vpop.trf.xlu1 }
0x165e   : > { %4499 = vmatpush1.bf16.xpose.msra.mxu0 %v4468_v53  ;;  %v4605_v0 = vpop.trf.xlu1 }
0x165f   : > { %4500 = vmatprep.subr.bf16.mxu0 %v4467_v25 }
0x1662   : > { %v4606_v58 = vpop.trf.xlu1 }
0x1666   : > { %4501 = vmatpush1.bf16.xpose.msra.mxu0 %v4466_v44  ;;  %v4607_v48 = vpop.trf.xlu1 }
0x1667   : > { %9521 = vmatprep.subr.msk.bf16.mxu0 %vm926_vm1, %v16817_v54 }
0x166a   : > { %v4608_v34 = vpop.trf.xlu1 }
0x166d   : > { %4519 = vmatmul.mubr.bf16.vlgmr.msra.gmra.mxu0 %v16816_v21 }
0x166e   : > { %4658 = vmatpush1.bf16.msra.mxu0 %v13945_v3  ;;  %4675 = vmatprep.mubr.bf16.mxu0 %v16965_v42  ;;  %v4609_v5 = vpop.trf.xlu1 }
0x1672   : > { %v4610_v27 = vpop.trf.xlu1 }
0x1675   : > { %9522 = vmatmul.mubr.msk.bf16.vlgmr.msra.gmra.mxu0 %vm901_vm2, %v4603_v6 }
0x1676   : > { %4685 = vmatprep.mubr.bf16.mxu0 %v16965_v42 }
0x167d   : > { %9523 = vmatmul.mubr.msk.bf16.gmra.mxu0 %vm901_vm2, %v4604_v45 }
0x167e   : > { %4695 = vmatprep.mubr.bf16.mxu0 %v16965_v42 }
0x1685   : > { %9524 = vmatmul.mubr.msk.bf16.gmra.mxu0 %vm901_vm2, %v4605_v0 }
0x1686   : > { %4705 = vmatprep.mubr.bf16.mxu0 %v16965_v42 }
0x168d   : > { %9525 = vmatmul.mubr.msk.bf16.gmra.mxu0 %vm901_vm2, %v4606_v58 }
0x168e   : > { %4715 = vmatprep.mubr.bf16.mxu0 %v16965_v42 }
0x1695   : > { %9526 = vmatmul.mubr.msk.bf16.gmra.mxu0 %vm901_vm2, %v4607_v48 }
0x1696   : > { %4725 = vmatprep.mubr.bf16.mxu0 %v16965_v42 }
0x169d   : > { %9527 = vmatmul.mubr.msk.bf16.gmra.mxu0 %vm901_vm2, %v4608_v34 }
0x169e   : > { %4735 = vmatprep.mubr.bf16.mxu0 %v16965_v42 }
0x16a5   : > { %9528 = vmatmul.mubr.msk.bf16.gmra.mxu0 %vm901_vm2, %v4609_v5 }
0x16a6   : > { %4745 = vmatprep.mubr.bf16.mxu0 %v16965_v42 }
0x16ad   : > { %9529 = vmatmul.mubr.msk.bf16.gmra.mxu0 %vm901_vm2, %v4610_v27 }
0x16cb   : > { %v9755_v43 = vpop.f32.mrf.mxu0 }
0x16cc   : > { %v13965_v23 = vadd.f32 %v9755_v43, %v13665_v47 }
0x16cd   : > { %v4044_v17 = vpop.f32.mrf.mxu0 }
0x16ce   : > { %v13968_v24 = vadd.f32 %v4044_v17, %v13668_v2 }
0x16cf   : > { %v9756_v46 = vpop.f32.mrf.mxu0 }
0x16d0   : > { %v13971_v63 = vadd.f32 %v9756_v46, %v13671_v10 }
0x16d1   : > { %v13973_v18 = vpop.f32.mrf.mxu0 }
0x16d2   : > { %16985 = vst [vmem:[#allocation26_spill] sm:$0xff] %v13973_v18 }
0x172d   : > { %v4520_v62 = vpop.f32.mrf.mxu0 }
0x172e   : > { %v4526_v56 = vpack.c.bf16 %v4520_v62, %v4520_v62 }
0x172f   : > { %v4522_v32 = vpop.f32.mrf.mxu0 }
0x1730   : > { %v4538_v37 = vsel %vm926_vm1, %v4526_v56, 0  ;;  %9823 = vmatprep.subr.msk.bf16.mxu1 %vm926_vm1, %v4526_v56 }
0x1731   : > { %v4523_v38 = vpop.f32.mrf.mxu0  ;;  %9758 = vmatpush3.bf16.msra.mxu1 %v4538_v37 }
0x1733   : > { %v4524_v47 = vpop.f32.mrf.mxu0 }
0x1735   : > { %v13977_v31 = vpop.f32.mrf.mxu0 }
0x1737   : > { %v13979_v2 = vpop.f32.mrf.mxu0 }
0x1738   : > { %v4756_v37 = vmax.f32 %v13977_v31, %v13979_v2 }
0x1739   : > { %v13981_v11 = vpop.f32.mrf.mxu0 }
0x173b   : > { %v13983_v10 = vpop.f32.mrf.mxu0 }
0x173c   : > { %v4759_v38 = vmax.f32 %v13981_v11, %v13983_v10 }
0x173d   : > { %v13985_v12 = vpop.f32.mrf.mxu0 }
0x173f   : > { %v13987_v15 = vpop.f32.mrf.mxu0 }
0x1740   : > { %v4762_v56 = vmax.f32 %v13985_v12, %v13987_v15 }
0x1741   : > { %v13989_v16 = vpop.f32.mrf.mxu0 }
0x1743   : > { %v13991_v50 = vpop.f32.mrf.mxu0 }
0x1744   : > { %v4765_v32 = vmax.f32 %v13989_v16, %v13991_v50 }
0x1745   : > { %v13993_v39 = vpop.f32.mrf.mxu0 }
0x1747   : > { %v13995_v13 = vpop.f32.mrf.mxu0 }
0x1748   : > { %v4768_v62 = vmax.f32 %v13993_v39, %v13995_v13 }
0x1749   : > { %v13997_v60 = vpop.f32.mrf.mxu0 }
0x174b   : > { %v13999_v51 = vpop.f32.mrf.mxu0 }
0x174c   : > { %v4771_v57 = vmax.f32 %v13997_v60, %v13999_v51 }
0x174d   : > { %v14003_v35 = vpop.f32.mrf.mxu0 }
0x174e   : > { %4772 = vmax.xlane.f32.xlu1 %v4771_v57 }
0x174f   : > { %v14005_v55 = vpop.f32.mrf.mxu0 }
0x1750   : > { %v4774_v17 = vmax.f32 %v14003_v35, %v14005_v55 }
0x1751   : > { %v14007_v14 = vpop.f32.mrf.mxu0 }
0x1753   : > { %v14009_v30 = vpop.f32.mrf.mxu0 }
0x1754   : > { %v4777_v46 = vmax.f32 %v14007_v14, %v14009_v30 }
0x1755   : > { %v4717_v22 = vpop.f32.mrf.mxu0 }
0x1757   : > { %v4719_v1 = vpop.f32.mrf.mxu0 }
0x1758   : > { %v4780_v27 = vmax.f32 %v4717_v22, %v4719_v1 }
0x1759   : > { %v14011_v19 = vpop.f32.mrf.mxu0 }
0x175b   : > { %v14013_v36 = vpop.f32.mrf.mxu0 }
0x175c   : > { %v4783_v43 = vmax.f32 %v14011_v19, %v14013_v36 }
0x175d   : > { %v4727_v33 = vpop.f32.mrf.mxu0 }
0x175f   : > { %v4729_v8 = vpop.f32.mrf.mxu0 }
0x1760   : > { %v4786_v34 = vmax.f32 %v4727_v33, %v4729_v8 }
0x1761   : > { %v14015_v29 = vpop.f32.mrf.mxu0 }
0x1763   : > { %v14017_v9 = vpop.f32.mrf.mxu0 }
0x1764   : > { %v4789_v5 = vmax.f32 %v14015_v29, %v14017_v9 }
0x1765   : > { %v14019_v52 = vpop.f32.mrf.mxu0 }
0x1767   : > { %v14021_v53 = vpop.f32.mrf.mxu0 }
0x1768   : > { %v4792_v25 = vmax.f32 %v14019_v52, %v14021_v53 }
0x1769   : > { %v14025_v20 = vpop.f32.mrf.mxu0 }
0x176a   : > { %4793 = vmax.xlane.f32.xlu0 %v4792_v25 }
0x176b   : > { %v14027_v28 = vpop.f32.mrf.mxu0 }
0x176c   : > { %v4795_v44 = vmax.f32 %v14025_v20, %v14027_v28 }
0x176d   : > { %v14031_v7 = vpop.f32.mrf.mxu0 }
0x176e   : > { %4796 = vmax.xlane.f32.xlu0 %v4795_v44 }
0x176f   : > { %v14033_v6 = vpop.f32.mrf.mxu0 }
0x1770   : > { %v4798_v45 = vmax.f32 %v14031_v7, %v14033_v6 }
0x1771   : > { %v14037_v0 = vpop.f32.mrf.mxu0 }
0x1772   : > { %4799 = vmax.xlane.f32.xlu0 %v4798_v45 }
0x1773   : > { %v14039_v58 = vpop.f32.mrf.mxu0 }
0x1774   : > { %v4801_v48 = vmax.f32 %v14037_v0, %v14039_v58 }
0x1776   : > { %4802 = vmax.xlane.f32.xlu0 %v4801_v48 }
0x177a   : > { %4787 = vmax.xlane.f32.xlu0 %v4786_v34 }
0x177e   : > { %4790 = vmax.xlane.f32.xlu0 %v4789_v5 }
0x1782   : > { %4781 = vmax.xlane.f32.xlu0 %v4780_v27 }
0x1786   : > { %4784 = vmax.xlane.f32.xlu0 %v4783_v43 }
0x178a   : > { %4775 = vmax.xlane.f32.xlu0 %v4774_v17 }
0x178e   : > { %4778 = vmax.xlane.f32.xlu0 %v4777_v46 }
0x1792   : > { %4769 = vmax.xlane.f32.xlu0 %v4768_v62 }
0x1796   : > { %4763 = vmax.xlane.f32.xlu0 %v4762_v56 }
0x179a   : > { %4766 = vmax.xlane.f32.xlu0 %v4765_v32 }
0x179e   : > { %4757 = vmax.xlane.f32.xlu0 %v4756_v37 }
0x17a2   : > { %4760 = vmax.xlane.f32.xlu0 %v4759_v38 }
0x17f3   : > { %v4794_v47 = vpop.xlane.xlu0 %4793 }
0x17f7   : > { %v4797_v57 = vpop.xlane.xlu0 %4796 }
0x17fb   : > { %v4800_v25 = vpop.xlane.xlu0 %4799 }
0x17ff   : > { %v4803_v44 = vpop.xlane.xlu0 %4802 }
0x1803   : > { %v4788_v45 = vpop.xlane.xlu0 %4787 }
0x1804   : > { %v4824_v34 = vsub.f32 %v4727_v33, %v4788_v45  ;;  %v4825_v5 = vsub.f32 %v4729_v8, %v4788_v45  ;;  %v4828_v33 = vsub.f32 %v14019_v52, %v4794_v47 }
0x1806   : > { %v4876_v46 = vmul.f32 1.442695, %v4824_v34  ;;  %v4878_v37 = vmul.f32 1.442695, %v4825_v5  ;;  %v4832_v34 = vsub.f32 %v14031_v7, %v4800_v25 }
0x1807   : > { %v4791_v48 = vpop.xlane.xlu0 %4790 }
0x1808   : > { %v4826_v62 = vsub.f32 %v14015_v29, %v4791_v48  ;;  %v4827_v21 = vsub.f32 %v14017_v9, %v4791_v48  ;;  %v4829_v29 = vsub.f32 %v14021_v53, %v4794_v47  ;;  %v4884_v9 = vmul.f32 1.442695, %v4828_v33 }
0x1809   : > { %v4830_v48 = vsub.f32 %v14025_v20, %v4797_v57  ;;  %v4892_v47 = vmul.f32 1.442695, %v4832_v34  ;;  %v4834_v20 = vsub.f32 %v14037_v0, %v4803_v44  ;;  %v11443_v34 = vld [vmem:[%s16745_s6 + $0x8] sm:$0xff]  }
0x180a   : > { %v4882_v45 = vmul.f32 1.442695, %v4827_v21 }
0x180b   : > { %v4782_v27 = vpop.xlane.xlu0 %4781  ;;  %v4888_v52 = vmul.f32 1.442695, %v4830_v48 }
0x180c   : > { %v4820_v43 = vsub.f32 %v4717_v22, %v4782_v27  ;;  %v4821_v17 = vsub.f32 %v4719_v1, %v4782_v27  ;;  %v4880_v22 = vmul.f32 1.442695, %v4826_v62 }
0x180e   : > { %v4868_v56 = vmul.f32 1.442695, %v4820_v43  ;;  %v4870_v32 = vmul.f32 1.442695, %v4821_v17  ;;  %v4896_v43 = vmul.f32 1.442695, %v4834_v20  ;;  %v4773_v20 = vpop.xlane.xlu1 %4772 }
0x180f   : > { %v4785_v38 = vpop.xlane.xlu0 %4784 }
0x1810   : > { %10574 = vpow2.f32 %v4868_v56  ;;  %v4822_v54 = vsub.f32 %v14011_v19, %v4785_v38  ;;  %v4823_v26 = vsub.f32 %v14013_v36, %v4785_v38  ;;  %v4886_v19 = vmul.f32 1.442695, %v4829_v29 }
0x1811   : > { %10576 = vpow2.f32 %v4870_v32  ;;  %v4831_v36 = vsub.f32 %v14027_v28, %v4797_v57  ;;  %v4835_v57 = vsub.f32 %v14039_v58, %v4803_v44 }
0x1812   : > { %10578 = vpow2.f32 %v4876_v46  ;;  %v4872_v1 = vmul.f32 1.442695, %v4822_v54  ;;  %v4874_v8 = vmul.f32 1.442695, %v4823_v26  ;;  %v4833_v54 = vsub.f32 %v14033_v6, %v4800_v25 }
0x1813   : > { %10580 = vpow2.f32 %v4878_v37  ;;  %v4890_v26 = vmul.f32 1.442695, %v4831_v36  ;;  %v4898_v0 = vmul.f32 1.442695, %v4835_v57  ;;  %v4776_v62 = vpop.xlane.xlu0 %4775 }
0x1814   : > { %10582 = vpow2.f32 %v4872_v1  ;;  %v4894_v28 = vmul.f32 1.442695, %v4833_v54 }
0x1815   : > { %10584 = vpow2.f32 %v4874_v8 }
0x1816   : > { %10586 = vpow2.f32 %v4880_v22 }
0x1817   : > { %10588 = vpow2.f32 %v4882_v45  ;;  %v4779_v38 = vpop.xlane.xlu0 %4778 }
0x1818   : > { %10590 = vpow2.f32 %v4884_v9 }
0x1819   : > { %10592 = vpow2.f32 %v4886_v19 }
0x181a   : > { %10594 = vpow2.f32 %v4888_v52 }
0x181b   : > { %10596 = vpow2.f32 %v4890_v26  ;;  %v4770_v9 = vpop.xlane.xlu0 %4769 }
0x181c   : > { %10598 = vpow2.f32 %v4892_v47  ;;  %v4816_v47 = vsub.f32 %v14003_v35, %v4776_v62 }
0x181d   : > { %v14071_v53 = vpop.eup %10574  ;;  %10600 = vpow2.f32 %v4894_v28  ;;  %v4817_v28 = vsub.f32 %v14005_v55, %v4776_v62 }
0x181e   : > { %v14073_v21 = vpop.eup %10576  ;;  %10602 = vpow2.f32 %v4896_v43  ;;  %v4860_v43 = vmul.f32 1.442695, %v4816_v47 }
0x181f   : > { %v14076_v5 = vpop.eup %10578  ;;  %v4924_v7 = vadd.f32 %v14073_v21, %v14071_v53  ;;  %10604 = vpow2.f32 %v4898_v0  ;;  %v4764_v52 = vpop.xlane.xlu0 %4763  ;;  %v4815_v0 = vsub.f32 %v13999_v51, %v4773_v20 }
0x1820   : > { %v14081_v27 = vpop.eup %10580  ;;  %10606 = vpow2.f32 %v4860_v43 }
0x1821   : > { %v14083_v6 = vpop.eup %10582  ;;  %4925 = vadd.xlane.f32.xlu0 %v4924_v7  ;;  %v4930_v46 = vadd.f32 %v14081_v27, %v14076_v5  ;;  %v4814_v7 = vsub.f32 %v13997_v60, %v4773_v20 }
0x1822   : > { %v14085_v25 = vpop.eup %10584 }
0x1823   : > { %v14087_v17 = vpop.eup %10586  ;;  %v4927_v58 = vadd.f32 %v14085_v25, %v14083_v6  ;;  %v4767_v54 = vpop.xlane.xlu0 %4766 }
0x1824   : > { %v14093_v44 = vpop.eup %10588 }
0x1825   : > { %4931 = vadd.xlane.f32.xlu0 %v4930_v46  ;;  %4928 = vadd.xlane.f32.xlu1 %v4927_v58  ;;  %v14095_v56 = vpop.eup %10590  ;;  %v4933_v32 = vadd.f32 %v14093_v44, %v14087_v17  ;;  %v4862_v46 = vmul.f32 1.442695, %v4817_v28  ;;  %v4856_v58 = vmul.f32 1.442695, %v4814_v7 }
0x1826   : > { %v14099_v37 = vpop.eup %10592 }
0x1827   : > { %v14101_v33 = vpop.eup %10594  ;;  %v4936_v22 = vadd.f32 %v14099_v37, %v14095_v56  ;;  %v4758_v57 = vpop.xlane.xlu0 %4757  ;;  %10608 = vpow2.f32 %v4862_v46 }
0x1828   : > { %v14105_v1 = vpop.eup %10596  ;;  %10610 = vpow2.f32 %v4856_v58  ;;  %v4804_v46 = vsub.f32 %v13977_v31, %v4758_v57 }
0x1829   : > { %4934 = vadd.xlane.f32.xlu0 %v4933_v32  ;;  %v14107_v8 = vpop.eup %10598  ;;  %v4939_v29 = vadd.f32 %v14105_v1, %v14101_v33  ;;  %v4810_v32 = vsub.f32 %v13989_v16, %v4767_v54 }
0x182a   : > { %v14111_v45 = vpop.eup %10600 }
0x182b   : > { %v14113_v48 = vpop.eup %10602  ;;  %v4942_v19 = vadd.f32 %v14111_v45, %v14107_v8  ;;  %v4848_v35 = vmul.f32 1.442695, %v4810_v32  ;;  %v4805_v32 = vsub.f32 %v13979_v2, %v4758_v57 }
0x182c   : > { %v14117_v36 = vpop.eup %10604 }
0x182d   : > { %4937 = vadd.xlane.f32.xlu0 %v4936_v22  ;;  %v4945_v26 = vadd.f32 %v14117_v36, %v14113_v48  ;;  %v4858_v22 = vmul.f32 1.442695, %v4815_v0 }
0x182f   : > { %10612 = vpow2.f32 %v4858_v22 }
0x1830   : > { %10614 = vpow2.f32 %v4848_v35 }
0x1831   : > { %4940 = vadd.xlane.f32.xlu0 %v4939_v29  ;;  %v4811_v29 = vsub.f32 %v13991_v50, %v4767_v54  ;;  %v14136_v50 = vpop.eup %10606 }
0x1833   : > { %v4850_v62 = vmul.f32 1.442695, %v4811_v29  ;;  %v4838_v29 = vmul.f32 1.442695, %v4805_v32 }
0x1835   : > { %4943 = vadd.xlane.f32.xlu0 %v4942_v19  ;;  %v4761_v19 = vpop.xlane.xlu0 %4760  ;;  %10616 = vpow2.f32 %v4850_v62 }
0x1836   : > { %4529 = vrot.lane.b32.xlu1 %v11443_v34, %s11528_s25  ;;  %v4806_v55 = vsub.f32 %v13981_v11, %v4761_v19  ;;  %v4807_v60 = vsub.f32 %v13983_v10, %v4761_v19  ;;  %v4818_v34 = vsub.f32 %v14007_v14, %v4779_v38  ;;  %v14139_v11 = vpop.eup %10608  ;;  %v4812_v10 = vsub.f32 %v13993_v39, %v4770_v9 }
0x1837   : > { %v14142_v47 = vpop.eup %10610  ;;  %v4918_v28 = vadd.f32 %v14139_v11, %v14136_v50  ;;  %v4809_v39 = vsub.f32 %v13987_v15, %v4764_v52 }
0x1838   : > { %v4840_v51 = vmul.f32 1.442695, %v4806_v55  ;;  %v4842_v16 = vmul.f32 1.442695, %v4807_v60  ;;  %v4864_v54 = vmul.f32 1.442695, %v4818_v34 }
0x1839   : > { %4946 = vadd.xlane.f32.xlu0 %v4945_v26  ;;  %v4819_v26 = vsub.f32 %v14009_v30, %v4779_v38  ;;  %v4852_v7 = vmul.f32 1.442695, %v4812_v10  ;;  %v4808_v30 = vsub.f32 %v13985_v12, %v4764_v52  ;;  %v4846_v12 = vmul.f32 1.442695, %v4809_v39  ;;  %v16986_v10 = vld [vmem:[#allocation6_spill] sm:$0xff] }
0x183a   : > { %10618 = vpow2.f32 %v4840_v51  ;;  %v4836_v52 = vmul.f32 1.442695, %v4804_v46 }
0x183b   : > { %10620 = vpow2.f32 %v4842_v16  ;;  %v4866_v20 = vmul.f32 1.442695, %v4819_v26 }
0x183c   : > { %v14147_v14 = vpop.eup %10612  ;;  %10622 = vpow2.f32 %v4864_v54 }
0x183d   : > { %v14150_v38 = vpop.eup %10614  ;;  %10624 = vpow2.f32 %v4866_v20  ;;  %v4915_v0 = vadd.f32 %v14147_v14, %v14142_v47  ;;  %v16987_v20 = vld [vmem:[#allocation8_spill] sm:$0xff] }
0x183e   : > { %10626 = vpow2.f32 %v4852_v7  ;;  %v16989_v7 = vld [vmem:[#allocation5_spill] sm:$0xff] }
0x184f   : > { %4527 = vrot.lane.b32.xlu0 %v13834_v4, %s11528_s25  ;;  %v4813_v4 = vsub.f32 %v13995_v13, %v4770_v9  ;;  %v14155_v13 = vpop.eup %10616  ;;  %v4844_v9 = vmul.f32 1.442695, %v4808_v30 }
0x1850   : > { %v14158_v58 = vpop.eup %10618  ;;  %v4909_v22 = vadd.f32 %v14155_v13, %v14150_v38 }
0x1851   : > { %v4854_v43 = vmul.f32 1.442695, %v4813_v4  ;;  %v14163_v15 = vpop.eup %10620  ;;  %v821_v4 = vadd.f32 %v16987_v20, %v16986_v10 }
0x1852   : > { %v4903_v19 = vadd.f32 %v14163_v15, %v14158_v58  ;;  %v14167_v31 = vpop.eup %10622 }
0x1853   : > { %10628 = vpow2.f32 %v4854_v43  ;;  %v14169_v35 = vpop.eup %10624 }
0x1854   : > { %10630 = vpow2.f32 %v4844_v9  ;;  %v14171_v2 = vpop.eup %10626  ;;  %v4921_v57 = vadd.f32 %v14169_v35, %v14167_v31 }
0x1855   : > { %10632 = vpow2.f32 %v4846_v12 }
0x1856   : > { %10634 = vpow2.f32 %v4836_v52 }
0x1857   : > { %10636 = vpow2.f32 %v4838_v29 }
0x185a   : > { %4919 = vadd.xlane.f32.xlu1 %v4918_v28  ;;  %v16988_v28 = vld [vmem:[#allocation7_spill] sm:$0xff] }
0x185b   : > { %v817_v30 = vadd.f32 %v16989_v7, %v16988_v28 }
0x185d   : > { %v14195_v43 = vpack.c.bf16 %v821_v4, %v817_v30 }
0x185e   : > { %4916 = vadd.xlane.f32.xlu1 %v4915_v0 }
0x185f   : > { %16990 = vst [vmem:[#allocation30_spill] sm:$0xff] %v14195_v43  ;;  %v5614_v39 = vrot.slane %v14195_v43, 2 }
0x1860   : > { %v14175_v55 = vpop.eup %10628 }
0x1861   : > { %v14177_v62 = vpop.eup %10630  ;;  %v4912_v60 = vadd.f32 %v14175_v55, %v14171_v2 }
0x1862   : > { %4910 = vadd.xlane.f32.xlu1 %v4909_v22  ;;  %v14181_v51 = vpop.eup %10632 }
0x1863   : > { %v14183_v16 = vpop.eup %10634  ;;  %v4906_v34 = vadd.f32 %v14181_v51, %v14177_v62 }
0x1864   : > { %v14187_v26 = vpop.eup %10636 }
0x1865   : > { %v4900_v54 = vadd.f32 %v14187_v26, %v14183_v16 }
0x1866   : > { %4904 = vadd.xlane.f32.xlu1 %v4903_v19 }
0x186e   : > { %4922 = vadd.xlane.f32.xlu0 %v4921_v57 }
0x1872   : > { %4913 = vadd.xlane.f32.xlu0 %v4912_v60  ;;  %v16820_v60 = vrot.slane %v13319_v41, 6 }
0x1876   : > { %4907 = vadd.xlane.f32.xlu0 %v4906_v34 }
0x187a   : > { %4901 = vadd.xlane.f32.xlu0 %v4900_v54 }
0x1893   : > { %5616 = vxpose.xlu1.c.b16.start.end [1/1] (short) %v5614_v39, 128 }
0x18a7   : > { %5159 = vxpose.xlu0.c.b16.start.end [1/1] (short) %v14195_v43, 128 }
0x18aa   : > { %v4926_v0 = vpop.xlane.xlu0 %4925 }
0x18ae   : > { %v4932_v9 = vpop.xlane.xlu0 %4931  ;;  %v4929_v29 = vpop.xlane.xlu1 %4928 }
0x18b2   : > { %v4935_v46 = vpop.xlane.xlu0 %4934  ;;  %v4530_v57 = vpop.permute.xlu1 %4529 }
0x18b6   : > { %v4938_v12 = vpop.xlane.xlu0 %4937 }
0x18ba   : > { %v4941_v32 = vpop.xlane.xlu0 %4940 }
0x18bb   : > { %10638 = vrcp.f32 %v4941_v32 }
0x18be   : > { %v4944_v22 = vpop.xlane.xlu0 %4943 }
0x18bf   : > { %10640 = vrcp.f32 %v4944_v22 }
0x18c0   : > { %10642 = vrcp.f32 %v4938_v12 }
0x18c2   : > { %v4947_v52 = vpop.xlane.xlu0 %4946 }
0x18c3   : > { %10644 = vrcp.f32 %v4947_v52 }
0x18c4   : > { %10646 = vrcp.f32 %v4935_v46 }
0x18c5   : > { %10648 = vrcp.f32 %v4932_v9 }
0x18c6   : > { %v4528_v19 = vpop.permute.xlu0 %4527  ;;  %10650 = vrcp.f32 %v4929_v29 }
0x18c7   : > { %9759 = vmatprep.mubr.msk.bf16.mxu1 %vm901_vm2, %v4528_v19  ;;  %10652 = vrcp.f32 %v4926_v0 }
0x18c8   : > { %9760 = vmatmul.mubr.msk.bf16.vlgmr.msra.gmra.mxu1 %vm901_vm2, %v4530_v57  ;;  %v10639_v34 = vpop.eup %10638 }
0x18c9   : > { %5048 = vmatprep.mubr.bf16.mxu1 %v16820_v60  ;;  %v4991_v4 = vmul.f32 %v10639_v34, %v14105_v1  ;;  %v4990_v1 = vmul.f32 %v10639_v34, %v14101_v33 }
0x18cc   : > { %v10641_v54 = vpop.eup %10640 }
0x18cd   : > { %v10643_v10 = vpop.eup %10642  ;;  %v4993_v28 = vmul.f32 %v10641_v54, %v14111_v45  ;;  %v4992_v30 = vmul.f32 %v10641_v54, %v14107_v8 }
0x18ce   : > { %v4989_v9 = vmul.f32 %v10643_v10, %v14099_v37 }
0x18d0   : > { %v10645_v20 = vpop.eup %10644  ;;  %v5009_v32 = vpack.c.bf16 %v4991_v4, %v4989_v9 }
0x18d1   : > { %v4995_v7 = vmul.f32 %v10645_v20, %v14117_v36  ;;  %v4994_v39 = vmul.f32 %v10645_v20, %v14113_v48  ;;  %v10647_v22 = vpop.eup %10646  ;;  %v4988_v36 = vmul.f32 %v10643_v10, %v14095_v56 }
0x18d2   : > { %v10649_v52 = vpop.eup %10648  ;;  %v4987_v45 = vmul.f32 %v10647_v22, %v14093_v44  ;;  %v4986_v19 = vmul.f32 %v10647_v22, %v14087_v17 }
0x18d3   : > { %v5011_v46 = vpack.c.bf16 %v4995_v7, %v4993_v28  ;;  %v5010_v12 = vpack.c.bf16 %v4994_v39, %v4992_v30  ;;  %v4985_v8 = vmul.f32 %v10649_v52, %v14081_v27  ;;  %v5008_v48 = vpack.c.bf16 %v4990_v1, %v4988_v36  ;;  %v10651_v0 = vpop.eup %10650 }
0x18d4   : > { %v10653_v37 = vpop.eup %10652  ;;  %v4983_v57 = vmul.f32 %v10651_v0, %v14085_v25  ;;  %v4984_v54 = vmul.f32 %v10649_v52, %v14076_v5  ;;  %v4982_v27 = vmul.f32 %v10651_v0, %v14083_v6 }
0x18d5   : > { %5016 = vmatprep.subr.bf16.mxu1 %v5011_v46  ;;  %v5007_v29 = vpack.c.bf16 %v4987_v45, %v4985_v8  ;;  %v4981_v33 = vmul.f32 %v10653_v37, %v14073_v21  ;;  %v4980_v56 = vmul.f32 %v10653_v37, %v14071_v53 }
0x18d6   : > { %5017 = vmatpush1.bf16.xpose.msra.mxu1 %v5010_v12  ;;  %v5006_v34 = vpack.c.bf16 %v4986_v19, %v4984_v54 }
0x18d7   : > { %5018 = vmatprep.subr.bf16.mxu1 %v5009_v32  ;;  %v5005_v44 = vpack.c.bf16 %v4983_v57, %v4981_v33  ;;  %v5004_v10 = vpack.c.bf16 %v4982_v27, %v4980_v56 }
0x18de   : > { %5019 = vmatpush1.bf16.xpose.msra.mxu1 %v5008_v48 }
0x18df   : > { %5020 = vmatprep.subr.bf16.mxu1 %v5007_v29 }
0x18e3   : > { %v4920_v20 = vpop.xlane.xlu1 %4919 }
0x18e4   : > { %10654 = vrcp.f32 %v4920_v20 }
0x18e6   : > { %5021 = vmatpush1.bf16.xpose.msra.mxu1 %v5006_v34  ;;  %v16991_v34 = vld [vmem:[#allocation15_spill] sm:$0xff] }
0x18e7   : > { %5022 = vmatprep.subr.bf16.mxu1 %v5005_v44  ;;  %v4917_v4 = vpop.xlane.xlu1 %4916 }
0x18eb   : > { %v4911_v5 = vpop.xlane.xlu1 %4910 }
0x18ee   : > { %5023 = vmatpush1.bf16.xpose.msra.mxu1 %v5004_v10 }
0x18ef   : > { %v4905_v6 = vpop.xlane.xlu1 %4904 }
0x18f1   : > { %v10655_v28 = vpop.eup %10654 }
0x18f2   : > { %v4977_v53 = vmul.f32 %v10655_v28, %v14139_v11  ;;  %v4976_v46 = vmul.f32 %v10655_v28, %v14136_v50 }
0x18f7   : > { %v4923_v17 = vpop.xlane.xlu0 %4922 }
0x18f8   : > { %10656 = vrcp.f32 %v4923_v17  ;;  %v5624_v17 = vpop.trf.xlu1 }
0x18f9   : > { %10658 = vrcp.f32 %v4917_v4 }
0x18fb   : > { %v4914_v25 = vpop.xlane.xlu0 %4913 }
0x18fc   : > { %10660 = vrcp.f32 %v4914_v25  ;;  %v5625_v25 = vpop.trf.xlu1 }
0x18fd   : > { %10662 = vrcp.f32 %v4911_v5 }
0x18ff   : > { %v4908_v21 = vpop.xlane.xlu0 %4907 }
0x1900   : > { %10664 = vrcp.f32 %v4908_v21  ;;  %v5626_v5 = vpop.trf.xlu1 }
0x1903   : > { %v4902_v7 = vpop.xlane.xlu0 %4901 }
0x1904   : > { %10666 = vrcp.f32 %v4902_v7  ;;  %v5627_v21 = vpop.trf.xlu1 }
0x1905   : > { %v10657_v30 = vpop.eup %10656  ;;  %10668 = vrcp.f32 %v4905_v6 }
0x1906   : > { %v4979_v39 = vmul.f32 %v10657_v30, %v14169_v35  ;;  %v4978_v12 = vmul.f32 %v10657_v30, %v14167_v31  ;;  %v10659_v9 = vpop.eup %10658 }
0x1907   : > { %v4975_v45 = vmul.f32 %v10659_v9, %v14147_v14  ;;  %v4974_v31 = vmul.f32 %v10659_v9, %v14142_v47 }
0x1908   : > { %v5003_v32 = vpack.c.bf16 %v4979_v39, %v4977_v53  ;;  %v5002_v22 = vpack.c.bf16 %v4978_v12, %v4976_v46  ;;  %v5628_v46 = vpop.trf.xlu1 }
0x1909   : > { %v10661_v52 = vpop.eup %10660 }
0x190a   : > { %5024 = vmatprep.subr.bf16.mxu1 %v5003_v32  ;;  %v4973_v1 = vmul.f32 %v10661_v52, %v14175_v55  ;;  %v10663_v36 = vpop.eup %10662  ;;  %v4972_v35 = vmul.f32 %v10661_v52, %v14171_v2 }
0x190b   : > { %5025 = vmatpush1.bf16.xpose.msra.mxu1 %v5002_v22  ;;  %v4971_v48 = vmul.f32 %v10663_v36, %v14155_v13  ;;  %v4970_v57 = vmul.f32 %v10663_v36, %v14150_v38  ;;  %v16992_v38 = vld [vmem:[#allocation16_spill] sm:$0xff] }
0x190c   : > { %v5001_v11 = vpack.c.bf16 %v4975_v45, %v4973_v1  ;;  %v5000_v0 = vpack.c.bf16 %v4974_v31, %v4972_v35  ;;  %v5629_v12 = vpop.trf.xlu1 }
0x190d   : > { %v10665_v8 = vpop.eup %10664 }
0x190e   : > { %5026 = vmatprep.subr.bf16.mxu1 %v5001_v11  ;;  %v4969_v50 = vmul.f32 %v10665_v8, %v14181_v51  ;;  %v4968_v14 = vmul.f32 %v10665_v8, %v14177_v62  ;;  %v16819_v62 = vrot.slane %v13341_v61, 6 }
0x1910   : > { %v4999_v29 = vpack.c.bf16 %v4971_v48, %v4969_v50  ;;  %v4998_v54 = vpack.c.bf16 %v4970_v57, %v4968_v14 }
0x1911   : > { %v10667_v37 = vpop.eup %10666 }
0x1912   : > { %v10669_v55 = vpop.eup %10668  ;;  %v4965_v19 = vmul.f32 %v10667_v37, %v14187_v26  ;;  %v4964_v47 = vmul.f32 %v10667_v37, %v14183_v16  ;;  %v5167_v16 = vpop.trf.xlu0 }
0x1913   : > { %5027 = vmatpush1.bf16.xpose.msra.mxu1 %v5000_v0  ;;  %v4967_v2 = vmul.f32 %v10669_v55, %v14163_v15  ;;  %v4966_v13 = vmul.f32 %v10669_v55, %v14158_v58  ;;  %v16993_v15 = vrot.slane %v16991_v34, 2  ;;  %v16994_v58 = vld [vmem:[#allocation17_spill] sm:$0xff] }
0x1914   : > { %5028 = vmatprep.subr.bf16.mxu1 %v4999_v29 }
0x1915   : > { %v4997_v51 = vpack.c.bf16 %v4967_v2, %v4965_v19  ;;  %v4996_v33 = vpack.c.bf16 %v4966_v13, %v4964_v47 }
0x1916   : > { %v5168_v26 = vpop.trf.xlu0 }
0x191a   : > { %v5169_v44 = vpop.trf.xlu0 }
0x191b   : > { %5029 = vmatpush1.bf16.xpose.msra.mxu1 %v4998_v54 }
0x191c   : > { %5030 = vmatprep.subr.bf16.mxu1 %v4997_v51 }
0x191e   : > { %v5170_v27 = vpop.trf.xlu0 }
0x1922   : > { %v5171_v56 = vpop.trf.xlu0 }
0x1923   : > { %5031 = vmatpush1.bf16.xpose.msra.mxu1 %v4996_v33 }
0x1924   : > { %9532 = vmatprep.subr.msk.bf16.mxu1 %vm926_vm1, %v16991_v34 }
0x1926   : > { %v5172_v10 = vpop.trf.xlu0 }
0x192a   : > { %5049 = vmatmul.mubr.bf16.vlgmr.msra.gmra.mxu1 %v16819_v62  ;;  %v5173_v20 = vpop.trf.xlu0 }
0x192b   : > { %5214 = vmatpush1.bf16.msra.mxu1 %v16992_v38  ;;  %5231 = vmatprep.mubr.bf16.mxu1 %v16965_v42 }
0x192c   : > { %9541 = vmatprep.subr.msk.bf16.mxu1 %vm926_vm1, %v16993_v15 }
0x192e   : > { %v5174_v4 = vpop.trf.xlu0 }
0x1932   : > { %9533 = vmatmul.mubr.msk.bf16.vlgmr.msra.gmra.mxu1 %vm901_vm2, %v5167_v16 }
0x1933   : > { %5671 = vmatpush1.bf16.msra.mxu1 %v16994_v58  ;;  %5241 = vmatprep.mubr.bf16.mxu1 %v16965_v42 }
0x193a   : > { %9534 = vmatmul.mubr.msk.bf16.gmra.mxu1 %vm901_vm2, %v5168_v26 }
0x193b   : > { %5251 = vmatprep.mubr.bf16.mxu1 %v16965_v42 }
0x1942   : > { %9535 = vmatmul.mubr.msk.bf16.gmra.mxu1 %vm901_vm2, %v5169_v44 }
0x1943   : > { %5261 = vmatprep.mubr.bf16.mxu1 %v16965_v42 }
0x194a   : > { %9536 = vmatmul.mubr.msk.bf16.gmra.mxu1 %vm901_vm2, %v5170_v27 }
0x194b   : > { %5271 = vmatprep.mubr.bf16.mxu1 %v16965_v42 }
0x1952   : > { %9537 = vmatmul.mubr.msk.bf16.gmra.mxu1 %vm901_vm2, %v5171_v56 }
0x1953   : > { %5281 = vmatprep.mubr.bf16.mxu1 %v16965_v42 }
0x195a   : > { %9538 = vmatmul.mubr.msk.bf16.gmra.mxu1 %vm901_vm2, %v5172_v10 }
0x195b   : > { %5291 = vmatprep.mubr.bf16.mxu1 %v16965_v42 }
0x1962   : > { %9539 = vmatmul.mubr.msk.bf16.gmra.mxu1 %vm901_vm2, %v5173_v20 }
0x1963   : > { %5301 = vmatprep.mubr.bf16.mxu1 %v16965_v42 }
0x196a   : > { %9540 = vmatmul.mubr.msk.bf16.gmra.mxu1 %vm901_vm2, %v5174_v4 }
0x196b   : > { %5688 = vmatprep.mubr.bf16.mxu1 %v16965_v42 }
0x1972   : > { %9542 = vmatmul.mubr.msk.bf16.vlgmr.msra.gmra.mxu1 %vm901_vm2, %v5624_v17 }
0x1973   : > { %5698 = vmatprep.mubr.bf16.mxu1 %v16965_v42 }
0x197a   : > { %9543 = vmatmul.mubr.msk.bf16.gmra.mxu1 %vm901_vm2, %v5625_v25 }
0x197b   : > { %5708 = vmatprep.mubr.bf16.mxu1 %v16965_v42 }
0x1982   : > { %9544 = vmatmul.mubr.msk.bf16.gmra.mxu1 %vm901_vm2, %v5626_v5 }
0x1983   : > { %5718 = vmatprep.mubr.bf16.mxu1 %v16965_v42 }
0x1988   : > { %v9761_v28 = vpop.f32.mrf.mxu1 }
0x1989   : > { %v14270_v7 = vadd.f32 %v9761_v28, %v13965_v23  ;;  %v5630_v23 = vpop.trf.xlu1 }
0x198a   : > { %v4574_v30 = vpop.f32.mrf.mxu1  ;;  %9545 = vmatmul.mubr.msk.bf16.gmra.mxu1 %vm901_vm2, %v5627_v21 }
0x198b   : > { %16995 = vst [vmem:[#allocation23_spill] sm:$0xff] %v14270_v7  ;;  %v14274_v6 = vadd.f32 %v4574_v30, %v13968_v24  ;;  %5728 = vmatprep.mubr.bf16.mxu1 %v16965_v42 }
0x198c   : > { %v9762_v53 = vpop.f32.mrf.mxu1 }
0x198d   : > { %16996 = vst [vmem:[#allocation29_spill] sm:$0xff] %v14274_v6  ;;  %v14278_v39 = vadd.f32 %v9762_v53, %v13971_v63  ;;  %v5631_v24 = vpop.trf.xlu1 }
0x198e   : > { %v14287_v63 = vpop.f32.mrf.mxu1 }
0x198f   : > { %16997 = vst [vmem:[#allocation14_spill] sm:$0xff] %v14278_v39  ;;  %16998 = vst [vmem:[#allocation10_spill] sm:$0xff] %v14287_v63 }
0x1992   : > { %9546 = vmatmul.mubr.msk.bf16.gmra.mxu1 %vm901_vm2, %v5628_v46 }
0x1993   : > { %5738 = vmatprep.mubr.bf16.mxu1 %v16965_v42 }
0x199a   : > { %9547 = vmatmul.mubr.msk.bf16.gmra.mxu1 %vm901_vm2, %v5629_v12 }
0x199b   : > { %5748 = vmatprep.mubr.bf16.mxu1 %v16965_v42 }
0x19a2   : > { %9548 = vmatmul.mubr.msk.bf16.gmra.mxu1 %vm901_vm2, %v5630_v23 }
0x19a3   : > { %5758 = vmatprep.mubr.bf16.mxu1 %v16965_v42 }
0x19aa   : > { %9549 = vmatmul.mubr.msk.bf16.gmra.mxu1 %vm901_vm2, %v5631_v24 }
0x19ea   : > { %v5050_v9 = vpop.f32.mrf.mxu1 }
0x19eb   : > { %v5056_v32 = vpack.c.bf16 %v5050_v9, %v5050_v9 }
0x19ec   : > { %v5052_v22 = vpop.f32.mrf.mxu1 }
0x19ed   : > { %v5068_v52 = vsel %vm926_vm1, %v5056_v32, 0  ;;  %9824 = vmatprep.subr.msk.bf16.mxu0 %vm926_vm1, %v5056_v32 }
0x19ee   : > { %v5053_v1 = vpop.f32.mrf.mxu1  ;;  %9764 = vmatpush3.bf16.msra.mxu0 %v5068_v52 }
0x19f0   : > { %v5054_v45 = vpop.f32.mrf.mxu1 }
0x19f2   : > { %v14291_v36 = vpop.f32.mrf.mxu1 }
0x19f4   : > { %v14293_v11 = vpop.f32.mrf.mxu1 }
0x19f6   : > { %v14295_v8 = vpop.f32.mrf.mxu1 }
0x19f8   : > { %v14297_v35 = vpop.f32.mrf.mxu1 }
0x19fa   : > { %v14299_v50 = vpop.f32.mrf.mxu1 }
0x19fc   : > { %v14301_v31 = vpop.f32.mrf.mxu1 }
0x19fe   : > { %v14303_v48 = vpop.f32.mrf.mxu1 }
0x1a00   : > { %v14305_v0 = vpop.f32.mrf.mxu1 }
0x1a02   : > { %v14307_v29 = vpop.f32.mrf.mxu1 }
0x1a04   : > { %v14309_v37 = vpop.f32.mrf.mxu1 }
0x1a06   : > { %v14311_v55 = vpop.f32.mrf.mxu1 }
0x1a08   : > { %v14313_v14 = vpop.f32.mrf.mxu1 }
0x1a09   : > { %v5327_v45 = vmax.f32 %v14311_v55, %v14313_v14 }
0x1a0a   : > { %v14315_v19 = vpop.f32.mrf.mxu1 }
0x1a0c   : > { %v14317_v57 = vpop.f32.mrf.mxu1 }
0x1a0e   : > { %v14319_v2 = vpop.f32.mrf.mxu1 }
0x1a10   : > { %v14321_v54 = vpop.f32.mrf.mxu1 }
0x1a11   : > { %v5333_v32 = vmax.f32 %v14319_v2, %v14321_v54 }
0x1a12   : > { %v14323_v51 = vpop.f32.mrf.mxu1 }
0x1a14   : > { %v14325_v47 = vpop.f32.mrf.mxu1 }
0x1a15   : > { %v5336_v22 = vmax.f32 %v14323_v51, %v14325_v47 }
0x1a16   : > { %v14327_v13 = vpop.f32.mrf.mxu1 }
0x1a18   : > { %v14329_v33 = vpop.f32.mrf.mxu1 }
0x1a19   : > { %v5339_v12 = vmax.f32 %v14327_v13, %v14329_v33 }
0x1a1a   : > { %v14331_v38 = vpop.f32.mrf.mxu1 }
0x1a1c   : > { %v14333_v15 = vpop.f32.mrf.mxu1 }
0x1a1d   : > { %v5342_v23 = vmax.f32 %v14331_v38, %v14333_v15 }
0x1a1e   : > { %v14335_v16 = vpop.f32.mrf.mxu1 }
0x1a20   : > { %v14337_v58 = vpop.f32.mrf.mxu1 }
0x1a21   : > { %v5345_v17 = vmax.f32 %v14335_v16, %v14337_v58 }
0x1a22   : > { %v14339_v26 = vpop.f32.mrf.mxu1 }
0x1a24   : > { %v14341_v44 = vpop.f32.mrf.mxu1 }
0x1a25   : > { %v5348_v28 = vmax.f32 %v14339_v26, %v14341_v44 }
0x1a26   : > { %v14343_v27 = vpop.f32.mrf.mxu1 }
0x1a28   : > { %v14345_v56 = vpop.f32.mrf.mxu1 }
0x1a29   : > { %v5351_v10 = vmax.f32 %v14343_v27, %v14345_v56 }
0x1a2a   : > { %v14349_v20 = vpop.f32.mrf.mxu1 }
0x1a2b   : > { %5352 = vmax.xlane.f32.xlu1 %v5351_v10  ;;  %v5330_v10 = vmax.f32 %v14315_v19, %v14317_v57 }
0x1a2c   : > { %v14351_v4 = vpop.f32.mrf.mxu1 }
0x1a2d   : > { %v5354_v25 = vmax.f32 %v14349_v20, %v14351_v4 }
0x1a2e   : > { %v14357_v5 = vpop.f32.mrf.mxu1 }
0x1a2f   : > { %5346 = vmax.xlane.f32.xlu1 %v5345_v17  ;;  %5355 = vmax.xlane.f32.xlu0 %v5354_v25 }
0x1a30   : > { %v14359_v21 = vpop.f32.mrf.mxu1 }
0x1a31   : > { %v5357_v30 = vmax.f32 %v14357_v5, %v14359_v21 }
0x1a32   : > { %v14365_v53 = vpop.f32.mrf.mxu1 }
0x1a33   : > { %5349 = vmax.xlane.f32.xlu0 %v5348_v28  ;;  %5358 = vmax.xlane.f32.xlu1 %v5357_v30  ;;  %v5321_v28 = vmax.f32 %v14303_v48, %v14305_v0  ;;  %v5324_v30 = vmax.f32 %v14307_v29, %v14309_v37 }
0x1a34   : > { %v14367_v46 = vpop.f32.mrf.mxu1 }
0x1a36   : > { %v14373_v24 = vpop.f32.mrf.mxu1 }
0x1a37   : > { %5343 = vmax.xlane.f32.xlu0 %v5342_v23  ;;  %5340 = vmax.xlane.f32.xlu1 %v5339_v12 }
0x1a38   : > { %v14375_v9 = vpop.f32.mrf.mxu1 }
0x1a3a   : > { %v14381_v52 = vpop.f32.mrf.mxu1 }
0x1a3b   : > { %16999 = vst [vmem:[#allocation12_spill] sm:$0xff] %v14381_v52  ;;  %5337 = vmax.xlane.f32.xlu0 %v5336_v22  ;;  %5334 = vmax.xlane.f32.xlu1 %v5333_v32  ;;  %v5315_v32 = vmax.f32 %v14295_v8, %v14297_v35  ;;  %v5318_v22 = vmax.f32 %v14299_v50, %v14301_v31 }
0x1a3c   : > { %v14383_v1 = vpop.f32.mrf.mxu1 }
0x1a3d   : > { %17000 = vst [vmem:[#allocation24_spill] sm:$0xff] %v14383_v1  ;;  %v5775_v60 = vmax.f32 %v14381_v52, %v14383_v1 }
0x1a3e   : > { %v14389_v17 = vpop.f32.mrf.mxu1 }
0x1a3f   : > { %17001 = vst [vmem:[#allocation19_spill] sm:$0xff] %v14389_v17  ;;  %5331 = vmax.xlane.f32.xlu0 %v5330_v10  ;;  %5328 = vmax.xlane.f32.xlu1 %v5327_v45 }
0x1a40   : > { %v14391_v25 = vpop.f32.mrf.mxu1 }
0x1a41   : > { %17002 = vst [vmem:[#allocation6_spill] sm:$0xff] %v14391_v25  ;;  %v5778_v10 = vmax.f32 %v14389_v17, %v14391_v25 }
0x1a42   : > { %v14397_v12 = vpop.f32.mrf.mxu1 }
0x1a43   : > { %17003 = vst [vmem:[#allocation8_spill] sm:$0xff] %v14397_v12  ;;  %5325 = vmax.xlane.f32.xlu0 %v5324_v30  ;;  %5322 = vmax.xlane.f32.xlu1 %v5321_v28  ;;  %v5312_v28 = vmax.f32 %v14291_v36, %v14293_v11 }
0x1a44   : > { %v14399_v23 = vpop.f32.mrf.mxu1 }
0x1a45   : > { %17004 = vst [vmem:[#allocation7_spill] sm:$0xff] %v14399_v23 }
0x1a46   : > { %v14405_v45 = vpop.f32.mrf.mxu1 }
0x1a47   : > { %17005 = vst [vmem:[#allocation5_spill] sm:$0xff] %v14405_v45  ;;  %5319 = vmax.xlane.f32.xlu0 %v5318_v22  ;;  %5316 = vmax.xlane.f32.xlu1 %v5315_v32  ;;  %v5781_v32 = vmax.f32 %v14397_v12, %v14399_v23 }
0x1a48   : > { %v14409_v62 = vpop.f32.mrf.mxu1 }
0x1a49   : > { %17006 = vst [vmem:[#allocation16_spill] sm:$0xff] %v14409_v62  ;;  %v5784_v63 = vmax.f32 %v14405_v45, %v14409_v62 }
0x1a4a   : > { %v14413_v30 = vpop.f32.mrf.mxu1 }
0x1a4b   : > { %17007 = vst [vmem:[#allocation17_spill] sm:$0xff] %v14413_v30  ;;  %5313 = vmax.xlane.f32.xlu0 %v5312_v28  ;;  %5779 = vmax.xlane.f32.xlu1 %v5778_v10 }
0x1a4c   : > { %v14419_v18 = vpop.f32.mrf.mxu1 }
0x1a4d   : > { %17008 = vst [vmem:[#allocation41_spill] sm:$0xff] %v14419_v18  ;;  %v5787_v28 = vmax.f32 %v14413_v30, %v14419_v18 }
0x1a4e   : > { %v14421_v3 = vpop.f32.mrf.mxu1 }
0x1a4f   : > { %17009 = vst [vmem:[#allocation42_spill] sm:$0xff] %v14421_v3  ;;  %5776 = vmax.xlane.f32.xlu0 %v5775_v60  ;;  %5785 = vmax.xlane.f32.xlu1 %v5784_v63 }
0x1a50   : > { %v14425_v22 = vpop.f32.mrf.mxu1 }
0x1a51   : > { %17010 = vst [vmem:[#allocation43_spill] sm:$0xff] %v14425_v22  ;;  %v5790_v61 = vmax.f32 %v14421_v3, %v14425_v22 }
0x1a52   : > { %v14429_v41 = vpop.f32.mrf.mxu1 }
0x1a53   : > { %17011 = vst [vmem:[#allocation44_spill] sm:$0xff] %v14429_v41  ;;  %5782 = vmax.xlane.f32.xlu0 %v5781_v32  ;;  %5791 = vmax.xlane.f32.xlu1 %v5790_v61 }
0x1a54   : > { %v14433_v10 = vpop.f32.mrf.mxu1 }
0x1a55   : > { %17012 = vst [vmem:[#allocation45_spill] sm:$0xff] %v14433_v10  ;;  %v5793_v60 = vmax.f32 %v14429_v41, %v14433_v10 }
0x1a56   : > { %v14435_v40 = vpop.f32.mrf.mxu1 }
0x1a57   : > { %17013 = vst [vmem:[#allocation46_spill] sm:$0xff] %v14435_v40  ;;  %5788 = vmax.xlane.f32.xlu0 %v5787_v28 }
0x1a58   : > { %v14439_v63 = vpop.f32.mrf.mxu1 }
0x1a59   : > { %17014 = vst [vmem:[#allocation47_spill] sm:$0xff] %v14439_v63  ;;  %v5796_v42 = vmax.f32 %v14435_v40, %v14439_v63 }
0x1a5a   : > { %v14443_v34 = vpop.f32.mrf.mxu1 }
0x1a5b   : > { %17015 = vst [vmem:[#allocation48_spill] sm:$0xff] %v14443_v34  ;;  %5794 = vmax.xlane.f32.xlu0 %v5793_v60  ;;  %5797 = vmax.xlane.f32.xlu1 %v5796_v42 }
0x1a5c   : > { %v14445_v39 = vpop.f32.mrf.mxu1 }
0x1a5d   : > { %17016 = vst [vmem:[#allocation49_spill] sm:$0xff] %v14445_v39  ;;  %v5799_v61 = vmax.f32 %v14443_v34, %v14445_v39 }
0x1a5e   : > { %v14449_v32 = vpop.f32.mrf.mxu1 }
0x1a5f   : > { %5800 = vmax.xlane.f32.xlu0 %v5799_v61 }
0x1a60   : > { %v14451_v6 = vpop.f32.mrf.mxu1 }
0x1a61   : > { %17017 = vst [vmem:[#allocation50_spill] sm:$0xff] %v14451_v6  ;;  %v5802_v28 = vmax.f32 %v14449_v32, %v14451_v6 }
0x1a62   : > { %v14455_v7 = vpop.f32.mrf.mxu1 }
0x1a63   : > { %5803 = vmax.xlane.f32.xlu1 %v5802_v28 }
0x1a64   : > { %v14457_v59 = vpop.f32.mrf.mxu1 }
0x1a65   : > { %v5805_v42 = vmax.f32 %v14455_v7, %v14457_v59 }
0x1a66   : > { %v14461_v60 = vpop.f32.mrf.mxu1 }
0x1a67   : > { %5806 = vmax.xlane.f32.xlu0 %v5805_v42 }
0x1a68   : > { %v14463_v43 = vpop.f32.mrf.mxu1 }
0x1a69   : > { %v5808_v61 = vmax.f32 %v14461_v60, %v14463_v43 }
0x1a6a   : > { %v14467_v49 = vpop.f32.mrf.mxu1 }
0x1a6b   : > { %5809 = vmax.xlane.f32.xlu1 %v5808_v61 }
0x1a6c   : > { %v14469_v1 = vpop.f32.mrf.mxu1 }
0x1a6d   : > { %v5811_v28 = vmax.f32 %v14467_v49, %v14469_v1 }
0x1a6e   : > { %v14473_v52 = vpop.f32.mrf.mxu1 }
0x1a6f   : > { %5812 = vmax.xlane.f32.xlu0 %v5811_v28 }
0x1a70   : > { %v14475_v25 = vpop.f32.mrf.mxu1 }
0x1a71   : > { %v5814_v42 = vmax.f32 %v14473_v52, %v14475_v25 }
0x1a73   : > { %5815 = vmax.xlane.f32.xlu1 %v5814_v42 }
0x1ab4   : > { %v5353_v17 = vpop.xlane.xlu1 %5352 }
0x1ab5   : > { %v5386_v6 = vsub.f32 %v14343_v27, %v5353_v17 }
0x1ab8   : > { %v5356_v23 = vpop.xlane.xlu0 %5355  ;;  %v5347_v12 = vpop.xlane.xlu1 %5346 }
0x1ab9   : > { %v5382_v61 = vsub.f32 %v14335_v16, %v5347_v12  ;;  %v5383_v18 = vsub.f32 %v14337_v58, %v5347_v12  ;;  %v5387_v12 = vsub.f32 %v14345_v56, %v5353_v17 }
0x1abb   : > { %v5436_v3 = vmul.f32 1.442695, %v5382_v61  ;;  %v5438_v10 = vmul.f32 1.442695, %v5383_v18 }
0x1abc   : > { %v5350_v62 = vpop.xlane.xlu0 %5349  ;;  %v5359_v45 = vpop.xlane.xlu1 %5358 }
0x1abd   : > { %10670 = vpow2.f32 %v5436_v3  ;;  %v5384_v18 = vsub.f32 %v14339_v26, %v5350_v62  ;;  %v5446_v3 = vmul.f32 1.442695, %v5387_v12 }
0x1abe   : > { %10672 = vpow2.f32 %v5438_v10 }
0x1ac0   : > { %v5344_v30 = vpop.xlane.xlu0 %5343  ;;  %v5341_v22 = vpop.xlane.xlu1 %5340 }
0x1ac1   : > { %v5378_v28 = vsub.f32 %v14327_v13, %v5341_v22  ;;  %v5379_v41 = vsub.f32 %v14329_v33, %v5341_v22  ;;  %v5380_v63 = vsub.f32 %v14331_v38, %v5344_v30  ;;  %v5381_v40 = vsub.f32 %v14333_v15, %v5344_v30 }
0x1ac2   : > { %v5385_v15 = vsub.f32 %v14341_v44, %v5350_v62  ;;  %v5444_v30 = vmul.f32 1.442695, %v5386_v6  ;;  %v5391_v6 = vsub.f32 %v14359_v21, %v5359_v45 }
0x1ac3   : > { %v5428_v42 = vmul.f32 1.442695, %v5378_v28  ;;  %v5430_v39 = vmul.f32 1.442695, %v5379_v41  ;;  %v5432_v13 = vmul.f32 1.442695, %v5380_v63 }
0x1ac4   : > { %v5338_v34 = vpop.xlane.xlu0 %5337  ;;  %v5434_v41 = vmul.f32 1.442695, %v5381_v40  ;;  %v5442_v27 = vmul.f32 1.442695, %v5385_v15  ;;  %v5390_v40 = vsub.f32 %v14357_v5, %v5359_v45 }
0x1ac5   : > { %v5376_v16 = vsub.f32 %v14323_v51, %v5338_v34  ;;  %v5377_v58 = vsub.f32 %v14325_v47, %v5338_v34  ;;  %10674 = vpow2.f32 %v5428_v42  ;;  %v5388_v51 = vsub.f32 %v14349_v20, %v5356_v23 }
0x1ac6   : > { %10676 = vpow2.f32 %v5430_v39  ;;  %v5440_v34 = vmul.f32 1.442695, %v5384_v18  ;;  %v5389_v47 = vsub.f32 %v14351_v4, %v5356_v23  ;;  %v5452_v4 = vmul.f32 1.442695, %v5390_v40 }
0x1ac7   : > { %v5424_v33 = vmul.f32 1.442695, %v5376_v16  ;;  %v5426_v38 = vmul.f32 1.442695, %v5377_v58  ;;  %v5448_v26 = vmul.f32 1.442695, %v5388_v51  ;;  %v5335_v16 = vpop.xlane.xlu1 %5334 }
0x1ac8   : > { %v5450_v56 = vmul.f32 1.442695, %v5389_v47  ;;  %v5454_v23 = vmul.f32 1.442695, %v5391_v6  ;;  %v5332_v63 = vpop.xlane.xlu0 %5331 }
0x1ac9   : > { %10678 = vpow2.f32 %v5424_v33 }
0x1aca   : > { %10680 = vpow2.f32 %v5426_v38  ;;  %v14494_v62 = vpop.eup %10670 }
0x1acb   : > { %10682 = vpow2.f32 %v5432_v13  ;;  %17018 = vst [vmem:[#allocation51_spill] sm:$0xff] %v14494_v62  ;;  %v14497_v39 = vpop.eup %10672 }
0x1acc   : > { %10684 = vpow2.f32 %v5434_v41  ;;  %17019 = vst [vmem:[#allocation52_spill] sm:$0xff] %v14497_v39  ;;  %v5489_v28 = vadd.f32 %v14497_v39, %v14494_v62  ;;  %v5326_v33 = vpop.xlane.xlu0 %5325 }
0x1acd   : > { %10686 = vpow2.f32 %v5444_v30  ;;  %v5329_v30 = vpop.xlane.xlu1 %5328  ;;  %v5369_v62 = vsub.f32 %v14309_v37, %v5326_v33 }
0x1ace   : > { %10688 = vpow2.f32 %v5446_v3  ;;  %v5769_v3 = vmax.f32 %v14365_v53, %v14367_v46 }
0x1acf   : > { %10690 = vpow2.f32 %v5440_v34  ;;  %v5410_v39 = vmul.f32 1.442695, %v5369_v62 }
0x1ad0   : > { %10692 = vpow2.f32 %v5442_v27  ;;  %v14539_v34 = vpop.xlane.xlu0 %5319  ;;  %v5772_v27 = vmax.f32 %v14373_v24, %v14375_v9 }
0x1ad1   : > { %10694 = vpow2.f32 %v5448_v26 }
0x1ad2   : > { %v14499_v44 = vpop.eup %10674  ;;  %10696 = vpow2.f32 %v5450_v56  ;;  %v5323_v56 = vpop.xlane.xlu1 %5322 }
0x1ad3   : > { %17020 = vst [vmem:[#allocation53_spill] sm:$0xff] %v14499_v44  ;;  %v14501_v20 = vpop.eup %10676  ;;  %10698 = vpow2.f32 %v5452_v4 }
0x1ad4   : > { %17021 = vst [vmem:[#allocation54_spill] sm:$0xff] %v14501_v20  ;;  %v5483_v22 = vadd.f32 %v14501_v20, %v14499_v44  ;;  %10700 = vpow2.f32 %v5454_v23  ;;  %v14549_v6 = vpop.xlane.xlu0 %5313 }
0x1ad6   : > { %v14503_v17 = vpop.eup %10678  ;;  %5484 = vadd.xlane.f32.xlu1 %v5483_v22  ;;  %v5317_v4 = vpop.xlane.xlu1 %5316 }
0x1ad7   : > { %17022 = vst [vmem:[#allocation55_spill] sm:$0xff] %v14503_v17  ;;  %v14507_v5 = vpop.eup %10680 }
0x1ad8   : > { %17023 = vst [vmem:[#allocation56_spill] sm:$0xff] %v14507_v5  ;;  %v14509_v10 = vpop.eup %10682  ;;  %v5480_v21 = vadd.f32 %v14507_v5, %v14503_v17  ;;  %v14551_v23 = vpop.xlane.xlu0 %5776  ;;  %v5374_v5 = vsub.f32 %v14319_v2, %v5335_v16  ;;  %v5367_v2 = vsub.f32 %v14305_v0, %v5323_v56  ;;  %v5363_v0 = vsub.f32 %v14297_v35, %v5317_v4 }
0x1ad9   : > { %17024 = vst [vmem:[#allocation57_spill] sm:$0xff] %v14509_v10  ;;  %v14513_v45 = vpop.eup %10684 }
0x1ada   : > { %v14515_v61 = vpop.eup %10686  ;;  %5481 = vadd.xlane.f32.xlu0 %v5480_v21  ;;  %5490 = vadd.xlane.f32.xlu1 %v5489_v28  ;;  %v5486_v12 = vadd.f32 %v14513_v45, %v14509_v10  ;;  %v14553_v22 = vpop.xlane.xlu1 %5779 }
0x1adb   : > { %v14519_v42 = vpop.eup %10688 }
0x1adc   : > { %v14521_v58 = vpop.eup %10690  ;;  %v5495_v13 = vadd.f32 %v14519_v42, %v14515_v61  ;;  %v14555_v21 = vpop.xlane.xlu0 %5782 }
0x1add   : > { %v14525_v18 = vpop.eup %10692 }
0x1ade   : > { %5487 = vadd.xlane.f32.xlu0 %v5486_v12  ;;  %v14529_v38 = vpop.eup %10694  ;;  %5496 = vadd.xlane.f32.xlu1 %v5495_v13  ;;  %v5492_v15 = vadd.f32 %v14525_v18, %v14521_v58  ;;  %v14557_v28 = vpop.xlane.xlu1 %5785  ;;  %v11444_v12 = vld [vmem:[%s16745_s6] sm:$0xff]  }
0x1adf   : > { %v14533_v41 = vpop.eup %10696 }
0x1ae0   : > { %v5498_v51 = vadd.f32 %v14533_v41, %v14529_v38  ;;  %v14541_v47 = vpop.eup %10698  ;;  %v14563_v13 = vpop.xlane.xlu0 %5788 }
0x1ae1   : > { %v14545_v26 = vpop.eup %10700 }
0x1ae2   : > { %5493 = vadd.xlane.f32.xlu0 %v5492_v15  ;;  %5770 = vmax.xlane.f32.xlu1 %v5769_v3  ;;  %v5501_v40 = vadd.f32 %v14545_v26, %v14541_v47  ;;  %v11445_v15 = vld [vmem:[%s16745_s6 + $0x8] sm:$0xff]   ;;  %v14569_v3 = vpop.xlane.xlu1 %5791 }
0x1ae6   : > { %5499 = vadd.xlane.f32.xlu0 %v5498_v51  ;;  %5773 = vmax.xlane.f32.xlu1 %v5772_v27  ;;  %v5372_v51 = vsub.f32 %v14315_v19, %v5332_v63  ;;  %v5373_v27 = vsub.f32 %v14317_v57, %v5332_v63  ;;  %v14575_v44 = vpop.xlane.xlu1 %5797  ;;  %v5370_v19 = vsub.f32 %v14311_v55, %v5329_v30 }
0x1ae7   : > { %v5371_v63 = vsub.f32 %v14313_v14, %v5329_v30  ;;  %v5365_v14 = vsub.f32 %v14301_v31, %v14539_v34  ;;  %v5361_v31 = vsub.f32 %v14293_v11, %v14549_v6 }
0x1ae8   : > { %v5416_v17 = vmul.f32 1.442695, %v5372_v51  ;;  %v5418_v20 = vmul.f32 1.442695, %v5373_v27  ;;  %v5366_v27 = vsub.f32 %v14303_v48, %v5323_v56  ;;  %v5406_v48 = vmul.f32 1.442695, %v5367_v2 }
0x1ae9   : > { %v5414_v55 = vmul.f32 1.442695, %v5371_v63 }
0x1aea   : > { %5502 = vadd.xlane.f32.xlu1 %v5501_v40  ;;  %v14573_v40 = vpop.xlane.xlu0 %5794  ;;  %10702 = vpow2.f32 %v5416_v17  ;;  %v5364_v17 = vsub.f32 %v14299_v50, %v14539_v34  ;;  %v5360_v50 = vsub.f32 %v14291_v36, %v14549_v6  ;;  %v5394_v36 = vmul.f32 1.442695, %v5361_v31 }
0x1aeb   : > { %10704 = vpow2.f32 %v5418_v20  ;;  %v5404_v20 = vmul.f32 1.442695, %v5366_v27 }
0x1aec   : > { %v14581_v10 = vpop.xlane.xlu1 %5803  ;;  %v5400_v30 = vmul.f32 1.442695, %v5364_v17 }
0x1aee   : > { %v14585_v51 = vpop.xlane.xlu0 %5800 }
0x1af2   : > { %v5807_v62 = vpop.xlane.xlu0 %5806 }
0x1af8   : > { %v5813_v34 = vpop.xlane.xlu0 %5812 }
0x1afb   : > { %5059 = vrot.lane.b32.xlu1 %v11445_v15, %s11529_s19  ;;  %v5375_v15 = vsub.f32 %v14321_v54, %v5335_v16  ;;  %v5412_v54 = vmul.f32 1.442695, %v5370_v19  ;;  %v14602_v19 = vpop.eup %10702 }
0x1afc   : > { %5057 = vrot.lane.b32.xlu0 %v11444_v12, %s11529_s19  ;;  %v5368_v12 = vsub.f32 %v14307_v29, %v5326_v33  ;;  %v5420_v29 = vmul.f32 1.442695, %v5374_v5  ;;  %v5810_v33 = vpop.xlane.xlu1 %5809  ;;  %v5362_v5 = vsub.f32 %v14295_v8, %v5317_v4  ;;  %v5392_v4 = vmul.f32 1.442695, %v5360_v50  ;;  %v14605_v11 = vpop.eup %10704 }
0x1afd   : > { %v5422_v37 = vmul.f32 1.442695, %v5375_v15  ;;  %v5845_v15 = vsub.f32 %v14467_v49, %v5813_v34  ;;  %v5843_v6 = vsub.f32 %v14461_v60, %v5810_v33  ;;  %v5844_v63 = vsub.f32 %v14463_v43, %v5810_v33 }
0x1afe   : > { %v5408_v57 = vmul.f32 1.442695, %v5368_v12  ;;  %v5396_v56 = vmul.f32 1.442695, %v5362_v5  ;;  %v5398_v12 = vmul.f32 1.442695, %v5363_v0  ;;  %v5474_v2 = vadd.f32 %v14605_v11, %v14602_v19 }
0x1aff   : > { %v5905_v49 = vmul.f32 1.442695, %v5845_v15  ;;  %v5839_v60 = vsub.f32 %v14449_v32, %v14581_v10  ;;  %v5901_v43 = vmul.f32 1.442695, %v5843_v6  ;;  %v17027_v32 = vld [vmem:[#allocation49_spill] sm:$0xff] }
0x1b00   : > { %10706 = vpow2.f32 %v5408_v57  ;;  %v5816_v16 = vpop.xlane.xlu1 %5815  ;;  %v5846_v57 = vsub.f32 %v14469_v1, %v5813_v34  ;;  %v17029_v34 = vld [vmem:[#allocation47_spill] sm:$0xff] }
0x1b01   : > { %10708 = vpow2.f32 %v5410_v39  ;;  %v5402_v39 = vmul.f32 1.442695, %v5365_v14  ;;  %v5847_v8 = vsub.f32 %v14473_v52, %v5816_v16  ;;  %v5848_v35 = vsub.f32 %v14475_v25, %v5816_v16  ;;  %v17026_v14 = vld [vmem:[#allocation48_spill] sm:$0xff] }
0x1b02   : > { %10710 = vpow2.f32 %v5420_v29  ;;  %v5841_v29 = vsub.f32 %v14455_v7, %v5807_v62  ;;  %v5907_v1 = vmul.f32 1.442695, %v5846_v57  ;;  %v17025_v7 = vld [vmem:[#allocation50_spill] sm:$0xff]  ;;  %v17031_v57 = vld [vmem:[#allocation45_spill] sm:$0xff] }
0x1b03   : > { %10712 = vpow2.f32 %v5422_v37  ;;  %v5909_v52 = vmul.f32 1.442695, %v5847_v8  ;;  %v5911_v25 = vmul.f32 1.442695, %v5848_v35  ;;  %v5842_v37 = vsub.f32 %v14457_v59, %v5807_v62  ;;  %v17030_v35 = vld [vmem:[#allocation44_spill] sm:$0xff] }
0x1b04   : > { %10714 = vpow2.f32 %v5412_v54  ;;  %v5840_v17 = vsub.f32 %v17025_v7, %v14581_v10  ;;  %v5837_v62 = vsub.f32 %v17026_v14, %v14585_v51  ;;  %v5834_v6 = vsub.f32 %v17031_v57, %v14573_v40  ;;  %v17034_v7 = vld [vmem:[#allocation17_spill] sm:$0xff]  ;;  %v17039_v57 = vld [vmem:[#allocation7_spill] sm:$0xff] }
0x1b05   : > { %10716 = vpow2.f32 %v5414_v55  ;;  %v5903_v55 = vmul.f32 1.442695, %v5844_v63  ;;  %v5899_v0 = vmul.f32 1.442695, %v5842_v37 }
0x1b06   : > { %10718 = vpow2.f32 %v5404_v20  ;;  %v5897_v20 = vmul.f32 1.442695, %v5841_v29  ;;  %v5895_v8 = vmul.f32 1.442695, %v5840_v17  ;;  %v5889_v15 = vmul.f32 1.442695, %v5837_v62 }
0x1b07   : > { %10720 = vpow2.f32 %v5406_v48  ;;  %v5838_v48 = vsub.f32 %v17027_v32, %v14585_v51  ;;  %v5829_v17 = vsub.f32 %v17034_v7, %v14563_v13  ;;  %v17035_v62 = vld [vmem:[#allocation41_spill] sm:$0xff]  ;;  %v5883_v32 = vmul.f32 1.442695, %v5834_v6 }
0x1b08   : > { %10722 = vpow2.f32 %v5400_v30  ;;  %v17028_v30 = vld [vmem:[#allocation46_spill] sm:$0xff]  ;;  %v5826_v6 = vsub.f32 %v17039_v57, %v14555_v21 }
0x1b09   : > { %10724 = vpow2.f32 %v5402_v39  ;;  %v5835_v50 = vsub.f32 %v17028_v30, %v14575_v44  ;;  %v5893_v39 = vmul.f32 1.442695, %v5839_v60 }
0x1b0a   : > { %10726 = vpow2.f32 %v5396_v56  ;;  %v5836_v56 = vsub.f32 %v17029_v34, %v14575_v44 }
0x1b0b   : > { %10728 = vpow2.f32 %v5398_v12 }
0x1b0c   : > { %10730 = vpow2.f32 %v5392_v4  ;;  %v5833_v4 = vsub.f32 %v17030_v35, %v14573_v40  ;;  %v5887_v60 = vmul.f32 1.442695, %v5836_v56 }
0x1b0d   : > { %v14610_v27 = vpop.eup %10706  ;;  %10732 = vpow2.f32 %v5394_v36 }
0x1b0e   : > { %v14615_v54 = vpop.eup %10708  ;;  %10734 = vpow2.f32 %v5909_v52  ;;  %v5891_v52 = vmul.f32 1.442695, %v5838_v48 }
0x1b0f   : > { %v14619_v33 = vpop.eup %10710  ;;  %10736 = vpow2.f32 %v5911_v25  ;;  %v5468_v10 = vadd.f32 %v14615_v54, %v14610_v27  ;;  %v17032_v25 = vld [vmem:[#allocation42_spill] sm:$0xff] }
0x1b10   : > { %v14623_v59 = vpop.eup %10712  ;;  %10738 = vpow2.f32 %v5905_v49  ;;  %v5831_v29 = vsub.f32 %v17032_v25, %v14569_v3  ;;  %v5885_v49 = vmul.f32 1.442695, %v5835_v50  ;;  %v17040_v25 = vld [vmem:[#allocation19_spill] sm:$0xff] }
0x1b11   : > { %v14627_v5 = vpop.eup %10714  ;;  %10740 = vpow2.f32 %v5907_v1  ;;  %v5477_v51 = vadd.f32 %v14623_v59, %v14619_v33  ;;  %v17033_v1 = vld [vmem:[#allocation43_spill] sm:$0xff] }
0x1b12   : > { %v14633_v16 = vpop.eup %10716  ;;  %10742 = vpow2.f32 %v5901_v43  ;;  %v5877_v30 = vmul.f32 1.442695, %v5831_v29  ;;  %v5823_v29 = vsub.f32 %v17040_v25, %v14553_v22 }
0x1b13   : > { %v14637_v31 = vpop.eup %10718  ;;  %10744 = vpow2.f32 %v5903_v55  ;;  %v5471_v44 = vadd.f32 %v14633_v16, %v14627_v5  ;;  %v5881_v55 = vmul.f32 1.442695, %v5833_v4  ;;  %v5873_v4 = vmul.f32 1.442695, %v5829_v17  ;;  %v17042_v17 = vld [vmem:[#allocation12_spill] sm:$0xff] }
0x1b14   : > { %v14643_v12 = vpop.eup %10720  ;;  %10746 = vpow2.f32 %v5897_v20  ;;  %v5830_v20 = vsub.f32 %v17035_v62, %v14563_v13 }
0x1b15   : > { %v14647_v36 = vpop.eup %10722  ;;  %10748 = vpow2.f32 %v5899_v0  ;;  %v5465_v40 = vadd.f32 %v14643_v12, %v14637_v31  ;;  %v17036_v0 = vld [vmem:[#allocation5_spill] sm:$0xff] }
0x1b16   : > { %v14653_v63 = vpop.eup %10724  ;;  %10750 = vpow2.f32 %v5893_v39  ;;  %v17037_v39 = vld [vmem:[#allocation16_spill] sm:$0xff] }
0x1b17   : > { %v14657_v37 = vpop.eup %10726  ;;  %10752 = vpow2.f32 %v5895_v8  ;;  %v5828_v34 = vsub.f32 %v17037_v39, %v14557_v28 }
0x1b18   : > { %v14663_v43 = vpop.eup %10728  ;;  %10754 = vpow2.f32 %v5889_v15 }
0x1b19   : > { %v14667_v14 = vpop.eup %10730  ;;  %10756 = vpow2.f32 %v5891_v52  ;;  %v5459_v13 = vadd.f32 %v14663_v43, %v14657_v37  ;;  %v5875_v52 = vmul.f32 1.442695, %v5830_v20 }
0x1b1a   : > { %v14673_v48 = vpop.eup %10732  ;;  %10758 = vpow2.f32 %v5885_v49 }
0x1b1b   : > { %5475 = vadd.xlane.f32.xlu0 %v5474_v2  ;;  %v5832_v2 = vsub.f32 %v17033_v1, %v14569_v3  ;;  %v5462_v3 = vadd.f32 %v14653_v63, %v14647_v36  ;;  %v14677_v50 = vpop.eup %10734  ;;  %10760 = vpow2.f32 %v5887_v60 }
0x1b1c   : > { %v14683_v8 = vpop.eup %10736  ;;  %10762 = vpow2.f32 %v5881_v55  ;;  %v5821_v55 = vsub.f32 %v17042_v17, %v14551_v23 }
0x1b1d   : > { %v5879_v56 = vmul.f32 1.442695, %v5832_v2  ;;  %v14687_v15 = vpop.eup %10738  ;;  %10764 = vpow2.f32 %v5883_v32  ;;  %v17041_v2 = vld [vmem:[#allocation6_spill] sm:$0xff]  ;;  %v17043_v32 = vld [vmem:[#allocation24_spill] sm:$0xff] }
0x1b1e   : > { %10766 = vpow2.f32 %v5877_v30  ;;  %v5824_v60 = vsub.f32 %v17041_v2, %v14553_v22  ;;  %v5861_v30 = vmul.f32 1.442695, %v5823_v29 }
0x1b1f   : > { %5469 = vadd.xlane.f32.xlu0 %v5468_v10  ;;  %5478 = vadd.xlane.f32.xlu1 %v5477_v51  ;;  %v5827_v10 = vsub.f32 %v17036_v0, %v14557_v28  ;;  %v17038_v51 = vld [vmem:[#allocation8_spill] sm:$0xff]  ;;  %v5456_v28 = vadd.f32 %v14673_v48, %v14667_v14  ;;  %10768 = vpow2.f32 %v5879_v56  ;;  %v5867_v0 = vmul.f32 1.442695, %v5826_v6 }
0x1b20   : > { %v5825_v35 = vsub.f32 %v17038_v51, %v14555_v21  ;;  %v5958_v21 = vadd.f32 %v14683_v8, %v14677_v50  ;;  %10770 = vpow2.f32 %v5873_v4 }
0x1b21   : > { %v5869_v49 = vmul.f32 1.442695, %v5827_v10 }
0x1b22   : > { %v5865_v62 = vmul.f32 1.442695, %v5825_v35 }
0x1b23   : > { %5472 = vadd.xlane.f32.xlu0 %v5471_v44  ;;  %5466 = vadd.xlane.f32.xlu1 %v5465_v40  ;;  %v14693_v44 = vpop.eup %10740  ;;  %v5871_v40 = vmul.f32 1.442695, %v5828_v34  ;;  %10772 = vpow2.f32 %v5875_v52  ;;  %v5863_v34 = vmul.f32 1.442695, %v5824_v60 }
0x1b24   : > { %v14697_v1 = vpop.eup %10742  ;;  %v5955_v22 = vadd.f32 %v14693_v44, %v14687_v15  ;;  %10774 = vpow2.f32 %v5869_v49 }
0x1b25   : > { %v14703_v7 = vpop.eup %10744  ;;  %10776 = vpow2.f32 %v5871_v40 }
0x1b26   : > { %v14707_v20 = vpop.eup %10746  ;;  %v5952_v56 = vadd.f32 %v14703_v7, %v14697_v1  ;;  %10778 = vpow2.f32 %v5865_v62 }
0x1b27   : > { %5463 = vadd.xlane.f32.xlu0 %v5462_v3  ;;  %5460 = vadd.xlane.f32.xlu1 %v5459_v13  ;;  %v5822_v3 = vsub.f32 %v17043_v32, %v14551_v23  ;;  %v14713_v10 = vpop.eup %10748  ;;  %v5857_v23 = vmul.f32 1.442695, %v5821_v55  ;;  %10780 = vpow2.f32 %v5867_v0 }
0x1b28   : > { %v14715_v39 = vpop.eup %10750  ;;  %v5949_v4 = vadd.f32 %v14713_v10, %v14707_v20  ;;  %10782 = vpow2.f32 %v5861_v30 }
0x1b29   : > { %v14719_v13 = vpop.eup %10752  ;;  %v5859_v35 = vmul.f32 1.442695, %v5822_v3  ;;  %10784 = vpow2.f32 %v5863_v34 }
0x1b2a   : > { %v14721_v51 = vpop.eup %10754  ;;  %v5946_v52 = vadd.f32 %v14719_v13, %v14715_v39  ;;  %10786 = vpow2.f32 %v5857_v23 }
0x1b2b   : > { %5457 = vadd.xlane.f32.xlu0 %v5456_v28  ;;  %5959 = vadd.xlane.f32.xlu1 %v5958_v21  ;;  %v14725_v57 = vpop.eup %10756  ;;  %10788 = vpow2.f32 %v5859_v35 }
0x1b2c   : > { %v14727_v6 = vpop.eup %10758  ;;  %v5943_v29 = vadd.f32 %v14725_v57, %v14721_v51 }
0x1b2d   : > { %v14731_v28 = vpop.eup %10760 }
0x1b2e   : > { %v14733_v25 = vpop.eup %10762  ;;  %v5940_v60 = vadd.f32 %v14731_v28, %v14727_v6 }
0x1b2f   : > { %5956 = vadd.xlane.f32.xlu0 %v5955_v22  ;;  %5953 = vadd.xlane.f32.xlu1 %v5952_v56  ;;  %v14737_v49 = vpop.eup %10764 }
0x1b30   : > { %v14739_v2 = vpop.eup %10766  ;;  %v5937_v17 = vadd.f32 %v14737_v49, %v14733_v25 }
0x1b31   : > { %17044 = vst [vmem:[#allocation50_spill] sm:$0xff] %v14739_v2  ;;  %v14743_v40 = vpop.eup %10768 }
0x1b32   : > { %17045 = vst [vmem:[#allocation48_spill] sm:$0xff] %v14743_v40  ;;  %v14745_v21 = vpop.eup %10770  ;;  %v5934_v32 = vadd.f32 %v14743_v40, %v14739_v2 }
0x1b33   : > { %5950 = vadd.xlane.f32.xlu0 %v5949_v4  ;;  %5947 = vadd.xlane.f32.xlu1 %v5946_v52  ;;  %17046 = vst [vmem:[#allocation49_spill] sm:$0xff] %v14745_v21  ;;  %v14749_v55 = vpop.eup %10772 }
0x1b34   : > { %v14751_v62 = vpop.eup %10774  ;;  %v5931_v22 = vadd.f32 %v14749_v55, %v14745_v21 }
0x1b35   : > { %17047 = vst [vmem:[#allocation46_spill] sm:$0xff] %v14751_v62  ;;  %v14755_v3 = vpop.eup %10776 }
0x1b36   : > { %17048 = vst [vmem:[#allocation47_spill] sm:$0xff] %v14755_v3  ;;  %v14757_v0 = vpop.eup %10778  ;;  %v5928_v56 = vadd.f32 %v14755_v3, %v14751_v62 }
0x1b37   : > { %5944 = vadd.xlane.f32.xlu0 %v5943_v29  ;;  %5941 = vadd.xlane.f32.xlu1 %v5940_v60  ;;  %17049 = vst [vmem:[#allocation44_spill] sm:$0xff] %v14757_v0  ;;  %v14761_v30 = vpop.eup %10780 }
0x1b38   : > { %17050 = vst [vmem:[#allocation45_spill] sm:$0xff] %v14761_v30  ;;  %v14763_v34 = vpop.eup %10782  ;;  %v5925_v4 = vadd.f32 %v14761_v30, %v14757_v0 }
0x1b39   : > { %17051 = vst [vmem:[#allocation42_spill] sm:$0xff] %v14763_v34  ;;  %v14767_v23 = vpop.eup %10784 }
0x1b3a   : > { %17052 = vst [vmem:[#allocation43_spill] sm:$0xff] %v14767_v23  ;;  %v14769_v35 = vpop.eup %10786  ;;  %v5922_v29 = vadd.f32 %v14767_v23, %v14763_v34 }
0x1b3b   : > { %5938 = vadd.xlane.f32.xlu0 %v5937_v17  ;;  %5935 = vadd.xlane.f32.xlu1 %v5934_v32  ;;  %17053 = vst [vmem:[#allocation17_spill] sm:$0xff] %v14769_v35  ;;  %v14773_v52 = vpop.eup %10788 }
0x1b3c   : > { %17054 = vst [vmem:[#allocation41_spill] sm:$0xff] %v14773_v52  ;;  %v5919_v60 = vadd.f32 %v14773_v52, %v14769_v35 }
0x1b3f   : > { %5932 = vadd.xlane.f32.xlu0 %v5931_v22  ;;  %5929 = vadd.xlane.f32.xlu1 %v5928_v56 }
0x1b43   : > { %5926 = vadd.xlane.f32.xlu0 %v5925_v4  ;;  %5923 = vadd.xlane.f32.xlu1 %v5922_v29 }
0x1b47   : > { %5920 = vadd.xlane.f32.xlu0 %v5919_v60 }
0x1b5f   : > { %v5485_v17 = vpop.xlane.xlu1 %5484 }
0x1b63   : > { %v5482_v32 = vpop.xlane.xlu0 %5481  ;;  %v5491_v22 = vpop.xlane.xlu1 %5490 }
0x1b67   : > { %v5488_v62 = vpop.xlane.xlu0 %5487  ;;  %v5497_v3 = vpop.xlane.xlu1 %5496 }
0x1b68   : > { %10790 = vrcp.f32 %v5497_v3 }
0x1b6b   : > { %v5494_v56 = vpop.xlane.xlu0 %5493  ;;  %v5771_v2 = vpop.xlane.xlu1 %5770 }
0x1b6c   : > { %v5817_v0 = vsub.f32 %v14365_v53, %v5771_v2  ;;  %v5818_v30 = vsub.f32 %v14367_v46, %v5771_v2  ;;  %v17055_v2 = vld [vmem:[#allocation28_spill] sm:$0xff] }
0x1b6e   : > { %v5849_v21 = vmul.f32 1.442695, %v5817_v0  ;;  %v5851_v40 = vmul.f32 1.442695, %v5818_v30 }
0x1b6f   : > { %v5500_v4 = vpop.xlane.xlu0 %5499  ;;  %v5774_v29 = vpop.xlane.xlu1 %5773 }
0x1b70   : > { %10792 = vpow2.f32 %v5849_v21  ;;  %v5819_v34 = vsub.f32 %v14373_v24, %v5774_v29  ;;  %v5820_v60 = vsub.f32 %v14375_v9, %v5774_v29 }
0x1b71   : > { %10794 = vpow2.f32 %v5851_v40 }
0x1b72   : > { %10796 = vrcp.f32 %v5494_v56  ;;  %v5853_v23 = vmul.f32 1.442695, %v5819_v34  ;;  %v5855_v52 = vmul.f32 1.442695, %v5820_v60 }
0x1b73   : > { %v5058_v35 = vpop.permute.xlu0 %5057  ;;  %10798 = vrcp.f32 %v5500_v4  ;;  %v5503_v53 = vpop.xlane.xlu1 %5502 }
0x1b74   : > { %9765 = vmatprep.mubr.msk.bf16.mxu0 %vm901_vm2, %v5058_v35  ;;  %10800 = vpow2.f32 %v5853_v23 }
0x1b75   : > { %10802 = vpow2.f32 %v5855_v52  ;;  %v10791_v24 = vpop.eup %10790 }
0x1b76   : > { %10804 = vrcp.f32 %v5503_v53  ;;  %v5547_v53 = vmul.f32 %v10791_v24, %v14519_v42  ;;  %v14811_v42 = vld [vmem:[%s16745_s6 + $0x8] sm:$0xff]  }
0x1b77   : > { %v5060_v46 = vpop.permute.xlu1 %5059  ;;  %10806 = vrcp.f32 %v5488_v62 }
0x1b78   : > { %9766 = vmatmul.mubr.msk.bf16.vlgmr.msra.gmra.mxu0 %vm901_vm2, %v5060_v46  ;;  %10808 = vrcp.f32 %v5491_v22 }
0x1b79   : > { %5600 = vmatprep.mubr.bf16.mxu0 %v17055_v2  ;;  %10810 = vrcp.f32 %v5482_v32 }
0x1b7a   : > { %10812 = vrcp.f32 %v5485_v17 }
0x1b7d   : > { %v14786_v9 = vpop.eup %10792 }
0x1b7e   : > { %v14788_v40 = vpop.eup %10794 }
0x1b7f   : > { %v10797_v21 = vpop.eup %10796  ;;  %v5913_v3 = vadd.f32 %v14788_v40, %v14786_v9 }
0x1b80   : > { %v10799_v0 = vpop.eup %10798  ;;  %v5545_v35 = vmul.f32 %v10797_v21, %v14525_v18 }
0x1b81   : > { %v14792_v30 = vpop.eup %10800  ;;  %5914 = vadd.xlane.f32.xlu0 %v5913_v3  ;;  %v5549_v52 = vmul.f32 %v10799_v0, %v14533_v41  ;;  %v5548_v56 = vmul.f32 %v10799_v0, %v14529_v38  ;;  %v5544_v41 = vmul.f32 %v10797_v21, %v14521_v58  ;;  %v5546_v38 = vmul.f32 %v10791_v24, %v14515_v61  ;;  %v17056_v3 = vld [vmem:[#allocation52_spill] sm:$0xff]  ;;  %v17060_v61 = vld [vmem:[#allocation54_spill] sm:$0xff] }
0x1b82   : > { %v14794_v34 = vpop.eup %10802  ;;  %v5565_v32 = vpack.c.bf16 %v5547_v53, %v5545_v35  ;;  %v17057_v35 = vld [vmem:[#allocation57_spill] sm:$0xff]  ;;  %v17058_v58 = vld [vmem:[#allocation56_spill] sm:$0xff] }
0x1b83   : > { %v10805_v23 = vpop.eup %10804  ;;  %v5916_v62 = vadd.f32 %v14794_v34, %v14792_v30  ;;  %v5564_v0 = vpack.c.bf16 %v5546_v38, %v5544_v41  ;;  %v17062_v53 = vld [vmem:[#allocation53_spill] sm:$0xff] }
0x1b84   : > { %v5551_v22 = vmul.f32 %v10805_v23, %v14545_v26  ;;  %v5550_v4 = vmul.f32 %v10805_v23, %v14541_v47  ;;  %v10807_v46 = vpop.eup %10806 }
0x1b85   : > { %5917 = vadd.xlane.f32.xlu1 %v5916_v62  ;;  %v10809_v18 = vpop.eup %10808  ;;  %v5541_v26 = vmul.f32 %v10807_v46, %v14513_v45  ;;  %v17059_v45 = vld [vmem:[#allocation51_spill] sm:$0xff] }
0x1b86   : > { %v5567_v29 = vpack.c.bf16 %v5551_v22, %v5549_v52  ;;  %v5566_v60 = vpack.c.bf16 %v5550_v4, %v5548_v56  ;;  %v5543_v47 = vmul.f32 %v10809_v18, %v17056_v3  ;;  %v10811_v17 = vpop.eup %10810  ;;  %v5540_v52 = vmul.f32 %v10807_v46, %v17057_v35 }
0x1b87   : > { %v10813_v62 = vpop.eup %10812  ;;  %v5537_v21 = vmul.f32 %v10811_v17, %v17058_v58  ;;  %v5542_v22 = vmul.f32 %v10809_v18, %v17059_v45 }
0x1b88   : > { %5568 = vmatprep.subr.bf16.mxu0 %v5567_v29  ;;  %v5563_v23 = vpack.c.bf16 %v5543_v47, %v5541_v26  ;;  %v5539_v24 = vmul.f32 %v10813_v62, %v17060_v61  ;;  %v17061_v29 = vld [vmem:[#allocation55_spill] sm:$0xff] }
0x1b89   : > { %5569 = vmatpush1.bf16.xpose.msra.mxu0 %v5566_v60  ;;  %v5562_v56 = vpack.c.bf16 %v5542_v22, %v5540_v52  ;;  %v5536_v60 = vmul.f32 %v10811_v17, %v17061_v29 }
0x1b8a   : > { %5570 = vmatprep.subr.bf16.mxu0 %v5565_v32  ;;  %v5561_v4 = vpack.c.bf16 %v5539_v24, %v5537_v21  ;;  %v5538_v32 = vmul.f32 %v10813_v62, %v17062_v53  ;;  %v17063_v62 = vld [vmem:[#allocation30_spill] sm:$0xff] }
0x1b8b   : > { %v6196_v58 = vrot.slane %v17063_v62, 4 }
0x1b8c   : > { %v5560_v41 = vpack.c.bf16 %v5538_v32, %v5536_v60 }
0x1b91   : > { %5571 = vmatpush1.bf16.xpose.msra.mxu0 %v5564_v0 }
0x1b92   : > { %5572 = vmatprep.subr.bf16.mxu0 %v5563_v23 }
0x1b96   : > { %6078 = vrot.lane.b32.xlu1 %v14811_v42, %s11523_s24 }
0x1b99   : > { %5573 = vmatpush1.bf16.xpose.msra.mxu0 %v5562_v56 }
0x1b9a   : > { %5574 = vmatprep.subr.bf16.mxu0 %v5561_v4 }
0x1ba1   : > { %5575 = vmatpush1.bf16.xpose.msra.mxu0 %v5560_v41 }
0x1ba4   : > { %v5476_v46 = vpop.xlane.xlu0 %5475 }
0x1ba5   : > { %10814 = vrcp.f32 %v5476_v46  ;;  %v14833_v46 = vld [vmem:[%s16745_s6] sm:$0xff]  }
0x1ba6   : > { %6076 = vrot.lane.b32.xlu0 %v14833_v46, %s11523_s24 }
0x1ba8   : > { %v5470_v26 = vpop.xlane.xlu0 %5469  ;;  %v5479_v18 = vpop.xlane.xlu1 %5478 }
0x1ba9   : > { %10816 = vrcp.f32 %v5470_v26 }
0x1baa   : > { %10818 = vrcp.f32 %v5479_v18 }
0x1bac   : > { %v5473_v38 = vpop.xlane.xlu0 %5472  ;;  %v5467_v3 = vpop.xlane.xlu1 %5466 }
0x1bad   : > { %10820 = vrcp.f32 %v5473_v38 }
0x1bb0   : > { %v5464_v47 = vpop.xlane.xlu0 %5463  ;;  %v5461_v17 = vpop.xlane.xlu1 %5460 }
0x1bb1   : > { %10822 = vrcp.f32 %v5464_v47 }
0x1bb2   : > { %10824 = vrcp.f32 %v5467_v3  ;;  %v10815_v0 = vpop.eup %10814 }
0x1bb3   : > { %v5533_v21 = vmul.f32 %v10815_v0, %v14605_v11  ;;  %v5532_v22 = vmul.f32 %v10815_v0, %v14602_v19 }
0x1bb4   : > { %v5458_v23 = vpop.xlane.xlu0 %5457  ;;  %v5960_v41 = vpop.xlane.xlu1 %5959 }
0x1bb5   : > { %10826 = vrcp.f32 %v5458_v23 }
0x1bb6   : > { %v10817_v35 = vpop.eup %10816  ;;  %10828 = vrcp.f32 %v5461_v17 }
0x1bb7   : > { %v10819_v52 = vpop.eup %10818  ;;  %v5529_v29 = vmul.f32 %v10817_v35, %v14615_v54  ;;  %v5528_v54 = vmul.f32 %v10817_v35, %v14610_v27 }
0x1bb8   : > { %v5535_v45 = vmul.f32 %v10819_v52, %v14623_v59  ;;  %v5534_v61 = vmul.f32 %v10819_v52, %v14619_v33  ;;  %v5957_v11 = vpop.xlane.xlu0 %5956 }
0x1bb9   : > { %6198 = vxpose.xlu1.c.b16.start.end [1/1] (short) %v6196_v58, 128  ;;  %10830 = vrcp.f32 %v5957_v11 }
0x1bba   : > { %v10821_v24 = vpop.eup %10820  ;;  %v5559_v56 = vpack.c.bf16 %v5535_v45, %v5533_v21  ;;  %v5558_v4 = vpack.c.bf16 %v5534_v61, %v5532_v22  ;;  %10832 = vrcp.f32 %v5960_v41 }
0x1bbb   : > { %v5531_v60 = vmul.f32 %v10821_v24, %v14633_v16  ;;  %v5530_v19 = vmul.f32 %v10821_v24, %v14627_v5 }
0x1bbc   : > { %5576 = vmatprep.subr.bf16.mxu0 %v5559_v56  ;;  %v5951_v5 = vpop.xlane.xlu0 %5950 }
0x1bbd   : > { %v5557_v53 = vpack.c.bf16 %v5531_v60, %v5529_v29  ;;  %5577 = vmatpush1.bf16.xpose.msra.mxu0 %v5558_v4  ;;  %v5556_v26 = vpack.c.bf16 %v5530_v19, %v5528_v54  ;;  %10834 = vrcp.f32 %v5951_v5 }
0x1bbe   : > { %v10823_v32 = vpop.eup %10822 }
0x1bbf   : > { %5578 = vmatprep.subr.bf16.mxu0 %v5557_v53  ;;  %v10825_v59 = vpop.eup %10824  ;;  %v5525_v33 = vmul.f32 %v10823_v32, %v14653_v63  ;;  %v5954_v63 = vpop.xlane.xlu1 %5953  ;;  %v5524_v47 = vmul.f32 %v10823_v32, %v14647_v36 }
0x1bc0   : > { %v5527_v16 = vmul.f32 %v10825_v59, %v14643_v12  ;;  %v5526_v27 = vmul.f32 %v10825_v59, %v14637_v31  ;;  %10836 = vrcp.f32 %v5954_v63  ;;  %v5945_v52 = vpop.xlane.xlu0 %5944  ;;  %v17065_v59 = vrot.slane %v17055_v2, 2 }
0x1bc1   : > { %10838 = vrcp.f32 %v5945_v52 }
0x1bc2   : > { %v5555_v18 = vpack.c.bf16 %v5527_v16, %v5525_v33  ;;  %v10827_v38 = vpop.eup %10826  ;;  %v5554_v23 = vpack.c.bf16 %v5526_v27, %v5524_v47 }
0x1bc3   : > { %v10829_v3 = vpop.eup %10828  ;;  %v5521_v0 = vmul.f32 %v10827_v38, %v14673_v48  ;;  %v5948_v21 = vpop.xlane.xlu1 %5947  ;;  %v5520_v45 = vmul.f32 %v10827_v38, %v14667_v14 }
0x1bc4   : > { %v5523_v12 = vmul.f32 %v10829_v3, %v14663_v43  ;;  %v5522_v48 = vmul.f32 %v10829_v3, %v14657_v37  ;;  %10840 = vrcp.f32 %v5948_v21  ;;  %v5939_v24 = vpop.xlane.xlu0 %5938 }
0x1bc5   : > { %5579 = vmatpush1.bf16.xpose.msra.mxu0 %v5556_v26  ;;  %10842 = vrcp.f32 %v5939_v24  ;;  %v17071_v24 = vld [vmem:[#allocation44_spill] sm:$0xff] }
0x1bc6   : > { %5580 = vmatprep.subr.bf16.mxu0 %v5555_v18  ;;  %v5553_v35 = vpack.c.bf16 %v5523_v12, %v5521_v0  ;;  %v10831_v17 = vpop.eup %10830  ;;  %v5552_v22 = vpack.c.bf16 %v5522_v48, %v5520_v45  ;;  %v17068_v45 = vld [vmem:[#allocation45_spill] sm:$0xff]  ;;  %v17069_v48 = vld [vmem:[#allocation50_spill] sm:$0xff] }
0x1bc7   : > { %v10833_v58 = vpop.eup %10832  ;;  %v6006_v36 = vmul.f32 %v10831_v17, %v14693_v44  ;;  %v5942_v4 = vpop.xlane.xlu1 %5941  ;;  %v6005_v29 = vmul.f32 %v10831_v17, %v14687_v15 }
0x1bc8   : > { %v6008_v31 = vmul.f32 %v10833_v58, %v14683_v8  ;;  %v6007_v44 = vmul.f32 %v10833_v58, %v14677_v50  ;;  %10844 = vrcp.f32 %v5942_v4  ;;  %v17064_v8 = vld [vmem:[#allocation18_spill] sm:$0xff]  ;;  %v5933_v11 = vpop.xlane.xlu0 %5932  ;;  %v17067_v58 = vld [vmem:[#allocation49_spill] sm:$0xff] }
0x1bc9   : > { %10846 = vrcp.f32 %v5933_v11  ;;  %v17072_v4 = vld [vmem:[#allocation41_spill] sm:$0xff] }
0x1bca   : > { %v6024_v43 = vpack.c.bf16 %v6008_v31, %v6006_v36  ;;  %v10835_v61 = vpop.eup %10834  ;;  %v6023_v60 = vpack.c.bf16 %v6007_v44, %v6005_v29  ;;  %v17070_v31 = vld [vmem:[#allocation47_spill] sm:$0xff]  ;;  %v17075_v11 = vld [vmem:[#allocation17_spill] sm:$0xff] }
0x1bcb   : > { %v6002_v14 = vmul.f32 %v10835_v61, %v14713_v10  ;;  %v5936_v41 = vpop.xlane.xlu1 %5935  ;;  %v6001_v10 = vmul.f32 %v10835_v61, %v14707_v20 }
0x1bcc   : > { %10848 = vrcp.f32 %v5936_v41  ;;  %v5927_v26 = vpop.xlane.xlu0 %5926 }
0x1bcd   : > { %5581 = vmatpush1.bf16.xpose.msra.mxu0 %v5554_v23  ;;  %v10837_v56 = vpop.eup %10836  ;;  %10850 = vrcp.f32 %v5927_v26 }
0x1bce   : > { %5582 = vmatprep.subr.bf16.mxu0 %v5553_v35  ;;  %v6004_v37 = vmul.f32 %v10837_v56, %v14703_v7  ;;  %v10839_v32 = vpop.eup %10838  ;;  %v6003_v7 = vmul.f32 %v10837_v56, %v14697_v1 }
0x1bcf   : > { %v5998_v50 = vmul.f32 %v10839_v32, %v14725_v57  ;;  %v5930_v38 = vpop.xlane.xlu1 %5929  ;;  %v5997_v5 = vmul.f32 %v10839_v32, %v14721_v51 }
0x1bd0   : > { %v6022_v53 = vpack.c.bf16 %v6004_v37, %v6002_v14  ;;  %v6021_v33 = vpack.c.bf16 %v6003_v7, %v6001_v10  ;;  %10852 = vrcp.f32 %v5930_v38  ;;  %v5921_v47 = vpop.xlane.xlu0 %5920  ;;  %v17073_v14 = vld [vmem:[#allocation46_spill] sm:$0xff]  ;;  %v17074_v37 = vld [vmem:[#allocation43_spill] sm:$0xff] }
0x1bd1   : > { %v10841_v15 = vpop.eup %10840  ;;  %10854 = vrcp.f32 %v5921_v47 }
0x1bd2   : > { %v6000_v19 = vmul.f32 %v10841_v15, %v14719_v13  ;;  %v10843_v16 = vpop.eup %10842  ;;  %v5999_v57 = vmul.f32 %v10841_v15, %v14715_v39  ;;  %v17066_v39 = vld [vmem:[#allocation48_spill] sm:$0xff]  ;;  %v17076_v15 = vld [vmem:[#allocation42_spill] sm:$0xff] }
0x1bd3   : > { %v5994_v20 = vmul.f32 %v10843_v16, %v14737_v49  ;;  %v5924_v27 = vpop.xlane.xlu1 %5923  ;;  %v5993_v12 = vmul.f32 %v10843_v16, %v14733_v25 }
0x1bd4   : > { %v6020_v54 = vpack.c.bf16 %v6000_v19, %v5998_v50  ;;  %v6019_v3 = vpack.c.bf16 %v5999_v57, %v5997_v5  ;;  %10856 = vrcp.f32 %v5924_v27 }
0x1bd5   : > { %5583 = vmatpush1.bf16.xpose.msra.mxu0 %v5552_v22  ;;  %v10845_v18 = vpop.eup %10844 }
0x1bd6   : > { %6025 = vmatprep.subr.bf16.mxu0 %v6024_v43  ;;  %v5996_v1 = vmul.f32 %v10845_v18, %v14731_v28  ;;  %v10847_v63 = vpop.eup %10846  ;;  %v5995_v49 = vmul.f32 %v10845_v18, %v14727_v6 }
0x1bd7   : > { %v5990_v51 = vmul.f32 %v10847_v63, %v14749_v55  ;;  %v5989_v21 = vmul.f32 %v10847_v63, %v17067_v58 }
0x1bd8   : > { %v6018_v13 = vpack.c.bf16 %v5996_v1, %v5994_v20  ;;  %v6017_v35 = vpack.c.bf16 %v5995_v49, %v5993_v12  ;;  %v17077_v20 = vrot.slane %v17064_v8, 2  ;;  %v17078_v1 = vld [vmem:[#allocation23_spill] sm:$0xff] }
0x1bd9   : > { %v10849_v0 = vpop.eup %10848 }
0x1bda   : > { %v5992_v23 = vmul.f32 %v10849_v0, %v17066_v39  ;;  %v10851_v17 = vpop.eup %10850  ;;  %v5991_v25 = vmul.f32 %v10849_v0, %v17069_v48 }
0x1bdb   : > { %v5986_v36 = vmul.f32 %v10851_v17, %v17068_v45  ;;  %v5985_v56 = vmul.f32 %v10851_v17, %v17071_v24 }
0x1bdc   : > { %5601 = vmatmul.mubr.bf16.vlgmr.msra.gmra.mxu0 %v17064_v8  ;;  %v6016_v28 = vpack.c.bf16 %v5992_v23, %v5990_v51  ;;  %v6015_v55 = vpack.c.bf16 %v5991_v25, %v5989_v21  ;;  %v17083_v23 = vrot.slane %v17055_v2, 4  ;;  %v17084_v21 = vld [vmem:[#allocation15_spill] sm:$0xff]  ;;  %v17087_v25 = vmov 0  }
0x1bdd   : > { %6026 = vmatpush1.bf16.xpose.msra.mxu0 %v6023_v60  ;;  %6057 = vmatprep.mubr.bf16.mxu0 %v17065_v59  ;;  %v10853_v52 = vpop.eup %10852  ;;  %v17085_v45 = vrot.slane %v17084_v21, 4 }
0x1bde   : > { %6027 = vmatprep.subr.bf16.mxu0 %v6022_v53  ;;  %v5988_v22 = vmul.f32 %v10853_v52, %v17070_v31  ;;  %v10855_v6 = vpop.eup %10854  ;;  %v5987_v44 = vmul.f32 %v10853_v52, %v17073_v14 }
0x1bdf   : > { %v5982_v29 = vmul.f32 %v10855_v6, %v17072_v4  ;;  %v5981_v59 = vmul.f32 %v10855_v6, %v17075_v11 }
0x1be0   : > { %v6014_v43 = vpack.c.bf16 %v5988_v22, %v5986_v36  ;;  %v6013_v53 = vpack.c.bf16 %v5987_v44, %v5985_v56 }
0x1be1   : > { %v10857_v61 = vpop.eup %10856 }
0x1be2   : > { %v5984_v60 = vmul.f32 %v10857_v61, %v17074_v37  ;;  %v5983_v41 = vmul.f32 %v10857_v61, %v17076_v15 }
0x1be4   : > { %v6012_v32 = vpack.c.bf16 %v5984_v60, %v5982_v29  ;;  %v6011_v50 = vpack.c.bf16 %v5983_v41, %v5981_v59 }
0x1be5   : > { %6028 = vmatpush1.bf16.xpose.msra.mxu0 %v6021_v33 }
0x1be6   : > { %6029 = vmatprep.subr.bf16.mxu0 %v6020_v54 }
0x1bed   : > { %6030 = vmatpush1.bf16.xpose.msra.mxu0 %v6019_v3 }
0x1bee   : > { %6031 = vmatprep.subr.bf16.mxu0 %v6018_v13 }
0x1bf5   : > { %6032 = vmatpush1.bf16.xpose.msra.mxu0 %v6017_v35 }
0x1bf6   : > { %6033 = vmatprep.subr.bf16.mxu0 %v6016_v28 }
0x1bfd   : > { %6034 = vmatpush1.bf16.xpose.msra.mxu0 %v6015_v55 }
0x1bfe   : > { %6035 = vmatprep.subr.bf16.mxu0 %v6014_v43 }
0x1c05   : > { %6036 = vmatpush1.bf16.xpose.msra.mxu0 %v6013_v53 }
0x1c06   : > { %6037 = vmatprep.subr.bf16.mxu0 %v6012_v32 }
0x1c0a   : > { %v5915_v10 = vpop.xlane.xlu0 %5914 }
0x1c0b   : > { %10858 = vrcp.f32 %v5915_v10 }
0x1c0d   : > { %6038 = vmatpush1.bf16.xpose.msra.mxu0 %v6011_v50 }
0x1c0e   : > { %v5918_v7 = vpop.xlane.xlu1 %5917 }
0x1c0f   : > { %10860 = vrcp.f32 %v5918_v7 }
0x1c12   : > { %v6079_v36 = vpop.permute.xlu1 %6078 }
0x1c18   : > { %v10859_v19 = vpop.eup %10858  ;;  %v6077_v47 = vpop.permute.xlu0 %6076 }
0x1c19   : > { %v5978_v54 = vmul.f32 %v10859_v19, %v14788_v40  ;;  %v5977_v26 = vmul.f32 %v10859_v19, %v14786_v9  ;;  %9771 = vmatprep.mubr.msk.bf16.mxu1 %vm901_vm2, %v6077_v47 }
0x1c1b   : > { %v6206_v31 = vpop.trf.xlu1 }
0x1c1c   : > { %v10861_v33 = vpop.eup %10860 }
0x1c1d   : > { %v5980_v16 = vmul.f32 %v10861_v33, %v14794_v34  ;;  %v5979_v18 = vmul.f32 %v10861_v33, %v14792_v30  ;;  %v17079_v34 = vld [vmem:[#allocation29_spill] sm:$0xff]  ;;  %v17081_v30 = vld [vmem:[#allocation14_spill] sm:$0xff] }
0x1c1f   : > { %v6010_v38 = vpack.c.bf16 %v5980_v16, %v5978_v54  ;;  %v6009_v5 = vpack.c.bf16 %v5979_v18, %v5977_v26  ;;  %v6207_v22 = vpop.trf.xlu1 }
0x1c21   : > { %6039 = vmatprep.subr.bf16.mxu0 %v6010_v38 }
0x1c22   : > { %6040 = vmatpush1.bf16.xpose.msra.mxu0 %v6009_v5 }
0x1c23   : > { %v6208_v55 = vpop.trf.xlu1 }
0x1c27   : > { %v6209_v43 = vpop.trf.xlu1 }
0x1c29   : > { %6058 = vmatmul.mubr.bf16.vlgmr.msra.gmra.mxu0 %v17077_v20 }
0x1c2a   : > { %9777 = vmatprep.mubr.msk.bf16.mxu0 %vm901_vm2, %v14833_v46 }
0x1c2b   : > { %v6210_v6 = vpop.trf.xlu1 }
0x1c2f   : > { %v6211_v61 = vpop.trf.xlu1 }
0x1c33   : > { %v6212_v24 = vpop.trf.xlu1 }
0x1c37   : > { %v6213_v56 = vpop.trf.xlu1 }
0x1c38   : > { %v9767_v57 = vpop.f32.mrf.mxu0 }
0x1c39   : > { %v14885_v3 = vadd.f32 %v9767_v57, %v17078_v1 }
0x1c3a   : > { %v5104_v40 = vpop.f32.mrf.mxu0 }
0x1c3b   : > { %v14888_v13 = vadd.f32 %v5104_v40, %v17079_v34 }
0x1c3c   : > { %v9768_v9 = vpop.f32.mrf.mxu0 }
0x1c3d   : > { %17080 = vst [vmem:[#allocation5_spill] sm:$0xff] %v14888_v13  ;;  %v14891_v63 = vadd.f32 %v9768_v9, %v17081_v30 }
0x1c3e   : > { %v14894_v0 = vpop.f32.mrf.mxu0 }
0x1c3f   : > { %17082 = vst [vmem:[#allocation16_spill] sm:$0xff] %v14891_v63 }
0x1c9c   : > { %v5602_v27 = vpop.f32.mrf.mxu0 }
0x1c9d   : > { %v5612_v12 = vpack.c.bf16 %v5602_v27, %v5602_v27 }
0x1c9e   : > { %v5604_v46 = vpop.f32.mrf.mxu0 }
0x1c9f   : > { %v6145_v51 = vsel %vm926_vm1, %v5612_v12, 0  ;;  %9826 = vmatprep.subr.msk.bf16.mxu0 %vm926_vm1, %v5612_v12 }
0x1ca0   : > { %v5605_v49 = vpop.f32.mrf.mxu0  ;;  %9776 = vmatpush3.bf16.msra.mxu0 %v6145_v51 }
0x1ca2   : > { %v5606_v39 = vpop.f32.mrf.mxu0 }
0x1ca3   : > { %9778 = vmatmul.mubr.msk.bf16.vlgmr.msra.gmra.mxu0 %vm901_vm2, %v14811_v42  ;;  %v17086_v42 = vld [vmem:[#allocation25_spill] sm:$0xff] }
0x1ca4   : > { %6639 = vmatprep.mubr.bf16.mxu0 %v17083_v23 }
0x1ce9   : > { %v6059_v35 = vpop.f32.mrf.mxu0 }
0x1cea   : > { %v6065_v28 = vpack.c.bf16 %v6059_v35, %v6059_v35 }
0x1ceb   : > { %v6061_v17 = vpop.f32.mrf.mxu0 }
0x1cec   : > { %v6087_v52 = vsel %vm926_vm1, %v6065_v28, 0  ;;  %9825 = vmatprep.subr.msk.bf16.mxu1 %vm926_vm1, %v6065_v28 }
0x1ced   : > { %v6062_v58 = vpop.f32.mrf.mxu0  ;;  %9770 = vmatpush3.bf16.msra.mxu1 %v6087_v52 }
0x1cee   : > { %9556 = vmatprep.subr.msk.bf16.mxu1 %vm926_vm1, %v17085_v45 }
0x1cef   : > { %v6063_v48 = vpop.f32.mrf.mxu0 }
0x1cf0   : > { %9772 = vmatmul.mubr.msk.bf16.vlgmr.msra.gmra.mxu1 %vm901_vm2, %v6079_v36 }
0x1cf1   : > { %6253 = vmatpush1.bf16.msra.mxu1 %v17086_v42  ;;  %6270 = vmatprep.mubr.bf16.mxu1 %v17087_v25 }
0x1cf8   : > { %9557 = vmatmul.mubr.msk.bf16.vlgmr.msra.gmra.mxu1 %vm901_vm2, %v6206_v31 }
0x1cf9   : > { %6280 = vmatprep.mubr.bf16.mxu1 %v17087_v25 }
0x1d00   : > { %9558 = vmatmul.mubr.msk.bf16.gmra.mxu1 %vm901_vm2, %v6207_v22 }
0x1d01   : > { %6290 = vmatprep.mubr.bf16.mxu1 %v17087_v25 }
0x1d08   : > { %9559 = vmatmul.mubr.msk.bf16.gmra.mxu1 %vm901_vm2, %v6208_v55 }
0x1d09   : > { %6300 = vmatprep.mubr.bf16.mxu1 %v17087_v25 }
0x1d10   : > { %9560 = vmatmul.mubr.msk.bf16.gmra.mxu1 %vm901_vm2, %v6209_v43 }
0x1d11   : > { %6310 = vmatprep.mubr.bf16.mxu1 %v17087_v25 }
0x1d18   : > { %9561 = vmatmul.mubr.msk.bf16.gmra.mxu1 %vm901_vm2, %v6210_v6 }
0x1d19   : > { %6320 = vmatprep.mubr.bf16.mxu1 %v17087_v25 }
0x1d20   : > { %9562 = vmatmul.mubr.msk.bf16.gmra.mxu1 %vm901_vm2, %v6211_v61 }
0x1d21   : > { %6330 = vmatprep.mubr.bf16.mxu1 %v17087_v25 }
0x1d28   : > { %9563 = vmatmul.mubr.msk.bf16.gmra.mxu1 %vm901_vm2, %v6212_v24 }
0x1d29   : > { %6340 = vmatprep.mubr.bf16.mxu1 %v17087_v25 }
0x1d30   : > { %9564 = vmatmul.mubr.msk.bf16.gmra.mxu1 %vm901_vm2, %v6213_v56 }
0x1db0   : > { %v14925_v4 = vpop.f32.mrf.mxu1 }
0x1db2   : > { %v14927_v29 = vpop.f32.mrf.mxu1 }
0x1db4   : > { %v14929_v14 = vpop.f32.mrf.mxu1 }
0x1db6   : > { %v14931_v44 = vpop.f32.mrf.mxu1 }
0x1db7   : > { %17088 = vst [vmem:[#allocation8_spill] sm:$0xff] %v14931_v44 }
0x1db8   : > { %v14933_v37 = vpop.f32.mrf.mxu1 }
0x1dba   : > { %v14935_v60 = vpop.f32.mrf.mxu1 }
0x1dbb   : > { %v6351_v6 = vmax.f32 %v14933_v37, %v14935_v60 }
0x1dbc   : > { %v14937_v53 = vpop.f32.mrf.mxu1 }
0x1dbe   : > { %v14939_v32 = vpop.f32.mrf.mxu1 }
0x1dbf   : > { %v6354_v52 = vmax.f32 %v14937_v53, %v14939_v32 }
0x1dc0   : > { %v14941_v11 = vpop.f32.mrf.mxu1 }
0x1dc2   : > { %v14943_v59 = vpop.f32.mrf.mxu1 }
0x1dc3   : > { %v6357_v43 = vmax.f32 %v14941_v11, %v14943_v59 }
0x1dc4   : > { %v14945_v15 = vpop.f32.mrf.mxu1 }
0x1dc6   : > { %v14947_v41 = vpop.f32.mrf.mxu1 }
0x1dc7   : > { %v6360_v28 = vmax.f32 %v14945_v15, %v14947_v41 }
0x1dc8   : > { %v14949_v10 = vpop.f32.mrf.mxu1 }
0x1dca   : > { %v14951_v50 = vpop.f32.mrf.mxu1 }
0x1dcb   : > { %v6363_v22 = vmax.f32 %v14949_v10, %v14951_v50 }
0x1dcc   : > { %v14953_v7 = vpop.f32.mrf.mxu1 }
0x1dce   : > { %v14955_v19 = vpop.f32.mrf.mxu1 }
0x1dcf   : > { %v6366_v55 = vmax.f32 %v14953_v7, %v14955_v19 }
0x1dd0   : > { %v14957_v33 = vpop.f32.mrf.mxu1 }
0x1dd2   : > { %v14959_v54 = vpop.f32.mrf.mxu1 }
0x1dd3   : > { %v6369_v42 = vmax.f32 %v14957_v33, %v14959_v54 }
0x1dd4   : > { %v14961_v16 = vpop.f32.mrf.mxu1 }
0x1dd6   : > { %v14963_v26 = vpop.f32.mrf.mxu1 }
0x1dd7   : > { %v6372_v31 = vmax.f32 %v14961_v16, %v14963_v26 }
0x1dd8   : > { %v14965_v18 = vpop.f32.mrf.mxu1 }
0x1dda   : > { %v14967_v38 = vpop.f32.mrf.mxu1 }
0x1ddb   : > { %v6375_v36 = vmax.f32 %v14965_v18, %v14967_v38 }
0x1ddc   : > { %v14969_v5 = vpop.f32.mrf.mxu1 }
0x1dde   : > { %v14971_v20 = vpop.f32.mrf.mxu1 }
0x1ddf   : > { %v6378_v48 = vmax.f32 %v14969_v5, %v14971_v20 }
0x1de0   : > { %v14973_v57 = vpop.f32.mrf.mxu1 }
0x1de2   : > { %v14975_v1 = vpop.f32.mrf.mxu1 }
0x1de3   : > { %v6381_v58 = vmax.f32 %v14973_v57, %v14975_v1 }
0x1de4   : > { %v14977_v40 = vpop.f32.mrf.mxu1 }
0x1de6   : > { %v14979_v34 = vpop.f32.mrf.mxu1 }
0x1de7   : > { %v6384_v45 = vmax.f32 %v14977_v40, %v14979_v34 }
0x1de8   : > { %v6332_v9 = vpop.f32.mrf.mxu1 }
0x1dea   : > { %v6334_v30 = vpop.f32.mrf.mxu1 }
0x1deb   : > { %v6387_v23 = vmax.f32 %v6332_v9, %v6334_v30 }
0x1dec   : > { %v6336_v47 = vpop.f32.mrf.mxu1 }
0x1dee   : > { %v6338_v27 = vpop.f32.mrf.mxu1 }
0x1def   : > { %v6390_v17 = vmax.f32 %v6336_v47, %v6338_v27 }
0x1df0   : > { %v6342_v12 = vpop.f32.mrf.mxu1 }
0x1df2   : > { %v6344_v46 = vpop.f32.mrf.mxu1 }
0x1df3   : > { %v6393_v51 = vmax.f32 %v6342_v12, %v6344_v46 }
0x1df4   : > { %v6346_v49 = vpop.f32.mrf.mxu1 }
0x1df5   : > { %6394 = vmax.xlane.f32.xlu0 %v6393_v51 }
0x1df6   : > { %v6348_v39 = vpop.f32.mrf.mxu1 }
0x1df7   : > { %v6396_v35 = vmax.f32 %v6346_v49, %v6348_v39 }
0x1df9   : > { %6388 = vmax.xlane.f32.xlu0 %v6387_v23  ;;  %6397 = vmax.xlane.f32.xlu1 %v6396_v35 }
0x1dfd   : > { %6391 = vmax.xlane.f32.xlu0 %v6390_v17  ;;  %6361 = vmax.xlane.f32.xlu1 %v6360_v28 }
0x1e01   : > { %6382 = vmax.xlane.f32.xlu0 %v6381_v58  ;;  %6355 = vmax.xlane.f32.xlu1 %v6354_v52 }
0x1e05   : > { %6385 = vmax.xlane.f32.xlu0 %v6384_v45 }
0x1e09   : > { %6376 = vmax.xlane.f32.xlu0 %v6375_v36 }
0x1e0d   : > { %6379 = vmax.xlane.f32.xlu0 %v6378_v48 }
0x1e11   : > { %6370 = vmax.xlane.f32.xlu0 %v6369_v42 }
0x1e15   : > { %6373 = vmax.xlane.f32.xlu0 %v6372_v31 }
0x1e19   : > { %6364 = vmax.xlane.f32.xlu0 %v6363_v22 }
0x1e1d   : > { %6367 = vmax.xlane.f32.xlu0 %v6366_v55 }
0x1e21   : > { %6358 = vmax.xlane.f32.xlu0 %v6357_v43 }
0x1e25   : > { %6352 = vmax.xlane.f32.xlu0 %v6351_v6 }
0x1e7e   : > { %v6395_v61 = vpop.xlane.xlu0 %6394 }
0x1e7f   : > { %v6427_v24 = vsub.f32 %v6342_v12, %v6395_v61  ;;  %v6428_v56 = vsub.f32 %v6344_v46, %v6395_v61 }
0x1e81   : > { %v6487_v51 = vmul.f32 1.442695, %v6427_v24  ;;  %v6489_v23 = vmul.f32 1.442695, %v6428_v56 }
0x1e82   : > { %v6389_v35 = vpop.xlane.xlu0 %6388  ;;  %v6398_v28 = vpop.xlane.xlu1 %6397 }
0x1e83   : > { %10862 = vpow2.f32 %v6487_v51  ;;  %v6423_v17 = vsub.f32 %v6332_v9, %v6389_v35  ;;  %v6424_v52 = vsub.f32 %v6334_v30, %v6389_v35  ;;  %v6429_v58 = vsub.f32 %v6346_v49, %v6398_v28 }
0x1e84   : > { %10864 = vpow2.f32 %v6489_v23  ;;  %v6430_v45 = vsub.f32 %v6348_v39, %v6398_v28 }
0x1e85   : > { %v6479_v36 = vmul.f32 1.442695, %v6423_v17  ;;  %v6481_v48 = vmul.f32 1.442695, %v6424_v52  ;;  %v6491_v42 = vmul.f32 1.442695, %v6429_v58 }
0x1e86   : > { %v6493_v31 = vmul.f32 1.442695, %v6430_v45  ;;  %v6392_v22 = vpop.xlane.xlu0 %6391 }
0x1e87   : > { %10866 = vpow2.f32 %v6479_v36  ;;  %v6425_v55 = vsub.f32 %v6336_v47, %v6392_v22  ;;  %v6426_v43 = vsub.f32 %v6338_v27, %v6392_v22 }
0x1e88   : > { %10868 = vpow2.f32 %v6481_v48 }
0x1e89   : > { %10870 = vpow2.f32 %v6491_v42  ;;  %v6483_v12 = vmul.f32 1.442695, %v6425_v55  ;;  %v6485_v46 = vmul.f32 1.442695, %v6426_v43 }
0x1e8a   : > { %10872 = vpow2.f32 %v6493_v31  ;;  %v6383_v6 = vpop.xlane.xlu0 %6382 }
0x1e8b   : > { %10874 = vpow2.f32 %v6483_v12  ;;  %v6419_v9 = vsub.f32 %v14973_v57, %v6383_v6  ;;  %v6420_v30 = vsub.f32 %v14975_v1, %v6383_v6 }
0x1e8c   : > { %10876 = vpow2.f32 %v6485_v46 }
0x1e8d   : > { %v6471_v49 = vmul.f32 1.442695, %v6419_v9  ;;  %v6473_v39 = vmul.f32 1.442695, %v6420_v30 }
0x1e8e   : > { %v6386_v61 = vpop.xlane.xlu0 %6385 }
0x1e8f   : > { %10878 = vpow2.f32 %v6471_v49  ;;  %v6421_v24 = vsub.f32 %v14977_v40, %v6386_v61  ;;  %v6422_v47 = vsub.f32 %v14979_v34, %v6386_v61 }
0x1e90   : > { %v15009_v27 = vpop.eup %10862  ;;  %10880 = vpow2.f32 %v6473_v39 }
0x1e91   : > { %v15011_v56 = vpop.eup %10864  ;;  %v6475_v51 = vmul.f32 1.442695, %v6421_v24  ;;  %v6477_v23 = vmul.f32 1.442695, %v6422_v47 }
0x1e92   : > { %v6377_v35 = vpop.xlane.xlu0 %6376  ;;  %v6537_v57 = vadd.f32 %v15011_v56, %v15009_v27 }
0x1e93   : > { %10882 = vpow2.f32 %v6475_v51  ;;  %v6415_v1 = vsub.f32 %v14965_v18, %v6377_v35  ;;  %v6416_v28 = vsub.f32 %v14967_v38, %v6377_v35 }
0x1e94   : > { %v15017_v17 = vpop.eup %10866  ;;  %10884 = vpow2.f32 %v6477_v23  ;;  %6538 = vadd.xlane.f32.xlu0 %v6537_v57 }
0x1e95   : > { %v15019_v40 = vpop.eup %10868  ;;  %v6463_v34 = vmul.f32 1.442695, %v6415_v1  ;;  %v6465_v52 = vmul.f32 1.442695, %v6416_v28 }
0x1e96   : > { %v15021_v58 = vpop.eup %10870  ;;  %v6380_v45 = vpop.xlane.xlu0 %6379  ;;  %v6531_v36 = vadd.f32 %v15019_v40, %v15017_v17 }
0x1e97   : > { %v15025_v48 = vpop.eup %10872  ;;  %10886 = vpow2.f32 %v6463_v34  ;;  %v6417_v18 = vsub.f32 %v14969_v5, %v6380_v45  ;;  %v6418_v38 = vsub.f32 %v14971_v20, %v6380_v45 }
0x1e98   : > { %v15029_v42 = vpop.eup %10874  ;;  %10888 = vpow2.f32 %v6465_v52  ;;  %6532 = vadd.xlane.f32.xlu0 %v6531_v36  ;;  %v6540_v31 = vadd.f32 %v15025_v48, %v15021_v58 }
0x1e99   : > { %v15033_v22 = vpop.eup %10876  ;;  %v6467_v55 = vmul.f32 1.442695, %v6417_v18  ;;  %v6469_v43 = vmul.f32 1.442695, %v6418_v38 }
0x1e9a   : > { %6541 = vadd.xlane.f32.xlu1 %v6540_v31  ;;  %v6371_v12 = vpop.xlane.xlu0 %6370  ;;  %v6534_v46 = vadd.f32 %v15033_v22, %v15029_v42 }
0x1e9b   : > { %10890 = vpow2.f32 %v6467_v55  ;;  %v6411_v5 = vsub.f32 %v14957_v33, %v6371_v12  ;;  %v6412_v20 = vsub.f32 %v14959_v54, %v6371_v12  ;;  %v6362_v54 = vpop.xlane.xlu1 %6361 }
0x1e9c   : > { %v15039_v6 = vpop.eup %10878  ;;  %10892 = vpow2.f32 %v6469_v43  ;;  %v6405_v52 = vsub.f32 %v14945_v15, %v6362_v54  ;;  %v6406_v18 = vsub.f32 %v14947_v41, %v6362_v54 }
0x1e9d   : > { %v15041_v9 = vpop.eup %10880  ;;  %v6455_v30 = vmul.f32 1.442695, %v6411_v5  ;;  %v6457_v49 = vmul.f32 1.442695, %v6412_v20 }
0x1e9e   : > { %6535 = vadd.xlane.f32.xlu1 %v6534_v46  ;;  %v6374_v39 = vpop.xlane.xlu0 %6373  ;;  %v6525_v61 = vadd.f32 %v15041_v9, %v15039_v6  ;;  %v6443_v15 = vmul.f32 1.442695, %v6405_v52  ;;  %v6445_v20 = vmul.f32 1.442695, %v6406_v18 }
0x1e9f   : > { %10894 = vpow2.f32 %v6455_v30  ;;  %v6413_v24 = vsub.f32 %v14961_v16, %v6374_v39  ;;  %v6414_v47 = vsub.f32 %v14963_v26, %v6374_v39  ;;  %v6356_v38 = vpop.xlane.xlu1 %6355 }
0x1ea0   : > { %v15047_v33 = vpop.eup %10882  ;;  %10896 = vpow2.f32 %v6457_v49  ;;  %6526 = vadd.xlane.f32.xlu0 %v6525_v61  ;;  %v6401_v46 = vsub.f32 %v14937_v53, %v6356_v38  ;;  %v6402_v30 = vsub.f32 %v14939_v32, %v6356_v38 }
0x1ea1   : > { %v15049_v51 = vpop.eup %10884  ;;  %v6459_v23 = vmul.f32 1.442695, %v6413_v24  ;;  %v6461_v35 = vmul.f32 1.442695, %v6414_v47 }
0x1ea2   : > { %v6365_v57 = vpop.xlane.xlu0 %6364  ;;  %v6528_v1 = vadd.f32 %v15049_v51, %v15047_v33  ;;  %v6435_v53 = vmul.f32 1.442695, %v6401_v46  ;;  %v6437_v32 = vmul.f32 1.442695, %v6402_v30 }
0x1ea3   : > { %10898 = vpow2.f32 %v6459_v23  ;;  %v6407_v28 = vsub.f32 %v14949_v10, %v6365_v57  ;;  %v6408_v16 = vsub.f32 %v14951_v50, %v6365_v57 }
0x1ea4   : > { %v15055_v34 = vpop.eup %10886  ;;  %10900 = vpow2.f32 %v6461_v35  ;;  %6529 = vadd.xlane.f32.xlu1 %v6528_v1 }
0x1ea5   : > { %v15057_v26 = vpop.eup %10888  ;;  %v6447_v45 = vmul.f32 1.442695, %v6407_v28  ;;  %v6449_v36 = vmul.f32 1.442695, %v6408_v16 }
0x1ea6   : > { %v6368_v31 = vpop.xlane.xlu0 %6367  ;;  %v6519_v55 = vadd.f32 %v15057_v26, %v15055_v34 }
0x1ea7   : > { %10902 = vpow2.f32 %v6447_v45  ;;  %v6409_v10 = vsub.f32 %v14953_v7, %v6368_v31  ;;  %v6410_v50 = vsub.f32 %v14955_v19, %v6368_v31 }
0x1ea8   : > { %v15065_v43 = vpop.eup %10890  ;;  %10904 = vpow2.f32 %v6449_v36  ;;  %6520 = vadd.xlane.f32.xlu0 %v6519_v55 }
0x1ea9   : > { %v15067_v12 = vpop.eup %10892  ;;  %v6451_v41 = vmul.f32 1.442695, %v6409_v10  ;;  %v6453_v5 = vmul.f32 1.442695, %v6410_v50 }
0x1eaa   : > { %v6359_v49 = vpop.xlane.xlu0 %6358  ;;  %v6522_v7 = vadd.f32 %v15067_v12, %v15065_v43 }
0x1eab   : > { %10906 = vpow2.f32 %v6451_v41  ;;  %v6403_v19 = vsub.f32 %v14941_v11, %v6359_v49  ;;  %v6404_v39 = vsub.f32 %v14943_v59, %v6359_v49 }
0x1eac   : > { %v15075_v61 = vpop.eup %10894  ;;  %10908 = vpow2.f32 %v6453_v5  ;;  %6523 = vadd.xlane.f32.xlu1 %v6522_v7 }
0x1ead   : > { %v15077_v24 = vpop.eup %10896  ;;  %10910 = vpow2.f32 %v6443_v15  ;;  %v6439_v47 = vmul.f32 1.442695, %v6403_v19  ;;  %v6441_v54 = vmul.f32 1.442695, %v6404_v39  ;;  %v6714_v19 = vrot.slane %v17063_v62, 6 }
0x1eae   : > { %10912 = vpow2.f32 %v6445_v20  ;;  %v6353_v23 = vpop.xlane.xlu0 %6352  ;;  %v6513_v35 = vadd.f32 %v15077_v24, %v15075_v61 }
0x1eaf   : > { %10914 = vpow2.f32 %v6439_v47  ;;  %v6399_v11 = vsub.f32 %v14933_v37, %v6353_v23  ;;  %v6400_v59 = vsub.f32 %v14935_v60, %v6353_v23 }
0x1eb0   : > { %v15083_v57 = vpop.eup %10898  ;;  %10916 = vpow2.f32 %v6441_v54  ;;  %6514 = vadd.xlane.f32.xlu0 %v6513_v35 }
0x1eb1   : > { %v15085_v1 = vpop.eup %10900  ;;  %10918 = vpow2.f32 %v6435_v53  ;;  %v6431_v28 = vmul.f32 1.442695, %v6399_v11  ;;  %v6433_v16 = vmul.f32 1.442695, %v6400_v59 }
0x1eb2   : > { %10920 = vpow2.f32 %v6437_v32  ;;  %v6516_v52 = vadd.f32 %v15085_v1, %v15083_v57 }
0x1eb3   : > { %10922 = vpow2.f32 %v6431_v28 }
0x1eb4   : > { %v15089_v45 = vpop.eup %10902  ;;  %10924 = vpow2.f32 %v6433_v16  ;;  %6517 = vadd.xlane.f32.xlu1 %v6516_v52 }
0x1eb5   : > { %v15091_v37 = vpop.eup %10904 }
0x1eb6   : > { %v6507_v60 = vadd.f32 %v15091_v37, %v15089_v45 }
0x1eb8   : > { %v15095_v36 = vpop.eup %10906  ;;  %6508 = vadd.xlane.f32.xlu0 %v6507_v60 }
0x1eb9   : > { %v15097_v18 = vpop.eup %10908 }
0x1eba   : > { %v15099_v38 = vpop.eup %10910  ;;  %v6510_v31 = vadd.f32 %v15097_v18, %v15095_v36 }
0x1ebb   : > { %v15103_v55 = vpop.eup %10912 }
0x1ebc   : > { %v15105_v10 = vpop.eup %10914  ;;  %6511 = vadd.xlane.f32.xlu1 %v6510_v31  ;;  %v6504_v41 = vadd.f32 %v15103_v55, %v15099_v38 }
0x1ebd   : > { %v15107_v50 = vpop.eup %10916 }
0x1ebe   : > { %v15109_v15 = vpop.eup %10918  ;;  %v6501_v46 = vadd.f32 %v15107_v50, %v15105_v10 }
0x1ebf   : > { %v15115_v5 = vpop.eup %10920 }
0x1ec0   : > { %v15117_v20 = vpop.eup %10922  ;;  %6502 = vadd.xlane.f32.xlu0 %v6501_v46  ;;  %6505 = vadd.xlane.f32.xlu1 %v6504_v41  ;;  %v6498_v7 = vadd.f32 %v15115_v5, %v15109_v15 }
0x1ec1   : > { %v15119_v30 = vpop.eup %10924 }
0x1ec2   : > { %v6495_v49 = vadd.f32 %v15119_v30, %v15117_v20 }
0x1ec4   : > { %6496 = vadd.xlane.f32.xlu0 %v6495_v49  ;;  %6499 = vadd.xlane.f32.xlu1 %v6498_v7 }
0x1ef1   : > { %6716 = vxpose.xlu0.c.b16.start.end [1/1] (short) %v6714_v19, 128 }
0x1f1d   : > { %v6539_v39 = vpop.xlane.xlu0 %6538 }
0x1f1e   : > { %10926 = vrcp.f32 %v6539_v39 }
0x1f21   : > { %v6533_v53 = vpop.xlane.xlu0 %6532 }
0x1f23   : > { %v6542_v47 = vpop.xlane.xlu1 %6541 }
0x1f24   : > { %10928 = vrcp.f32 %v6542_v47 }
0x1f25   : > { %10930 = vrcp.f32 %v6533_v53 }
0x1f27   : > { %v6536_v54 = vpop.xlane.xlu1 %6535 }
0x1f28   : > { %10932 = vrcp.f32 %v6536_v54 }
0x1f29   : > { %v6527_v32 = vpop.xlane.xlu0 %6526 }
0x1f2a   : > { %10934 = vrcp.f32 %v6527_v32 }
0x1f2b   : > { %v10927_v35 = vpop.eup %10926 }
0x1f2c   : > { %v6588_v28 = vmul.f32 %v10927_v35, %v15011_v56  ;;  %v6587_v16 = vmul.f32 %v10927_v35, %v15009_v27 }
0x1f2d   : > { %v6530_v23 = vpop.xlane.xlu1 %6529 }
0x1f2e   : > { %10936 = vrcp.f32 %v6530_v23 }
0x1f31   : > { %v10929_v11 = vpop.eup %10928  ;;  %v6521_v59 = vpop.xlane.xlu0 %6520 }
0x1f32   : > { %v6590_v62 = vmul.f32 %v10929_v11, %v15025_v48  ;;  %v6589_v52 = vmul.f32 %v10929_v11, %v15021_v58  ;;  %v10931_v60 = vpop.eup %10930  ;;  %10938 = vrcp.f32 %v6521_v59 }
0x1f33   : > { %v6584_v7 = vmul.f32 %v10931_v60, %v15019_v40  ;;  %v6583_v53 = vmul.f32 %v10931_v60, %v15017_v17 }
0x1f34   : > { %v6606_v31 = vpack.c.bf16 %v6590_v62, %v6588_v28  ;;  %v6605_v46 = vpack.c.bf16 %v6589_v52, %v6587_v16 }
0x1f35   : > { %v10933_v41 = vpop.eup %10932  ;;  %v6524_v49 = vpop.xlane.xlu1 %6523 }
0x1f36   : > { %6607 = vmatprep.subr.bf16.mxu0 %v6606_v31  ;;  %10940 = vrcp.f32 %v6524_v49  ;;  %v6586_v19 = vmul.f32 %v10933_v41, %v15033_v22  ;;  %v6585_v27 = vmul.f32 %v10933_v41, %v15029_v42 }
0x1f37   : > { %6608 = vmatpush1.bf16.xpose.msra.mxu0 %v6605_v46  ;;  %v10935_v39 = vpop.eup %10934 }
0x1f38   : > { %v6604_v56 = vpack.c.bf16 %v6586_v19, %v6584_v7  ;;  %v6580_v47 = vmul.f32 %v10935_v39, %v15041_v9  ;;  %v6603_v32 = vpack.c.bf16 %v6585_v27, %v6583_v53  ;;  %v6579_v59 = vmul.f32 %v10935_v39, %v15039_v6 }
0x1f39   : > { %v6515_v48 = vpop.xlane.xlu0 %6514 }
0x1f3a   : > { %6609 = vmatprep.subr.bf16.mxu0 %v6604_v56  ;;  %10942 = vrcp.f32 %v6515_v48 }
0x1f3b   : > { %v10937_v58 = vpop.eup %10936 }
0x1f3c   : > { %v6582_v54 = vmul.f32 %v10937_v58, %v15049_v51  ;;  %v6581_v11 = vmul.f32 %v10937_v58, %v15047_v33 }
0x1f3d   : > { %v6518_v23 = vpop.xlane.xlu1 %6517 }
0x1f3e   : > { %10944 = vrcp.f32 %v6518_v23  ;;  %v6602_v40 = vpack.c.bf16 %v6582_v54, %v6580_v47  ;;  %v6601_v28 = vpack.c.bf16 %v6581_v11, %v6579_v59 }
0x1f3f   : > { %6610 = vmatpush1.bf16.xpose.msra.mxu0 %v6603_v32  ;;  %v10939_v22 = vpop.eup %10938 }
0x1f40   : > { %6611 = vmatprep.subr.bf16.mxu0 %v6602_v40  ;;  %v6576_v17 = vmul.f32 %v10939_v22, %v15057_v26  ;;  %v6575_v6 = vmul.f32 %v10939_v22, %v15055_v34 }
0x1f41   : > { %v6509_v35 = vpop.xlane.xlu0 %6508 }
0x1f42   : > { %10946 = vrcp.f32 %v6509_v35 }
0x1f43   : > { %v10941_v42 = vpop.eup %10940 }
0x1f44   : > { %v6578_v9 = vmul.f32 %v10941_v42, %v15067_v12  ;;  %v6577_v31 = vmul.f32 %v10941_v42, %v15065_v43  ;;  %v17089_v42 = vrot.slane %v17084_v21, 6 }
0x1f45   : > { %v6512_v51 = vpop.xlane.xlu1 %6511 }
0x1f46   : > { %10948 = vrcp.f32 %v6512_v51  ;;  %v6600_v62 = vpack.c.bf16 %v6578_v9, %v6576_v17  ;;  %v6599_v46 = vpack.c.bf16 %v6577_v31, %v6575_v6 }
0x1f47   : > { %6612 = vmatpush1.bf16.xpose.msra.mxu0 %v6601_v28  ;;  %v10943_v16 = vpop.eup %10942  ;;  %v15180_v28 = vpop.f32.mrf.mxu0 }
0x1f48   : > { %6613 = vmatprep.subr.bf16.mxu0 %v6600_v62  ;;  %v6572_v26 = vmul.f32 %v10943_v16, %v15077_v24  ;;  %v6571_v39 = vmul.f32 %v10943_v16, %v15075_v61 }
0x1f49   : > { %v6503_v52 = vpop.xlane.xlu0 %6502  ;;  %v6506_v60 = vpop.xlane.xlu1 %6505 }
0x1f4a   : > { %10950 = vrcp.f32 %v6503_v52  ;;  %v15182_v51 = vpop.f32.mrf.mxu0 }
0x1f4b   : > { %v10945_v33 = vpop.eup %10944  ;;  %10952 = vrcp.f32 %v6506_v60 }
0x1f4c   : > { %v6574_v12 = vmul.f32 %v10945_v33, %v15085_v1  ;;  %v6573_v56 = vmul.f32 %v10945_v33, %v15083_v57  ;;  %v15184_v62 = vpop.f32.mrf.mxu0 }
0x1f4d   : > { %v6497_v41 = vpop.xlane.xlu0 %6496  ;;  %v6500_v7 = vpop.xlane.xlu1 %6499 }
0x1f4e   : > { %v6598_v49 = vpack.c.bf16 %v6574_v12, %v6572_v26  ;;  %10954 = vrcp.f32 %v6497_v41  ;;  %v6597_v48 = vpack.c.bf16 %v6573_v56, %v6571_v39  ;;  %v15186_v16 = vpop.f32.mrf.mxu0 }
0x1f4f   : > { %6614 = vmatpush1.bf16.xpose.msra.mxu0 %v6599_v46  ;;  %v10947_v19 = vpop.eup %10946  ;;  %10956 = vrcp.f32 %v6500_v7  ;;  %17092 = vst [vmem:[#allocation7_spill] sm:$0xff] %v15186_v16 }
0x1f50   : > { %6615 = vmatprep.subr.bf16.mxu0 %v6598_v49  ;;  %v6568_v34 = vmul.f32 %v10947_v19, %v15091_v37  ;;  %v6567_v54 = vmul.f32 %v10947_v19, %v15089_v45 }
0x1f53   : > { %v10949_v43 = vpop.eup %10948 }
0x1f54   : > { %v6570_v24 = vmul.f32 %v10949_v43, %v15097_v18  ;;  %v6569_v53 = vmul.f32 %v10949_v43, %v15095_v36 }
0x1f56   : > { %v6596_v1 = vpack.c.bf16 %v6570_v24, %v6568_v34  ;;  %v6595_v32 = vpack.c.bf16 %v6569_v53, %v6567_v54 }
0x1f57   : > { %v10951_v27 = vpop.eup %10950  ;;  %6616 = vmatpush1.bf16.xpose.msra.mxu0 %v6597_v48 }
0x1f58   : > { %v10953_v58 = vpop.eup %10952  ;;  %6617 = vmatprep.subr.bf16.mxu0 %v6596_v1  ;;  %v6564_v47 = vmul.f32 %v10951_v27, %v15107_v50  ;;  %v6563_v18 = vmul.f32 %v10951_v27, %v15105_v10  ;;  %v17091_v10 = vld [vmem:[#allocation21_spill] sm:$0xff] }
0x1f59   : > { %v6566_v57 = vmul.f32 %v10953_v58, %v15103_v55  ;;  %v6565_v40 = vmul.f32 %v10953_v58, %v15099_v38  ;;  %v17090_v38 = vrot.slane %v17064_v8, 4 }
0x1f5b   : > { %v10955_v61 = vpop.eup %10954  ;;  %v6594_v23 = vpack.c.bf16 %v6566_v57, %v6564_v47  ;;  %v6593_v35 = vpack.c.bf16 %v6565_v40, %v6563_v18 }
0x1f5c   : > { %v10957_v37 = vpop.eup %10956  ;;  %v6560_v22 = vmul.f32 %v10955_v61, %v15119_v30  ;;  %v6559_v45 = vmul.f32 %v10955_v61, %v15117_v20 }
0x1f5d   : > { %v6562_v36 = vmul.f32 %v10957_v37, %v15115_v5  ;;  %v6561_v55 = vmul.f32 %v10957_v37, %v15109_v15  ;;  %v6724_v5 = vpop.trf.xlu0 }
0x1f5f   : > { %6618 = vmatpush1.bf16.xpose.msra.mxu0 %v6595_v32  ;;  %v6592_v50 = vpack.c.bf16 %v6562_v36, %v6560_v22  ;;  %v6591_v11 = vpack.c.bf16 %v6561_v55, %v6559_v45 }
0x1f60   : > { %6619 = vmatprep.subr.bf16.mxu0 %v6594_v23 }
0x1f61   : > { %v6725_v20 = vpop.trf.xlu0 }
0x1f65   : > { %v6726_v21 = vpop.trf.xlu0 }
0x1f67   : > { %6620 = vmatpush1.bf16.xpose.msra.mxu0 %v6593_v35 }
0x1f68   : > { %6621 = vmatprep.subr.bf16.mxu0 %v6592_v50 }
0x1f69   : > { %v6727_v15 = vpop.trf.xlu0 }
0x1f6d   : > { %v6728_v30 = vpop.trf.xlu0 }
0x1f6f   : > { %6622 = vmatpush1.bf16.xpose.msra.mxu0 %v6591_v11 }
0x1f70   : > { %9567 = vmatprep.subr.msk.bf16.mxu0 %vm926_vm1, %v17089_v42 }
0x1f71   : > { %v6729_v59 = vpop.trf.xlu0 }
0x1f75   : > { %v6730_v17 = vpop.trf.xlu0 }
0x1f76   : > { %6640 = vmatmul.mubr.bf16.vlgmr.msra.gmra.mxu0 %v17090_v38 }
0x1f77   : > { %6771 = vmatpush1.bf16.msra.mxu0 %v17091_v10  ;;  %6788 = vmatprep.mubr.bf16.mxu0 %v17087_v25 }
0x1f79   : > { %v6731_v9 = vpop.trf.xlu0 }
0x1f7e   : > { %9568 = vmatmul.mubr.msk.bf16.vlgmr.msra.gmra.mxu0 %vm901_vm2, %v6724_v5 }
0x1f7f   : > { %6798 = vmatprep.mubr.bf16.mxu0 %v17087_v25 }
0x1f86   : > { %9569 = vmatmul.mubr.msk.bf16.gmra.mxu0 %vm901_vm2, %v6725_v20 }
0x1f87   : > { %6808 = vmatprep.mubr.bf16.mxu0 %v17087_v25 }
0x1f8e   : > { %9570 = vmatmul.mubr.msk.bf16.gmra.mxu0 %vm901_vm2, %v6726_v21 }
0x1f8f   : > { %6818 = vmatprep.mubr.bf16.mxu0 %v17087_v25 }
0x1f96   : > { %9571 = vmatmul.mubr.msk.bf16.gmra.mxu0 %vm901_vm2, %v6727_v15 }
0x1f97   : > { %6828 = vmatprep.mubr.bf16.mxu0 %v17087_v25 }
0x1f9e   : > { %9572 = vmatmul.mubr.msk.bf16.gmra.mxu0 %vm901_vm2, %v6728_v30 }
0x1f9f   : > { %6838 = vmatprep.mubr.bf16.mxu0 %v17087_v25 }
0x1fa6   : > { %9573 = vmatmul.mubr.msk.bf16.gmra.mxu0 %vm901_vm2, %v6729_v59 }
0x1fa7   : > { %6848 = vmatprep.mubr.bf16.mxu0 %v17087_v25 }
0x1fae   : > { %9574 = vmatmul.mubr.msk.bf16.gmra.mxu0 %vm901_vm2, %v6730_v17 }
0x1faf   : > { %6858 = vmatprep.mubr.bf16.mxu0 %v17087_v25 }
0x1fb6   : > { %9575 = vmatmul.mubr.msk.bf16.gmra.mxu0 %vm901_vm2, %v6731_v9 }
0x2036   : > { %v6641_v52 = vpop.f32.mrf.mxu0 }
0x2037   : > { %v6647_v60 = vpack.c.bf16 %v6641_v52, %v6641_v52 }
0x2038   : > { %v6643_v31 = vpop.f32.mrf.mxu0 }
0x2039   : > { %v6659_v33 = vsel %vm926_vm1, %v6647_v60, 0  ;;  %9827 = vmatprep.subr.msk.bf16.mxu1 %vm926_vm1, %v6647_v60 }
0x203a   : > { %v6644_v6 = vpop.f32.mrf.mxu0  ;;  %9782 = vmatpush3.bf16.msra.mxu1 %v6659_v33 }
0x203c   : > { %v6645_v26 = vpop.f32.mrf.mxu0 }
0x203e   : > { %v15190_v12 = vpop.f32.mrf.mxu0 }
0x2040   : > { %v15192_v46 = vpop.f32.mrf.mxu0 }
0x2041   : > { %v6869_v33 = vmax.f32 %v15190_v12, %v15192_v46 }
0x2042   : > { %v15194_v41 = vpop.f32.mrf.mxu0 }
0x2044   : > { %v15196_v49 = vpop.f32.mrf.mxu0 }
0x2045   : > { %v6872_v6 = vmax.f32 %v15194_v41, %v15196_v49 }
0x2046   : > { %v15198_v7 = vpop.f32.mrf.mxu0 }
0x2048   : > { %v15200_v19 = vpop.f32.mrf.mxu0 }
0x2049   : > { %v6875_v56 = vmax.f32 %v15198_v7, %v15200_v19 }
0x204a   : > { %v15204_v43 = vpop.f32.mrf.mxu0 }
0x204b   : > { %6876 = vmax.xlane.f32.xlu0 %v6875_v56 }
0x204c   : > { %v15206_v39 = vpop.f32.mrf.mxu0 }
0x204d   : > { %v6878_v31 = vmax.f32 %v15204_v43, %v15206_v39 }
0x204e   : > { %v15208_v34 = vpop.f32.mrf.mxu0 }
0x2050   : > { %v15210_v24 = vpop.f32.mrf.mxu0 }
0x2051   : > { %v6881_v52 = vmax.f32 %v15208_v34, %v15210_v24 }
0x2052   : > { %v15212_v48 = vpop.f32.mrf.mxu0 }
0x2054   : > { %v15214_v1 = vpop.f32.mrf.mxu0 }
0x2055   : > { %v6884_v60 = vmax.f32 %v15212_v48, %v15214_v1 }
0x2056   : > { %v15216_v27 = vpop.f32.mrf.mxu0 }
0x2058   : > { %v15218_v58 = vpop.f32.mrf.mxu0 }
0x2059   : > { %v6887_v17 = vmax.f32 %v15216_v27, %v15218_v58 }
0x205a   : > { %v15220_v53 = vpop.f32.mrf.mxu0 }
0x205c   : > { %v15222_v47 = vpop.f32.mrf.mxu0 }
0x205d   : > { %v6890_v9 = vmax.f32 %v15220_v53, %v15222_v47 }
0x205e   : > { %v6830_v57 = vpop.f32.mrf.mxu0 }
0x2060   : > { %v6832_v54 = vpop.f32.mrf.mxu0 }
0x2061   : > { %v6893_v30 = vmax.f32 %v6830_v57, %v6832_v54 }
0x2062   : > { %v15224_v32 = vpop.f32.mrf.mxu0 }
0x2064   : > { %v15226_v61 = vpop.f32.mrf.mxu0 }
0x2065   : > { %v6896_v59 = vmax.f32 %v15224_v32, %v15226_v61 }
0x2066   : > { %v6840_v23 = vpop.f32.mrf.mxu0 }
0x2068   : > { %v6842_v37 = vpop.f32.mrf.mxu0 }
0x2069   : > { %v6899_v21 = vmax.f32 %v6840_v23, %v6842_v37 }
0x206a   : > { %v15228_v18 = vpop.f32.mrf.mxu0 }
0x206c   : > { %v15230_v40 = vpop.f32.mrf.mxu0 }
0x206d   : > { %v6902_v15 = vmax.f32 %v15228_v18, %v15230_v40 }
0x206e   : > { %v15232_v22 = vpop.f32.mrf.mxu0 }
0x2070   : > { %v15234_v36 = vpop.f32.mrf.mxu0 }
0x2071   : > { %v6905_v35 = vmax.f32 %v15232_v22, %v15234_v36 }
0x2072   : > { %v15238_v50 = vpop.f32.mrf.mxu0 }
0x2073   : > { %6906 = vmax.xlane.f32.xlu1 %v6905_v35 }
0x2074   : > { %v15240_v45 = vpop.f32.mrf.mxu0 }
0x2075   : > { %v6908_v55 = vmax.f32 %v15238_v50, %v15240_v45 }
0x2076   : > { %v15244_v11 = vpop.f32.mrf.mxu0 }
0x2077   : > { %6909 = vmax.xlane.f32.xlu1 %v6908_v55 }
0x2078   : > { %v15246_v42 = vpop.f32.mrf.mxu0 }
0x2079   : > { %v6911_v38 = vmax.f32 %v15244_v11, %v15246_v42 }
0x207a   : > { %v15250_v10 = vpop.f32.mrf.mxu0 }
0x207b   : > { %6912 = vmax.xlane.f32.xlu1 %v6911_v38 }
0x207c   : > { %v15252_v5 = vpop.f32.mrf.mxu0 }
0x207d   : > { %v6914_v20 = vmax.f32 %v15250_v10, %v15252_v5 }
0x207f   : > { %6915 = vmax.xlane.f32.xlu1 %v6914_v20 }
0x2083   : > { %6900 = vmax.xlane.f32.xlu1 %v6899_v21 }
0x2087   : > { %6903 = vmax.xlane.f32.xlu1 %v6902_v15 }
0x208b   : > { %6894 = vmax.xlane.f32.xlu1 %v6893_v30 }
0x208f   : > { %6897 = vmax.xlane.f32.xlu1 %v6896_v59 }
0x2093   : > { %6888 = vmax.xlane.f32.xlu1 %v6887_v17 }
0x2097   : > { %6891 = vmax.xlane.f32.xlu1 %v6890_v9 }
0x209b   : > { %6882 = vmax.xlane.f32.xlu1 %v6881_v52 }
0x209f   : > { %6885 = vmax.xlane.f32.xlu1 %v6884_v60 }
0x20a3   : > { %6879 = vmax.xlane.f32.xlu1 %v6878_v31 }
0x20a7   : > { %6870 = vmax.xlane.f32.xlu1 %v6869_v33 }
0x20ab   : > { %6873 = vmax.xlane.f32.xlu1 %v6872_v6 }
0x20fc   : > { %v6907_v26 = vpop.xlane.xlu1 %6906 }
0x2100   : > { %v6910_v56 = vpop.xlane.xlu1 %6909 }
0x2104   : > { %v6913_v35 = vpop.xlane.xlu1 %6912 }
0x2108   : > { %v6916_v55 = vpop.xlane.xlu1 %6915 }
0x210c   : > { %v6901_v38 = vpop.xlane.xlu1 %6900 }
0x210d   : > { %v6937_v21 = vsub.f32 %v6840_v23, %v6901_v38  ;;  %v6938_v15 = vsub.f32 %v6842_v37, %v6901_v38  ;;  %v6941_v23 = vsub.f32 %v15232_v22, %v6907_v26 }
0x210f   : > { %v6989_v9 = vmul.f32 1.442695, %v6937_v21  ;;  %v6991_v33 = vmul.f32 1.442695, %v6938_v15  ;;  %v6945_v21 = vsub.f32 %v15244_v11, %v6913_v35 }
0x2110   : > { %v6904_v20 = vpop.xlane.xlu1 %6903 }
0x2111   : > { %v6939_v52 = vsub.f32 %v15228_v18, %v6904_v20  ;;  %v6940_v16 = vsub.f32 %v15230_v40, %v6904_v20  ;;  %v6942_v18 = vsub.f32 %v15234_v36, %v6907_v26  ;;  %v6997_v40 = vmul.f32 1.442695, %v6941_v23 }
0x2112   : > { %v6943_v20 = vsub.f32 %v15238_v50, %v6910_v56  ;;  %v7005_v26 = vmul.f32 1.442695, %v6945_v21  ;;  %v6947_v50 = vsub.f32 %v15250_v10, %v6916_v55 }
0x2113   : > { %v6995_v38 = vmul.f32 1.442695, %v6940_v16 }
0x2114   : > { %v6895_v30 = vpop.xlane.xlu1 %6894  ;;  %v7001_v22 = vmul.f32 1.442695, %v6943_v20 }
0x2115   : > { %v6933_v59 = vsub.f32 %v6830_v57, %v6895_v30  ;;  %v6934_v17 = vsub.f32 %v6832_v54, %v6895_v30  ;;  %v6993_v57 = vmul.f32 1.442695, %v6939_v52 }
0x2117   : > { %v6981_v60 = vmul.f32 1.442695, %v6933_v59  ;;  %v6983_v31 = vmul.f32 1.442695, %v6934_v17  ;;  %v7009_v59 = vmul.f32 1.442695, %v6947_v50 }
0x2118   : > { %v6898_v6 = vpop.xlane.xlu1 %6897 }
0x2119   : > { %10958 = vpow2.f32 %v6981_v60  ;;  %v6935_v44 = vsub.f32 %v15224_v32, %v6898_v6  ;;  %v6936_v63 = vsub.f32 %v15226_v61, %v6898_v6  ;;  %v6999_v32 = vmul.f32 1.442695, %v6942_v18 }
0x211a   : > { %10960 = vpow2.f32 %v6983_v31  ;;  %v6944_v61 = vsub.f32 %v15240_v45, %v6910_v56  ;;  %v6948_v56 = vsub.f32 %v15252_v5, %v6916_v55 }
0x211b   : > { %10962 = vpow2.f32 %v6989_v9  ;;  %v6985_v54 = vmul.f32 1.442695, %v6935_v44  ;;  %v6987_v37 = vmul.f32 1.442695, %v6936_v63  ;;  %v6946_v44 = vsub.f32 %v15246_v42, %v6913_v35 }
0x211c   : > { %10964 = vpow2.f32 %v6991_v33  ;;  %v7003_v63 = vmul.f32 1.442695, %v6944_v61  ;;  %v7011_v10 = vmul.f32 1.442695, %v6948_v56  ;;  %v15308_v52 = vpop.xlane.xlu1 %6888 }
0x211d   : > { %10966 = vpow2.f32 %v6985_v54  ;;  %v7007_v45 = vmul.f32 1.442695, %v6946_v44 }
0x211e   : > { %10968 = vpow2.f32 %v6987_v37 }
0x211f   : > { %10970 = vpow2.f32 %v6993_v57 }
0x2120   : > { %10972 = vpow2.f32 %v6995_v38  ;;  %v6892_v6 = vpop.xlane.xlu1 %6891 }
0x2121   : > { %10974 = vpow2.f32 %v6997_v40  ;;  %v6932_v50 = vsub.f32 %v15222_v47, %v6892_v6 }
0x2122   : > { %10976 = vpow2.f32 %v6999_v32 }
0x2123   : > { %10978 = vpow2.f32 %v7001_v22 }
0x2124   : > { %10980 = vpow2.f32 %v7003_v63  ;;  %v6883_v40 = vpop.xlane.xlu1 %6882  ;;  %v15339_v63 = vld [vmem:[%s16745_s6 + $0x8] sm:$0xff]  }
0x2125   : > { %10982 = vpow2.f32 %v7005_v26  ;;  %v6931_v26 = vsub.f32 %v15220_v53, %v6892_v6  ;;  %v15352_v53 = vld [vmem:[%s16745_s6] sm:$0xff]  }
0x2126   : > { %v15284_v36 = vpop.eup %10958  ;;  %10984 = vpow2.f32 %v7007_v45 }
0x2127   : > { %v15286_v16 = vpop.eup %10960  ;;  %10986 = vpow2.f32 %v7009_v59  ;;  %v6977_v56 = vmul.f32 1.442695, %v6931_v26  ;;  %v6979_v59 = vmul.f32 1.442695, %v6932_v50  ;;  %v6925_v26 = vsub.f32 %v15208_v34, %v6883_v40  ;;  %v6877_v50 = vpop.xlane.xlu0 %6876 }
0x2128   : > { %v15289_v15 = vpop.eup %10962  ;;  %v7037_v11 = vadd.f32 %v15286_v16, %v15284_v36  ;;  %10988 = vpow2.f32 %v7011_v10  ;;  %v6886_v22 = vpop.xlane.xlu1 %6885  ;;  %v6922_v34 = vsub.f32 %v15200_v19, %v6877_v50 }
0x2129   : > { %v15294_v30 = vpop.eup %10964  ;;  %v6928_v10 = vsub.f32 %v15214_v1, %v6886_v22  ;;  %10990 = vpow2.f32 %v6977_v56 }
0x212a   : > { %v15296_v42 = vpop.eup %10966  ;;  %7038 = vadd.xlane.f32.xlu1 %v7037_v11  ;;  %v7043_v9 = vadd.f32 %v15294_v30, %v15289_v15  ;;  %v6927_v11 = vsub.f32 %v15212_v48, %v6886_v22  ;;  %10992 = vpow2.f32 %v6979_v59 }
0x212b   : > { %v15298_v35 = vpop.eup %10968 }
0x212c   : > { %v15300_v17 = vpop.eup %10970  ;;  %v7040_v5 = vadd.f32 %v15298_v35, %v15296_v42  ;;  %v6880_v44 = vpop.xlane.xlu1 %6879 }
0x212d   : > { %v15306_v55 = vpop.eup %10972 }
0x212e   : > { %7044 = vadd.xlane.f32.xlu1 %v7043_v9  ;;  %7041 = vadd.xlane.f32.xlu0 %v7040_v5  ;;  %v15310_v60 = vpop.eup %10974  ;;  %v7046_v31 = vadd.f32 %v15306_v55, %v15300_v17  ;;  %v6969_v9 = vmul.f32 1.442695, %v6927_v11  ;;  %v6923_v5 = vsub.f32 %v15204_v43, %v6880_v44  ;;  %v6926_v11 = vsub.f32 %v15210_v24, %v6883_v40 }
0x212f   : > { %v15314_v33 = vpop.eup %10976 }
0x2130   : > { %v15316_v23 = vpop.eup %10978  ;;  %v7049_v57 = vadd.f32 %v15314_v33, %v15310_v60  ;;  %v6871_v45 = vpop.xlane.xlu1 %6870  ;;  %10994 = vpow2.f32 %v6969_v9  ;;  %v6961_v48 = vmul.f32 1.442695, %v6923_v5  ;;  %v6967_v9 = vmul.f32 1.442695, %v6926_v11 }
0x2131   : > { %v15320_v54 = vpop.eup %10980 }
0x2132   : > { %7047 = vadd.xlane.f32.xlu1 %v7046_v31  ;;  %v15322_v37 = vpop.eup %10982  ;;  %v7052_v18 = vadd.f32 %v15320_v54, %v15316_v23  ;;  %v6971_v31 = vmul.f32 1.442695, %v6928_v10 }
0x2133   : > { %v15326_v38 = vpop.eup %10984 }
0x2134   : > { %v15328_v20 = vpop.eup %10986  ;;  %v7055_v32 = vadd.f32 %v15326_v38, %v15322_v37  ;;  %10996 = vpow2.f32 %v6971_v31  ;;  %v6917_v31 = vsub.f32 %v15190_v12, %v6871_v45 }
0x2135   : > { %v15332_v61 = vpop.eup %10988  ;;  %10998 = vpow2.f32 %v6961_v48 }
0x2136   : > { %7050 = vadd.xlane.f32.xlu1 %v7049_v57  ;;  %v7058_v21 = vadd.f32 %v15332_v61, %v15328_v20  ;;  %v6924_v57 = vsub.f32 %v15206_v39, %v6880_v44  ;;  %v15360_v22 = vpop.eup %10990 }
0x2137   : > { %v15364_v44 = vpop.eup %10992 }
0x2138   : > { %v6963_v47 = vmul.f32 1.442695, %v6924_v57 }
0x213a   : > { %7053 = vadd.xlane.f32.xlu1 %v7052_v18  ;;  %v6874_v18 = vpop.xlane.xlu1 %6873  ;;  %11000 = vpow2.f32 %v6963_v47 }
0x213b   : > { %v6919_v1 = vsub.f32 %v15194_v41, %v6874_v18  ;;  %v6920_v43 = vsub.f32 %v15196_v49, %v6874_v18  ;;  %v6918_v18 = vsub.f32 %v15192_v46, %v6871_v45 }
0x213d   : > { %v6953_v6 = vmul.f32 1.442695, %v6919_v1  ;;  %v6955_v39 = vmul.f32 1.442695, %v6920_v43  ;;  %v15367_v49 = vpop.eup %10994  ;;  %v6949_v1 = vmul.f32 1.442695, %v6917_v31 }
0x213e   : > { %7056 = vadd.xlane.f32.xlu1 %v7055_v32  ;;  %v6929_v32 = vsub.f32 %v15216_v27, %v15308_v52  ;;  %v7034_v27 = vadd.f32 %v15364_v44, %v15360_v22  ;;  %v6951_v47 = vmul.f32 1.442695, %v6918_v18 }
0x213f   : > { %11002 = vpow2.f32 %v6953_v6 }
0x2140   : > { %11004 = vpow2.f32 %v6955_v39  ;;  %v6973_v41 = vmul.f32 1.442695, %v6929_v32 }
0x2141   : > { %v15372_v59 = vpop.eup %10996 }
0x2142   : > { %7059 = vadd.xlane.f32.xlu1 %v7058_v21  ;;  %v6930_v21 = vsub.f32 %v15218_v58, %v15308_v52  ;;  %v6921_v58 = vsub.f32 %v15198_v7, %v6877_v50  ;;  %11006 = vpow2.f32 %v6973_v41  ;;  %v6965_v52 = vmul.f32 1.442695, %v6925_v26  ;;  %v15375_v10 = vpop.eup %10998 }
0x2143   : > { %v7028_v5 = vadd.f32 %v15372_v59, %v15367_v49  ;;  %v6959_v7 = vmul.f32 1.442695, %v6922_v34  ;;  %v17095_v34 = vld [vmem:[#allocation38_spill] sm:$0xff] }
0x2144   : > { %6650 = vrot.lane.b32.xlu0 %v15339_v63, %s11524_s13  ;;  %v6975_v56 = vmul.f32 1.442695, %v6930_v21  ;;  %v6957_v40 = vmul.f32 1.442695, %v6921_v58  ;;  %v17094_v58 = vld [vmem:[#allocation13_spill] sm:$0xff] }
0x2146   : > { %11008 = vpow2.f32 %v6975_v56 }
0x2147   : > { %v15380_v24 = vpop.eup %11000  ;;  %11010 = vpow2.f32 %v6965_v52 }
0x2148   : > { %11012 = vpow2.f32 %v6967_v9  ;;  %v7022_v19 = vadd.f32 %v15380_v24, %v15375_v10  ;;  %v17096_v9 = vld [vmem:[#allocation11_spill] sm:$0xff] }
0x2149   : > { %11014 = vpow2.f32 %v6957_v40 }
0x214a   : > { %11016 = vpow2.f32 %v6959_v7 }
0x214b   : > { %11018 = vpow2.f32 %v6949_v1 }
0x214c   : > { %v15383_v57 = vpop.eup %11002  ;;  %11020 = vpow2.f32 %v6951_v47 }
0x214d   : > { %v15388_v48 = vpop.eup %11004 }
0x214e   : > { %v7016_v43 = vadd.f32 %v15388_v48, %v15383_v57 }
0x214f   : > { %v15392_v12 = vpop.eup %11006 }
0x2153   : > { %6648 = vrot.lane.b32.xlu1 %v15352_v53, %s11524_s13  ;;  %v15394_v6 = vpop.eup %11008  ;;  %s16691_s13 = scalar_lea.hbm %s16747_s8, %s9628_s22 }
0x2154   : > { %v15396_v46 = vpop.eup %11010  ;;  %v7031_v45 = vadd.f32 %v15394_v6, %v15392_v12 }
0x2155   : > { %v15400_v39 = vpop.eup %11012 }
0x2156   : > { %v15402_v32 = vpop.eup %11014  ;;  %v7025_v21 = vadd.f32 %v15400_v39, %v15396_v46 }
0x2157   : > { %v15406_v41 = vpop.eup %11016 }
0x2158   : > { %v15408_v26 = vpop.eup %11018  ;;  %v7019_v50 = vadd.f32 %v15406_v41, %v15402_v32 }
0x2159   : > { %v15412_v56 = vpop.eup %11020 }
0x215a   : > { %v7013_v11 = vadd.f32 %v15412_v56, %v15408_v26 }
0x2163   : > { %7035 = vadd.xlane.f32.xlu0 %v7034_v27  ;;  %v17093_v27 = vld [vmem:[#allocation9_spill] sm:$0xff] }
0x2164   : > { %v831_v52 = vadd.f32 %v17094_v58, %v17093_v27 }
0x2167   : > { %7029 = vadd.xlane.f32.xlu0 %v7028_v5  ;;  %v827_v5 = vadd.f32 %v17096_v9, %v17095_v34 }
0x2169   : > { %v15420_v40 = vpack.c.bf16 %v831_v52, %v827_v5 }
0x216b   : > { %7023 = vadd.xlane.f32.xlu0 %v7022_v19 }
0x216f   : > { %7017 = vadd.xlane.f32.xlu0 %v7016_v43 }
0x2177   : > { %7032 = vadd.xlane.f32.xlu1 %v7031_v45 }
0x217b   : > { %7026 = vadd.xlane.f32.xlu1 %v7025_v21 }
0x217f   : > { %7020 = vadd.xlane.f32.xlu1 %v7019_v50 }
0x2183   : > { %7014 = vadd.xlane.f32.xlu1 %v7013_v11  ;;  %v17097_v11 = vrot.slane %v17055_v2, 6 }
0x21b0   : > { %7232 = vxpose.xlu1.c.b16.start.end [1/1] (short) %v15420_v40, 128 }
0x21b3   : > { %v7039_v31 = vpop.xlane.xlu1 %7038 }
0x21b7   : > { %v7045_v7 = vpop.xlane.xlu1 %7044  ;;  %v7042_v45 = vpop.xlane.xlu0 %7041 }
0x21bb   : > { %v7048_v18 = vpop.xlane.xlu1 %7047  ;;  %v6651_v50 = vpop.permute.xlu0 %6650 }
0x21bf   : > { %v7051_v19 = vpop.xlane.xlu1 %7050 }
0x21c3   : > { %v7054_v1 = vpop.xlane.xlu1 %7053 }
0x21c4   : > { %11022 = vrcp.f32 %v7054_v1 }
0x21c7   : > { %v7057_v47 = vpop.xlane.xlu1 %7056 }
0x21c8   : > { %11024 = vrcp.f32 %v7057_v47 }
0x21c9   : > { %11026 = vrcp.f32 %v7051_v19 }
0x21cb   : > { %v7060_v43 = vpop.xlane.xlu1 %7059 }
0x21cc   : > { %11028 = vrcp.f32 %v7060_v43 }
0x21cd   : > { %11030 = vrcp.f32 %v7048_v18 }
0x21ce   : > { %11032 = vrcp.f32 %v7045_v7 }
0x21cf   : > { %v6649_v21 = vpop.permute.xlu1 %6648  ;;  %11034 = vrcp.f32 %v7042_v45 }
0x21d0   : > { %9783 = vmatprep.mubr.msk.bf16.mxu1 %vm901_vm2, %v6649_v21  ;;  %11036 = vrcp.f32 %v7039_v31 }
0x21d1   : > { %9784 = vmatmul.mubr.msk.bf16.vlgmr.msra.gmra.mxu1 %vm901_vm2, %v6651_v50  ;;  %v11023_v27 = vpop.eup %11022 }
0x21d2   : > { %7157 = vmatprep.mubr.bf16.mxu1 %v17097_v11  ;;  %v7104_v9 = vmul.f32 %v11023_v27, %v15320_v54  ;;  %v7103_v54 = vmul.f32 %v11023_v27, %v15316_v23 }
0x21d5   : > { %v11025_v58 = vpop.eup %11024 }
0x21d6   : > { %v11027_v52 = vpop.eup %11026  ;;  %v7106_v5 = vmul.f32 %v11025_v58, %v15326_v38  ;;  %v7105_v1 = vmul.f32 %v11025_v58, %v15322_v37 }
0x21d7   : > { %v7102_v7 = vmul.f32 %v11027_v52, %v15314_v33 }
0x21d9   : > { %v11029_v34 = vpop.eup %11028  ;;  %v7122_v43 = vpack.c.bf16 %v7104_v9, %v7102_v7 }
0x21da   : > { %v7108_v19 = vmul.f32 %v11029_v34, %v15332_v61  ;;  %v7107_v47 = vmul.f32 %v11029_v34, %v15328_v20  ;;  %v11031_v21 = vpop.eup %11030  ;;  %v7101_v61 = vmul.f32 %v11027_v52, %v15310_v60 }
0x21db   : > { %v11033_v45 = vpop.eup %11032  ;;  %v7100_v38 = vmul.f32 %v11031_v21, %v15306_v55  ;;  %v7099_v11 = vmul.f32 %v11031_v21, %v15300_v17 }
0x21dc   : > { %v7124_v18 = vpack.c.bf16 %v7108_v19, %v7106_v5  ;;  %v7123_v2 = vpack.c.bf16 %v7107_v47, %v7105_v1  ;;  %v7098_v37 = vmul.f32 %v11033_v45, %v15294_v30  ;;  %v7121_v20 = vpack.c.bf16 %v7103_v54, %v7101_v61  ;;  %v11035_v31 = vpop.eup %11034 }
0x21dd   : > { %v11037_v33 = vpop.eup %11036  ;;  %v7096_v58 = vmul.f32 %v11035_v31, %v15298_v35  ;;  %v7097_v34 = vmul.f32 %v11033_v45, %v15289_v15  ;;  %v7095_v30 = vmul.f32 %v11035_v31, %v15296_v42 }
0x21de   : > { %7125 = vmatprep.subr.bf16.mxu1 %v7124_v18  ;;  %v7120_v50 = vpack.c.bf16 %v7100_v38, %v7098_v37  ;;  %v7094_v23 = vmul.f32 %v11037_v33, %v15286_v16  ;;  %v7093_v60 = vmul.f32 %v11037_v33, %v15284_v36 }
0x21df   : > { %7126 = vmatpush1.bf16.xpose.msra.mxu1 %v7123_v2  ;;  %v7119_v27 = vpack.c.bf16 %v7099_v11, %v7097_v34 }
0x21e0   : > { %7127 = vmatprep.subr.bf16.mxu1 %v7122_v43  ;;  %v7118_v55 = vpack.c.bf16 %v7096_v58, %v7094_v23  ;;  %v7117_v52 = vpack.c.bf16 %v7095_v30, %v7093_v60 }
0x21e7   : > { %7128 = vmatpush1.bf16.xpose.msra.mxu1 %v7121_v20 }
0x21e8   : > { %7129 = vmatprep.subr.bf16.mxu1 %v7120_v50 }
0x21ec   : > { %v7036_v9 = vpop.xlane.xlu0 %7035 }
0x21ed   : > { %11038 = vrcp.f32 %v7036_v9  ;;  %v6190_v9 = vadd.f32 %v15180_v28, %v14925_v4 }
0x21ef   : > { %7130 = vmatpush1.bf16.xpose.msra.mxu1 %v7119_v27 }
0x21f0   : > { %7131 = vmatprep.subr.bf16.mxu1 %v7118_v55  ;;  %v7030_v5 = vpop.xlane.xlu0 %7029  ;;  %v17098_v55 = vld [vmem:[#allocation39_spill] sm:$0xff] }
0x21f4   : > { %v7024_v15 = vpop.xlane.xlu0 %7023 }
0x21f7   : > { %7132 = vmatpush1.bf16.xpose.msra.mxu1 %v7117_v52 }
0x21f8   : > { %v7018_v42 = vpop.xlane.xlu0 %7017 }
0x21fa   : > { %v11039_v19 = vpop.eup %11038 }
0x21fb   : > { %v7092_v36 = vmul.f32 %v11039_v19, %v15364_v44  ;;  %v7091_v7 = vmul.f32 %v11039_v19, %v15360_v22 }
0x2200   : > { %v7033_v17 = vpop.xlane.xlu1 %7032 }
0x2201   : > { %11040 = vrcp.f32 %v7033_v17  ;;  %v6182_v17 = vadd.f32 %v15182_v51, %v14927_v29 }
0x2202   : > { %11042 = vrcp.f32 %v7030_v5 }
0x2204   : > { %v7027_v35 = vpop.xlane.xlu1 %7026 }
0x2205   : > { %11044 = vrcp.f32 %v7027_v35 }
0x2206   : > { %11046 = vrcp.f32 %v7024_v15 }
0x2208   : > { %v7021_v16 = vpop.xlane.xlu1 %7020 }
0x2209   : > { %11048 = vrcp.f32 %v7021_v16  ;;  %v6193_v16 = vadd.f32 %v15184_v62, %v14929_v14 }
0x220c   : > { %v7015_v1 = vpop.xlane.xlu1 %7014 }
0x220d   : > { %11050 = vrcp.f32 %v7015_v1 }
0x220e   : > { %v11041_v47 = vpop.eup %11040  ;;  %11052 = vrcp.f32 %v7018_v42 }
0x220f   : > { %v7090_v18 = vmul.f32 %v11041_v47, %v15394_v6  ;;  %v7089_v2 = vmul.f32 %v11041_v47, %v15392_v12  ;;  %v11043_v43 = vpop.eup %11042 }
0x2210   : > { %v7088_v61 = vmul.f32 %v11043_v43, %v15372_v59  ;;  %v7087_v22 = vmul.f32 %v11043_v43, %v15367_v49 }
0x2211   : > { %v7116_v21 = vpack.c.bf16 %v7092_v36, %v7090_v18  ;;  %v7115_v45 = vpack.c.bf16 %v7091_v7, %v7089_v2 }
0x2212   : > { %v11045_v54 = vpop.eup %11044 }
0x2213   : > { %7133 = vmatprep.subr.bf16.mxu1 %v7116_v21  ;;  %v7086_v38 = vmul.f32 %v11045_v54, %v15400_v39  ;;  %v11047_v37 = vpop.eup %11046  ;;  %v7085_v6 = vmul.f32 %v11045_v54, %v15396_v46 }
0x2214   : > { %7134 = vmatpush1.bf16.xpose.msra.mxu1 %v7115_v45  ;;  %v7084_v31 = vmul.f32 %v11047_v37, %v15380_v24  ;;  %v7083_v34 = vmul.f32 %v11047_v37, %v15375_v10  ;;  %v7240_v10 = vpop.trf.xlu1 }
0x2215   : > { %v7114_v44 = vpack.c.bf16 %v7088_v61, %v7086_v38  ;;  %v7113_v50 = vpack.c.bf16 %v7087_v22, %v7085_v6 }
0x2216   : > { %v11049_v20 = vpop.eup %11048 }
0x2217   : > { %7135 = vmatprep.subr.bf16.mxu1 %v7114_v44  ;;  %v7082_v12 = vmul.f32 %v11049_v20, %v15406_v41  ;;  %v7081_v59 = vmul.f32 %v11049_v20, %v15402_v32  ;;  %v17099_v32 = vrot.slane %v17064_v8, 6 }
0x2219   : > { %v7112_v33 = vpack.c.bf16 %v7084_v31, %v7082_v12  ;;  %v7111_v23 = vpack.c.bf16 %v7083_v34, %v7081_v59 }
0x221a   : > { %v11051_v11 = vpop.eup %11050 }
0x221b   : > { %v11053_v39 = vpop.eup %11052  ;;  %v7078_v58 = vmul.f32 %v11051_v11, %v15412_v56  ;;  %v7077_v49 = vmul.f32 %v11051_v11, %v15408_v26  ;;  %v17100_v56 = vld [vmem:[#allocation36_spill] sm:$0xff] }
0x221c   : > { %7136 = vmatpush1.bf16.xpose.msra.mxu1 %v7113_v50  ;;  %v7080_v46 = vmul.f32 %v11053_v39, %v15388_v48  ;;  %v7079_v24 = vmul.f32 %v11053_v39, %v15383_v57  ;;  %v7241_v48 = vpop.trf.xlu1 }
0x221d   : > { %7137 = vmatprep.subr.bf16.mxu1 %v7112_v33 }
0x221e   : > { %v7110_v41 = vpack.c.bf16 %v7080_v46, %v7078_v58  ;;  %v7109_v27 = vpack.c.bf16 %v7079_v24, %v7077_v49 }
0x2220   : > { %v7242_v57 = vpop.trf.xlu1 }
0x2224   : > { %7138 = vmatpush1.bf16.xpose.msra.mxu1 %v7111_v23  ;;  %v7243_v8 = vpop.trf.xlu1 }
0x2225   : > { %7139 = vmatprep.subr.bf16.mxu1 %v7110_v41 }
0x2228   : > { %v7244_v26 = vpop.trf.xlu1 }
0x222c   : > { %7140 = vmatpush1.bf16.xpose.msra.mxu1 %v7109_v27  ;;  %v7245_v30 = vpop.trf.xlu1 }
0x222d   : > { %9578 = vmatprep.subr.msk.bf16.mxu1 %vm926_vm1, %v17098_v55 }
0x2230   : > { %v7246_v60 = vpop.trf.xlu1 }
0x2233   : > { %7158 = vmatmul.mubr.bf16.vlgmr.msra.gmra.mxu1 %v17099_v32 }
0x2234   : > { %7287 = vmatpush1.bf16.msra.mxu1 %v17100_v56  ;;  %7304 = vmatprep.mubr.bf16.mxu1 %v17087_v25  ;;  %v7247_v52 = vpop.trf.xlu1 }
0x223b   : > { %9579 = vmatmul.mubr.msk.bf16.vlgmr.msra.gmra.mxu1 %vm901_vm2, %v7240_v10 }
0x223c   : > { %7314 = vmatprep.mubr.bf16.mxu1 %v17087_v25 }
0x2243   : > { %9580 = vmatmul.mubr.msk.bf16.gmra.mxu1 %vm901_vm2, %v7241_v48 }
0x2244   : > { %7324 = vmatprep.mubr.bf16.mxu1 %v17087_v25 }
0x224b   : > { %9581 = vmatmul.mubr.msk.bf16.gmra.mxu1 %vm901_vm2, %v7242_v57 }
0x224c   : > { %7334 = vmatprep.mubr.bf16.mxu1 %v17087_v25 }
0x2253   : > { %9582 = vmatmul.mubr.msk.bf16.gmra.mxu1 %vm901_vm2, %v7243_v8 }
0x2254   : > { %7344 = vmatprep.mubr.bf16.mxu1 %v17087_v25 }
0x225b   : > { %9583 = vmatmul.mubr.msk.bf16.gmra.mxu1 %vm901_vm2, %v7244_v26 }
0x225c   : > { %7354 = vmatprep.mubr.bf16.mxu1 %v17087_v25 }
0x2263   : > { %9584 = vmatmul.mubr.msk.bf16.gmra.mxu1 %vm901_vm2, %v7245_v30 }
0x2264   : > { %7364 = vmatprep.mubr.bf16.mxu1 %v17087_v25 }
0x226b   : > { %9585 = vmatmul.mubr.msk.bf16.gmra.mxu1 %vm901_vm2, %v7246_v60 }
0x226c   : > { %7374 = vmatprep.mubr.bf16.mxu1 %v17087_v25 }
0x2273   : > { %9586 = vmatmul.mubr.msk.bf16.gmra.mxu1 %vm901_vm2, %v7247_v52 }
0x2291   : > { %v9785_v5 = vpop.f32.mrf.mxu1 }
0x2292   : > { %v15484_v35 = vadd.f32 %v9785_v5, %v6190_v9 }
0x2293   : > { %v6695_v15 = vpop.f32.mrf.mxu1 }
0x2294   : > { %v15488_v19 = vadd.f32 %v6695_v15, %v6182_v17 }
0x2295   : > { %v9786_v1 = vpop.f32.mrf.mxu1 }
0x2296   : > { %v15490_v47 = vadd.f32 %v9786_v1, %v6193_v16 }
0x2297   : > { %v15492_v42 = vpop.f32.mrf.mxu1 }
0x2298   : > { %17101 = vst [vmem:[#allocation19_spill] sm:$0xff] %v15492_v42 }
0x22f3   : > { %v7159_v36 = vpop.f32.mrf.mxu1 }
0x22f4   : > { %v7165_v18 = vpack.c.bf16 %v7159_v36, %v7159_v36 }
0x22f5   : > { %v7161_v4 = vpop.f32.mrf.mxu1 }
0x22f6   : > { %v7177_v28 = vsel %vm926_vm1, %v7165_v18, 0  ;;  %9828 = vmatprep.subr.msk.bf16.mxu0 %vm926_vm1, %v7165_v18 }
0x22f7   : > { %v7162_v29 = vpop.f32.mrf.mxu1  ;;  %9788 = vmatpush3.bf16.msra.mxu0 %v7177_v28 }
0x22f9   : > { %v7163_v51 = vpop.f32.mrf.mxu1 }
0x22fb   : > { %v15496_v2 = vpop.f32.mrf.mxu1 }
0x22fd   : > { %v15498_v14 = vpop.f32.mrf.mxu1 }
0x22fe   : > { %v7385_v36 = vmax.f32 %v15496_v2, %v15498_v14 }
0x22ff   : > { %v15500_v62 = vpop.f32.mrf.mxu1 }
0x2301   : > { %v15502_v7 = vpop.f32.mrf.mxu1 }
0x2302   : > { %v7388_v18 = vmax.f32 %v15500_v62, %v15502_v7 }
0x2303   : > { %v15504_v43 = vpop.f32.mrf.mxu1 }
0x2305   : > { %v15506_v21 = vpop.f32.mrf.mxu1 }
0x2306   : > { %v7391_v16 = vmax.f32 %v15504_v43, %v15506_v21 }
0x2307   : > { %v15508_v45 = vpop.f32.mrf.mxu1 }
0x2309   : > { %v15510_v54 = vpop.f32.mrf.mxu1 }
0x230a   : > { %v7394_v1 = vmax.f32 %v15508_v45, %v15510_v54 }
0x230b   : > { %v15512_v38 = vpop.f32.mrf.mxu1 }
0x230d   : > { %v15514_v61 = vpop.f32.mrf.mxu1 }
0x230e   : > { %v7397_v15 = vmax.f32 %v15512_v38, %v15514_v61 }
0x230f   : > { %v15516_v37 = vpop.f32.mrf.mxu1 }
0x2311   : > { %v15518_v44 = vpop.f32.mrf.mxu1 }
0x2312   : > { %v7400_v20 = vmax.f32 %v15516_v37, %v15518_v44 }
0x2313   : > { %v15522_v6 = vpop.f32.mrf.mxu1 }
0x2314   : > { %7401 = vmax.xlane.f32.xlu1 %v7400_v20 }
0x2315   : > { %v15524_v12 = vpop.f32.mrf.mxu1 }
0x2316   : > { %v7403_v5 = vmax.f32 %v15522_v6, %v15524_v12 }
0x2317   : > { %v15526_v22 = vpop.f32.mrf.mxu1 }
0x2319   : > { %v15528_v31 = vpop.f32.mrf.mxu1 }
0x231a   : > { %v7406_v17 = vmax.f32 %v15526_v22, %v15528_v31 }
0x231b   : > { %v7346_v50 = vpop.f32.mrf.mxu1 }
0x231d   : > { %v7348_v33 = vpop.f32.mrf.mxu1 }
0x231e   : > { %v7409_v52 = vmax.f32 %v7346_v50, %v7348_v33 }
0x231f   : > { %v15530_v11 = vpop.f32.mrf.mxu1 }
0x2321   : > { %v15532_v39 = vpop.f32.mrf.mxu1 }
0x2322   : > { %v7412_v9 = vmax.f32 %v15530_v11, %v15532_v39 }
0x2323   : > { %v7356_v59 = vpop.f32.mrf.mxu1 }
0x2325   : > { %v7358_v58 = vpop.f32.mrf.mxu1 }
0x2326   : > { %v7415_v30 = vmax.f32 %v7356_v59, %v7358_v58 }
0x2327   : > { %v15534_v34 = vpop.f32.mrf.mxu1 }
0x2329   : > { %v15536_v46 = vpop.f32.mrf.mxu1 }
0x232a   : > { %v7418_v60 = vmax.f32 %v15534_v34, %v15536_v46 }
0x232b   : > { %v15538_v23 = vpop.f32.mrf.mxu1 }
0x232d   : > { %v15540_v41 = vpop.f32.mrf.mxu1 }
0x232e   : > { %v7421_v49 = vmax.f32 %v15538_v23, %v15540_v41 }
0x232f   : > { %v15544_v24 = vpop.f32.mrf.mxu1 }
0x2330   : > { %7422 = vmax.xlane.f32.xlu0 %v7421_v49 }
0x2331   : > { %v15546_v27 = vpop.f32.mrf.mxu1 }
0x2332   : > { %v7424_v32 = vmax.f32 %v15544_v24, %v15546_v27 }
0x2333   : > { %v15550_v56 = vpop.f32.mrf.mxu1 }
0x2334   : > { %7425 = vmax.xlane.f32.xlu0 %v7424_v32 }
0x2335   : > { %v15552_v10 = vpop.f32.mrf.mxu1 }
0x2336   : > { %v7427_v48 = vmax.f32 %v15550_v56, %v15552_v10 }
0x2337   : > { %v15556_v57 = vpop.f32.mrf.mxu1 }
0x2338   : > { %7428 = vmax.xlane.f32.xlu0 %v7427_v48 }
0x2339   : > { %v15558_v8 = vpop.f32.mrf.mxu1 }
0x233a   : > { %v7430_v26 = vmax.f32 %v15556_v57, %v15558_v8 }
0x233c   : > { %7431 = vmax.xlane.f32.xlu0 %v7430_v26 }
0x2340   : > { %7416 = vmax.xlane.f32.xlu0 %v7415_v30 }
0x2344   : > { %7419 = vmax.xlane.f32.xlu0 %v7418_v60 }
0x2348   : > { %7410 = vmax.xlane.f32.xlu0 %v7409_v52 }
0x234c   : > { %7413 = vmax.xlane.f32.xlu0 %v7412_v9 }
0x2350   : > { %7404 = vmax.xlane.f32.xlu0 %v7403_v5 }
0x2354   : > { %7407 = vmax.xlane.f32.xlu0 %v7406_v17 }
0x2358   : > { %7398 = vmax.xlane.f32.xlu0 %v7397_v15 }
0x235c   : > { %7392 = vmax.xlane.f32.xlu0 %v7391_v16 }
0x2360   : > { %7395 = vmax.xlane.f32.xlu0 %v7394_v1 }
0x2364   : > { %7386 = vmax.xlane.f32.xlu0 %v7385_v36 }
0x2368   : > { %7389 = vmax.xlane.f32.xlu0 %v7388_v18 }
0x23b9   : > { %v7423_v4 = vpop.xlane.xlu0 %7422 }
0x23bd   : > { %v7426_v28 = vpop.xlane.xlu0 %7425 }
0x23c1   : > { %v7429_v29 = vpop.xlane.xlu0 %7428 }
0x23c5   : > { %v7432_v51 = vpop.xlane.xlu0 %7431 }
0x23c9   : > { %v7417_v20 = vpop.xlane.xlu0 %7416 }
0x23ca   : > { %v7453_v32 = vsub.f32 %v7356_v59, %v7417_v20  ;;  %v7454_v48 = vsub.f32 %v7358_v58, %v7417_v20  ;;  %v7457_v59 = vsub.f32 %v15538_v23, %v7423_v4 }
0x23cc   : > { %v7505_v52 = vmul.f32 1.442695, %v7453_v32  ;;  %v7507_v15 = vmul.f32 1.442695, %v7454_v48  ;;  %v7461_v32 = vsub.f32 %v15550_v56, %v7429_v29 }
0x23cd   : > { %v7420_v49 = vpop.xlane.xlu0 %7419 }
0x23ce   : > { %v7455_v9 = vsub.f32 %v15534_v34, %v7420_v49  ;;  %v7456_v16 = vsub.f32 %v15536_v46, %v7420_v49  ;;  %v7458_v34 = vsub.f32 %v15540_v41, %v7423_v4  ;;  %v7513_v46 = vmul.f32 1.442695, %v7457_v59 }
0x23cf   : > { %v7459_v49 = vsub.f32 %v15544_v24, %v7426_v28  ;;  %v7462_v41 = vsub.f32 %v15552_v10, %v7429_v29  ;;  %v7463_v24 = vsub.f32 %v15556_v57, %v7432_v51 }
0x23d0   : > { %v7511_v20 = vmul.f32 1.442695, %v7456_v16 }
0x23d1   : > { %v7411_v26 = vpop.xlane.xlu0 %7410  ;;  %v7517_v23 = vmul.f32 1.442695, %v7459_v49 }
0x23d2   : > { %v7449_v30 = vsub.f32 %v7346_v50, %v7411_v26  ;;  %v7450_v60 = vsub.f32 %v7348_v33, %v7411_v26  ;;  %v7509_v50 = vmul.f32 1.442695, %v7455_v9  ;;  %v7525_v9 = vmul.f32 1.442695, %v7463_v24 }
0x23d4   : > { %v7497_v5 = vmul.f32 1.442695, %v7449_v30  ;;  %v7499_v17 = vmul.f32 1.442695, %v7450_v60  ;;  %v7521_v30 = vmul.f32 1.442695, %v7461_v32 }
0x23d5   : > { %v7414_v1 = vpop.xlane.xlu0 %7413 }
0x23d6   : > { %11054 = vpow2.f32 %v7497_v5  ;;  %v7451_v36 = vsub.f32 %v15530_v11, %v7414_v1  ;;  %v7452_v18 = vsub.f32 %v15532_v39, %v7414_v1  ;;  %v7515_v11 = vmul.f32 1.442695, %v7458_v34 }
0x23d7   : > { %11056 = vpow2.f32 %v7499_v17  ;;  %v7460_v39 = vsub.f32 %v15546_v27, %v7426_v28  ;;  %v7523_v27 = vmul.f32 1.442695, %v7462_v41  ;;  %v7464_v28 = vsub.f32 %v15558_v8, %v7432_v51 }
0x23d8   : > { %11058 = vpow2.f32 %v7505_v52  ;;  %v7501_v33 = vmul.f32 1.442695, %v7451_v36  ;;  %v7503_v58 = vmul.f32 1.442695, %v7452_v18 }
0x23d9   : > { %11060 = vpow2.f32 %v7507_v15  ;;  %v7519_v48 = vmul.f32 1.442695, %v7460_v39  ;;  %v7527_v57 = vmul.f32 1.442695, %v7464_v28  ;;  %v7405_v15 = vpop.xlane.xlu0 %7404 }
0x23da   : > { %11062 = vpow2.f32 %v7501_v33  ;;  %v7445_v41 = vsub.f32 %v15522_v6, %v7405_v15  ;;  %v7446_v24 = vsub.f32 %v15524_v12, %v7405_v15 }
0x23db   : > { %11064 = vpow2.f32 %v7503_v58 }
0x23dc   : > { %11066 = vpow2.f32 %v7509_v50 }
0x23dd   : > { %11068 = vpow2.f32 %v7511_v20  ;;  %v7408_v18 = vpop.xlane.xlu0 %7407 }
0x23de   : > { %11070 = vpow2.f32 %v7513_v46 }
0x23df   : > { %11072 = vpow2.f32 %v7515_v11 }
0x23e0   : > { %11074 = vpow2.f32 %v7517_v23 }
0x23e1   : > { %11076 = vpow2.f32 %v7519_v48  ;;  %v7399_v46 = vpop.xlane.xlu0 %7398 }
0x23e2   : > { %11078 = vpow2.f32 %v7521_v30  ;;  %v7402_v30 = vpop.xlane.xlu1 %7401 }
0x23e3   : > { %v15590_v4 = vpop.eup %11054  ;;  %11080 = vpow2.f32 %v7523_v27  ;;  %v7443_v28 = vsub.f32 %v15516_v37, %v7402_v30 }
0x23e4   : > { %v15592_v26 = vpop.eup %11056  ;;  %11082 = vpow2.f32 %v7525_v9  ;;  %v7444_v9 = vsub.f32 %v15518_v44, %v7402_v30 }
0x23e5   : > { %v15595_v60 = vpop.eup %11058  ;;  %v7553_v56 = vadd.f32 %v15592_v26, %v15590_v4  ;;  %11084 = vpow2.f32 %v7527_v57  ;;  %v7393_v23 = vpop.xlane.xlu0 %7392  ;;  %v7491_v57 = vmul.f32 1.442695, %v7446_v24 }
0x23e6   : > { %v15600_v52 = vpop.eup %11060 }
0x23e7   : > { %v15602_v10 = vpop.eup %11062  ;;  %7554 = vadd.xlane.f32.xlu0 %v7553_v56  ;;  %v7559_v17 = vadd.f32 %v15600_v52, %v15595_v60  ;;  %v7489_v56 = vmul.f32 1.442695, %v7445_v41 }
0x23e8   : > { %v15604_v29 = vpop.eup %11064 }
0x23e9   : > { %v15606_v5 = vpop.eup %11066  ;;  %v7556_v8 = vadd.f32 %v15604_v29, %v15602_v10  ;;  %v7396_v48 = vpop.xlane.xlu0 %7395  ;;  %11086 = vpow2.f32 %v7489_v56 }
0x23ea   : > { %v15612_v51 = vpop.eup %11068  ;;  %11088 = vpow2.f32 %v7491_v57 }
0x23eb   : > { %7560 = vadd.xlane.f32.xlu0 %v7559_v17  ;;  %7557 = vadd.xlane.f32.xlu1 %v7556_v8  ;;  %v15614_v16 = vpop.eup %11070  ;;  %v7562_v1 = vadd.f32 %v15612_v51, %v15606_v5  ;;  %v7485_v17 = vmul.f32 1.442695, %v7443_v28  ;;  %v7487_v8 = vmul.f32 1.442695, %v7444_v9 }
0x23ec   : > { %v15618_v36 = vpop.eup %11072 }
0x23ed   : > { %v15620_v59 = vpop.eup %11074  ;;  %v7565_v50 = vadd.f32 %v15618_v36, %v15614_v16  ;;  %v7387_v27 = vpop.xlane.xlu0 %7386  ;;  %11090 = vpow2.f32 %v7485_v17 }
0x23ee   : > { %v15624_v33 = vpop.eup %11076  ;;  %11092 = vpow2.f32 %v7487_v8  ;;  %v7433_v9 = vsub.f32 %v15496_v2, %v7387_v27  ;;  %v7434_v17 = vsub.f32 %v15498_v14, %v7387_v27 }
0x23ef   : > { %7563 = vadd.xlane.f32.xlu0 %v7562_v1  ;;  %v15626_v58 = vpop.eup %11078  ;;  %v7568_v34 = vadd.f32 %v15624_v33, %v15620_v59  ;;  %v7440_v1 = vsub.f32 %v15510_v54, %v7396_v48 }
0x23f0   : > { %v15630_v20 = vpop.eup %11080  ;;  %v7467_v8 = vmul.f32 1.442695, %v7434_v17 }
0x23f1   : > { %v15632_v49 = vpop.eup %11082  ;;  %v7571_v11 = vadd.f32 %v15630_v20, %v15626_v58  ;;  %v7479_v15 = vmul.f32 1.442695, %v7440_v1 }
0x23f2   : > { %v15636_v39 = vpop.eup %11084 }
0x23f3   : > { %7566 = vadd.xlane.f32.xlu0 %v7565_v50  ;;  %v7574_v32 = vadd.f32 %v15636_v39, %v15632_v49  ;;  %v7390_v50 = vpop.xlane.xlu0 %7389 }
0x23f4   : > { %v7435_v12 = vsub.f32 %v15500_v62, %v7390_v50  ;;  %v7436_v37 = vsub.f32 %v15502_v7, %v7390_v50  ;;  %v7441_v7 = vsub.f32 %v15512_v38, %v7399_v46  ;;  %v7438_v38 = vsub.f32 %v15506_v21, %v7393_v23 }
0x23f6   : > { %v7469_v44 = vmul.f32 1.442695, %v7435_v12  ;;  %v15653_v54 = vpop.eup %11086  ;;  %v7481_v24 = vmul.f32 1.442695, %v7441_v7 }
0x23f7   : > { %7569 = vadd.xlane.f32.xlu0 %v7568_v34  ;;  %v7447_v34 = vsub.f32 %v15526_v22, %v7408_v18  ;;  %v15656_v62 = vpop.eup %11088 }
0x23f8   : > { %v7547_v30 = vadd.f32 %v15656_v62, %v15653_v54 }
0x23fb   : > { %7572 = vadd.xlane.f32.xlu0 %v7571_v11  ;;  %v7448_v11 = vsub.f32 %v15528_v31, %v7408_v18  ;;  %v7437_v31 = vsub.f32 %v15504_v43, %v7393_v23  ;;  %v7475_v43 = vmul.f32 1.442695, %v7438_v38  ;;  %v7465_v23 = vmul.f32 1.442695, %v7433_v9  ;;  %v17102_v9 = vld [vmem:[#allocation34_spill] sm:$0xff] }
0x23fc   : > { %7168 = vrot.lane.b32.xlu1 %v15339_v63, %s11525_s17  ;;  %v7439_v63 = vsub.f32 %v15508_v45, %v7396_v48  ;;  %v7471_v45 = vmul.f32 1.442695, %v7436_v37  ;;  %v15659_v48 = vpop.eup %11090 }
0x23fd   : > { %v7495_v41 = vmul.f32 1.442695, %v7448_v11  ;;  %v15664_v22 = vpop.eup %11092 }
0x23fe   : > { %v7477_v6 = vmul.f32 1.442695, %v7439_v63  ;;  %v7544_v56 = vadd.f32 %v15664_v22, %v15659_v48 }
0x23ff   : > { %7575 = vadd.xlane.f32.xlu0 %v7574_v32  ;;  %v7493_v32 = vmul.f32 1.442695, %v7447_v34 }
0x2400   : > { %11094 = vpow2.f32 %v7477_v6 }
0x2401   : > { %11096 = vpow2.f32 %v7479_v15 }
0x2402   : > { %11098 = vpow2.f32 %v7469_v44 }
0x2403   : > { %11100 = vpow2.f32 %v7471_v45 }
0x2404   : > { %11102 = vpow2.f32 %v7493_v32  ;;  %v7749_v32 = vrot.slane %v15420_v40, 2 }
0x2405   : > { %11104 = vpow2.f32 %v7495_v41 }
0x2406   : > { %11106 = vpow2.f32 %v7481_v24 }
0x240d   : > { %v15667_v18 = vpop.eup %11094 }
0x2415   : > { %7166 = vrot.lane.b32.xlu0 %v15352_v53, %s11525_s17  ;;  %v7442_v53 = vsub.f32 %v15514_v61, %v7399_v46  ;;  %v15672_v61 = vpop.eup %11096  ;;  %v7473_v46 = vmul.f32 1.442695, %v7437_v31 }
0x2416   : > { %v15675_v57 = vpop.eup %11098  ;;  %v7538_v63 = vadd.f32 %v15672_v61, %v15667_v18 }
0x2417   : > { %v7483_v28 = vmul.f32 1.442695, %v7442_v53  ;;  %v15680_v21 = vpop.eup %11100 }
0x2418   : > { %v7532_v1 = vadd.f32 %v15680_v21, %v15675_v57  ;;  %v15684_v2 = vpop.eup %11102 }
0x2419   : > { %11108 = vpow2.f32 %v7483_v28  ;;  %v15686_v50 = vpop.eup %11104 }
0x241a   : > { %11110 = vpow2.f32 %v7473_v46  ;;  %v15688_v14 = vpop.eup %11106  ;;  %v7550_v27 = vadd.f32 %v15686_v50, %v15684_v2 }
0x241b   : > { %11112 = vpow2.f32 %v7475_v43 }
0x241c   : > { %11114 = vpow2.f32 %v7465_v23 }
0x241d   : > { %11116 = vpow2.f32 %v7467_v8 }
0x2420   : > { %7548 = vadd.xlane.f32.xlu1 %v7547_v30 }
0x2424   : > { %7545 = vadd.xlane.f32.xlu1 %v7544_v56 }
0x2426   : > { %v15692_v6 = vpop.eup %11108 }
0x2427   : > { %v15694_v12 = vpop.eup %11110  ;;  %v7541_v15 = vadd.f32 %v15692_v6, %v15688_v14 }
0x2428   : > { %7539 = vadd.xlane.f32.xlu1 %v7538_v63  ;;  %v15698_v37 = vpop.eup %11112 }
0x2429   : > { %v15700_v44 = vpop.eup %11114  ;;  %v7535_v45 = vadd.f32 %v15698_v37, %v15694_v12 }
0x242a   : > { %v15704_v34 = vpop.eup %11116 }
0x242b   : > { %v7529_v11 = vadd.f32 %v15704_v34, %v15700_v44 }
0x242c   : > { %7533 = vadd.xlane.f32.xlu1 %v7532_v1 }
0x2434   : > { %7551 = vadd.xlane.f32.xlu0 %v7550_v27 }
0x2438   : > { %7542 = vadd.xlane.f32.xlu0 %v7541_v15 }
0x243c   : > { %7536 = vadd.xlane.f32.xlu0 %v7535_v45 }
0x2440   : > { %7530 = vadd.xlane.f32.xlu0 %v7529_v11 }
0x246d   : > { %7751 = vxpose.xlu0.c.b16.start.end [1/1] (short) %v7749_v32, 128 }
0x2470   : > { %v7555_v7 = vpop.xlane.xlu0 %7554 }
0x2474   : > { %v7561_v41 = vpop.xlane.xlu0 %7560  ;;  %v7558_v38 = vpop.xlane.xlu1 %7557 }
0x2478   : > { %v7564_v53 = vpop.xlane.xlu0 %7563  ;;  %v7169_v46 = vpop.permute.xlu1 %7168 }
0x247c   : > { %v7567_v30 = vpop.xlane.xlu0 %7566 }
0x2480   : > { %v7570_v24 = vpop.xlane.xlu0 %7569 }
0x2481   : > { %11118 = vrcp.f32 %v7570_v24 }
0x2484   : > { %v7573_v31 = vpop.xlane.xlu0 %7572 }
0x2485   : > { %11120 = vrcp.f32 %v7573_v31 }
0x2486   : > { %11122 = vrcp.f32 %v7567_v30 }
0x2488   : > { %v7576_v28 = vpop.xlane.xlu0 %7575 }
0x2489   : > { %11124 = vrcp.f32 %v7576_v28 }
0x248a   : > { %11126 = vrcp.f32 %v7564_v53 }
0x248b   : > { %11128 = vrcp.f32 %v7561_v41 }
0x248c   : > { %v7167_v56 = vpop.permute.xlu0 %7166  ;;  %11130 = vrcp.f32 %v7558_v38 }
0x248d   : > { %9789 = vmatprep.mubr.msk.bf16.mxu0 %vm901_vm2, %v7167_v56  ;;  %11132 = vrcp.f32 %v7555_v7 }
0x248e   : > { %9790 = vmatmul.mubr.msk.bf16.vlgmr.msra.gmra.mxu0 %vm901_vm2, %v7169_v46  ;;  %v11119_v43 = vpop.eup %11118 }
0x248f   : > { %7673 = vmatprep.mubr.bf16.mxu0 %v17102_v9  ;;  %v7620_v8 = vmul.f32 %v11119_v43, %v15624_v33  ;;  %v7619_v33 = vmul.f32 %v11119_v43, %v15620_v59 }
0x2492   : > { %v11121_v17 = vpop.eup %11120 }
0x2493   : > { %v11123_v63 = vpop.eup %11122  ;;  %v7622_v1 = vmul.f32 %v11121_v17, %v15630_v20  ;;  %v7621_v15 = vmul.f32 %v11121_v17, %v15626_v58 }
0x2494   : > { %v7618_v41 = vmul.f32 %v11123_v63, %v15618_v36 }
0x2496   : > { %v11125_v23 = vpop.eup %11124  ;;  %v7638_v53 = vpack.c.bf16 %v7620_v8, %v7618_v41 }
0x2497   : > { %v7624_v27 = vmul.f32 %v11125_v23, %v15636_v39  ;;  %v7623_v45 = vmul.f32 %v11125_v23, %v15632_v49  ;;  %v11127_v30 = vpop.eup %11126  ;;  %v7617_v39 = vmul.f32 %v11123_v63, %v15614_v16 }
0x2498   : > { %v11129_v24 = vpop.eup %11128  ;;  %v7616_v20 = vmul.f32 %v11127_v30, %v15612_v51  ;;  %v7615_v28 = vmul.f32 %v11127_v30, %v15606_v5 }
0x2499   : > { %v7640_v11 = vpack.c.bf16 %v7624_v27, %v7622_v1  ;;  %v7639_v32 = vpack.c.bf16 %v7623_v45, %v7621_v15  ;;  %v7614_v58 = vmul.f32 %v11129_v24, %v15600_v52  ;;  %v7637_v49 = vpack.c.bf16 %v7619_v33, %v7617_v39  ;;  %v11131_v7 = vpop.eup %11130 }
0x249a   : > { %v11133_v36 = vpop.eup %11132  ;;  %v7612_v38 = vmul.f32 %v11131_v7, %v15604_v29  ;;  %v7613_v56 = vmul.f32 %v11129_v24, %v15595_v60  ;;  %v7611_v52 = vmul.f32 %v11131_v7, %v15602_v10 }
0x249b   : > { %7641 = vmatprep.subr.bf16.mxu0 %v7640_v11  ;;  %v7636_v31 = vpack.c.bf16 %v7616_v20, %v7614_v58  ;;  %v7610_v59 = vmul.f32 %v11133_v36, %v15592_v26  ;;  %v7609_v16 = vmul.f32 %v11133_v36, %v15590_v4 }
0x249c   : > { %7642 = vmatpush1.bf16.xpose.msra.mxu0 %v7639_v32  ;;  %v7635_v46 = vpack.c.bf16 %v7615_v28, %v7613_v56  ;;  %v17103_v56 = vrot.slane %v17098_v55, 2 }
0x249d   : > { %7643 = vmatprep.subr.bf16.mxu0 %v7638_v53  ;;  %v7634_v51 = vpack.c.bf16 %v7612_v38, %v7610_v59  ;;  %v7633_v43 = vpack.c.bf16 %v7611_v52, %v7609_v16 }
0x24a4   : > { %7644 = vmatpush1.bf16.xpose.msra.mxu0 %v7637_v49 }
0x24a5   : > { %7645 = vmatprep.subr.bf16.mxu0 %v7636_v31 }
0x24a9   : > { %v7549_v17 = vpop.xlane.xlu1 %7548 }
0x24aa   : > { %11134 = vrcp.f32 %v7549_v17 }
0x24ac   : > { %7646 = vmatpush1.bf16.xpose.msra.mxu0 %v7635_v46 }
0x24ad   : > { %7647 = vmatprep.subr.bf16.mxu0 %v7634_v51  ;;  %v7546_v63 = vpop.xlane.xlu1 %7545 }
0x24b1   : > { %v7540_v60 = vpop.xlane.xlu1 %7539 }
0x24b4   : > { %7648 = vmatpush1.bf16.xpose.msra.mxu0 %v7633_v43 }
0x24b5   : > { %v7534_v10 = vpop.xlane.xlu1 %7533 }
0x24b7   : > { %v11135_v23 = vpop.eup %11134 }
0x24b8   : > { %v7606_v4 = vmul.f32 %v11135_v23, %v15656_v62  ;;  %v7605_v15 = vmul.f32 %v11135_v23, %v15653_v54 }
0x24bd   : > { %v7552_v5 = vpop.xlane.xlu0 %7551 }
0x24be   : > { %11136 = vrcp.f32 %v7552_v5 }
0x24bf   : > { %11138 = vrcp.f32 %v7546_v63 }
0x24c1   : > { %v7543_v29 = vpop.xlane.xlu0 %7542 }
0x24c2   : > { %11140 = vrcp.f32 %v7543_v29 }
0x24c3   : > { %11142 = vrcp.f32 %v7540_v60 }
0x24c5   : > { %v7537_v26 = vpop.xlane.xlu0 %7536 }
0x24c6   : > { %11144 = vrcp.f32 %v7537_v26 }
0x24c9   : > { %v7531_v8 = vpop.xlane.xlu0 %7530 }
0x24ca   : > { %11146 = vrcp.f32 %v7531_v8 }
0x24cb   : > { %v11137_v1 = vpop.eup %11136  ;;  %11148 = vrcp.f32 %v7534_v10 }
0x24cc   : > { %v7608_v27 = vmul.f32 %v11137_v1, %v15686_v50  ;;  %v7607_v45 = vmul.f32 %v11137_v1, %v15684_v2  ;;  %v11139_v11 = vpop.eup %11138 }
0x24cd   : > { %v7604_v24 = vmul.f32 %v11139_v11, %v15664_v22  ;;  %v7603_v2 = vmul.f32 %v11139_v11, %v15659_v48 }
0x24ce   : > { %v7632_v32 = vpack.c.bf16 %v7608_v27, %v7606_v4  ;;  %v7631_v41 = vpack.c.bf16 %v7607_v45, %v7605_v15 }
0x24cf   : > { %v11141_v53 = vpop.eup %11140 }
0x24d0   : > { %7649 = vmatprep.subr.bf16.mxu0 %v7632_v32  ;;  %v7602_v30 = vmul.f32 %v11141_v53, %v15692_v6  ;;  %v11143_v33 = vpop.eup %11142  ;;  %v7601_v50 = vmul.f32 %v11141_v53, %v15688_v14 }
0x24d1   : > { %7650 = vmatpush1.bf16.xpose.msra.mxu0 %v7631_v41  ;;  %v7600_v39 = vmul.f32 %v11143_v33, %v15672_v61  ;;  %v7599_v36 = vmul.f32 %v11143_v33, %v15667_v18  ;;  %v7759_v18 = vpop.trf.xlu0 }
0x24d2   : > { %v7630_v62 = vpack.c.bf16 %v7604_v24, %v7602_v30  ;;  %v7629_v58 = vpack.c.bf16 %v7603_v2, %v7601_v50 }
0x24d3   : > { %v11145_v20 = vpop.eup %11144 }
0x24d4   : > { %7651 = vmatprep.subr.bf16.mxu0 %v7630_v62  ;;  %v7598_v54 = vmul.f32 %v11145_v20, %v15698_v37  ;;  %v7597_v22 = vmul.f32 %v11145_v20, %v15694_v12  ;;  %v17104_v12 = vld [vmem:[#allocation35_spill] sm:$0xff] }
0x24d6   : > { %v7628_v49 = vpack.c.bf16 %v7600_v39, %v7598_v54  ;;  %v7627_v28 = vpack.c.bf16 %v7599_v36, %v7597_v22 }
0x24d7   : > { %v11147_v7 = vpop.eup %11146 }
0x24d8   : > { %v11149_v6 = vpop.eup %11148  ;;  %v7594_v31 = vmul.f32 %v11147_v7, %v15704_v34  ;;  %v7593_v48 = vmul.f32 %v11147_v7, %v15700_v44  ;;  %v17105_v34 = vld [vmem:[#allocation32_spill] sm:$0xff] }
0x24d9   : > { %7652 = vmatpush1.bf16.xpose.msra.mxu0 %v7629_v58  ;;  %v7596_v14 = vmul.f32 %v11149_v6, %v15680_v21  ;;  %v7595_v61 = vmul.f32 %v11149_v6, %v15675_v57  ;;  %v7760_v21 = vpop.trf.xlu0 }
0x24da   : > { %7653 = vmatprep.subr.bf16.mxu0 %v7628_v49 }
0x24db   : > { %v7626_v37 = vpack.c.bf16 %v7596_v14, %v7594_v31  ;;  %v7625_v38 = vpack.c.bf16 %v7595_v61, %v7593_v48 }
0x24dd   : > { %v7761_v57 = vpop.trf.xlu0 }
0x24e1   : > { %7654 = vmatpush1.bf16.xpose.msra.mxu0 %v7627_v28  ;;  %v7762_v44 = vpop.trf.xlu0 }
0x24e2   : > { %7655 = vmatprep.subr.bf16.mxu0 %v7626_v37 }
0x24e5   : > { %v7763_v59 = vpop.trf.xlu0 }
0x24e9   : > { %7656 = vmatpush1.bf16.xpose.msra.mxu0 %v7625_v38  ;;  %v7764_v46 = vpop.trf.xlu0 }
0x24ea   : > { %9589 = vmatprep.subr.msk.bf16.mxu0 %vm926_vm1, %v17103_v56 }
0x24ed   : > { %v7765_v51 = vpop.trf.xlu0 }
0x24f0   : > { %7674 = vmatmul.mubr.bf16.vlgmr.msra.gmra.mxu0 %v17104_v12 }
0x24f1   : > { %7806 = vmatpush1.bf16.msra.mxu0 %v17105_v34  ;;  %7823 = vmatprep.mubr.bf16.mxu0 %v17087_v25  ;;  %v7766_v52 = vpop.trf.xlu0 }
0x24f8   : > { %9590 = vmatmul.mubr.msk.bf16.vlgmr.msra.gmra.mxu0 %vm901_vm2, %v7759_v18 }
0x24f9   : > { %7833 = vmatprep.mubr.bf16.mxu0 %v17087_v25 }
0x2500   : > { %9591 = vmatmul.mubr.msk.bf16.gmra.mxu0 %vm901_vm2, %v7760_v21 }
0x2501   : > { %7843 = vmatprep.mubr.bf16.mxu0 %v17087_v25 }
0x2508   : > { %9592 = vmatmul.mubr.msk.bf16.gmra.mxu0 %vm901_vm2, %v7761_v57 }
0x2509   : > { %7853 = vmatprep.mubr.bf16.mxu0 %v17087_v25 }
0x2510   : > { %9593 = vmatmul.mubr.msk.bf16.gmra.mxu0 %vm901_vm2, %v7762_v44 }
0x2511   : > { %7863 = vmatprep.mubr.bf16.mxu0 %v17087_v25 }
0x2518   : > { %9594 = vmatmul.mubr.msk.bf16.gmra.mxu0 %vm901_vm2, %v7763_v59 }
0x2519   : > { %7873 = vmatprep.mubr.bf16.mxu0 %v17087_v25 }
0x2520   : > { %9595 = vmatmul.mubr.msk.bf16.gmra.mxu0 %vm901_vm2, %v7764_v46 }
0x2521   : > { %7883 = vmatprep.mubr.bf16.mxu0 %v17087_v25 }
0x2528   : > { %9596 = vmatmul.mubr.msk.bf16.gmra.mxu0 %vm901_vm2, %v7765_v51 }
0x2529   : > { %7893 = vmatprep.mubr.bf16.mxu0 %v17087_v25 }
0x2530   : > { %9597 = vmatmul.mubr.msk.bf16.gmra.mxu0 %vm901_vm2, %v7766_v52 }
0x254e   : > { %v9791_v16 = vpop.f32.mrf.mxu0 }
0x254f   : > { %v15766_v43 = vadd.f32 %v9791_v16, %v15484_v35 }
0x2550   : > { %v7213_v17 = vpop.f32.mrf.mxu0 }
0x2551   : > { %v15769_v63 = vadd.f32 %v7213_v17, %v15488_v19 }
0x2552   : > { %v9792_v5 = vpop.f32.mrf.mxu0 }
0x2553   : > { %v15772_v29 = vadd.f32 %v9792_v5, %v15490_v47 }
0x2554   : > { %v15774_v60 = vpop.f32.mrf.mxu0 }
0x2555   : > { %17106 = vst [vmem:[#allocation6_spill] sm:$0xff] %v15774_v60 }
0x25b0   : > { %v7675_v26 = vpop.f32.mrf.mxu0 }
0x25b1   : > { %v7681_v23 = vpack.c.bf16 %v7675_v26, %v7675_v26 }
0x25b2   : > { %v7677_v8 = vpop.f32.mrf.mxu0 }
0x25b3   : > { %v7693_v1 = vsel %vm926_vm1, %v7681_v23, 0  ;;  %9829 = vmatprep.subr.msk.bf16.mxu1 %vm926_vm1, %v7681_v23 }
0x25b4   : > { %v7678_v10 = vpop.f32.mrf.mxu0  ;;  %9794 = vmatpush3.bf16.msra.mxu1 %v7693_v1 }
0x25b6   : > { %v7679_v35 = vpop.f32.mrf.mxu0 }
0x25b8   : > { %v15778_v4 = vpop.f32.mrf.mxu0 }
0x25ba   : > { %v15780_v19 = vpop.f32.mrf.mxu0 }
0x25bb   : > { %v7904_v23 = vmax.f32 %v15778_v4, %v15780_v19 }
0x25bc   : > { %v15782_v27 = vpop.f32.mrf.mxu0 }
0x25be   : > { %v15784_v47 = vpop.f32.mrf.mxu0 }
0x25bf   : > { %v7907_v8 = vmax.f32 %v15782_v27, %v15784_v47 }
0x25c0   : > { %v15786_v15 = vpop.f32.mrf.mxu0 }
0x25c2   : > { %v15788_v45 = vpop.f32.mrf.mxu0 }
0x25c3   : > { %v7910_v11 = vmax.f32 %v15786_v15, %v15788_v45 }
0x25c4   : > { %v15792_v32 = vpop.f32.mrf.mxu0 }
0x25c5   : > { %7911 = vmax.xlane.f32.xlu0 %v7910_v11 }
0x25c6   : > { %v15794_v41 = vpop.f32.mrf.mxu0 }
0x25c7   : > { %v7913_v26 = vmax.f32 %v15792_v32, %v15794_v41 }
0x25c8   : > { %v15796_v53 = vpop.f32.mrf.mxu0 }
0x25ca   : > { %v15798_v30 = vpop.f32.mrf.mxu0 }
0x25cb   : > { %v7916_v17 = vmax.f32 %v15796_v53, %v15798_v30 }
0x25cc   : > { %v15800_v24 = vpop.f32.mrf.mxu0 }
0x25ce   : > { %v15802_v33 = vpop.f32.mrf.mxu0 }
0x25cf   : > { %v7919_v5 = vmax.f32 %v15800_v24, %v15802_v33 }
0x25d0   : > { %v15804_v62 = vpop.f32.mrf.mxu0 }
0x25d2   : > { %v15806_v20 = vpop.f32.mrf.mxu0 }
0x25d3   : > { %v7922_v52 = vmax.f32 %v15804_v62, %v15806_v20 }
0x25d4   : > { %v15808_v50 = vpop.f32.mrf.mxu0 }
0x25d6   : > { %v15810_v54 = vpop.f32.mrf.mxu0 }
0x25d7   : > { %v7925_v16 = vmax.f32 %v15808_v50, %v15810_v54 }
0x25d8   : > { %v7865_v2 = vpop.f32.mrf.mxu0 }
0x25da   : > { %v7867_v39 = vpop.f32.mrf.mxu0 }
0x25db   : > { %v7928_v46 = vmax.f32 %v7865_v2, %v7867_v39 }
0x25dc   : > { %v15812_v58 = vpop.f32.mrf.mxu0 }
0x25de   : > { %v15814_v49 = vpop.f32.mrf.mxu0 }
0x25df   : > { %v7931_v51 = vmax.f32 %v15812_v58, %v15814_v49 }
0x25e0   : > { %v7875_v7 = vpop.f32.mrf.mxu0 }
0x25e2   : > { %v7877_v6 = vpop.f32.mrf.mxu0 }
0x25e3   : > { %v7934_v44 = vmax.f32 %v7875_v7, %v7877_v6 }
0x25e4   : > { %v15816_v22 = vpop.f32.mrf.mxu0 }
0x25e6   : > { %v15818_v31 = vpop.f32.mrf.mxu0 }
0x25e7   : > { %v7937_v59 = vmax.f32 %v15816_v22, %v15818_v31 }
0x25e8   : > { %v15820_v36 = vpop.f32.mrf.mxu0 }
0x25ea   : > { %v15822_v14 = vpop.f32.mrf.mxu0 }
0x25eb   : > { %v7940_v28 = vmax.f32 %v15820_v36, %v15822_v14 }
0x25ec   : > { %v15826_v37 = vpop.f32.mrf.mxu0 }
0x25ed   : > { %7941 = vmax.xlane.f32.xlu1 %v7940_v28 }
0x25ee   : > { %v15828_v48 = vpop.f32.mrf.mxu0 }
0x25ef   : > { %v7943_v61 = vmax.f32 %v15826_v37, %v15828_v48 }
0x25f0   : > { %v15832_v38 = vpop.f32.mrf.mxu0 }
0x25f1   : > { %7944 = vmax.xlane.f32.xlu1 %v7943_v61 }
0x25f2   : > { %v15834_v56 = vpop.f32.mrf.mxu0 }
0x25f3   : > { %v7946_v34 = vmax.f32 %v15832_v38, %v15834_v56 }
0x25f4   : > { %v15838_v18 = vpop.f32.mrf.mxu0 }
0x25f5   : > { %7947 = vmax.xlane.f32.xlu1 %v7946_v34 }
0x25f6   : > { %v15840_v21 = vpop.f32.mrf.mxu0 }
0x25f7   : > { %v7949_v57 = vmax.f32 %v15838_v18, %v15840_v21 }
0x25f9   : > { %7950 = vmax.xlane.f32.xlu1 %v7949_v57 }
0x25fd   : > { %7935 = vmax.xlane.f32.xlu1 %v7934_v44 }
0x2601   : > { %7938 = vmax.xlane.f32.xlu1 %v7937_v59 }
0x2605   : > { %7929 = vmax.xlane.f32.xlu1 %v7928_v46 }
0x2609   : > { %7932 = vmax.xlane.f32.xlu1 %v7931_v51 }
0x260d   : > { %7923 = vmax.xlane.f32.xlu1 %v7922_v52 }
0x2611   : > { %7926 = vmax.xlane.f32.xlu1 %v7925_v16 }
0x2615   : > { %7917 = vmax.xlane.f32.xlu1 %v7916_v17 }
0x2619   : > { %7920 = vmax.xlane.f32.xlu1 %v7919_v5 }
0x261d   : > { %7914 = vmax.xlane.f32.xlu1 %v7913_v26 }
0x2621   : > { %7905 = vmax.xlane.f32.xlu1 %v7904_v23 }
0x2625   : > { %7908 = vmax.xlane.f32.xlu1 %v7907_v8 }
0x2676   : > { %v7942_v1 = vpop.xlane.xlu1 %7941 }
0x267a   : > { %v7945_v10 = vpop.xlane.xlu1 %7944 }
0x267e   : > { %v7948_v35 = vpop.xlane.xlu1 %7947 }
0x2682   : > { %v7951_v11 = vpop.xlane.xlu1 %7950 }
0x2686   : > { %v7936_v28 = vpop.xlane.xlu1 %7935 }
0x2687   : > { %v7972_v34 = vsub.f32 %v7875_v7, %v7936_v28  ;;  %v7973_v57 = vsub.f32 %v7877_v6, %v7936_v28  ;;  %v7976_v7 = vsub.f32 %v15820_v36, %v7942_v1 }
0x2689   : > { %v8024_v51 = vmul.f32 1.442695, %v7972_v34  ;;  %v8026_v5 = vmul.f32 1.442695, %v7973_v57  ;;  %v7980_v34 = vsub.f32 %v15832_v38, %v7948_v35 }
0x268a   : > { %v7939_v61 = vpop.xlane.xlu1 %7938 }
0x268b   : > { %v7974_v52 = vsub.f32 %v15816_v22, %v7939_v61  ;;  %v7975_v26 = vsub.f32 %v15818_v31, %v7939_v61  ;;  %v7977_v22 = vsub.f32 %v15822_v14, %v7942_v1  ;;  %v8032_v31 = vmul.f32 1.442695, %v7976_v7 }
0x268c   : > { %v7978_v61 = vsub.f32 %v15826_v37, %v7945_v10  ;;  %v7981_v14 = vsub.f32 %v15834_v56, %v7948_v35  ;;  %v7982_v37 = vsub.f32 %v15838_v18, %v7951_v11 }
0x268d   : > { %v8030_v28 = vmul.f32 1.442695, %v7975_v26 }
0x268e   : > { %v7930_v44 = vpop.xlane.xlu1 %7929  ;;  %v8036_v36 = vmul.f32 1.442695, %v7978_v61 }
0x268f   : > { %v7968_v59 = vsub.f32 %v7865_v2, %v7930_v44  ;;  %v7969_v46 = vsub.f32 %v7867_v39, %v7930_v44  ;;  %v8028_v2 = vmul.f32 1.442695, %v7974_v52  ;;  %v8040_v44 = vmul.f32 1.442695, %v7980_v34 }
0x2691   : > { %v8016_v16 = vmul.f32 1.442695, %v7968_v59  ;;  %v8018_v17 = vmul.f32 1.442695, %v7969_v46 }
0x2692   : > { %v7933_v23 = vpop.xlane.xlu1 %7932 }
0x2693   : > { %11150 = vpow2.f32 %v8016_v16  ;;  %v7970_v8 = vsub.f32 %v15812_v58, %v7933_v23  ;;  %v7971_v60 = vsub.f32 %v15814_v49, %v7933_v23  ;;  %v8034_v58 = vmul.f32 1.442695, %v7977_v22 }
0x2694   : > { %11152 = vpow2.f32 %v8018_v17  ;;  %v7979_v49 = vsub.f32 %v15828_v48, %v7945_v10  ;;  %v8042_v48 = vmul.f32 1.442695, %v7981_v14  ;;  %v7983_v10 = vsub.f32 %v15840_v21, %v7951_v11 }
0x2695   : > { %11154 = vpow2.f32 %v8024_v51  ;;  %v8020_v39 = vmul.f32 1.442695, %v7970_v8  ;;  %v8022_v6 = vmul.f32 1.442695, %v7971_v60  ;;  %v8044_v51 = vmul.f32 1.442695, %v7982_v37 }
0x2696   : > { %11156 = vpow2.f32 %v8026_v5  ;;  %v8038_v60 = vmul.f32 1.442695, %v7979_v49  ;;  %v8046_v18 = vmul.f32 1.442695, %v7983_v10  ;;  %v15896_v17 = vpop.xlane.xlu1 %7923 }
0x2697   : > { %11158 = vpow2.f32 %v8020_v39 }
0x2698   : > { %11160 = vpow2.f32 %v8022_v6 }
0x2699   : > { %11162 = vpow2.f32 %v8028_v2 }
0x269a   : > { %11164 = vpow2.f32 %v8030_v28  ;;  %v7927_v8 = vpop.xlane.xlu1 %7926 }
0x269b   : > { %11166 = vpow2.f32 %v8032_v31  ;;  %v7967_v37 = vsub.f32 %v15810_v54, %v7927_v8 }
0x269c   : > { %11168 = vpow2.f32 %v8034_v58 }
0x269d   : > { %11170 = vpow2.f32 %v8036_v36 }
0x269e   : > { %11172 = vpow2.f32 %v8038_v60  ;;  %v7918_v31 = vpop.xlane.xlu1 %7917  ;;  %v15927_v60 = vld [vmem:[%s16745_s6 + $0x8] sm:$0xff]  }
0x269f   : > { %11174 = vpow2.f32 %v8040_v44  ;;  %v7966_v44 = vsub.f32 %v15808_v50, %v7927_v8  ;;  %v15940_v50 = vld [vmem:[%s16745_s6] sm:$0xff]  }
0x26a0   : > { %v15872_v1 = vpop.eup %11150  ;;  %11176 = vpow2.f32 %v8042_v48 }
0x26a1   : > { %v15874_v57 = vpop.eup %11152  ;;  %11178 = vpow2.f32 %v8044_v51  ;;  %v8012_v10 = vmul.f32 1.442695, %v7966_v44  ;;  %v8014_v51 = vmul.f32 1.442695, %v7967_v37  ;;  %v7960_v44 = vsub.f32 %v15796_v53, %v7918_v31  ;;  %v7912_v37 = vpop.xlane.xlu0 %7911 }
0x26a2   : > { %v15877_v59 = vpop.eup %11154  ;;  %v8072_v38 = vadd.f32 %v15874_v57, %v15872_v1  ;;  %11180 = vpow2.f32 %v8046_v18  ;;  %v7921_v36 = vpop.xlane.xlu1 %7920  ;;  %v7957_v53 = vsub.f32 %v15788_v45, %v7912_v37 }
0x26a3   : > { %v15882_v46 = vpop.eup %11156  ;;  %v7963_v18 = vsub.f32 %v15802_v33, %v7921_v36  ;;  %11182 = vpow2.f32 %v8012_v10 }
0x26a4   : > { %v15884_v56 = vpop.eup %11158  ;;  %8073 = vadd.xlane.f32.xlu1 %v8072_v38  ;;  %v8078_v16 = vadd.f32 %v15882_v46, %v15877_v59  ;;  %v7962_v38 = vsub.f32 %v15800_v24, %v7921_v36  ;;  %11184 = vpow2.f32 %v8014_v51 }
0x26a5   : > { %v15886_v35 = vpop.eup %11160 }
0x26a6   : > { %v15888_v52 = vpop.eup %11162  ;;  %v8075_v21 = vadd.f32 %v15886_v35, %v15884_v56  ;;  %v7915_v14 = vpop.xlane.xlu1 %7914 }
0x26a7   : > { %v15894_v11 = vpop.eup %11164 }
0x26a8   : > { %8079 = vadd.xlane.f32.xlu1 %v8078_v16  ;;  %8076 = vadd.xlane.f32.xlu0 %v8075_v21  ;;  %v15898_v5 = vpop.eup %11166  ;;  %v8081_v26 = vadd.f32 %v15894_v11, %v15888_v52  ;;  %v8004_v16 = vmul.f32 1.442695, %v7962_v38  ;;  %v7958_v21 = vsub.f32 %v15792_v32, %v7915_v14  ;;  %v7961_v38 = vsub.f32 %v15798_v30, %v7918_v31 }
0x26a9   : > { %v15902_v23 = vpop.eup %11168 }
0x26aa   : > { %v15904_v7 = vpop.eup %11170  ;;  %v8084_v2 = vadd.f32 %v15902_v23, %v15898_v5  ;;  %v7906_v48 = vpop.xlane.xlu1 %7905  ;;  %11186 = vpow2.f32 %v8004_v16  ;;  %v7996_v24 = vmul.f32 1.442695, %v7958_v21  ;;  %v8002_v16 = vmul.f32 1.442695, %v7961_v38 }
0x26ab   : > { %v15908_v39 = vpop.eup %11172 }
0x26ac   : > { %8082 = vadd.xlane.f32.xlu1 %v8081_v26  ;;  %v15910_v6 = vpop.eup %11174  ;;  %v8087_v22 = vadd.f32 %v15908_v39, %v15904_v7  ;;  %v8006_v26 = vmul.f32 1.442695, %v7963_v18 }
0x26ad   : > { %v15914_v28 = vpop.eup %11176 }
0x26ae   : > { %v15916_v61 = vpop.eup %11178  ;;  %v8090_v58 = vadd.f32 %v15914_v28, %v15910_v6  ;;  %11188 = vpow2.f32 %v8006_v26  ;;  %v7952_v26 = vsub.f32 %v15778_v4, %v7906_v48 }
0x26af   : > { %v15920_v49 = vpop.eup %11180  ;;  %11190 = vpow2.f32 %v7996_v24 }
0x26b0   : > { %8085 = vadd.xlane.f32.xlu1 %v8084_v2  ;;  %v8093_v34 = vadd.f32 %v15920_v49, %v15916_v61  ;;  %v7959_v2 = vsub.f32 %v15794_v41, %v7915_v14  ;;  %v15948_v36 = vpop.eup %11182 }
0x26b1   : > { %v15952_v14 = vpop.eup %11184 }
0x26b2   : > { %v7998_v54 = vmul.f32 1.442695, %v7959_v2 }
0x26b4   : > { %8088 = vadd.xlane.f32.xlu1 %v8087_v22  ;;  %v7909_v22 = vpop.xlane.xlu1 %7908  ;;  %11192 = vpow2.f32 %v7998_v54 }
0x26b5   : > { %v7954_v33 = vsub.f32 %v15782_v27, %v7909_v22  ;;  %v7955_v32 = vsub.f32 %v15784_v47, %v7909_v22  ;;  %v7953_v22 = vsub.f32 %v15780_v19, %v7906_v48 }
0x26b7   : > { %v7988_v8 = vmul.f32 1.442695, %v7954_v33  ;;  %v7990_v41 = vmul.f32 1.442695, %v7955_v32  ;;  %v15955_v47 = vpop.eup %11186  ;;  %v7984_v33 = vmul.f32 1.442695, %v7952_v26 }
0x26b8   : > { %8091 = vadd.xlane.f32.xlu1 %v8090_v58  ;;  %v7964_v58 = vsub.f32 %v15804_v62, %v15896_v17  ;;  %v8069_v62 = vadd.f32 %v15952_v14, %v15948_v36  ;;  %v7986_v54 = vmul.f32 1.442695, %v7953_v22 }
0x26b9   : > { %11194 = vpow2.f32 %v7988_v8 }
0x26ba   : > { %11196 = vpow2.f32 %v7990_v41  ;;  %v8008_v27 = vmul.f32 1.442695, %v7964_v58 }
0x26bb   : > { %v15960_v51 = vpop.eup %11188 }
0x26bc   : > { %8094 = vadd.xlane.f32.xlu1 %v8093_v34  ;;  %v7965_v34 = vsub.f32 %v15806_v20, %v15896_v17  ;;  %v7956_v20 = vsub.f32 %v15786_v15, %v7912_v37  ;;  %11198 = vpow2.f32 %v8008_v27  ;;  %v8000_v17 = vmul.f32 1.442695, %v7960_v44  ;;  %v15963_v18 = vpop.eup %11190 }
0x26bd   : > { %v8063_v21 = vadd.f32 %v15960_v51, %v15955_v47  ;;  %v7994_v15 = vmul.f32 1.442695, %v7957_v53 }
0x26be   : > { %7684 = vrot.lane.b32.xlu0 %v15927_v60, %s11526_s12  ;;  %v8010_v10 = vmul.f32 1.442695, %v7965_v34  ;;  %v7992_v31 = vmul.f32 1.442695, %v7956_v20 }
0x26c0   : > { %11200 = vpow2.f32 %v8010_v10 }
0x26c1   : > { %v15968_v30 = vpop.eup %11192  ;;  %11202 = vpow2.f32 %v8000_v17 }
0x26c2   : > { %11204 = vpow2.f32 %v8002_v16  ;;  %v8057_v45 = vadd.f32 %v15968_v30, %v15963_v18 }
0x26c3   : > { %11206 = vpow2.f32 %v7992_v31 }
0x26c4   : > { %11208 = vpow2.f32 %v7994_v15 }
0x26c5   : > { %11210 = vpow2.f32 %v7984_v33  ;;  %v17107_v33 = vrot.slane %v17102_v9, 2 }
0x26c6   : > { %v15971_v2 = vpop.eup %11194  ;;  %11212 = vpow2.f32 %v7986_v54 }
0x26c7   : > { %v15976_v24 = vpop.eup %11196 }
0x26c8   : > { %v8051_v32 = vadd.f32 %v15976_v24, %v15971_v2 }
0x26c9   : > { %v15980_v4 = vpop.eup %11198 }
0x26cd   : > { %7682 = vrot.lane.b32.xlu1 %v15940_v50, %s11526_s12  ;;  %v15982_v8 = vpop.eup %11200 }
0x26ce   : > { %v15984_v19 = vpop.eup %11202  ;;  %v8066_v48 = vadd.f32 %v15982_v8, %v15980_v4 }
0x26cf   : > { %v15988_v41 = vpop.eup %11204 }
0x26d0   : > { %v15990_v58 = vpop.eup %11206  ;;  %v8060_v34 = vadd.f32 %v15988_v41, %v15984_v19 }
0x26d1   : > { %v15994_v27 = vpop.eup %11208 }
0x26d2   : > { %v15996_v44 = vpop.eup %11210  ;;  %v8054_v37 = vadd.f32 %v15994_v27, %v15990_v58 }
0x26d3   : > { %v16000_v10 = vpop.eup %11212 }
0x26d4   : > { %v8048_v38 = vadd.f32 %v16000_v10, %v15996_v44 }
0x26dd   : > { %8070 = vadd.xlane.f32.xlu0 %v8069_v62  ;;  %v8267_v62 = vrot.slane %v15420_v40, 4 }
0x26e1   : > { %8064 = vadd.xlane.f32.xlu0 %v8063_v21 }
0x26e5   : > { %8058 = vadd.xlane.f32.xlu0 %v8057_v45 }
0x26e9   : > { %8052 = vadd.xlane.f32.xlu0 %v8051_v32 }
0x26f1   : > { %8067 = vadd.xlane.f32.xlu1 %v8066_v48 }
0x26f5   : > { %8061 = vadd.xlane.f32.xlu1 %v8060_v34 }
0x26f9   : > { %8055 = vadd.xlane.f32.xlu1 %v8054_v37 }
0x26fd   : > { %8049 = vadd.xlane.f32.xlu1 %v8048_v38 }
0x272a   : > { %8269 = vxpose.xlu1.c.b16.start.end [1/1] (short) %v8267_v62, 128 }
0x272d   : > { %v8074_v20 = vpop.xlane.xlu1 %8073 }
0x2731   : > { %v8080_v17 = vpop.xlane.xlu1 %8079  ;;  %v8077_v15 = vpop.xlane.xlu0 %8076 }
0x2735   : > { %v8083_v53 = vpop.xlane.xlu1 %8082  ;;  %v7685_v45 = vpop.permute.xlu0 %7684 }
0x2739   : > { %v8086_v16 = vpop.xlane.xlu1 %8085 }
0x273d   : > { %v8089_v21 = vpop.xlane.xlu1 %8088 }
0x273e   : > { %11214 = vrcp.f32 %v8089_v21 }
0x2741   : > { %v8092_v31 = vpop.xlane.xlu1 %8091 }
0x2742   : > { %11216 = vrcp.f32 %v8092_v31 }
0x2743   : > { %11218 = vrcp.f32 %v8086_v16 }
0x2745   : > { %v8095_v26 = vpop.xlane.xlu1 %8094 }
0x2746   : > { %11220 = vrcp.f32 %v8095_v26 }
0x2747   : > { %11222 = vrcp.f32 %v8083_v53 }
0x2748   : > { %11224 = vrcp.f32 %v8080_v17 }
0x2749   : > { %v7683_v22 = vpop.permute.xlu1 %7682  ;;  %11226 = vrcp.f32 %v8077_v15 }
0x274a   : > { %9795 = vmatprep.mubr.msk.bf16.mxu1 %vm901_vm2, %v7683_v22  ;;  %11228 = vrcp.f32 %v8074_v20 }
0x274b   : > { %9796 = vmatmul.mubr.msk.bf16.vlgmr.msra.gmra.mxu1 %vm901_vm2, %v7685_v45  ;;  %v11215_v54 = vpop.eup %11214 }
0x274c   : > { %8192 = vmatprep.mubr.bf16.mxu1 %v17107_v33  ;;  %v8139_v37 = vmul.f32 %v11215_v54, %v15908_v39  ;;  %v8138_v39 = vmul.f32 %v11215_v54, %v15904_v7 }
0x274f   : > { %v11217_v32 = vpop.eup %11216 }
0x2750   : > { %v11219_v48 = vpop.eup %11218  ;;  %v8141_v38 = vmul.f32 %v11217_v32, %v15914_v28  ;;  %v8140_v16 = vmul.f32 %v11217_v32, %v15910_v6 }
0x2751   : > { %v8137_v17 = vmul.f32 %v11219_v48, %v15902_v23 }
0x2753   : > { %v11221_v34 = vpop.eup %11220  ;;  %v8157_v26 = vpack.c.bf16 %v8139_v37, %v8137_v17 }
0x2754   : > { %v8143_v62 = vmul.f32 %v11221_v34, %v15920_v49  ;;  %v8142_v21 = vmul.f32 %v11221_v34, %v15916_v61  ;;  %v11223_v22 = vpop.eup %11222  ;;  %v8136_v49 = vmul.f32 %v11219_v48, %v15898_v5 }
0x2755   : > { %v11225_v15 = vpop.eup %11224  ;;  %v8135_v28 = vmul.f32 %v11223_v22, %v15894_v11  ;;  %v8134_v33 = vmul.f32 %v11223_v22, %v15888_v52 }
0x2756   : > { %v8159_v53 = vpack.c.bf16 %v8143_v62, %v8141_v38  ;;  %v8158_v31 = vpack.c.bf16 %v8142_v21, %v8140_v16  ;;  %v8133_v6 = vmul.f32 %v11225_v15, %v15882_v46  ;;  %v8156_v61 = vpack.c.bf16 %v8138_v39, %v8136_v49  ;;  %v11227_v20 = vpop.eup %11226 }
0x2757   : > { %v11229_v23 = vpop.eup %11228  ;;  %v8131_v32 = vmul.f32 %v11227_v20, %v15886_v35  ;;  %v8132_v34 = vmul.f32 %v11225_v15, %v15877_v59  ;;  %v8130_v46 = vmul.f32 %v11227_v20, %v15884_v56 }
0x2758   : > { %8160 = vmatprep.subr.bf16.mxu1 %v8159_v53  ;;  %v8155_v45 = vpack.c.bf16 %v8135_v28, %v8133_v6  ;;  %v8129_v7 = vmul.f32 %v11229_v23, %v15874_v57  ;;  %v8128_v5 = vmul.f32 %v11229_v23, %v15872_v1 }
0x2759   : > { %8161 = vmatpush1.bf16.xpose.msra.mxu1 %v8158_v31  ;;  %v8154_v54 = vpack.c.bf16 %v8134_v33, %v8132_v34 }
0x275a   : > { %8162 = vmatprep.subr.bf16.mxu1 %v8157_v26  ;;  %v8153_v11 = vpack.c.bf16 %v8131_v32, %v8129_v7  ;;  %v8152_v48 = vpack.c.bf16 %v8130_v46, %v8128_v5 }
0x2761   : > { %8163 = vmatpush1.bf16.xpose.msra.mxu1 %v8156_v61 }
0x2762   : > { %8164 = vmatprep.subr.bf16.mxu1 %v8155_v45 }
0x2766   : > { %v8071_v37 = vpop.xlane.xlu0 %8070 }
0x2767   : > { %11230 = vrcp.f32 %v8071_v37 }
0x2769   : > { %8165 = vmatpush1.bf16.xpose.msra.mxu1 %v8154_v54 }
0x276a   : > { %8166 = vmatprep.subr.bf16.mxu1 %v8153_v11  ;;  %v8065_v38 = vpop.xlane.xlu0 %8064  ;;  %v17108_v11 = vrot.slane %v17098_v55, 4 }
0x276e   : > { %v8059_v59 = vpop.xlane.xlu0 %8058 }
0x2771   : > { %8167 = vmatpush1.bf16.xpose.msra.mxu1 %v8152_v48 }
0x2772   : > { %v8053_v56 = vpop.xlane.xlu0 %8052 }
0x2774   : > { %v11231_v62 = vpop.eup %11230 }
0x2775   : > { %v8127_v1 = vmul.f32 %v11231_v62, %v15952_v14  ;;  %v8126_v17 = vmul.f32 %v11231_v62, %v15948_v36 }
0x277a   : > { %v8068_v52 = vpop.xlane.xlu1 %8067 }
0x277b   : > { %11232 = vrcp.f32 %v8068_v52 }
0x277c   : > { %11234 = vrcp.f32 %v8065_v38 }
0x277e   : > { %v8062_v35 = vpop.xlane.xlu1 %8061 }
0x277f   : > { %11236 = vrcp.f32 %v8062_v35 }
0x2780   : > { %11238 = vrcp.f32 %v8059_v59 }
0x2782   : > { %v8056_v57 = vpop.xlane.xlu1 %8055 }
0x2783   : > { %11240 = vrcp.f32 %v8056_v57 }
0x2786   : > { %v8050_v16 = vpop.xlane.xlu1 %8049 }
0x2787   : > { %11242 = vrcp.f32 %v8050_v16 }
0x2788   : > { %v11233_v21 = vpop.eup %11232  ;;  %11244 = vrcp.f32 %v8053_v56 }
0x2789   : > { %v8125_v53 = vmul.f32 %v11233_v21, %v15982_v8  ;;  %v8124_v31 = vmul.f32 %v11233_v21, %v15980_v4  ;;  %v11235_v26 = vpop.eup %11234 }
0x278a   : > { %v8123_v49 = vmul.f32 %v11235_v26, %v15960_v51  ;;  %v8122_v36 = vmul.f32 %v11235_v26, %v15955_v47 }
0x278b   : > { %v8151_v22 = vpack.c.bf16 %v8127_v1, %v8125_v53  ;;  %v8150_v15 = vpack.c.bf16 %v8126_v17, %v8124_v31 }
0x278c   : > { %v11237_v39 = vpop.eup %11236 }
0x278d   : > { %8168 = vmatprep.subr.bf16.mxu1 %v8151_v22  ;;  %v8121_v28 = vmul.f32 %v11237_v39, %v15988_v41  ;;  %v11239_v6 = vpop.eup %11238  ;;  %v8120_v8 = vmul.f32 %v11237_v39, %v15984_v19 }
0x278e   : > { %8169 = vmatpush1.bf16.xpose.msra.mxu1 %v8150_v15  ;;  %v8119_v20 = vmul.f32 %v11239_v6, %v15968_v30  ;;  %v8118_v34 = vmul.f32 %v11239_v6, %v15963_v18  ;;  %v17110_v18 = vld [vmem:[#allocation31_spill] sm:$0xff] }
0x278f   : > { %v8149_v14 = vpack.c.bf16 %v8123_v49, %v8121_v28  ;;  %v8148_v45 = vpack.c.bf16 %v8122_v36, %v8120_v8 }
0x2790   : > { %v11241_v61 = vpop.eup %11240 }
0x2791   : > { %8170 = vmatprep.subr.bf16.mxu1 %v8149_v14  ;;  %v8117_v4 = vmul.f32 %v11241_v61, %v15994_v27  ;;  %v8116_v51 = vmul.f32 %v11241_v61, %v15990_v58  ;;  %v17109_v58 = vrot.slane %v17104_v12, 2 }
0x2793   : > { %v8147_v23 = vpack.c.bf16 %v8119_v20, %v8117_v4  ;;  %v8146_v7 = vpack.c.bf16 %v8118_v34, %v8116_v51 }
0x2794   : > { %v11243_v33 = vpop.eup %11242 }
0x2795   : > { %v11245_v41 = vpop.eup %11244  ;;  %v8113_v32 = vmul.f32 %v11243_v33, %v16000_v10  ;;  %v8112_v47 = vmul.f32 %v11243_v33, %v15996_v44 }
0x2796   : > { %8171 = vmatpush1.bf16.xpose.msra.mxu1 %v8148_v45  ;;  %v8115_v19 = vmul.f32 %v11245_v41, %v15976_v24  ;;  %v8114_v30 = vmul.f32 %v11245_v41, %v15971_v2  ;;  %v8277_v24 = vpop.trf.xlu1 }
0x2797   : > { %8172 = vmatprep.subr.bf16.mxu1 %v8147_v23 }
0x2798   : > { %v8145_v27 = vpack.c.bf16 %v8115_v19, %v8113_v32  ;;  %v8144_v54 = vpack.c.bf16 %v8114_v30, %v8112_v47 }
0x279a   : > { %v8278_v44 = vpop.trf.xlu1 }
0x279e   : > { %8173 = vmatpush1.bf16.xpose.msra.mxu1 %v8146_v7  ;;  %v8279_v2 = vpop.trf.xlu1 }
0x279f   : > { %8174 = vmatprep.subr.bf16.mxu1 %v8145_v27 }
0x27a2   : > { %v8280_v10 = vpop.trf.xlu1 }
0x27a6   : > { %8175 = vmatpush1.bf16.xpose.msra.mxu1 %v8144_v54  ;;  %v8281_v46 = vpop.trf.xlu1 }
0x27a7   : > { %9600 = vmatprep.subr.msk.bf16.mxu1 %vm926_vm1, %v17108_v11 }
0x27aa   : > { %v8282_v5 = vpop.trf.xlu1 }
0x27ad   : > { %8193 = vmatmul.mubr.bf16.vlgmr.msra.gmra.mxu1 %v17109_v58 }
0x27ae   : > { %8324 = vmatpush1.bf16.msra.mxu1 %v17110_v18  ;;  %8341 = vmatprep.mubr.bf16.mxu1 %v17087_v25  ;;  %v8283_v48 = vpop.trf.xlu1 }
0x27b2   : > { %v8284_v37 = vpop.trf.xlu1 }
0x27b5   : > { %9601 = vmatmul.mubr.msk.bf16.vlgmr.msra.gmra.mxu1 %vm901_vm2, %v8277_v24 }
0x27b6   : > { %8351 = vmatprep.mubr.bf16.mxu1 %v17087_v25 }
0x27bd   : > { %9602 = vmatmul.mubr.msk.bf16.gmra.mxu1 %vm901_vm2, %v8278_v44 }
0x27be   : > { %8361 = vmatprep.mubr.bf16.mxu1 %v17087_v25 }
0x27c5   : > { %9603 = vmatmul.mubr.msk.bf16.gmra.mxu1 %vm901_vm2, %v8279_v2 }
0x27c6   : > { %8371 = vmatprep.mubr.bf16.mxu1 %v17087_v25 }
0x27cd   : > { %9604 = vmatmul.mubr.msk.bf16.gmra.mxu1 %vm901_vm2, %v8280_v10 }
0x27ce   : > { %8381 = vmatprep.mubr.bf16.mxu1 %v17087_v25 }
0x27d5   : > { %9605 = vmatmul.mubr.msk.bf16.gmra.mxu1 %vm901_vm2, %v8281_v46 }
0x27d6   : > { %8391 = vmatprep.mubr.bf16.mxu1 %v17087_v25 }
0x27dd   : > { %9606 = vmatmul.mubr.msk.bf16.gmra.mxu1 %vm901_vm2, %v8282_v5 }
0x27de   : > { %8401 = vmatprep.mubr.bf16.mxu1 %v17087_v25 }
0x27e5   : > { %9607 = vmatmul.mubr.msk.bf16.gmra.mxu1 %vm901_vm2, %v8283_v48 }
0x27e6   : > { %8411 = vmatprep.mubr.bf16.mxu1 %v17087_v25 }
0x27ed   : > { %9608 = vmatmul.mubr.msk.bf16.gmra.mxu1 %vm901_vm2, %v8284_v37 }
0x280b   : > { %v9797_v38 = vpop.f32.mrf.mxu1 }
0x280c   : > { %v16064_v52 = vadd.f32 %v9797_v38, %v15766_v43 }
0x280d   : > { %v7729_v35 = vpop.f32.mrf.mxu1 }
0x280e   : > { %v16067_v59 = vadd.f32 %v7729_v35, %v15769_v63 }
0x280f   : > { %v9798_v57 = vpop.f32.mrf.mxu1 }
0x2810   : > { %v16070_v62 = vadd.f32 %v9798_v57, %v15772_v29 }
0x2811   : > { %v16072_v16 = vpop.f32.mrf.mxu1 }
0x2812   : > { %17111 = vst [vmem:[#allocation12_spill] sm:$0xff] %v16072_v16 }
0x286d   : > { %v8194_v21 = vpop.f32.mrf.mxu1 }
0x286e   : > { %v8200_v56 = vpack.c.bf16 %v8194_v21, %v8194_v21 }
0x286f   : > { %v8196_v1 = vpop.f32.mrf.mxu1 }
0x2870   : > { %v8212_v53 = vsel %vm926_vm1, %v8200_v56, 0  ;;  %9830 = vmatprep.subr.msk.bf16.mxu0 %vm926_vm1, %v8200_v56 }
0x2871   : > { %v8197_v31 = vpop.f32.mrf.mxu1  ;;  %9800 = vmatpush3.bf16.msra.mxu0 %v8212_v53 }
0x2873   : > { %v8198_v43 = vpop.f32.mrf.mxu1 }
0x2875   : > { %v16076_v17 = vpop.f32.mrf.mxu1 }
0x2877   : > { %v16078_v63 = vpop.f32.mrf.mxu1 }
0x2878   : > { %v8422_v53 = vmax.f32 %v16076_v17, %v16078_v63 }
0x2879   : > { %v16080_v26 = vpop.f32.mrf.mxu1 }
0x287b   : > { %v16082_v29 = vpop.f32.mrf.mxu1 }
0x287c   : > { %v8425_v31 = vmax.f32 %v16080_v26, %v16082_v29 }
0x287d   : > { %v16084_v22 = vpop.f32.mrf.mxu1 }
0x287f   : > { %v16086_v15 = vpop.f32.mrf.mxu1 }
0x2880   : > { %v8428_v56 = vmax.f32 %v16084_v22, %v16086_v15 }
0x2881   : > { %v16088_v39 = vpop.f32.mrf.mxu1 }
0x2883   : > { %v16090_v28 = vpop.f32.mrf.mxu1 }
0x2884   : > { %v8431_v1 = vmax.f32 %v16088_v39, %v16090_v28 }
0x2885   : > { %v16092_v49 = vpop.f32.mrf.mxu1 }
0x2887   : > { %v16094_v6 = vpop.f32.mrf.mxu1 }
0x2888   : > { %v8434_v21 = vmax.f32 %v16092_v49, %v16094_v6 }
0x2889   : > { %v16096_v14 = vpop.f32.mrf.mxu1 }
0x288b   : > { %v16098_v61 = vpop.f32.mrf.mxu1 }
0x288c   : > { %v8437_v8 = vmax.f32 %v16096_v14, %v16098_v61 }
0x288d   : > { %v16102_v4 = vpop.f32.mrf.mxu1 }
0x288e   : > { %8438 = vmax.xlane.f32.xlu1 %v8437_v8 }
0x288f   : > { %v16104_v36 = vpop.f32.mrf.mxu1 }
0x2890   : > { %v8440_v35 = vmax.f32 %v16102_v4, %v16104_v36 }
0x2891   : > { %v16106_v20 = vpop.f32.mrf.mxu1 }
0x2893   : > { %v16108_v45 = vpop.f32.mrf.mxu1 }
0x2894   : > { %v8443_v57 = vmax.f32 %v16106_v20, %v16108_v45 }
0x2895   : > { %v8383_v23 = vpop.f32.mrf.mxu1 }
0x2897   : > { %v8385_v33 = vpop.f32.mrf.mxu1 }
0x2898   : > { %v8446_v37 = vmax.f32 %v8383_v23, %v8385_v33 }
0x2899   : > { %v16110_v41 = vpop.f32.mrf.mxu1 }
0x289b   : > { %v16112_v51 = vpop.f32.mrf.mxu1 }
0x289c   : > { %v8449_v38 = vmax.f32 %v16110_v41, %v16112_v51 }
0x289d   : > { %v8393_v32 = vpop.f32.mrf.mxu1 }
0x289f   : > { %v8395_v34 = vpop.f32.mrf.mxu1 }
0x28a0   : > { %v8452_v5 = vmax.f32 %v8393_v32, %v8395_v34 }
0x28a1   : > { %v16114_v19 = vpop.f32.mrf.mxu1 }
0x28a3   : > { %v16116_v7 = vpop.f32.mrf.mxu1 }
0x28a4   : > { %v8455_v48 = vmax.f32 %v16114_v19, %v16116_v7 }
0x28a5   : > { %v16118_v27 = vpop.f32.mrf.mxu1 }
0x28a7   : > { %v16120_v47 = vpop.f32.mrf.mxu1 }
0x28a8   : > { %v8458_v30 = vmax.f32 %v16118_v27, %v16120_v47 }
0x28a9   : > { %v16124_v54 = vpop.f32.mrf.mxu1 }
0x28aa   : > { %8459 = vmax.xlane.f32.xlu0 %v8458_v30 }
0x28ab   : > { %v16126_v11 = vpop.f32.mrf.mxu1 }
0x28ac   : > { %v8461_v58 = vmax.f32 %v16124_v54, %v16126_v11 }
0x28ad   : > { %v16130_v18 = vpop.f32.mrf.mxu1 }
0x28ae   : > { %8462 = vmax.xlane.f32.xlu0 %v8461_v58 }
0x28af   : > { %v16132_v24 = vpop.f32.mrf.mxu1 }
0x28b0   : > { %v8464_v44 = vmax.f32 %v16130_v18, %v16132_v24 }
0x28b1   : > { %v16136_v2 = vpop.f32.mrf.mxu1 }
0x28b2   : > { %8465 = vmax.xlane.f32.xlu0 %v8464_v44 }
0x28b3   : > { %v16138_v10 = vpop.f32.mrf.mxu1 }
0x28b4   : > { %v8467_v46 = vmax.f32 %v16136_v2, %v16138_v10 }
0x28b6   : > { %8468 = vmax.xlane.f32.xlu0 %v8467_v46 }
0x28ba   : > { %8453 = vmax.xlane.f32.xlu0 %v8452_v5 }
0x28be   : > { %8456 = vmax.xlane.f32.xlu0 %v8455_v48 }
0x28c2   : > { %8447 = vmax.xlane.f32.xlu0 %v8446_v37 }
0x28c6   : > { %8450 = vmax.xlane.f32.xlu0 %v8449_v38 }
0x28ca   : > { %8441 = vmax.xlane.f32.xlu0 %v8440_v35 }
0x28ce   : > { %8444 = vmax.xlane.f32.xlu0 %v8443_v57 }
0x28d2   : > { %8435 = vmax.xlane.f32.xlu0 %v8434_v21 }
0x28d6   : > { %8429 = vmax.xlane.f32.xlu0 %v8428_v56 }
0x28da   : > { %8432 = vmax.xlane.f32.xlu0 %v8431_v1 }
0x28de   : > { %8423 = vmax.xlane.f32.xlu0 %v8422_v53 }
0x28e2   : > { %8426 = vmax.xlane.f32.xlu0 %v8425_v31 }
0x2933   : > { %v8460_v43 = vpop.xlane.xlu0 %8459 }
0x2937   : > { %v8463_v8 = vpop.xlane.xlu0 %8462 }
0x293b   : > { %v8466_v30 = vpop.xlane.xlu0 %8465 }
0x293f   : > { %v8469_v58 = vpop.xlane.xlu0 %8468 }
0x2943   : > { %v8454_v44 = vpop.xlane.xlu0 %8453 }
0x2944   : > { %v8490_v5 = vsub.f32 %v8393_v32, %v8454_v44  ;;  %v8491_v48 = vsub.f32 %v8395_v34, %v8454_v44  ;;  %v8494_v32 = vsub.f32 %v16118_v27, %v8460_v43 }
0x2946   : > { %v8542_v57 = vmul.f32 1.442695, %v8490_v5  ;;  %v8544_v53 = vmul.f32 1.442695, %v8491_v48  ;;  %v8498_v5 = vsub.f32 %v16130_v18, %v8466_v30 }
0x2947   : > { %v8457_v46 = vpop.xlane.xlu0 %8456 }
0x2948   : > { %v8492_v21 = vsub.f32 %v16114_v19, %v8457_v46  ;;  %v8493_v16 = vsub.f32 %v16116_v7, %v8457_v46  ;;  %v8495_v19 = vsub.f32 %v16120_v47, %v8460_v43  ;;  %v8550_v7 = vmul.f32 1.442695, %v8494_v32 }
0x2949   : > { %v8496_v46 = vsub.f32 %v16124_v54, %v8463_v8  ;;  %v8558_v43 = vmul.f32 1.442695, %v8498_v5  ;;  %v8500_v54 = vsub.f32 %v16136_v2, %v8469_v58 }
0x294a   : > { %v8548_v44 = vmul.f32 1.442695, %v8493_v16 }
0x294b   : > { %v8448_v37 = vpop.xlane.xlu0 %8447  ;;  %v8554_v27 = vmul.f32 1.442695, %v8496_v46 }
0x294c   : > { %v8486_v38 = vsub.f32 %v8383_v23, %v8448_v37  ;;  %v8487_v35 = vsub.f32 %v8385_v33, %v8448_v37  ;;  %v8546_v23 = vmul.f32 1.442695, %v8492_v21 }
0x294e   : > { %v8534_v56 = vmul.f32 1.442695, %v8486_v38  ;;  %v8536_v1 = vmul.f32 1.442695, %v8487_v35  ;;  %v8562_v38 = vmul.f32 1.442695, %v8500_v54 }
0x294f   : > { %v8451_v31 = vpop.xlane.xlu0 %8450 }
0x2950   : > { %11246 = vpow2.f32 %v8534_v56  ;;  %v8488_v42 = vsub.f32 %v16110_v41, %v8451_v31  ;;  %v8489_v13 = vsub.f32 %v16112_v51, %v8451_v31  ;;  %v8552_v41 = vmul.f32 1.442695, %v8495_v19 }
0x2951   : > { %11248 = vpow2.f32 %v8536_v1  ;;  %v8497_v51 = vsub.f32 %v16126_v11, %v8463_v8  ;;  %v8501_v8 = vsub.f32 %v16138_v10, %v8469_v58 }
0x2952   : > { %11250 = vpow2.f32 %v8542_v57  ;;  %v8538_v33 = vmul.f32 1.442695, %v8488_v42  ;;  %v8540_v34 = vmul.f32 1.442695, %v8489_v13  ;;  %v8499_v42 = vsub.f32 %v16132_v24, %v8466_v30 }
0x2953   : > { %11252 = vpow2.f32 %v8544_v53  ;;  %v8556_v13 = vmul.f32 1.442695, %v8497_v51  ;;  %v8564_v2 = vmul.f32 1.442695, %v8501_v8  ;;  %v8442_v21 = vpop.xlane.xlu0 %8441 }
0x2954   : > { %11254 = vpow2.f32 %v8538_v33  ;;  %v8560_v11 = vmul.f32 1.442695, %v8499_v42  ;;  %v8482_v42 = vsub.f32 %v16102_v4, %v8442_v21  ;;  %v8483_v54 = vsub.f32 %v16104_v36, %v8442_v21 }
0x2955   : > { %11256 = vpow2.f32 %v8540_v34 }
0x2956   : > { %11258 = vpow2.f32 %v8546_v23 }
0x2957   : > { %11260 = vpow2.f32 %v8548_v44  ;;  %v8445_v31 = vpop.xlane.xlu0 %8444 }
0x2958   : > { %11262 = vpow2.f32 %v8550_v7 }
0x2959   : > { %11264 = vpow2.f32 %v8552_v41 }
0x295a   : > { %11266 = vpow2.f32 %v8554_v27 }
0x295b   : > { %11268 = vpow2.f32 %v8556_v13  ;;  %v8436_v7 = vpop.xlane.xlu0 %8435 }
0x295c   : > { %11270 = vpow2.f32 %v8558_v43  ;;  %v8439_v43 = vpop.xlane.xlu1 %8438 }
0x295d   : > { %v16170_v47 = vpop.eup %11246  ;;  %11272 = vpow2.f32 %v8560_v11  ;;  %v8480_v8 = vsub.f32 %v16096_v14, %v8439_v43 }
0x295e   : > { %v16172_v16 = vpop.eup %11248  ;;  %11274 = vpow2.f32 %v8562_v38  ;;  %v8481_v38 = vsub.f32 %v16098_v61, %v8439_v43 }
0x295f   : > { %v16175_v48 = vpop.eup %11250  ;;  %v8590_v18 = vadd.f32 %v16172_v16, %v16170_v47  ;;  %11276 = vpow2.f32 %v8564_v2  ;;  %v8430_v27 = vpop.xlane.xlu0 %8429  ;;  %v8528_v2 = vmul.f32 1.442695, %v8483_v54 }
0x2960   : > { %v16180_v37 = vpop.eup %11252 }
0x2961   : > { %v16182_v24 = vpop.eup %11254  ;;  %8591 = vadd.xlane.f32.xlu0 %v8590_v18  ;;  %v8596_v57 = vadd.f32 %v16180_v37, %v16175_v48  ;;  %v8526_v18 = vmul.f32 1.442695, %v8482_v42 }
0x2962   : > { %v16184_v30 = vpop.eup %11256 }
0x2963   : > { %v16186_v35 = vpop.eup %11258  ;;  %v8593_v10 = vadd.f32 %v16184_v30, %v16182_v24  ;;  %v8433_v13 = vpop.xlane.xlu0 %8432  ;;  %11278 = vpow2.f32 %v8526_v18 }
0x2964   : > { %v16192_v58 = vpop.eup %11260  ;;  %11280 = vpow2.f32 %v8528_v2 }
0x2965   : > { %8597 = vadd.xlane.f32.xlu0 %v8596_v57  ;;  %8594 = vadd.xlane.f32.xlu1 %v8593_v10  ;;  %v16194_v56 = vpop.eup %11262  ;;  %v8599_v1 = vadd.f32 %v16192_v58, %v16186_v35  ;;  %v8522_v57 = vmul.f32 1.442695, %v8480_v8  ;;  %v8524_v10 = vmul.f32 1.442695, %v8481_v38 }
0x2966   : > { %v16198_v53 = vpop.eup %11264 }
0x2967   : > { %v16200_v32 = vpop.eup %11266  ;;  %v8602_v23 = vadd.f32 %v16198_v53, %v16194_v56  ;;  %v8424_v11 = vpop.xlane.xlu0 %8423  ;;  %11282 = vpow2.f32 %v8522_v57 }
0x2968   : > { %v16204_v33 = vpop.eup %11268  ;;  %11284 = vpow2.f32 %v8524_v10  ;;  %v8470_v38 = vsub.f32 %v16076_v17, %v8424_v11  ;;  %v8471_v57 = vsub.f32 %v16078_v63, %v8424_v11 }
0x2969   : > { %8600 = vadd.xlane.f32.xlu0 %v8599_v1  ;;  %v16206_v34 = vpop.eup %11270  ;;  %v8605_v19 = vadd.f32 %v16204_v33, %v16200_v32  ;;  %v8477_v1 = vsub.f32 %v16090_v28, %v8433_v13 }
0x296a   : > { %v16210_v44 = vpop.eup %11272  ;;  %v8504_v10 = vmul.f32 1.442695, %v8471_v57 }
0x296b   : > { %v16212_v46 = vpop.eup %11274  ;;  %v8608_v41 = vadd.f32 %v16210_v44, %v16206_v34  ;;  %v8516_v21 = vmul.f32 1.442695, %v8477_v1 }
0x296c   : > { %v16216_v51 = vpop.eup %11276 }
0x296d   : > { %8603 = vadd.xlane.f32.xlu0 %v8602_v23  ;;  %v8611_v5 = vadd.f32 %v16216_v51, %v16212_v46  ;;  %v8427_v23 = vpop.xlane.xlu0 %8426 }
0x296e   : > { %v8472_v36 = vsub.f32 %v16080_v26, %v8427_v23  ;;  %v8473_v14 = vsub.f32 %v16082_v29, %v8427_v23  ;;  %v8478_v29 = vsub.f32 %v16092_v49, %v8436_v7  ;;  %v8475_v49 = vsub.f32 %v16086_v15, %v8430_v27 }
0x2970   : > { %v8506_v61 = vmul.f32 1.442695, %v8472_v36  ;;  %v16233_v28 = vpop.eup %11278  ;;  %v8518_v54 = vmul.f32 1.442695, %v8478_v29 }
0x2971   : > { %8606 = vadd.xlane.f32.xlu0 %v8605_v19  ;;  %v8484_v19 = vsub.f32 %v16106_v20, %v8445_v31  ;;  %v16236_v26 = vpop.eup %11280 }
0x2972   : > { %v8584_v43 = vadd.f32 %v16236_v26, %v16233_v28 }
0x2975   : > { %8609 = vadd.xlane.f32.xlu0 %v8608_v41  ;;  %v8485_v41 = vsub.f32 %v16108_v45, %v8445_v31  ;;  %v8474_v45 = vsub.f32 %v16084_v22, %v8430_v27  ;;  %v8512_v22 = vmul.f32 1.442695, %v8475_v49  ;;  %v8502_v27 = vmul.f32 1.442695, %v8470_v38 }
0x2976   : > { %8203 = vrot.lane.b32.xlu1 %v15927_v60, %s11527_s18  ;;  %v8476_v60 = vsub.f32 %v16088_v39, %v8433_v13  ;;  %v8508_v39 = vmul.f32 1.442695, %v8473_v14  ;;  %v16239_v13 = vpop.eup %11282 }
0x2977   : > { %v8532_v42 = vmul.f32 1.442695, %v8485_v41  ;;  %v16244_v20 = vpop.eup %11284 }
0x2978   : > { %v8514_v4 = vmul.f32 1.442695, %v8476_v60  ;;  %v8581_v18 = vadd.f32 %v16244_v20, %v16239_v13 }
0x2979   : > { %8612 = vadd.xlane.f32.xlu0 %v8611_v5  ;;  %v8530_v5 = vmul.f32 1.442695, %v8484_v19 }
0x297a   : > { %11286 = vpow2.f32 %v8514_v4 }
0x297b   : > { %11288 = vpow2.f32 %v8516_v21 }
0x297c   : > { %11290 = vpow2.f32 %v8506_v61 }
0x297d   : > { %11292 = vpow2.f32 %v8508_v39 }
0x297e   : > { %11294 = vpow2.f32 %v8530_v5  ;;  %v8785_v5 = vrot.slane %v15420_v40, 6  ;;  %v17112_v40 = vrot.slane %v17102_v9, 4 }
0x297f   : > { %11296 = vpow2.f32 %v8532_v42 }
0x2980   : > { %11298 = vpow2.f32 %v8518_v54 }
0x2987   : > { %v16247_v31 = vpop.eup %11286 }
0x298f   : > { %8201 = vrot.lane.b32.xlu0 %v15940_v50, %s11527_s18  ;;  %v8479_v50 = vsub.f32 %v16094_v6, %v8436_v7  ;;  %v16252_v6 = vpop.eup %11288  ;;  %v8510_v7 = vmul.f32 1.442695, %v8474_v45 }
0x2990   : > { %v16255_v2 = vpop.eup %11290  ;;  %v8575_v60 = vadd.f32 %v16252_v6, %v16247_v31 }
0x2991   : > { %v8520_v8 = vmul.f32 1.442695, %v8479_v50  ;;  %v16260_v15 = vpop.eup %11292 }
0x2992   : > { %v8569_v1 = vadd.f32 %v16260_v15, %v16255_v2  ;;  %v16264_v17 = vpop.eup %11294 }
0x2993   : > { %11300 = vpow2.f32 %v8520_v8  ;;  %v16266_v23 = vpop.eup %11296 }
0x2994   : > { %11302 = vpow2.f32 %v8510_v7  ;;  %v16268_v63 = vpop.eup %11298  ;;  %v8587_v11 = vadd.f32 %v16266_v23, %v16264_v17 }
0x2995   : > { %11304 = vpow2.f32 %v8512_v22 }
0x2996   : > { %11306 = vpow2.f32 %v8502_v27 }
0x2997   : > { %11308 = vpow2.f32 %v8504_v10 }
0x299a   : > { %8585 = vadd.xlane.f32.xlu1 %v8584_v43 }
0x299e   : > { %8582 = vadd.xlane.f32.xlu1 %v8581_v18 }
0x29a0   : > { %v16272_v4 = vpop.eup %11300 }
0x29a1   : > { %v16274_v36 = vpop.eup %11302  ;;  %v8578_v21 = vadd.f32 %v16272_v4, %v16268_v63 }
0x29a2   : > { %8576 = vadd.xlane.f32.xlu1 %v8575_v60  ;;  %v16278_v14 = vpop.eup %11304 }
0x29a3   : > { %v16280_v61 = vpop.eup %11306  ;;  %v8572_v39 = vadd.f32 %v16278_v14, %v16274_v36 }
0x29a4   : > { %v16284_v19 = vpop.eup %11308 }
0x29a5   : > { %v8566_v41 = vadd.f32 %v16284_v19, %v16280_v61 }
0x29a6   : > { %8570 = vadd.xlane.f32.xlu1 %v8569_v1 }
0x29ae   : > { %8588 = vadd.xlane.f32.xlu0 %v8587_v11 }
0x29b2   : > { %8579 = vadd.xlane.f32.xlu0 %v8578_v21 }
0x29b6   : > { %8573 = vadd.xlane.f32.xlu0 %v8572_v39 }
0x29ba   : > { %8567 = vadd.xlane.f32.xlu0 %v8566_v41 }
0x29e7   : > { %8787 = vxpose.xlu0.c.b16.start.end [1/1] (short) %v8785_v5, 128 }
0x29ea   : > { %v8592_v29 = vpop.xlane.xlu0 %8591 }
0x29ee   : > { %v8598_v42 = vpop.xlane.xlu0 %8597  ;;  %v8595_v49 = vpop.xlane.xlu1 %8594 }
0x29f2   : > { %v8601_v50 = vpop.xlane.xlu0 %8600  ;;  %v8204_v7 = vpop.permute.xlu1 %8203 }
0x29f6   : > { %v8604_v43 = vpop.xlane.xlu0 %8603 }
0x29fa   : > { %v8607_v54 = vpop.xlane.xlu0 %8606 }
0x29fb   : > { %11310 = vrcp.f32 %v8607_v54 }
0x29fe   : > { %v8610_v45 = vpop.xlane.xlu0 %8609 }
0x29ff   : > { %11312 = vrcp.f32 %v8610_v45 }
0x2a00   : > { %11314 = vrcp.f32 %v8604_v43 }
0x2a02   : > { %v8613_v8 = vpop.xlane.xlu0 %8612 }
0x2a03   : > { %11316 = vrcp.f32 %v8613_v8 }
0x2a04   : > { %11318 = vrcp.f32 %v8601_v50 }
0x2a05   : > { %11320 = vrcp.f32 %v8598_v42 }
0x2a06   : > { %v8202_v18 = vpop.permute.xlu0 %8201  ;;  %11322 = vrcp.f32 %v8595_v49 }
0x2a07   : > { %9801 = vmatprep.mubr.msk.bf16.mxu0 %vm901_vm2, %v8202_v18  ;;  %11324 = vrcp.f32 %v8592_v29 }
0x2a08   : > { %9802 = vmatmul.mubr.msk.bf16.vlgmr.msra.gmra.mxu0 %vm901_vm2, %v8204_v7  ;;  %v11311_v38 = vpop.eup %11310 }
0x2a09   : > { %8710 = vmatprep.mubr.bf16.mxu0 %v17112_v40  ;;  %v8657_v27 = vmul.f32 %v11311_v38, %v16204_v33  ;;  %v8656_v33 = vmul.f32 %v11311_v38, %v16200_v32 }
0x2a0c   : > { %v11313_v22 = vpop.eup %11312 }
0x2a0d   : > { %v11315_v57 = vpop.eup %11314  ;;  %v8659_v10 = vmul.f32 %v11313_v22, %v16210_v44  ;;  %v8658_v11 = vmul.f32 %v11313_v22, %v16206_v34 }
0x2a0e   : > { %v8655_v5 = vmul.f32 %v11315_v57, %v16198_v53 }
0x2a10   : > { %v11317_v60 = vpop.eup %11316  ;;  %v8675_v42 = vpack.c.bf16 %v8657_v27, %v8655_v5 }
0x2a11   : > { %v8661_v1 = vmul.f32 %v11317_v60, %v16216_v51  ;;  %v8660_v21 = vmul.f32 %v11317_v60, %v16212_v46  ;;  %v11319_v50 = vpop.eup %11318  ;;  %v8654_v51 = vmul.f32 %v11315_v57, %v16194_v56 }
0x2a12   : > { %v11321_v43 = vpop.eup %11320  ;;  %v8653_v44 = vmul.f32 %v11319_v50, %v16192_v58  ;;  %v8652_v45 = vmul.f32 %v11319_v50, %v16186_v35 }
0x2a13   : > { %v8677_v39 = vpack.c.bf16 %v8661_v1, %v8659_v10  ;;  %v8676_v41 = vpack.c.bf16 %v8660_v21, %v8658_v11  ;;  %v8651_v34 = vmul.f32 %v11321_v43, %v16180_v37  ;;  %v8674_v46 = vpack.c.bf16 %v8656_v33, %v8654_v51  ;;  %v11323_v29 = vpop.eup %11322 }
0x2a14   : > { %v11325_v53 = vpop.eup %11324  ;;  %v8649_v8 = vmul.f32 %v11323_v29, %v16184_v30  ;;  %v8650_v49 = vmul.f32 %v11321_v43, %v16175_v48  ;;  %v8648_v37 = vmul.f32 %v11323_v29, %v16182_v24 }
0x2a15   : > { %8678 = vmatprep.subr.bf16.mxu0 %v8677_v39  ;;  %v8673_v54 = vpack.c.bf16 %v8653_v44, %v8651_v34  ;;  %v8647_v32 = vmul.f32 %v11325_v53, %v16172_v16  ;;  %v8646_v56 = vmul.f32 %v11325_v53, %v16170_v47 }
0x2a16   : > { %8679 = vmatpush1.bf16.xpose.msra.mxu0 %v8676_v41  ;;  %v8672_v18 = vpack.c.bf16 %v8652_v45, %v8650_v49  ;;  %v17113_v45 = vrot.slane %v17098_v55, 6 }
0x2a17   : > { %8680 = vmatprep.subr.bf16.mxu0 %v8675_v42  ;;  %v8671_v58 = vpack.c.bf16 %v8649_v8, %v8647_v32  ;;  %v8670_v7 = vpack.c.bf16 %v8648_v37, %v8646_v56 }
0x2a1e   : > { %8681 = vmatpush1.bf16.xpose.msra.mxu0 %v8674_v46 }
0x2a1f   : > { %8682 = vmatprep.subr.bf16.mxu0 %v8673_v54 }
0x2a23   : > { %v8586_v40 = vpop.xlane.xlu1 %8585 }
0x2a24   : > { %11326 = vrcp.f32 %v8586_v40 }
0x2a26   : > { %8683 = vmatpush1.bf16.xpose.msra.mxu0 %v8672_v18 }
0x2a27   : > { %8684 = vmatprep.subr.bf16.mxu0 %v8671_v58  ;;  %v8583_v38 = vpop.xlane.xlu1 %8582 }
0x2a2b   : > { %v8577_v48 = vpop.xlane.xlu1 %8576 }
0x2a2e   : > { %8685 = vmatpush1.bf16.xpose.msra.mxu0 %v8670_v7 }
0x2a2f   : > { %v8571_v24 = vpop.xlane.xlu1 %8570 }
0x2a31   : > { %v11327_v22 = vpop.eup %11326 }
0x2a32   : > { %v8643_v47 = vmul.f32 %v11327_v22, %v16236_v26  ;;  %v8642_v10 = vmul.f32 %v11327_v22, %v16233_v28 }
0x2a37   : > { %v8589_v35 = vpop.xlane.xlu0 %8588 }
0x2a38   : > { %11328 = vrcp.f32 %v8589_v35 }
0x2a39   : > { %11330 = vrcp.f32 %v8583_v38 }
0x2a3b   : > { %v8580_v30 = vpop.xlane.xlu0 %8579 }
0x2a3c   : > { %11332 = vrcp.f32 %v8580_v30 }
0x2a3d   : > { %11334 = vrcp.f32 %v8577_v48 }
0x2a3f   : > { %v8574_v16 = vpop.xlane.xlu0 %8573 }
0x2a40   : > { %11336 = vrcp.f32 %v8574_v16 }
0x2a43   : > { %v8568_v57 = vpop.xlane.xlu0 %8567 }
0x2a44   : > { %11338 = vrcp.f32 %v8568_v57 }
0x2a45   : > { %v11329_v60 = vpop.eup %11328  ;;  %11340 = vrcp.f32 %v8571_v24 }
0x2a46   : > { %v8645_v27 = vmul.f32 %v11329_v60, %v16266_v23  ;;  %v8644_v1 = vmul.f32 %v11329_v60, %v16264_v17  ;;  %v11331_v11 = vpop.eup %11330 }
0x2a47   : > { %v8641_v42 = vmul.f32 %v11331_v11, %v16244_v20  ;;  %v8640_v17 = vmul.f32 %v11331_v11, %v16239_v13 }
0x2a48   : > { %v8669_v21 = vpack.c.bf16 %v8645_v27, %v8643_v47  ;;  %v8668_v39 = vpack.c.bf16 %v8644_v1, %v8642_v10 }
0x2a49   : > { %v11333_v41 = vpop.eup %11332 }
0x2a4a   : > { %8686 = vmatprep.subr.bf16.mxu0 %v8669_v21  ;;  %v8639_v5 = vmul.f32 %v11333_v41, %v16272_v4  ;;  %v11335_v50 = vpop.eup %11334  ;;  %v8638_v23 = vmul.f32 %v11333_v41, %v16268_v63 }
0x2a4b   : > { %8687 = vmatpush1.bf16.xpose.msra.mxu0 %v8668_v39  ;;  %v8637_v33 = vmul.f32 %v11335_v50, %v16252_v6  ;;  %v8636_v29 = vmul.f32 %v11335_v50, %v16247_v31  ;;  %v17115_v31 = vld [vmem:[#allocation27_spill] sm:$0xff] }
0x2a4c   : > { %v8667_v26 = vpack.c.bf16 %v8641_v42, %v8639_v5  ;;  %v8666_v44 = vpack.c.bf16 %v8640_v17, %v8638_v23 }
0x2a4d   : > { %v11337_v43 = vpop.eup %11336 }
0x2a4e   : > { %8688 = vmatprep.subr.bf16.mxu0 %v8667_v26  ;;  %v8635_v28 = vmul.f32 %v11337_v43, %v16278_v14  ;;  %v8634_v20 = vmul.f32 %v11337_v43, %v16274_v36  ;;  %v17114_v36 = vrot.slane %v17104_v12, 4 }
0x2a50   : > { %v8665_v51 = vpack.c.bf16 %v8637_v33, %v8635_v28  ;;  %v8664_v54 = vpack.c.bf16 %v8636_v29, %v8634_v20 }
0x2a51   : > { %v11339_v34 = vpop.eup %11338 }
0x2a52   : > { %v11341_v4 = vpop.eup %11340  ;;  %v8631_v46 = vmul.f32 %v11339_v34, %v16284_v19  ;;  %v8630_v13 = vmul.f32 %v11339_v34, %v16280_v61 }
0x2a53   : > { %8689 = vmatpush1.bf16.xpose.msra.mxu0 %v8666_v44  ;;  %v8633_v63 = vmul.f32 %v11341_v4, %v16260_v15  ;;  %v8632_v6 = vmul.f32 %v11341_v4, %v16255_v2  ;;  %v8795_v15 = vpop.trf.xlu0 }
0x2a54   : > { %8690 = vmatprep.subr.bf16.mxu0 %v8665_v51 }
0x2a55   : > { %v8663_v14 = vpack.c.bf16 %v8633_v63, %v8631_v46  ;;  %v8662_v53 = vpack.c.bf16 %v8632_v6, %v8630_v13 }
0x2a57   : > { %v8796_v61 = vpop.trf.xlu0 }
0x2a5b   : > { %8691 = vmatpush1.bf16.xpose.msra.mxu0 %v8664_v54  ;;  %v8797_v55 = vpop.trf.xlu0 }
0x2a5c   : > { %8692 = vmatprep.subr.bf16.mxu0 %v8663_v14 }
0x2a5f   : > { %v8798_v2 = vpop.trf.xlu0 }
0x2a63   : > { %8693 = vmatpush1.bf16.xpose.msra.mxu0 %v8662_v53  ;;  %v8799_v19 = vpop.trf.xlu0 }
0x2a64   : > { %9611 = vmatprep.subr.msk.bf16.mxu0 %vm926_vm1, %v17113_v45 }
0x2a67   : > { %v8800_v8 = vpop.trf.xlu0 }
0x2a6a   : > { %8711 = vmatmul.mubr.bf16.vlgmr.msra.gmra.mxu0 %v17114_v36 }
0x2a6b   : > { %8842 = vmatpush1.bf16.msra.mxu0 %v17115_v31  ;;  %8859 = vmatprep.mubr.bf16.mxu0 %v17087_v25  ;;  %v8801_v49 = vpop.trf.xlu0 }
0x2a6f   : > { %v8802_v32 = vpop.trf.xlu0 }
0x2a72   : > { %9612 = vmatmul.mubr.msk.bf16.vlgmr.msra.gmra.mxu0 %vm901_vm2, %v8795_v15 }
0x2a73   : > { %8869 = vmatprep.mubr.bf16.mxu0 %v17087_v25 }
0x2a7a   : > { %9613 = vmatmul.mubr.msk.bf16.gmra.mxu0 %vm901_vm2, %v8796_v61 }
0x2a7b   : > { %8879 = vmatprep.mubr.bf16.mxu0 %v17087_v25 }
0x2a82   : > { %9614 = vmatmul.mubr.msk.bf16.gmra.mxu0 %vm901_vm2, %v8797_v55 }
0x2a83   : > { %8889 = vmatprep.mubr.bf16.mxu0 %v17087_v25 }
0x2a8a   : > { %9615 = vmatmul.mubr.msk.bf16.gmra.mxu0 %vm901_vm2, %v8798_v2 }
0x2a8b   : > { %8899 = vmatprep.mubr.bf16.mxu0 %v17087_v25 }
0x2a92   : > { %9616 = vmatmul.mubr.msk.bf16.gmra.mxu0 %vm901_vm2, %v8799_v19 }
0x2a93   : > { %8909 = vmatprep.mubr.bf16.mxu0 %v17087_v25 }
0x2a9a   : > { %9617 = vmatmul.mubr.msk.bf16.gmra.mxu0 %vm901_vm2, %v8800_v8 }
0x2a9b   : > { %8919 = vmatprep.mubr.bf16.mxu0 %v17087_v25 }
0x2aa2   : > { %9618 = vmatmul.mubr.msk.bf16.gmra.mxu0 %vm901_vm2, %v8801_v49 }
0x2aa3   : > { %8929 = vmatprep.mubr.bf16.mxu0 %v17087_v25 }
0x2aaa   : > { %9619 = vmatmul.mubr.msk.bf16.gmra.mxu0 %vm901_vm2, %v8802_v32 }
0x2ac8   : > { %v9803_v18 = vpop.f32.mrf.mxu0 }
0x2ac9   : > { %v16348_v58 = vadd.f32 %v9803_v18, %v16064_v52 }
0x2aca   : > { %v8248_v37 = vpop.f32.mrf.mxu0 }
0x2acb   : > { %v16351_v56 = vadd.f32 %v8248_v37, %v16067_v59 }
0x2acc   : > { %v9804_v7 = vpop.f32.mrf.mxu0 }
0x2acd   : > { %v16354_v40 = vadd.f32 %v9804_v7, %v16070_v62 }
0x2ace   : > { %v16356_v38 = vpop.f32.mrf.mxu0 }
0x2b2a   : > { %v8712_v35 = vpop.f32.mrf.mxu0 }
0x2b2b   : > { %v8718_v30 = vpack.c.bf16 %v8712_v35, %v8712_v35 }
0x2b2c   : > { %v8714_v25 = vpop.f32.mrf.mxu0 }
0x2b2d   : > { %v8730_v48 = vsel %vm926_vm1, %v8718_v30, 0  ;;  %9831 = vmatprep.subr.msk.bf16.mxu1 %vm926_vm1, %v8718_v30 }
0x2b2e   : > { %v8715_v16 = vpop.f32.mrf.mxu0  ;;  %9806 = vmatpush3.bf16.msra.mxu1 %v8730_v48 }
0x2b30   : > { %v8716_v52 = vpop.f32.mrf.mxu0 }
0x2b32   : > { %v16360_v22 = vpop.f32.mrf.mxu0 }
0x2b34   : > { %v16362_v59 = vpop.f32.mrf.mxu0 }
0x2b35   : > { %v8940_v32 = vmax.f32 %v16360_v22, %v16362_v59 }
0x2b36   : > { %v16364_v57 = vpop.f32.mrf.mxu0 }
0x2b38   : > { %v16366_v62 = vpop.f32.mrf.mxu0 }
0x2b39   : > { %v8943_v18 = vmax.f32 %v16364_v57, %v16366_v62 }
0x2b3a   : > { %v16368_v60 = vpop.f32.mrf.mxu0 }
0x2b3c   : > { %v16370_v24 = vpop.f32.mrf.mxu0 }
0x2b3d   : > { %v8946_v47 = vmax.f32 %v16368_v60, %v16370_v24 }
0x2b3e   : > { %v16374_v27 = vpop.f32.mrf.mxu0 }
0x2b3f   : > { %8947 = vmax.xlane.f32.xlu0 %v8946_v47 }
0x2b40   : > { %v16376_v10 = vpop.f32.mrf.mxu0 }
0x2b41   : > { %v8949_v49 = vmax.f32 %v16374_v27, %v16376_v10 }
0x2b42   : > { %v16378_v1 = vpop.f32.mrf.mxu0 }
0x2b44   : > { %v16380_v11 = vpop.f32.mrf.mxu0 }
0x2b45   : > { %v8952_v19 = vmax.f32 %v16378_v1, %v16380_v11 }
0x2b46   : > { %v16382_v21 = vpop.f32.mrf.mxu0 }
0x2b48   : > { %v16384_v39 = vpop.f32.mrf.mxu0 }
0x2b49   : > { %v8955_v8 = vmax.f32 %v16382_v21, %v16384_v39 }
0x2b4a   : > { %v16386_v41 = vpop.f32.mrf.mxu0 }
0x2b4c   : > { %v16388_v5 = vpop.f32.mrf.mxu0 }
0x2b4d   : > { %v8958_v55 = vmax.f32 %v16386_v41, %v16388_v5 }
0x2b4e   : > { %v16390_v42 = vpop.f32.mrf.mxu0 }
0x2b50   : > { %v16392_v50 = vpop.f32.mrf.mxu0 }
0x2b51   : > { %v8961_v2 = vmax.f32 %v16390_v42, %v16392_v50 }
0x2b52   : > { %v8901_v26 = vpop.f32.mrf.mxu0 }
0x2b54   : > { %v8903_v43 = vpop.f32.mrf.mxu0 }
0x2b55   : > { %v8964_v15 = vmax.f32 %v8901_v26, %v8903_v43 }
0x2b56   : > { %v16394_v23 = vpop.f32.mrf.mxu0 }
0x2b58   : > { %v16396_v28 = vpop.f32.mrf.mxu0 }
0x2b59   : > { %v8967_v61 = vmax.f32 %v16394_v23, %v16396_v28 }
0x2b5a   : > { %v8911_v17 = vpop.f32.mrf.mxu0 }
0x2b5c   : > { %v8913_v33 = vpop.f32.mrf.mxu0 }
0x2b5d   : > { %v8970_v36 = vmax.f32 %v8911_v17, %v8913_v33 }
0x2b5e   : > { %v16398_v44 = vpop.f32.mrf.mxu0 }
0x2b60   : > { %v16400_v51 = vpop.f32.mrf.mxu0 }
0x2b61   : > { %v8973_v31 = vmax.f32 %v16398_v44, %v16400_v51 }
0x2b62   : > { %v16402_v34 = vpop.f32.mrf.mxu0 }
0x2b64   : > { %v16404_v4 = vpop.f32.mrf.mxu0 }
0x2b65   : > { %v8976_v20 = vmax.f32 %v16402_v34, %v16404_v4 }
0x2b66   : > { %v16408_v46 = vpop.f32.mrf.mxu0 }
0x2b67   : > { %8977 = vmax.xlane.f32.xlu1 %v8976_v20 }
0x2b68   : > { %v16410_v29 = vpop.f32.mrf.mxu0 }
0x2b69   : > { %v8979_v63 = vmax.f32 %v16408_v46, %v16410_v29 }
0x2b6a   : > { %v16414_v54 = vpop.f32.mrf.mxu0 }
0x2b6b   : > { %8980 = vmax.xlane.f32.xlu1 %v8979_v63 }
0x2b6c   : > { %v16416_v14 = vpop.f32.mrf.mxu0 }
0x2b6d   : > { %v8982_v13 = vmax.f32 %v16414_v54, %v16416_v14 }
0x2b6e   : > { %v16420_v6 = vpop.f32.mrf.mxu0 }
0x2b6f   : > { %8983 = vmax.xlane.f32.xlu1 %v8982_v13 }
0x2b70   : > { %v16422_v53 = vpop.f32.mrf.mxu0 }
0x2b71   : > { %v8985_v45 = vmax.f32 %v16420_v6, %v16422_v53 }
0x2b73   : > { %8986 = vmax.xlane.f32.xlu1 %v8985_v45 }
0x2b77   : > { %8971 = vmax.xlane.f32.xlu1 %v8970_v36 }
0x2b7b   : > { %8974 = vmax.xlane.f32.xlu1 %v8973_v31 }
0x2b7f   : > { %8965 = vmax.xlane.f32.xlu1 %v8964_v15 }
0x2b83   : > { %8968 = vmax.xlane.f32.xlu1 %v8967_v61 }
0x2b87   : > { %8959 = vmax.xlane.f32.xlu1 %v8958_v55 }
0x2b8b   : > { %8962 = vmax.xlane.f32.xlu1 %v8961_v2 }
0x2b8f   : > { %8953 = vmax.xlane.f32.xlu1 %v8952_v19 }
0x2b93   : > { %8956 = vmax.xlane.f32.xlu1 %v8955_v8 }
0x2b97   : > { %8950 = vmax.xlane.f32.xlu1 %v8949_v49 }
0x2b9b   : > { %8941 = vmax.xlane.f32.xlu1 %v8940_v32 }
0x2b9f   : > { %8944 = vmax.xlane.f32.xlu1 %v8943_v18 }
0x2bf0   : > { %v8978_v37 = vpop.xlane.xlu1 %8977 }
0x2bf4   : > { %v8981_v7 = vpop.xlane.xlu1 %8980 }
0x2bf5   : > { %v9014_v49 = vsub.f32 %v16408_v46, %v8981_v7 }
0x2bf8   : > { %v8984_v35 = vpop.xlane.xlu1 %8983 }
0x2bf9   : > { %v9016_v32 = vsub.f32 %v16414_v54, %v8984_v35 }
0x2bfc   : > { %v8987_v30 = vpop.xlane.xlu1 %8986 }
0x2bfd   : > { %v9018_v46 = vsub.f32 %v16420_v6, %v8987_v30 }
0x2c00   : > { %v8972_v25 = vpop.xlane.xlu1 %8971 }
0x2c01   : > { %v9008_v16 = vsub.f32 %v8911_v17, %v8972_v25  ;;  %v9009_v52 = vsub.f32 %v8913_v33, %v8972_v25  ;;  %v9012_v17 = vsub.f32 %v16402_v34, %v8978_v37  ;;  %v9072_v34 = vmul.f32 1.442695, %v9014_v49 }
0x2c03   : > { %v9060_v13 = vmul.f32 1.442695, %v9008_v16  ;;  %v9062_v15 = vmul.f32 1.442695, %v9009_v52 }
0x2c04   : > { %v8975_v48 = vpop.xlane.xlu1 %8974 }
0x2c05   : > { %v9010_v45 = vsub.f32 %v16398_v44, %v8975_v48  ;;  %v9011_v61 = vsub.f32 %v16400_v51, %v8975_v48  ;;  %v9013_v44 = vsub.f32 %v16404_v4, %v8978_v37  ;;  %v9068_v51 = vmul.f32 1.442695, %v9012_v17 }
0x2c06   : > { %v9017_v4 = vsub.f32 %v16416_v14, %v8984_v35  ;;  %v9076_v48 = vmul.f32 1.442695, %v9016_v32 }
0x2c07   : > { %v9066_v8 = vmul.f32 1.442695, %v9011_v61 }
0x2c08   : > { %v8966_v47 = vpop.xlane.xlu1 %8965 }
0x2c09   : > { %v9004_v20 = vsub.f32 %v8901_v26, %v8966_v47  ;;  %v9005_v63 = vsub.f32 %v8903_v43, %v8966_v47  ;;  %v9064_v26 = vmul.f32 1.442695, %v9010_v45  ;;  %v9080_v47 = vmul.f32 1.442695, %v9018_v46 }
0x2c0b   : > { %v9052_v36 = vmul.f32 1.442695, %v9004_v20  ;;  %v9054_v31 = vmul.f32 1.442695, %v9005_v63 }
0x2c0c   : > { %v8969_v55 = vpop.xlane.xlu1 %8968 }
0x2c0d   : > { %11342 = vpow2.f32 %v9052_v36  ;;  %v9006_v2 = vsub.f32 %v16394_v23, %v8969_v55  ;;  %v9007_v19 = vsub.f32 %v16396_v28, %v8969_v55  ;;  %v9070_v23 = vmul.f32 1.442695, %v9013_v44 }
0x2c0e   : > { %11344 = vpow2.f32 %v9054_v31  ;;  %v9015_v28 = vsub.f32 %v16410_v29, %v8981_v7  ;;  %v9078_v29 = vmul.f32 1.442695, %v9017_v4  ;;  %v9019_v7 = vsub.f32 %v16422_v53, %v8987_v30 }
0x2c0f   : > { %11346 = vpow2.f32 %v9060_v13  ;;  %v9056_v43 = vmul.f32 1.442695, %v9006_v2  ;;  %v9058_v33 = vmul.f32 1.442695, %v9007_v19 }
0x2c10   : > { %11348 = vpow2.f32 %v9062_v15  ;;  %v9074_v18 = vmul.f32 1.442695, %v9015_v28  ;;  %v9082_v6 = vmul.f32 1.442695, %v9019_v7  ;;  %v16478_v13 = vpop.xlane.xlu1 %8959 }
0x2c11   : > { %11350 = vpow2.f32 %v9056_v43 }
0x2c12   : > { %11352 = vpow2.f32 %v9058_v33 }
0x2c13   : > { %11354 = vpow2.f32 %v9064_v26 }
0x2c14   : > { %11356 = vpow2.f32 %v9066_v8  ;;  %v8963_v15 = vpop.xlane.xlu1 %8962 }
0x2c15   : > { %11358 = vpow2.f32 %v9068_v51  ;;  %v9003_v32 = vsub.f32 %v16392_v50, %v8963_v15 }
0x2c16   : > { %11360 = vpow2.f32 %v9070_v23  ;;  %v16509_v23 = vld [vmem:[%s16745_s6 + $0x8] sm:$0xff]  }
0x2c17   : > { %11362 = vpow2.f32 %v9072_v34  ;;  %v9002_v34 = vsub.f32 %v16390_v42, %v8963_v15  ;;  %v9050_v46 = vmul.f32 1.442695, %v9003_v32  ;;  %v16522_v42 = vld [vmem:[%s16745_s6] sm:$0xff]  }
0x2c18   : > { %11364 = vpow2.f32 %v9074_v18  ;;  %v8954_v43 = vpop.xlane.xlu1 %8953 }
0x2c19   : > { %11366 = vpow2.f32 %v9076_v48  ;;  %v9048_v4 = vmul.f32 1.442695, %v9002_v34 }
0x2c1a   : > { %v16454_v37 = vpop.eup %11342  ;;  %11368 = vpow2.f32 %v9078_v29 }
0x2c1b   : > { %v16456_v25 = vpop.eup %11344  ;;  %11370 = vpow2.f32 %v9080_v47 }
0x2c1c   : > { %v16459_v16 = vpop.eup %11346  ;;  %v9108_v54 = vadd.f32 %v16456_v25, %v16454_v37  ;;  %11372 = vpow2.f32 %v9082_v6  ;;  %v8957_v51 = vpop.xlane.xlu1 %8956 }
0x2c1d   : > { %v16464_v52 = vpop.eup %11348  ;;  %v8998_v48 = vsub.f32 %v16382_v21, %v8957_v51  ;;  %v8999_v29 = vsub.f32 %v16384_v39, %v8957_v51  ;;  %11374 = vpow2.f32 %v9048_v4  ;;  %v8948_v51 = vpop.xlane.xlu0 %8947 }
0x2c1e   : > { %v16466_v14 = vpop.eup %11350  ;;  %9109 = vadd.xlane.f32.xlu1 %v9108_v54  ;;  %v9114_v63 = vadd.f32 %v16464_v52, %v16459_v16  ;;  %11376 = vpow2.f32 %v9050_v46 }
0x2c1f   : > { %v16468_v35 = vpop.eup %11352  ;;  %v9040_v7 = vmul.f32 1.442695, %v8998_v48  ;;  %v9042_v47 = vmul.f32 1.442695, %v8999_v29 }
0x2c20   : > { %v16470_v20 = vpop.eup %11354  ;;  %v9111_v53 = vadd.f32 %v16468_v35, %v16466_v14  ;;  %v8951_v28 = vpop.xlane.xlu1 %8950 }
0x2c21   : > { %v16476_v30 = vpop.eup %11356  ;;  %v8994_v54 = vsub.f32 %v16374_v27, %v8951_v28  ;;  %v8995_v6 = vsub.f32 %v16376_v10, %v8951_v28  ;;  %11378 = vpow2.f32 %v9040_v7  ;;  %v8997_v28 = vsub.f32 %v16380_v11, %v8954_v43 }
0x2c22   : > { %9115 = vadd.xlane.f32.xlu1 %v9114_v63  ;;  %9112 = vadd.xlane.f32.xlu0 %v9111_v53  ;;  %v16480_v45 = vpop.eup %11358  ;;  %v9117_v36 = vadd.f32 %v16476_v30, %v16470_v20  ;;  %11380 = vpow2.f32 %v9042_v47 }
0x2c23   : > { %v16484_v31 = vpop.eup %11360  ;;  %v9032_v21 = vmul.f32 1.442695, %v8994_v54  ;;  %v9034_v50 = vmul.f32 1.442695, %v8995_v6  ;;  %v9038_v4 = vmul.f32 1.442695, %v8997_v28 }
0x2c24   : > { %v16486_v61 = vpop.eup %11362  ;;  %v9120_v55 = vadd.f32 %v16484_v31, %v16480_v45  ;;  %v8942_v18 = vpop.xlane.xlu1 %8941 }
0x2c25   : > { %v16490_v2 = vpop.eup %11364  ;;  %11382 = vpow2.f32 %v9032_v21  ;;  %v8988_v46 = vsub.f32 %v16360_v22, %v8942_v18  ;;  %v8989_v7 = vsub.f32 %v16362_v59, %v8942_v18 }
0x2c26   : > { %9118 = vadd.xlane.f32.xlu1 %v9117_v36  ;;  %v16492_v19 = vpop.eup %11366  ;;  %v9123_v17 = vadd.f32 %v16490_v2, %v16486_v61  ;;  %11384 = vpow2.f32 %v9034_v50  ;;  %v9000_v36 = vsub.f32 %v16386_v41, %v16478_v13 }
0x2c27   : > { %v16496_v26 = vpop.eup %11368  ;;  %v9020_v47 = vmul.f32 1.442695, %v8988_v46  ;;  %v9022_v6 = vmul.f32 1.442695, %v8989_v7 }
0x2c28   : > { %v16498_v33 = vpop.eup %11370  ;;  %v9126_v44 = vadd.f32 %v16496_v26, %v16492_v19  ;;  %v8945_v63 = vpop.xlane.xlu1 %8944 }
0x2c29   : > { %v16502_v8 = vpop.eup %11372  ;;  %v8990_v39 = vsub.f32 %v16364_v57, %v8945_v63  ;;  %v8991_v27 = vsub.f32 %v16366_v62, %v8945_v63  ;;  %v9044_v57 = vmul.f32 1.442695, %v9000_v36 }
0x2c2a   : > { %9121 = vadd.xlane.f32.xlu1 %v9120_v55  ;;  %v9129_v49 = vadd.f32 %v16502_v8, %v16498_v33  ;;  %v16530_v15 = vpop.eup %11374  ;;  %v9001_v55 = vsub.f32 %v16388_v5, %v16478_v13  ;;  %v8992_v5 = vsub.f32 %v16368_v60, %v8948_v51 }
0x2c2b   : > { %v9024_v53 = vmul.f32 1.442695, %v8990_v39  ;;  %v9026_v10 = vmul.f32 1.442695, %v8991_v27 }
0x2c2d   : > { %11386 = vpow2.f32 %v9024_v53 }
0x2c2e   : > { %9124 = vadd.xlane.f32.xlu1 %v9123_v17  ;;  %11388 = vpow2.f32 %v9026_v10  ;;  %v16534_v17 = vpop.eup %11376 }
0x2c2f   : > { %v16537_v62 = vpop.eup %11378  ;;  %v9105_v41 = vadd.f32 %v16534_v17, %v16530_v15  ;;  %11390 = vpow2.f32 %v9044_v57 }
0x2c30   : > { %v16542_v34 = vpop.eup %11380 }
0x2c31   : > { %v9099_v48 = vadd.f32 %v16542_v34, %v16537_v62 }
0x2c32   : > { %9127 = vadd.xlane.f32.xlu1 %v9126_v44  ;;  %v8996_v44 = vsub.f32 %v16378_v1, %v8954_v43  ;;  %v16545_v32 = vpop.eup %11382  ;;  %v8993_v1 = vsub.f32 %v16370_v24, %v8948_v51  ;;  %v9028_v43 = vmul.f32 1.442695, %v8992_v5  ;;  %v9307_v51 = vld [vmem:[%s16746_s7] sm:$0xff] }
0x2c33   : > { %v16550_v11 = vpop.eup %11384 }
0x2c34   : > { %v9036_v13 = vmul.f32 1.442695, %v8996_v44  ;;  %v9030_v60 = vmul.f32 1.442695, %v8993_v1  ;;  %v9093_v24 = vadd.f32 %v16550_v11, %v16545_v32  ;;  %v5129_v44 = vld [vmem:[%s16746_s7 + $0x10] sm:$0xff] }
0x2c36   : > { %9130 = vadd.xlane.f32.xlu1 %v9129_v49  ;;  %v9046_v49 = vmul.f32 1.442695, %v9001_v55 }
0x2c38   : > { %8721 = vrot.lane.b32.xlu0 %v16509_v23, %s11528_s25  ;;  %11392 = vpow2.f32 %v9046_v49  ;;  %v5128_v49 = vld [vmem:[%s16746_s7 + $0x8] sm:$0xff] }
0x2c39   : > { %11394 = vpow2.f32 %v9036_v13 }
0x2c3a   : > { %v16553_v29 = vpop.eup %11386  ;;  %11396 = vpow2.f32 %v9038_v4 }
0x2c3b   : > { %v16558_v54 = vpop.eup %11388  ;;  %11398 = vpow2.f32 %v9028_v43 }
0x2c3c   : > { %11400 = vpow2.f32 %v9030_v60  ;;  %v9087_v63 = vadd.f32 %v16558_v54, %v16553_v29  ;;  %v16562_v22 = vpop.eup %11390  ;;  %v17116_v60 = vrot.slane %v17102_v9, 6 }
0x2c3d   : > { %11402 = vpow2.f32 %v9020_v47 }
0x2c3e   : > { %11404 = vpow2.f32 %v9022_v6 }
0x2c45   : > { %v16564_v21 = vpop.eup %11392 }
0x2c46   : > { %v16566_v59 = vpop.eup %11394  ;;  %v9102_v18 = vadd.f32 %v16564_v21, %v16562_v22 }
0x2c47   : > { %8719 = vrot.lane.b32.xlu1 %v16522_v42, %s11528_s25  ;;  %v16570_v39 = vpop.eup %11396 }
0x2c48   : > { %v16572_v50 = vpop.eup %11398  ;;  %v9096_v27 = vadd.f32 %v16570_v39, %v16566_v59 }
0x2c49   : > { %v16576_v53 = vpop.eup %11400 }
0x2c4a   : > { %v16578_v10 = vpop.eup %11402  ;;  %v9090_v36 = vadd.f32 %v16576_v53, %v16572_v50 }
0x2c4b   : > { %v16582_v55 = vpop.eup %11404 }
0x2c4c   : > { %v9084_v57 = vadd.f32 %v16582_v55, %v16578_v10 }
0x2c57   : > { %9106 = vadd.xlane.f32.xlu0 %v9105_v41 }
0x2c5b   : > { %9100 = vadd.xlane.f32.xlu0 %v9099_v48 }
0x2c5f   : > { %9094 = vadd.xlane.f32.xlu0 %v9093_v24 }
0x2c63   : > { %9088 = vadd.xlane.f32.xlu0 %v9087_v63 }
0x2c6b   : > { %9103 = vadd.xlane.f32.xlu1 %v9102_v18 }
0x2c6f   : > { %9097 = vadd.xlane.f32.xlu1 %v9096_v27 }
0x2c73   : > { %9091 = vadd.xlane.f32.xlu1 %v9090_v36 }
0x2c77   : > { %9085 = vadd.xlane.f32.xlu1 %v9084_v57 }
0x2c79   : > { %9239 = vrot.lane.b32.xlu0 %v16509_v23, %s11529_s19  ;;  %v5130_v23 = vld [vmem:[%s16746_s7 + $0x18] sm:$0xff] }
0x2c7d   : > { %5143 = vperm.xlu0 %9882, %v5129_v44  }
0x2c81   : > { %9313 = vperm.xlu0 %9882, %v9307_v51  }
0x2c85   : > { %9323 = vperm.xlu0 %9882, %v5129_v44  }
0x2c88   : > { %9237 = vrot.lane.b32.xlu1 %v16522_v42, %s11529_s19  ;;  %s296_s19 = sand.u32 1, %s11512_s28  }
0x2c89   : > { %s9419_s18 = sshll.u32 %s296_s19, 6  ;;  %s16699_s9 = scalar_lea.sflag [#allocation3], %s296_s19 }
0x2c8a   : > { %s16631_s24 = scalar_lea.vmem [#allocation2], %s9419_s18 }
0x2c8b   : > { %s9353_s25 = sshll.u32 %s16631_s24, 4  ;;  %s16693_s25 = int_to_ptr.vmem [resolvable:$true] %s9353_s25 }
0x2c8c   : > { %5133 = vperm.xlu1 %9883, %v9307_v51   ;;  %s11460_s17 = scalar_lea.vmem %s16693_s25, 1024 }
0x2c8d   : > { %p11461_p11 = scmp.ne.s32.totalorder %s16693_s25, %s11460_s17 }
0x2c8f   : > { %p11462_p12 = pnand %p11461_p11, %p11616_p5 }
0x2c90   : > { %5138 = vperm.xlu1 %9883, %v5128_v49  }
0x2c91   : > { %p11463_p13 = pneg %p11462_p12 }
0x2c94   : > { %5148 = vperm.xlu1 %9883, %v5130_v23  }
0x2c98   : > { %9318 = vperm.xlu1 %9883, %v5128_v49  }
0x2c9c   : > { %9328 = vperm.xlu1 %9883, %v5130_v23  }
0x2ca7   : > { %v9110_v28 = vpop.xlane.xlu1 %9109 }
0x2cab   : > { %v9116_v41 = vpop.xlane.xlu1 %9115  ;;  %v9113_v48 = vpop.xlane.xlu0 %9112 }
0x2caf   : > { %v9119_v5 = vpop.xlane.xlu1 %9118  ;;  %v8722_v46 = vpop.permute.xlu0 %8721 }
0x2cb3   : > { %v9122_v13 = vpop.xlane.xlu1 %9121 }
0x2cb7   : > { %v9125_v1 = vpop.xlane.xlu1 %9124 }
0x2cb8   : > { %11406 = vrcp.f32 %v9125_v1 }
0x2cbb   : > { %v9128_v4 = vpop.xlane.xlu1 %9127 }
0x2cbc   : > { %11408 = vrcp.f32 %v9128_v4 }
0x2cbd   : > { %11410 = vrcp.f32 %v9122_v13 }
0x2cbf   : > { %v9131_v42 = vpop.xlane.xlu1 %9130 }
0x2cc0   : > { %11412 = vrcp.f32 %v9131_v42 }
0x2cc1   : > { %11414 = vrcp.f32 %v9119_v5 }
0x2cc2   : > { %11416 = vrcp.f32 %v9116_v41 }
0x2cc3   : > { %v8720_v43 = vpop.permute.xlu1 %8719  ;;  %11418 = vrcp.f32 %v9113_v48 }
0x2cc4   : > { %9807 = vmatprep.mubr.msk.bf16.mxu1 %vm901_vm2, %v8720_v43  ;;  %11420 = vrcp.f32 %v9110_v28 }
0x2cc5   : > { %9808 = vmatmul.mubr.msk.bf16.vlgmr.msra.gmra.mxu1 %vm901_vm2, %v8722_v46  ;;  %v11407_v7 = vpop.eup %11406 }
0x2cc6   : > { %9228 = vmatprep.mubr.bf16.mxu1 %v17116_v60  ;;  %v9175_v63 = vmul.f32 %v11407_v7, %v16490_v2  ;;  %v9174_v2 = vmul.f32 %v11407_v7, %v16486_v61  ;;  %v11452_v60 = vld [vmem:[%s11631_s21 + $0x20] sm:$0xff] }
0x2cc7   : > { %v5125_v7 = vadd.f32 %v11452_v60, %v14885_v3  ;;  %v17121_v3 = vld [vmem:[#allocation22_spill] sm:$0xff] }
0x2cc9   : > { %v11409_v24 = vpop.eup %11408 }
0x2cca   : > { %v11411_v47 = vpop.eup %11410  ;;  %v9177_v18 = vmul.f32 %v11409_v24, %v16496_v26  ;;  %v9176_v36 = vmul.f32 %v11409_v24, %v16492_v19 }
0x2ccb   : > { %v9173_v51 = vmul.f32 %v11411_v47, %v16484_v31 }
0x2ccd   : > { %v11413_v6 = vpop.eup %11412  ;;  %v9193_v49 = vpack.c.bf16 %v9175_v63, %v9173_v51 }
0x2cce   : > { %v9179_v27 = vmul.f32 %v11413_v6, %v16502_v8  ;;  %v9178_v57 = vmul.f32 %v11413_v6, %v16498_v33  ;;  %v11415_v23 = vpop.eup %11414  ;;  %v9172_v8 = vmul.f32 %v11411_v47, %v16480_v45  ;;  %v17118_v6 = vld [vmem:[#allocation40_spill] sm:$0xff] }
0x2ccf   : > { %v11417_v41 = vpop.eup %11416  ;;  %v9171_v26 = vmul.f32 %v11415_v23, %v16476_v30  ;;  %v9170_v13 = vmul.f32 %v11415_v23, %v16470_v20 }
0x2cd0   : > { %v9195_v44 = vpack.c.bf16 %v9179_v27, %v9177_v18  ;;  %v9194_v9 = vpack.c.bf16 %v9178_v57, %v9176_v36  ;;  %v9169_v19 = vmul.f32 %v11417_v41, %v16464_v52  ;;  %v9192_v33 = vpack.c.bf16 %v9174_v2, %v9172_v8  ;;  %v11419_v28 = vpop.eup %11418  ;;  %v17119_v18 = vld [vmem:[#allocation37_spill] sm:$0xff] }
0x2cd1   : > { %v11421_v31 = vpop.eup %11420  ;;  %v9167_v1 = vmul.f32 %v11419_v28, %v16468_v35  ;;  %v9168_v4 = vmul.f32 %v11417_v41, %v16459_v16  ;;  %v9166_v48 = vmul.f32 %v11419_v28, %v16466_v14  ;;  %v17120_v57 = vld [vmem:[#allocation33_spill] sm:$0xff]  ;;  %v17122_v41 = vld [vmem:[#allocation26_spill] sm:$0xff] }
0x2cd2   : > { %9196 = vmatprep.subr.bf16.mxu1 %v9195_v44  ;;  %v9191_v5 = vpack.c.bf16 %v9171_v26, %v9169_v19  ;;  %v9165_v30 = vmul.f32 %v11421_v31, %v16456_v25  ;;  %v9164_v43 = vmul.f32 %v11421_v31, %v16454_v37  ;;  %v17117_v37 = vld [vmem:[#allocation20_spill] sm:$0xff]  ;;  %v17123_v31 = vld [vmem:[#allocation10_spill] sm:$0xff] }
0x2cd3   : > { %9197 = vmatpush1.bf16.xpose.msra.mxu1 %v9194_v9  ;;  %v9190_v42 = vpack.c.bf16 %v9170_v13, %v9168_v4  ;;  %v1935_v63 = vadd.f32 %v17118_v6, %v17117_v37 }
0x2cd4   : > { %9198 = vmatprep.subr.bf16.mxu1 %v9193_v49  ;;  %v9189_v45 = vpack.c.bf16 %v9167_v1, %v9165_v30  ;;  %v9188_v46 = vpack.c.bf16 %v9166_v48, %v9164_v43  ;;  %v17124_v30 = vld [vmem:[#allocation5_spill] sm:$0xff] }
0x2cd5   : > { %v2473_v27 = vadd.f32 %v17119_v18, %v1935_v63 }
0x2cd7   : > { %v3003_v44 = vadd.f32 %v17120_v57, %v2473_v27 }
0x2cd9   : > { %v3525_v51 = vadd.f32 %v17121_v3, %v3003_v44 }
0x2cdb   : > { %9199 = vmatpush1.bf16.xpose.msra.mxu1 %v9192_v33  ;;  %v4060_v2 = vadd.f32 %v17122_v41, %v3525_v51 }
0x2cdc   : > { %9200 = vmatprep.subr.bf16.mxu1 %v9191_v5 }
0x2cdd   : > { %v4590_v13 = vadd.f32 %v17123_v31, %v4060_v2  ;;  %v17130_v31 = vld [vmem:[#allocation6_spill] sm:$0xff] }
0x2ce0   : > { %v9107_v61 = vpop.xlane.xlu0 %9106 }
0x2ce1   : > { %11422 = vrcp.f32 %v9107_v61 }
0x2ce3   : > { %9201 = vmatpush1.bf16.xpose.msra.mxu1 %v9190_v42 }
0x2ce4   : > { %v9101_v52 = vpop.xlane.xlu0 %9100  ;;  %9202 = vmatprep.subr.bf16.mxu1 %v9189_v45 }
0x2ce8   : > { %v9095_v20 = vpop.xlane.xlu0 %9094 }
0x2ceb   : > { %9203 = vmatpush1.bf16.xpose.msra.mxu1 %v9188_v46 }
0x2cec   : > { %v9089_v35 = vpop.xlane.xlu0 %9088 }
0x2cee   : > { %v11423_v9 = vpop.eup %11422 }
0x2cef   : > { %v9163_v26 = vmul.f32 %v11423_v9, %v16534_v17  ;;  %v9162_v33 = vmul.f32 %v11423_v9, %v16530_v15  ;;  %v5120_v17 = vadd.f32 %v14894_v0, %v4590_v13  ;;  %v11454_v0 = vld [vmem:[%s11631_s21 + $0x10] sm:$0xff] }
0x2cf0   : > { %v16622_v16 = vpop.permute.xlu0 %9239 }
0x2cf4   : > { %v9104_v25 = vpop.xlane.xlu1 %9103 }
0x2cf5   : > { %11424 = vrcp.f32 %v9104_v25 }
0x2cf6   : > { %11426 = vrcp.f32 %v9101_v52 }
0x2cf8   : > { %v5144_v24 = vpop.permute.xlu0 %5143  ;;  %v9098_v14 = vpop.xlane.xlu1 %9097 }
0x2cf9   : > { %v5153_v47 = vadd.f32 %v5144_v24, %v5125_v7  ;;  %11428 = vrcp.f32 %v9098_v14  ;;  %v11455_v14 = vld [vmem:[%s11631_s21 + $0x30] sm:$0xff] }
0x2cfa   : > { %11430 = vrcp.f32 %v9095_v20 }
0x2cfb   : > { %5157 = vst [vmem:[%s16631_s24 + $0x20] sm:$0xff] %v5153_v47  ;;  %v17125_v47 = vld [vmem:[#allocation16_spill] sm:$0xff] }
0x2cfc   : > { %v9092_v36 = vpop.xlane.xlu1 %9091  ;;  %v5126_v37 = vadd.f32 %v11455_v14, %v17125_v47 }
0x2cfd   : > { %11432 = vrcp.f32 %v9092_v36 }
0x2d00   : > { %v9086_v49 = vpop.xlane.xlu1 %9085 }
0x2d01   : > { %11434 = vrcp.f32 %v9086_v49  ;;  %v17126_v49 = vrot.slane %v17104_v12, 6 }
0x2d02   : > { %v11425_v23 = vpop.eup %11424  ;;  %11436 = vrcp.f32 %v9089_v35  ;;  %v5124_v35 = vadd.f32 %v11454_v0, %v5120_v17 }
0x2d03   : > { %v9161_v8 = vmul.f32 %v11425_v23, %v16564_v21  ;;  %v9160_v19 = vmul.f32 %v11425_v23, %v16562_v22  ;;  %v11427_v28 = vpop.eup %11426  ;;  %v11453_v21 = vld [vmem:[%s11631_s21] sm:$0xff] }
0x2d04   : > { %v9238_v5 = vpop.permute.xlu1 %9237  ;;  %v5123_v22 = vadd.f32 %v11453_v21, %v17124_v30  ;;  %v9159_v42 = vmul.f32 %v11427_v28, %v16542_v34  ;;  %v9158_v34 = vmul.f32 %v11427_v28, %v16537_v62  ;;  %v17129_v28 = vld [vmem:[#allocation19_spill] sm:$0xff] }
0x2d05   : > { %v9187_v1 = vpack.c.bf16 %v9163_v26, %v9161_v8  ;;  %v9186_v4 = vpack.c.bf16 %v9162_v33, %v9160_v19  ;;  %9813 = vmatprep.mubr.msk.bf16.mxu0 %vm901_vm2, %v9238_v5  ;;  %v9314_v5 = vpop.permute.xlu0 %9313 }
0x2d06   : > { %v11429_v61 = vpop.eup %11428 }
0x2d07   : > { %9204 = vmatprep.subr.bf16.mxu1 %v9187_v1  ;;  %v9157_v15 = vmul.f32 %v11429_v61, %v16570_v39  ;;  %v11431_v52 = vpop.eup %11430  ;;  %v9156_v46 = vmul.f32 %v11429_v61, %v16566_v59 }
0x2d08   : > { %9205 = vmatpush1.bf16.xpose.msra.mxu1 %v9186_v4  ;;  %v5134_v45 = vpop.permute.xlu1 %5133  ;;  %v9155_v7 = vmul.f32 %v11431_v52, %v16550_v11  ;;  %v9154_v36 = vmul.f32 %v11431_v52, %v16545_v32  ;;  %v17131_v4 = vld [vmem:[#allocation12_spill] sm:$0xff] }
0x2d09   : > { %v5151_v48 = vadd.f32 %v5134_v45, %v5123_v22  ;;  %v9185_v43 = vpack.c.bf16 %v9159_v42, %v9157_v15  ;;  %v9184_v24 = vpack.c.bf16 %v9158_v34, %v9156_v46  ;;  %v9324_v45 = vpop.permute.xlu0 %9323 }
0x2d0a   : > { %v11433_v20 = vpop.eup %11432 }
0x2d0b   : > { %5155 = vst [vmem:[%s16631_s24] sm:$0xff] %v5151_v48  ;;  %9206 = vmatprep.subr.bf16.mxu1 %v9185_v43  ;;  %v9153_v25 = vmul.f32 %v11433_v20, %v16576_v53  ;;  %v9152_v53 = vmul.f32 %v11433_v20, %v16572_v50  ;;  %v11457_v20 = vld [vmem:[%s11631_s21 + $0x8] sm:$0xff] }
0x2d0c   : > { %v5139_v60 = vpop.permute.xlu1 %5138 }
0x2d0d   : > { %v5152_v39 = vadd.f32 %v5139_v60, %v5124_v35  ;;  %v9183_v6 = vpack.c.bf16 %v9155_v7, %v9153_v25  ;;  %v9182_v57 = vpack.c.bf16 %v9154_v36, %v9152_v53 }
0x2d0e   : > { %v11435_v59 = vpop.eup %11434 }
0x2d0f   : > { %5156 = vst [vmem:[%s16631_s24 + $0x10] sm:$0xff] %v5152_v39  ;;  %v11437_v27 = vpop.eup %11436  ;;  %v9149_v62 = vmul.f32 %v11435_v59, %v16582_v55  ;;  %v9148_v9 = vmul.f32 %v11435_v59, %v16578_v10 }
0x2d10   : > { %9207 = vmatpush1.bf16.xpose.msra.mxu1 %v9184_v24  ;;  %v5149_v63 = vpop.permute.xlu1 %5148  ;;  %v9151_v11 = vmul.f32 %v11437_v27, %v16558_v54  ;;  %v9150_v3 = vmul.f32 %v11437_v27, %v16553_v29  ;;  %v11459_v24 = vld [vmem:[%s11631_s21 + $0x18] sm:$0xff] }
0x2d11   : > { %v5154_v18 = vadd.f32 %v5149_v63, %v5126_v37  ;;  %9208 = vmatprep.subr.bf16.mxu1 %v9183_v6 }
0x2d12   : > { %v9181_v44 = vpack.c.bf16 %v9151_v11, %v9149_v62  ;;  %v9180_v51 = vpack.c.bf16 %v9150_v3, %v9148_v9 }
0x2d13   : > { %5158 = vst [vmem:[%s16631_s24 + $0x30] sm:$0xff] %v5154_v18 }
0x2d14   : > { %v9319_v21 = vpop.permute.xlu1 %9318 }
0x2d18   : > { %9209 = vmatpush1.bf16.xpose.msra.mxu1 %v9182_v57  ;;  %v9329_v39 = vpop.permute.xlu1 %9328 }
0x2d19   : > { %9210 = vmatprep.subr.bf16.mxu1 %v9181_v44 }
0x2d20   : > { %9211 = vmatpush1.bf16.xpose.msra.mxu1 %v9180_v51 }
0x2d27   : > { %9229 = vmatmul.mubr.bf16.vlgmr.msra.gmra.mxu1 %v17126_v49 }
0x2d85   : > { %v9809_v50 = vpop.f32.mrf.mxu1 }
0x2d86   : > { %v8783_v55 = vadd.f32 %v9809_v50, %v16348_v58  ;;  %v17127_v58 = vld [vmem:[#allocation8_spill] sm:$0xff] }
0x2d87   : > { %v8766_v23 = vpop.f32.mrf.mxu1 }
0x2d88   : > { %v8781_v32 = vadd.f32 %v8766_v23, %v16351_v56  ;;  %v17128_v56 = vld [vmem:[#allocation7_spill] sm:$0xff] }
0x2d89   : > { %v9810_v54 = vpop.f32.mrf.mxu1  ;;  %v6185_v33 = vadd.f32 %v17128_v56, %v17127_v58 }
0x2d8a   : > { %v8784_v41 = vadd.f32 %v9810_v54, %v16354_v40 }
0x2d8b   : > { %v8769_v2 = vpop.f32.mrf.mxu1  ;;  %v6711_v40 = vadd.f32 %v17129_v28, %v6185_v33 }
0x2d8d   : > { %v7229_v13 = vadd.f32 %v17130_v31, %v6711_v40 }
0x2d8f   : > { %v7745_v61 = vadd.f32 %v17131_v4, %v7229_v13 }
0x2d91   : > { %v8264_v22 = vadd.f32 %v16356_v38, %v7745_v61  ;;  %v11458_v38 = vld [vmem:[%s11631_s21 + $0x38] sm:$0xff] }
0x2d93   : > { %v8782_v48 = vadd.f32 %v8769_v2, %v8264_v22 }
0x2de7   : > { %v9230_v26 = vpop.f32.mrf.mxu1 }
0x2de8   : > { %v9236_v8 = vpack.c.bf16 %v9230_v26, %v9230_v26 }
0x2de9   : > { %v9232_v10 = vpop.f32.mrf.mxu1 }
0x2dea   : > { %v9248_v29 = vsel %vm926_vm1, %v9236_v8, 0  ;;  %9832 = vmatprep.subr.msk.bf16.mxu0 %vm926_vm1, %v9236_v8 }
0x2deb   : > { %v9233_v12 = vpop.f32.mrf.mxu1  ;;  %9812 = vmatpush3.bf16.msra.mxu0 %v9248_v29 }
0x2ded   : > { %v9234_v19 = vpop.f32.mrf.mxu1 }
0x2dee   : > { %9814 = vmatmul.mubr.msk.bf16.vlgmr.msra.gmra.mxu0 %vm901_vm2, %v16622_v16  ;;  %v11456_v16 = vld [vmem:[%s11631_s21 + $0x28] sm:$0xff]  ;;  %s11530_s21 = smov [#allocation2]  }
0x2def   : > { %s11464_s10 = sshll.u32 %s11530_s21, 4  ;;  %s11465_s10 = int_to_ptr.vmem [resolvable:$false] %s11464_s10 }
0x2df0   : > { %s11466_s20 = scalar_lea.vmem %s11465_s10, 2048  ;;  %p11467_p0 = scmp.lt.s32.totalorder %s16693_s25, %s11465_s10 }
0x2df1   : > { %p11468_p1 = scmp.lt.s32.totalorder %s11466_s20, %s11460_s17 }
0x2df3   : > { %p11469_p2 = por %p11468_p1, %p11467_p0 }
0x2df5   : > { %p11470_p3 = pnand %p11469_p2, %p11463_p13 }
0x2eae   : > { %v9815_v1 = vpop.f32.mrf.mxu0 }
0x2eaf   : > { %v9301_v17 = vadd.f32 %v9815_v1, %v8783_v55 }
0x2eb0   : > { %v9284_v30 = vpop.f32.mrf.mxu0 }
0x2eb1   : > { %v9305_v15 = vadd.f32 %v11456_v16, %v9301_v17  ;;  %v9299_v42 = vadd.f32 %v9284_v30, %v8781_v32 }
0x2eb2   : > { %v9816_v52 = vpop.f32.mrf.mxu0 }
0x2eb3   : > { %v9333_v43 = vadd.f32 %v9324_v45, %v9305_v15  ;;  %v9303_v46 = vadd.f32 %v11457_v20, %v9299_v42  ;;  %v9302_v0 = vadd.f32 %v9816_v52, %v8784_v41 }
0x2eb4   : > { %v9287_v35 = vpop.f32.mrf.mxu0 }
0x2eb5   : > { %9337 = vst [vmem:[%s16631_s24 + $0x28] sm:$0xff] %v9333_v43  ;;  %v9331_v25 = vadd.f32 %v9314_v5, %v9303_v46  ;;  %v9306_v60 = vadd.f32 %v11458_v38, %v9302_v0  ;;  %v9300_v34 = vadd.f32 %v9287_v35, %v8782_v48 }
0x2eb7   : > { %9335 = vst [vmem:[%s16631_s24 + $0x8] sm:$0xff] %v9331_v25  ;;  %v9334_v7 = vadd.f32 %v9329_v39, %v9306_v60  ;;  %v9304_v14 = vadd.f32 %v11459_v24, %v9300_v34 }
0x2eb9   : > { %9338 = vst [vmem:[%s16631_s24 + $0x38] sm:$0xff] %v9334_v7  ;;  %v9332_v47 = vadd.f32 %v9319_v21, %v9304_v14 }
0x2ebb   : > { %9336 = vst [vmem:[%s16631_s24 + $0x18] sm:$0xff] %v9332_v47 }
0x2ebc   : > { %11473 = shalt.err (!%p11470_p3)
}
0x2ebd   : > { %s11474_s12 = scalar_lea.hbm %s16691_s13, 1024  ;;  %s11478_s24 = scalar_lea.hbm %s16747_s8, 2048 }
0x2ebe   : > { %p11475_p4 = scmp.ne.s32.totalorder %s16691_s13, %s11474_s12  ;;  %p11479_p9 = scmp.lt.s32.totalorder %s16691_s13, %s16747_s8 }
0x2ebf   : > { %p11480_p10 = scmp.lt.s32.totalorder %s11478_s24, %s11474_s12 }
0x2ec0   : > { %p11476_p7 = pnand %p11475_p4, %p11616_p5 }
0x2ec1   : > { %p11481_p11 = por %p11480_p10, %p11479_p9 }
0x2ec2   : > { %p11477_p8 = pneg %p11476_p7 }
0x2ec4   : > { %p11482_p12 = pnand %p11481_p11, %p11477_p8 }
0x2ec6   : > { %11485 = shalt.err (!%p11482_p12)
}
0x2ec7   : > { %s11531_s26 = smov 256   ;;  %s11532_s17 = smov 16  }
0x2ec8   : > { %9833 = dma.vmem_to_hbm [thread:$0]  (%p11616_p5), %s16693_s25, 1024, %s16691_s13, %s16699_s9, %s11531_s26, %s11531_s26, %s11532_s17  }
0x2ec9 PF: > { %p9839_p13 = scmp.ge.s32.totalorder %s11520_s30, 2  ;;  %s9368_s21 = sand.u32 1, %s11508_s27  }
0x2eca   : > { %s9369_s10 = scalar_lea.sflag [#allocation3], %s9368_s21 }
0x2ecb   : > { %p9836_p0 = pnand %p9839_p13, %p11620_p6 }
0x2ecd   : > { %p9837_p1 = pneg %p9836_p0 }
0x2ecf   : > { %11503 = dma.done.wait (%p9837_p1), %s9369_s10, 1024  }
0x2ed0   : > { %11505 = vsyncadd (%p9837_p1), %s9369_s10, 4294966272  ;;  %p18_p2 = scmp.ge.s32.totalorder %s11603_s11, 4   ;;  %s17132_s27 = smov %s11512_s28 }
0x2ed1   : > { %s17133_s28 = smov %s11516_s29  ;;  %s17134_s29 = smov %s11614_s14 }
0x2ed2   : > { %s17135_s30 = smov %s11603_s11  ;;  %20 = sbr.rel (!%p18_p2) target bundleno = 3 (0x3), region = 87 }
0x2ed7   :  { %9374 = vsyncpa [#allocation3], 1 }
0x2ed8   :  { %9376 = vsyncpa [#allocation3 + $0x1], 1 }

</bundles_post_ra>
